<compile_context>
chip_gen: v6e
topology: v6e:2x2x1
jax: 0.10.0
libtpu: 0.0.40
codegen_flags: <defaults>
</compile_context>

<pallas_src>
import jax
import jax.numpy as jnp
from jax.experimental import pallas as pl
from jax.experimental.pallas import tpu as pltpu

# ----------------------------- model dims -----------------------------------
OBS_LEN = 8
PRED_LEN = 6
INPUT_DIM = 2
OUTPUT_DIM = 5
ENCODER_DIM = 64
DECODER_DIM = 128
DYN_EMB_DIM = 32
INPUT_EMB_DIM = 32
GRID = (8, 8)
CONV1_DEPTH = 64
CONV2_DEPTH = 16
SOC_EMB_DIM = 3 * 3 * CONV2_DEPTH          # 144
DEC_IN_DIM = SOC_EMB_DIM + DYN_EMB_DIM     # 176
C_PAD = 128                                 # channels / hidden / gate blocks padded to one lane tile


def _lrelu(x):
    # LeakyReLU(0.1)
    return jnp.maximum(x, 0.1 * x)


# --------------------------- kernel 1: encoder --------------------------------
def encoder_kernel(x_ref, ipw_ref, ipb_ref, wx4_ref, wh4_ref, b4_ref, hout_ref):
    """Fused input-embedding + single-layer LSTM over the full sequence.

    x_ref holds the whole time-major trajectory flattened to (T*Bp, 2).  The
    embedding uses the VPU (K=2 outer product); the input-side gate matmul is
    hoisted out of the recurrence.  Gate blocks are padded to 128 lanes, so the
    padded lanes of h/c stay exactly 0 (pad-lane candidate gate = tanh(0) = 0)
    and the output is lane-dense (Bp, 128)."""
    Bp, HP = hout_ref.shape                         # (padded batch, 128)
    T = x_ref.shape[0] // Bp

    x = x_ref[...]                                  # (T*Bp, 2)
    # input embedding on the VPU: two broadcast FMAs instead of a K=2 MXU call
    emb = _lrelu(x[:, 0:1] * ipw_ref[0:1, :] + x[:, 1:2] * ipw_ref[1:2, :]
                 + ipb_ref[...])                    # (T*Bp, 32)
    # hoisted input-side gate pre-activation for every time step at once
    xg = jnp.dot(emb, wx4_ref[...],
                 preferred_element_type=jnp.float32) + b4_ref[...]              # (T*Bp, 512)

    wh4 = wh4_ref[...]                              # (128, 512)
    h = jnp.zeros((Bp, HP), jnp.float32)
    c = jnp.zeros((Bp, HP), jnp.float32)
    for t in range(T):                              # T == 8, fully unrolled
        g = xg[t * Bp:(t + 1) * Bp, :] + jnp.dot(h, wh4,
                                                 preferred_element_type=jnp.float32)
        i = jax.nn.sigmoid(g[:, 0 * HP:1 * HP])     # gate slices at 128-lane boundaries
        f = jax.nn.sigmoid(g[:, 1 * HP:2 * HP])
        gg = jnp.tanh(g[:, 2 * HP:3 * HP])
        o = jax.nn.sigmoid(g[:, 3 * HP:4 * HP])
        c = f * c + i * gg
        h = o * jnp.tanh(c)
    hout_ref[...] = h                               # lanes >= 64 are exactly 0


# ----------------------- kernel 2: social conv + decoder ----------------------
def social_decoder_kernel(soc_ref, obsh_ref, dynw_ref, dynb_ref,
                          w1_ref, b1_ref, w2_ref, b2_ref,
                          wx_ref, wh_ref, b4_ref, opw_ref, opb_ref, out_ref):
    """dyn_emb + social conv1/conv2/maxpool + decoder LSTM + output head for one
    batch tile.  soc_ref is laid out (H, W, tileB, C=128): both conv shift axes
    are major dims, so every conv/pool slice is a whole-(8,128)-tile slice."""
    H, W, TB, C = soc_ref.shape                     # (8, 8, tile_batch, 128)
    DH = wh_ref.shape[0]                            # 128
    C2 = w2_ref.shape[-1]                           # 16
    pred_len = out_ref.shape[0]

    OH1, OW1 = H - 2, W - 2                         # 6, 6  (conv1 valid output)
    OH2, OW2 = OH1 - 2, OW1 - 2                     # 4, 4  (conv2 valid output)
    PH, PW = OH2 - 1, OW2 - 1                       # 3, 3  (2x2/stride-1 maxpool)

    # soc_conv1 (3x3 valid) + LeakyReLU as 9 accumulating whole-map matmuls
    acc1 = jnp.zeros((OH1 * OW1 * TB, C), jnp.float32)
    for dy in range(3):
        for dx in range(3):
            lhs = soc_ref[dy:dy + OH1, dx:dx + OW1, :, :].reshape(OH1 * OW1 * TB, C)
            acc1 = acc1 + jnp.dot(lhs, w1_ref[dy, dx, :, :],
                                  preferred_element_type=jnp.float32)
    a1 = _lrelu(acc1 + b1_ref[...]).reshape(OH1, OW1, TB, C)

    # soc_conv2 (3x3 valid) + LeakyReLU
    acc2 = jnp.zeros((OH2 * OW2 * TB, C2), jnp.float32)
    for dy in range(3):
        for dx in range(3):
            lhs = a1[dy:dy + OH2, dx:dx + OW2, :, :].reshape(OH2 * OW2 * TB, C)
            acc2 = acc2 + jnp.dot(lhs, w2_ref[dy, dx, :, :],
                                  preferred_element_type=jnp.float32)
    a2 = _lrelu(acc2 + b2_ref[...]).reshape(OH2, OW2, TB, C2)

    # maxpool 2x2, stride 1 -> (3, 3, TB, 16); only major-dim slices
    m = jnp.maximum(a2[:, 0:PW], a2[:, 1:PW + 1])
    pool = jnp.maximum(m[0:PH], m[1:PH + 1])

    # dyn_emb on the ego hidden (encoder output is lane-dense (TB,128),
    # dyn_w rows were zero-padded to 128 in prepare_params)
    obs_enc = _lrelu(jnp.dot(obsh_ref[...], dynw_ref[...],
                             preferred_element_type=jnp.float32) + dynb_ref[...])   # (TB, 32)

    # one 176-wide feature row per batch element; dec_wx rows were permuted in
    # prepare_params to match this (i, j, c)+dyn lane order.
    feat = jnp.concatenate(
        [pool[i, j, :, :] for i in range(PH) for j in range(PW)] + [obs_enc],
        axis=-1)                                                                     # (TB, 176)

    # enc.repeat(pred_len,1,1) feeds the identical input every step, so the
    # input-side pre-activation is one (TB,176)@(176,512) matmul.
    xw = jnp.dot(feat, wx_ref[...],
                 preferred_element_type=jnp.float32) + b4_ref[...]                   # (TB, 512)

    # decoder LSTM recurrence: only h @ Wh[4H] per step.
    wh = wh_ref[...]
    h = jnp.zeros((TB, DH), jnp.float32)
    c = jnp.zeros((TB, DH), jnp.float32)
    hs = []
    for t in range(pred_len):                        # 6 steps, fully unrolled
        g = xw + jnp.dot(h, wh, preferred_element_type=jnp.float32)
        i_g = jax.nn.sigmoid(g[:, 0:DH])
        f_g = jax.nn.sigmoid(g[:, DH:2 * DH])
        g_g = jnp.tanh(g[:, 2 * DH:3 * DH])
        o_g = jax.nn.sigmoid(g[:, 3 * DH:4 * DH])
        c = f_g * c + i_g * g_g
        h = o_g * jnp.tanh(c)
        hs.append(h)
    hs_all = jnp.concatenate(hs, axis=0)             # (pred_len*TB, 128), sublane-aligned

    # output linear (columns padded to 128 -> lane-dense stores) + activation.
    op = jnp.dot(hs_all, opw_ref[...],
                 preferred_element_type=jnp.float32) + opb_ref[...]                  # (pred_len*TB, 128)
    col = jax.lax.broadcasted_iota(jnp.int32, op.shape, 1)
    # TODO(synk): output_activation is undefined in the reference snippet; using
    # the standard (mu, mu, exp, exp, tanh) bivariate-Gaussian head on cols 0..4.
    act = jnp.where(col < 2, op, jnp.where(col < 4, jnp.exp(op), jnp.tanh(op)))
    for t in range(pred_len):
        out_ref[t, :, :] = act[t * TB:(t + 1) * TB, :]


# ----------------------------- wrappers --------------------------------------
def run_encoder(p, x_flat, bp):
    return pl.pallas_call(
        encoder_kernel,
        out_shape=jax.ShapeDtypeStruct((bp, C_PAD), jnp.float32),
    )(x_flat, p['ip_w'], p['ip_b'], p['enc_wx4'], p['enc_wh4'], p['enc_b4'])


def run_social_decoder(p, soc_hwbc, obs_h, pred_len, tile_b=8):
    H, W, Bp, C = soc_hwbc.shape
    grid = (Bp // tile_b,)
    return pl.pallas_call(
        social_decoder_kernel,
        out_shape=jax.ShapeDtypeStruct((pred_len, Bp, C_PAD), jnp.float32),
        grid=grid,
        in_specs=[
            pl.BlockSpec((H, W, tile_b, C), lambda b: (0, 0, b, 0)),            # social map tile
            pl.BlockSpec((tile_b, C_PAD), lambda b: (b, 0)),                    # ego hidden tile
            pl.BlockSpec((C_PAD, DYN_EMB_DIM), lambda b: (0, 0)),               # dyn_w
            pl.BlockSpec((1, DYN_EMB_DIM), lambda b: (0, 0)),                   # dyn_b
            pl.BlockSpec((3, 3, C_PAD, C_PAD), lambda b: (0, 0, 0, 0)),         # conv1 w (HWIO)
            pl.BlockSpec((1, C_PAD), lambda b: (0, 0)),                         # conv1 b
            pl.BlockSpec((3, 3, C_PAD, CONV2_DEPTH), lambda b: (0, 0, 0, 0)),   # conv2 w
            pl.BlockSpec((1, CONV2_DEPTH), lambda b: (0, 0)),                   # conv2 b
            pl.BlockSpec((DEC_IN_DIM, 4 * DECODER_DIM), lambda b: (0, 0)),      # dec Wx (fused)
            pl.BlockSpec((DECODER_DIM, 4 * DECODER_DIM), lambda b: (0, 0)),     # dec Wh (fused)
            pl.BlockSpec((1, 4 * DECODER_DIM), lambda b: (0, 0)),               # dec bias (fused)
            pl.BlockSpec((DECODER_DIM, C_PAD), lambda b: (0, 0)),               # op w (padded)
            pl.BlockSpec((1, C_PAD), lambda b: (0, 0)),                         # op b (padded)
        ],
        out_specs=pl.BlockSpec((pred_len, tile_b, C_PAD), lambda b: (0, b, 0)),
        compiler_params=pltpu.CompilerParams(dimension_semantics=("parallel",)),
    )(soc_hwbc, obs_h, p['dyn_w'], p['dyn_b'],
      p['conv1_w'], p['conv1_b'], p['conv2_w'], p['conv2_b'],
      p['dec_wx4'], p['dec_wh4'], p['dec_b4'], p['op_w'], p['op_b'])


# ----------------------------- glue -------------------------------------------
def masked_scatter(masks_bool, src):
    """JAX equivalent of torch.Tensor.masked_scatter_ on a zero tensor."""
    flat_mask = masks_bool.reshape(-1)
    src_flat = src.reshape(-1)
    pos = jnp.cumsum(flat_mask.astype(jnp.int32)) - 1
    pos = jnp.clip(pos, 0, src_flat.shape[0] - 1)
    out = jnp.where(flat_mask, src_flat[pos], jnp.float32(0.0))
    return out.reshape(masks_bool.shape)


def social_conv_lstm_forward(params, obs_traj, nbrs_traj, masks, pred_len=PRED_LEN):
    T, B, D = obs_traj.shape
    N = nbrs_traj.shape[1]
    bn = B + N
    bp_enc = ((bn + 7) // 8) * 8              # combined batch padded to a sublane multiple

    # one shared-weight encoder call over ego + neighbor trajectories
    x = jnp.concatenate([obs_traj, nbrs_traj], axis=1)                 # (T, B+N, 2)
    x = jnp.pad(x, ((0, 0), (0, bp_enc - bn), (0, 0)))
    h_all = run_encoder(params, x.reshape(T * bp_enc, D), bp_enc)      # (bp_enc, 128)
    obs_h = h_all[:B]                                                  # (B, 128), lanes>=64 are 0
    nbrs_h = h_all[B:bn, :ENCODER_DIM]                                 # (N, 64)

    # masked_scatter_ into the social grid, then lay out as (H, W, B, C):
    # torch permute(0,3,2,1) gives NCHW with H=g1, W=g0, so (H,W,B,C)[h,w,b,c]
    # = soc[b, g0=w, g1=h, c].  Channels padded to 128, batch padded to 8k.
    soc = masked_scatter(masks, nbrs_h)                                # (B, g0, g1, 64)
    soc_hwbc = jnp.transpose(soc, (2, 1, 0, 3))                        # (H, W, B, 64)
    soc_hwbc = jnp.pad(soc_hwbc, ((0, 0), (0, 0), (0, 0), (0, C_PAD - ENCODER_DIM)))

    bp_dec = ((B + 7) // 8) * 8
    soc_hwbc = jnp.pad(soc_hwbc, ((0, 0), (0, 0), (0, bp_dec - B), (0, 0)))
    obs_h = jnp.pad(obs_h, ((0, bp_dec - B), (0, 0)))

    out = run_social_decoder(params, soc_hwbc, obs_h, pred_len)        # (pred_len, bp_dec, 128)
    return out[:, :B, :OUTPUT_DIM]


# ----------------------------- parameters -------------------------------------
def init_params(key):
    """Torch-equivalent parameters: per-gate LSTM weights pre-transposed to
    (in, hidden), per-gate bias = b_ih + b_hh, conv weights in HWIO."""
    keys = iter(jax.random.split(key, 64))

    def n(shape, scale=0.1):
        return (jax.random.normal(next(keys), shape) * scale).astype(jnp.float32)

    p = {}
    p['ip_w'] = n((INPUT_DIM, INPUT_EMB_DIM))
    p['ip_b'] = n((1, INPUT_EMB_DIM))
    for g in 'ifgo':
        p[f'enc_wx_{g}'] = n((INPUT_EMB_DIM, ENCODER_DIM))
        p[f'enc_wh_{g}'] = n((ENCODER_DIM, ENCODER_DIM))
        p[f'enc_b_{g}'] = n((1, ENCODER_DIM))
    p['dyn_w'] = n((ENCODER_DIM, DYN_EMB_DIM))
    p['dyn_b'] = n((1, DYN_EMB_DIM))
    p['conv1_w'] = n((3, 3, ENCODER_DIM, CONV1_DEPTH))       # HWIO
    p['conv1_b'] = n((1, CONV1_DEPTH))
    p['conv2_w'] = n((3, 3, CONV1_DEPTH, CONV2_DEPTH))
    p['conv2_b'] = n((1, CONV2_DEPTH))
    for g in 'ifgo':
        p[f'dec_wx_{g}'] = n((DEC_IN_DIM, DECODER_DIM))
        p[f'dec_wh_{g}'] = n((DECODER_DIM, DECODER_DIM))
        p[f'dec_b_{g}'] = n((1, DECODER_DIM))
    p['op_w'] = n((DECODER_DIM, OUTPUT_DIM))
    p['op_b'] = n((1, OUTPUT_DIM))
    return p


def prepare_params(p):
    """Kernel-layout weights: 4-gate LSTM weights fused and (for the encoder)
    padded to 128-lane gate tiles, conv weights channel-padded, decoder Wx rows
    permuted to the kernel's pooled-feature lane order, output head padded to a
    lane-dense 128-wide store."""
    q = {}
    q['ip_w'], q['ip_b'] = p['ip_w'], p['ip_b']

    # encoder LSTM: each 64-wide gate block zero-padded to a 128-lane tile, and
    # the 64-wide hidden zero-padded to 128 rows.
    gp = C_PAD - ENCODER_DIM
    q['enc_wx4'] = jnp.concatenate(
        [jnp.pad(p[f'enc_wx_{g}'], ((0, 0), (0, gp))) for g in 'ifgo'], axis=1)     # (32, 512)
    q['enc_wh4'] = jnp.concatenate(
        [jnp.pad(p[f'enc_wh_{g}'], ((0, gp), (0, gp))) for g in 'ifgo'], axis=1)    # (128, 512)
    q['enc_b4'] = jnp.concatenate(
        [jnp.pad(p[f'enc_b_{g}'], ((0, 0), (0, gp))) for g in 'ifgo'], axis=1)      # (1, 512)

    # dyn_emb: rows padded to the lane-dense 128-wide encoder output
    q['dyn_w'] = jnp.pad(p['dyn_w'], ((0, C_PAD - ENCODER_DIM), (0, 0)))            # (128, 32)
    q['dyn_b'] = p['dyn_b']

    # conv weights (HWIO), channels padded to full lane tiles
    q['conv1_w'] = jnp.pad(p['conv1_w'], ((0, 0), (0, 0),
                                          (0, C_PAD - ENCODER_DIM),
                                          (0, C_PAD - CONV1_DEPTH)))                # (3,3,128,128)
    q['conv1_b'] = jnp.pad(p['conv1_b'], ((0, 0), (0, C_PAD - CONV1_DEPTH)))        # (1, 128)
    q['conv2_w'] = jnp.pad(p['conv2_w'], ((0, 0), (0, 0),
                                          (0, C_PAD - CONV1_DEPTH), (0, 0)))        # (3,3,128,16)
    q['conv2_b'] = p['conv2_b']

    # decoder LSTM: fuse gates; permute soc rows from torch's NCHW-flatten order
    # (c*9 + i*3 + j) to the kernel's lane order ((i*3 + j)*16 + c); dyn rows last.
    dec_wx4 = jnp.concatenate([p[f'dec_wx_{g}'] for g in 'ifgo'], axis=1)           # (176, 512)
    soc_rows = dec_wx4[:SOC_EMB_DIM].reshape(CONV2_DEPTH, 3, 3, 4 * DECODER_DIM)
    soc_rows = jnp.transpose(soc_rows, (1, 2, 0, 3)).reshape(SOC_EMB_DIM, 4 * DECODER_DIM)
    q['dec_wx4'] = jnp.concatenate([soc_rows, dec_wx4[SOC_EMB_DIM:]], axis=0)       # (176, 512)
    q['dec_wh4'] = jnp.concatenate([p[f'dec_wh_{g}'] for g in 'ifgo'], axis=1)      # (128, 512)
    q['dec_b4'] = jnp.concatenate([p[f'dec_b_{g}'] for g in 'ifgo'], axis=1)        # (1, 512)

    # output head padded so the decoder store is lane-dense (128 wide)
    q['op_w'] = jnp.pad(p['op_w'], ((0, 0), (0, C_PAD - OUTPUT_DIM)))               # (128, 128)
    q['op_b'] = jnp.pad(p['op_b'], ((0, 0), (0, C_PAD - OUTPUT_DIM)))               # (1, 128)
    return q


# ----------------------------- main --------------------------------------------
if __name__ == "__main__":
    key = jax.random.PRNGKey(0)
    kp, kx, kn = jax.random.split(key, 3)
    params = prepare_params(init_params(kp))

    batch, num_nbrs = 2, 5
    obs_traj = jax.random.normal(kx, (OBS_LEN, batch, INPUT_DIM), jnp.float32)
    nbrs_traj = jax.random.normal(kn, (OBS_LEN, num_nbrs, INPUT_DIM), jnp.float32)

    # masks: (batch, grid0, grid1, encoder_dim) bool; each neighbor owns a full
    # grid-cell channel slice, consistent with masked_scatter_ fill order.
    masks = jnp.zeros((batch, GRID[0], GRID[1], ENCODER_DIM), dtype=bool)
    for (b, gx, gy) in [(0, 1, 2), (0, 3, 4), (0, 5, 5), (1, 2, 2), (1, 6, 1)]:
        masks = masks.at[b, gx, gy, :].set(True)

    fwd = jax.jit(social_conv_lstm_forward)
    out = jax.block_until_ready(fwd(params, obs_traj, nbrs_traj, masks))
    assert out.shape == (PRED_LEN, batch, OUTPUT_DIM), out.shape
    assert bool(jnp.all(jnp.isfinite(out)))
    print("KERNEL_OK")
</pallas_src>

<mosaic_0001>
module attributes {stable_mosaic.version = 11 : i64} {
  func.func @encoder_kernel(%arg0: memref<64x2xf32, #tpu.memory_space<vmem>>, %arg1: memref<2x32xf32, #tpu.memory_space<vmem>>, %arg2: memref<1x32xf32, #tpu.memory_space<vmem>>, %arg3: memref<32x512xf32, #tpu.memory_space<vmem>>, %arg4: memref<128x512xf32, #tpu.memory_space<vmem>>, %arg5: memref<1x512xf32, #tpu.memory_space<vmem>>, %arg6: memref<8x128xf32, #tpu.memory_space<vmem>>) attributes {dimension_semantics = [], scalar_prefetch = 0 : i64, scratch_operands = 0 : i64, tpu.core_type = #tpu.core_type<tc>} {
    %c0 = arith.constant 0 : index
    %c0_0 = arith.constant 0 : index
    %0 = vector.load %arg0[%c0, %c0_0] : memref<64x2xf32, #tpu.memory_space<vmem>>, vector<64x2xf32>
    %1 = vector.extract_strided_slice %0 {offsets = [0, 0], sizes = [64, 1], strides = [1, 1]} : vector<64x2xf32> to vector<64x1xf32>
    %c0_1 = arith.constant 0 : index
    %c0_2 = arith.constant 0 : index
    %2 = vector.load %arg1[%c0_1, %c0_2] : memref<2x32xf32, #tpu.memory_space<vmem>>, vector<1x32xf32>
    %3 = vector.broadcast %1 : vector<64x1xf32> to vector<64x32xf32>
    %4 = vector.broadcast %2 : vector<1x32xf32> to vector<64x32xf32>
    %5 = arith.mulf %3, %4 : vector<64x32xf32>
    %6 = vector.extract_strided_slice %0 {offsets = [0, 1], sizes = [64, 1], strides = [1, 1]} : vector<64x2xf32> to vector<64x1xf32>
    %c1 = arith.constant 1 : index
    %c0_3 = arith.constant 0 : index
    %7 = vector.load %arg1[%c1, %c0_3] : memref<2x32xf32, #tpu.memory_space<vmem>>, vector<1x32xf32>
    %8 = vector.broadcast %6 : vector<64x1xf32> to vector<64x32xf32>
    %9 = vector.broadcast %7 : vector<1x32xf32> to vector<64x32xf32>
    %10 = arith.mulf %8, %9 : vector<64x32xf32>
    %11 = arith.addf %5, %10 : vector<64x32xf32>
    %c0_4 = arith.constant 0 : index
    %c0_5 = arith.constant 0 : index
    %12 = vector.load %arg2[%c0_4, %c0_5] : memref<1x32xf32, #tpu.memory_space<vmem>>, vector<1x32xf32>
    %13 = vector.broadcast %12 : vector<1x32xf32> to vector<64x32xf32>
    %14 = arith.addf %11, %13 : vector<64x32xf32>
    %cst = arith.constant 1.000000e-01 : f32
    %15 = vector.broadcast %cst : f32 to vector<64x32xf32>
    %16 = arith.mulf %15, %14 : vector<64x32xf32>
    %17 = arith.maximumf %14, %16 : vector<64x32xf32>
    %c0_6 = arith.constant 0 : index
    %c0_7 = arith.constant 0 : index
    %18 = vector.load %arg3[%c0_6, %c0_7] : memref<32x512xf32, #tpu.memory_space<vmem>>, vector<32x512xf32>
    %cst_8 = arith.constant dense<0.000000e+00> : vector<64x512xf32>
    %19 = tpu.matmul %17, %18, %cst_8 {dimension_numbers = #tpu.dot_dimension_numbers<[1], [0], [0], [1], [0, 0, 1, 1], [], []>} : vector<64x32xf32>, vector<32x512xf32>, vector<64x512xf32> -> vector<64x512xf32>
    %c0_9 = arith.constant 0 : index
    %c0_10 = arith.constant 0 : index
    %20 = vector.load %arg5[%c0_9, %c0_10] : memref<1x512xf32, #tpu.memory_space<vmem>>, vector<1x512xf32>
    %21 = vector.broadcast %20 : vector<1x512xf32> to vector<64x512xf32>
    %22 = arith.addf %19, %21 : vector<64x512xf32>
    %c0_11 = arith.constant 0 : index
    %c0_12 = arith.constant 0 : index
    %23 = vector.load %arg4[%c0_11, %c0_12] : memref<128x512xf32, #tpu.memory_space<vmem>>, vector<128x512xf32>
    %cst_13 = arith.constant 0.000000e+00 : f32
    %24 = vector.broadcast %cst_13 : f32 to vector<8x128xf32>
    %cst_14 = arith.constant 0.000000e+00 : f32
    %25 = vector.broadcast %cst_14 : f32 to vector<8x128xf32>
    %26 = vector.extract_strided_slice %22 {offsets = [0, 0], sizes = [8, 512], strides = [1, 1]} : vector<64x512xf32> to vector<8x512xf32>
    %cst_15 = arith.constant dense<0.000000e+00> : vector<8x512xf32>
    %27 = tpu.matmul %24, %23, %cst_15 {dimension_numbers = #tpu.dot_dimension_numbers<[1], [0], [0], [1], [0, 0, 1, 1], [], []>} : vector<8x128xf32>, vector<128x512xf32>, vector<8x512xf32> -> vector<8x512xf32>
    %28 = arith.addf %26, %27 : vector<8x512xf32>
    %29 = vector.extract_strided_slice %28 {offsets = [0, 0], sizes = [8, 128], strides = [1, 1]} : vector<8x512xf32> to vector<8x128xf32>
    %30 = arith.negf %29 : vector<8x128xf32>
    %31 = math.exp %30 : vector<8x128xf32>
    %cst_16 = arith.constant 1.000000e+00 : f32
    %32 = vector.broadcast %cst_16 : f32 to vector<8x128xf32>
    %33 = arith.addf %32, %31 : vector<8x128xf32>
    %34 = arith.divf %32, %33 : vector<8x128xf32>
    %35 = vector.extract_strided_slice %28 {offsets = [0, 128], sizes = [8, 128], strides = [1, 1]} : vector<8x512xf32> to vector<8x128xf32>
    %36 = arith.negf %35 : vector<8x128xf32>
    %37 = math.exp %36 : vector<8x128xf32>
    %cst_17 = arith.constant 1.000000e+00 : f32
    %38 = vector.broadcast %cst_17 : f32 to vector<8x128xf32>
    %39 = arith.addf %38, %37 : vector<8x128xf32>
    %40 = arith.divf %38, %39 : vector<8x128xf32>
    %41 = vector.extract_strided_slice %28 {offsets = [0, 256], sizes = [8, 128], strides = [1, 1]} : vector<8x512xf32> to vector<8x128xf32>
    %42 = math.tanh %41 : vector<8x128xf32>
    %43 = vector.extract_strided_slice %28 {offsets = [0, 384], sizes = [8, 128], strides = [1, 1]} : vector<8x512xf32> to vector<8x128xf32>
    %44 = arith.negf %43 : vector<8x128xf32>
    %45 = math.exp %44 : vector<8x128xf32>
    %cst_18 = arith.constant 1.000000e+00 : f32
    %46 = vector.broadcast %cst_18 : f32 to vector<8x128xf32>
    %47 = arith.addf %46, %45 : vector<8x128xf32>
    %48 = arith.divf %46, %47 : vector<8x128xf32>
    %49 = arith.mulf %40, %25 : vector<8x128xf32>
    %50 = arith.mulf %34, %42 : vector<8x128xf32>
    %51 = arith.addf %49, %50 : vector<8x128xf32>
    %52 = math.tanh %51 : vector<8x128xf32>
    %53 = arith.mulf %48, %52 : vector<8x128xf32>
    %54 = vector.extract_strided_slice %22 {offsets = [8, 0], sizes = [8, 512], strides = [1, 1]} : vector<64x512xf32> to vector<8x512xf32>
    %cst_19 = arith.constant dense<0.000000e+00> : vector<8x512xf32>
    %55 = tpu.matmul %53, %23, %cst_19 {dimension_numbers = #tpu.dot_dimension_numbers<[1], [0], [0], [1], [0, 0, 1, 1], [], []>} : vector<8x128xf32>, vector<128x512xf32>, vector<8x512xf32> -> vector<8x512xf32>
    %56 = arith.addf %54, %55 : vector<8x512xf32>
    %57 = vector.extract_strided_slice %56 {offsets = [0, 0], sizes = [8, 128], strides = [1, 1]} : vector<8x512xf32> to vector<8x128xf32>
    %58 = arith.negf %57 : vector<8x128xf32>
    %59 = math.exp %58 : vector<8x128xf32>
    %cst_20 = arith.constant 1.000000e+00 : f32
    %60 = vector.broadcast %cst_20 : f32 to vector<8x128xf32>
    %61 = arith.addf %60, %59 : vector<8x128xf32>
    %62 = arith.divf %60, %61 : vector<8x128xf32>
    %63 = vector.extract_strided_slice %56 {offsets = [0, 128], sizes = [8, 128], strides = [1, 1]} : vector<8x512xf32> to vector<8x128xf32>
    %64 = arith.negf %63 : vector<8x128xf32>
    %65 = math.exp %64 : vector<8x128xf32>
    %cst_21 = arith.constant 1.000000e+00 : f32
    %66 = vector.broadcast %cst_21 : f32 to vector<8x128xf32>
    %67 = arith.addf %66, %65 : vector<8x128xf32>
    %68 = arith.divf %66, %67 : vector<8x128xf32>
    %69 = vector.extract_strided_slice %56 {offsets = [0, 256], sizes = [8, 128], strides = [1, 1]} : vector<8x512xf32> to vector<8x128xf32>
    %70 = math.tanh %69 : vector<8x128xf32>
    %71 = vector.extract_strided_slice %56 {offsets = [0, 384], sizes = [8, 128], strides = [1, 1]} : vector<8x512xf32> to vector<8x128xf32>
    %72 = arith.negf %71 : vector<8x128xf32>
    %73 = math.exp %72 : vector<8x128xf32>
    %cst_22 = arith.constant 1.000000e+00 : f32
    %74 = vector.broadcast %cst_22 : f32 to vector<8x128xf32>
    %75 = arith.addf %74, %73 : vector<8x128xf32>
    %76 = arith.divf %74, %75 : vector<8x128xf32>
    %77 = arith.mulf %68, %51 : vector<8x128xf32>
    %78 = arith.mulf %62, %70 : vector<8x128xf32>
    %79 = arith.addf %77, %78 : vector<8x128xf32>
    %80 = math.tanh %79 : vector<8x128xf32>
    %81 = arith.mulf %76, %80 : vector<8x128xf32>
    %82 = vector.extract_strided_slice %22 {offsets = [16, 0], sizes = [8, 512], strides = [1, 1]} : vector<64x512xf32> to vector<8x512xf32>
    %cst_23 = arith.constant dense<0.000000e+00> : vector<8x512xf32>
    %83 = tpu.matmul %81, %23, %cst_23 {dimension_numbers = #tpu.dot_dimension_numbers<[1], [0], [0], [1], [0, 0, 1, 1], [], []>} : vector<8x128xf32>, vector<128x512xf32>, vector<8x512xf32> -> vector<8x512xf32>
    %84 = arith.addf %82, %83 : vector<8x512xf32>
    %85 = vector.extract_strided_slice %84 {offsets = [0, 0], sizes = [8, 128], strides = [1, 1]} : vector<8x512xf32> to vector<8x128xf32>
    %86 = arith.negf %85 : vector<8x128xf32>
    %87 = math.exp %86 : vector<8x128xf32>
    %cst_24 = arith.constant 1.000000e+00 : f32
    %88 = vector.broadcast %cst_24 : f32 to vector<8x128xf32>
    %89 = arith.addf %88, %87 : vector<8x128xf32>
    %90 = arith.divf %88, %89 : vector<8x128xf32>
    %91 = vector.extract_strided_slice %84 {offsets = [0, 128], sizes = [8, 128], strides = [1, 1]} : vector<8x512xf32> to vector<8x128xf32>
    %92 = arith.negf %91 : vector<8x128xf32>
    %93 = math.exp %92 : vector<8x128xf32>
    %cst_25 = arith.constant 1.000000e+00 : f32
    %94 = vector.broadcast %cst_25 : f32 to vector<8x128xf32>
    %95 = arith.addf %94, %93 : vector<8x128xf32>
    %96 = arith.divf %94, %95 : vector<8x128xf32>
    %97 = vector.extract_strided_slice %84 {offsets = [0, 256], sizes = [8, 128], strides = [1, 1]} : vector<8x512xf32> to vector<8x128xf32>
    %98 = math.tanh %97 : vector<8x128xf32>
    %99 = vector.extract_strided_slice %84 {offsets = [0, 384], sizes = [8, 128], strides = [1, 1]} : vector<8x512xf32> to vector<8x128xf32>
    %100 = arith.negf %99 : vector<8x128xf32>
    %101 = math.exp %100 : vector<8x128xf32>
    %cst_26 = arith.constant 1.000000e+00 : f32
    %102 = vector.broadcast %cst_26 : f32 to vector<8x128xf32>
    %103 = arith.addf %102, %101 : vector<8x128xf32>
    %104 = arith.divf %102, %103 : vector<8x128xf32>
    %105 = arith.mulf %96, %79 : vector<8x128xf32>
    %106 = arith.mulf %90, %98 : vector<8x128xf32>
    %107 = arith.addf %105, %106 : vector<8x128xf32>
    %108 = math.tanh %107 : vector<8x128xf32>
    %109 = arith.mulf %104, %108 : vector<8x128xf32>
    %110 = vector.extract_strided_slice %22 {offsets = [24, 0], sizes = [8, 512], strides = [1, 1]} : vector<64x512xf32> to vector<8x512xf32>
    %cst_27 = arith.constant dense<0.000000e+00> : vector<8x512xf32>
    %111 = tpu.matmul %109, %23, %cst_27 {dimension_numbers = #tpu.dot_dimension_numbers<[1], [0], [0], [1], [0, 0, 1, 1], [], []>} : vector<8x128xf32>, vector<128x512xf32>, vector<8x512xf32> -> vector<8x512xf32>
    %112 = arith.addf %110, %111 : vector<8x512xf32>
    %113 = vector.extract_strided_slice %112 {offsets = [0, 0], sizes = [8, 128], strides = [1, 1]} : vector<8x512xf32> to vector<8x128xf32>
    %114 = arith.negf %113 : vector<8x128xf32>
    %115 = math.exp %114 : vector<8x128xf32>
    %cst_28 = arith.constant 1.000000e+00 : f32
    %116 = vector.broadcast %cst_28 : f32 to vector<8x128xf32>
    %117 = arith.addf %116, %115 : vector<8x128xf32>
    %118 = arith.divf %116, %117 : vector<8x128xf32>
    %119 = vector.extract_strided_slice %112 {offsets = [0, 128], sizes = [8, 128], strides = [1, 1]} : vector<8x512xf32> to vector<8x128xf32>
    %120 = arith.negf %119 : vector<8x128xf32>
    %121 = math.exp %120 : vector<8x128xf32>
    %cst_29 = arith.constant 1.000000e+00 : f32
    %122 = vector.broadcast %cst_29 : f32 to vector<8x128xf32>
    %123 = arith.addf %122, %121 : vector<8x128xf32>
    %124 = arith.divf %122, %123 : vector<8x128xf32>
    %125 = vector.extract_strided_slice %112 {offsets = [0, 256], sizes = [8, 128], strides = [1, 1]} : vector<8x512xf32> to vector<8x128xf32>
    %126 = math.tanh %125 : vector<8x128xf32>
    %127 = vector.extract_strided_slice %112 {offsets = [0, 384], sizes = [8, 128], strides = [1, 1]} : vector<8x512xf32> to vector<8x128xf32>
    %128 = arith.negf %127 : vector<8x128xf32>
    %129 = math.exp %128 : vector<8x128xf32>
    %cst_30 = arith.constant 1.000000e+00 : f32
    %130 = vector.broadcast %cst_30 : f32 to vector<8x128xf32>
    %131 = arith.addf %130, %129 : vector<8x128xf32>
    %132 = arith.divf %130, %131 : vector<8x128xf32>
    %133 = arith.mulf %124, %107 : vector<8x128xf32>
    %134 = arith.mulf %118, %126 : vector<8x128xf32>
    %135 = arith.addf %133, %134 : vector<8x128xf32>
    %136 = math.tanh %135 : vector<8x128xf32>
    %137 = arith.mulf %132, %136 : vector<8x128xf32>
    %138 = vector.extract_strided_slice %22 {offsets = [32, 0], sizes = [8, 512], strides = [1, 1]} : vector<64x512xf32> to vector<8x512xf32>
    %cst_31 = arith.constant dense<0.000000e+00> : vector<8x512xf32>
    %139 = tpu.matmul %137, %23, %cst_31 {dimension_numbers = #tpu.dot_dimension_numbers<[1], [0], [0], [1], [0, 0, 1, 1], [], []>} : vector<8x128xf32>, vector<128x512xf32>, vector<8x512xf32> -> vector<8x512xf32>
    %140 = arith.addf %138, %139 : vector<8x512xf32>
    %141 = vector.extract_strided_slice %140 {offsets = [0, 0], sizes = [8, 128], strides = [1, 1]} : vector<8x512xf32> to vector<8x128xf32>
    %142 = arith.negf %141 : vector<8x128xf32>
    %143 = math.exp %142 : vector<8x128xf32>
    %cst_32 = arith.constant 1.000000e+00 : f32
    %144 = vector.broadcast %cst_32 : f32 to vector<8x128xf32>
    %145 = arith.addf %144, %143 : vector<8x128xf32>
    %146 = arith.divf %144, %145 : vector<8x128xf32>
    %147 = vector.extract_strided_slice %140 {offsets = [0, 128], sizes = [8, 128], strides = [1, 1]} : vector<8x512xf32> to vector<8x128xf32>
    %148 = arith.negf %147 : vector<8x128xf32>
    %149 = math.exp %148 : vector<8x128xf32>
    %cst_33 = arith.constant 1.000000e+00 : f32
    %150 = vector.broadcast %cst_33 : f32 to vector<8x128xf32>
    %151 = arith.addf %150, %149 : vector<8x128xf32>
    %152 = arith.divf %150, %151 : vector<8x128xf32>
    %153 = vector.extract_strided_slice %140 {offsets = [0, 256], sizes = [8, 128], strides = [1, 1]} : vector<8x512xf32> to vector<8x128xf32>
    %154 = math.tanh %153 : vector<8x128xf32>
    %155 = vector.extract_strided_slice %140 {offsets = [0, 384], sizes = [8, 128], strides = [1, 1]} : vector<8x512xf32> to vector<8x128xf32>
    %156 = arith.negf %155 : vector<8x128xf32>
    %157 = math.exp %156 : vector<8x128xf32>
    %cst_34 = arith.constant 1.000000e+00 : f32
    %158 = vector.broadcast %cst_34 : f32 to vector<8x128xf32>
    %159 = arith.addf %158, %157 : vector<8x128xf32>
    %160 = arith.divf %158, %159 : vector<8x128xf32>
    %161 = arith.mulf %152, %135 : vector<8x128xf32>
    %162 = arith.mulf %146, %154 : vector<8x128xf32>
    %163 = arith.addf %161, %162 : vector<8x128xf32>
    %164 = math.tanh %163 : vector<8x128xf32>
    %165 = arith.mulf %160, %164 : vector<8x128xf32>
    %166 = vector.extract_strided_slice %22 {offsets = [40, 0], sizes = [8, 512], strides = [1, 1]} : vector<64x512xf32> to vector<8x512xf32>
    %cst_35 = arith.constant dense<0.000000e+00> : vector<8x512xf32>
    %167 = tpu.matmul %165, %23, %cst_35 {dimension_numbers = #tpu.dot_dimension_numbers<[1], [0], [0], [1], [0, 0, 1, 1], [], []>} : vector<8x128xf32>, vector<128x512xf32>, vector<8x512xf32> -> vector<8x512xf32>
    %168 = arith.addf %166, %167 : vector<8x512xf32>
    %169 = vector.extract_strided_slice %168 {offsets = [0, 0], sizes = [8, 128], strides = [1, 1]} : vector<8x512xf32> to vector<8x128xf32>
    %170 = arith.negf %169 : vector<8x128xf32>
    %171 = math.exp %170 : vector<8x128xf32>
    %cst_36 = arith.constant 1.000000e+00 : f32
    %172 = vector.broadcast %cst_36 : f32 to vector<8x128xf32>
    %173 = arith.addf %172, %171 : vector<8x128xf32>
    %174 = arith.divf %172, %173 : vector<8x128xf32>
    %175 = vector.extract_strided_slice %168 {offsets = [0, 128], sizes = [8, 128], strides = [1, 1]} : vector<8x512xf32> to vector<8x128xf32>
    %176 = arith.negf %175 : vector<8x128xf32>
    %177 = math.exp %176 : vector<8x128xf32>
    %cst_37 = arith.constant 1.000000e+00 : f32
    %178 = vector.broadcast %cst_37 : f32 to vector<8x128xf32>
    %179 = arith.addf %178, %177 : vector<8x128xf32>
    %180 = arith.divf %178, %179 : vector<8x128xf32>
    %181 = vector.extract_strided_slice %168 {offsets = [0, 256], sizes = [8, 128], strides = [1, 1]} : vector<8x512xf32> to vector<8x128xf32>
    %182 = math.tanh %181 : vector<8x128xf32>
    %183 = vector.extract_strided_slice %168 {offsets = [0, 384], sizes = [8, 128], strides = [1, 1]} : vector<8x512xf32> to vector<8x128xf32>
    %184 = arith.negf %183 : vector<8x128xf32>
    %185 = math.exp %184 : vector<8x128xf32>
    %cst_38 = arith.constant 1.000000e+00 : f32
    %186 = vector.broadcast %cst_38 : f32 to vector<8x128xf32>
    %187 = arith.addf %186, %185 : vector<8x128xf32>
    %188 = arith.divf %186, %187 : vector<8x128xf32>
    %189 = arith.mulf %180, %163 : vector<8x128xf32>
    %190 = arith.mulf %174, %182 : vector<8x128xf32>
    %191 = arith.addf %189, %190 : vector<8x128xf32>
    %192 = math.tanh %191 : vector<8x128xf32>
    %193 = arith.mulf %188, %192 : vector<8x128xf32>
    %194 = vector.extract_strided_slice %22 {offsets = [48, 0], sizes = [8, 512], strides = [1, 1]} : vector<64x512xf32> to vector<8x512xf32>
    %cst_39 = arith.constant dense<0.000000e+00> : vector<8x512xf32>
    %195 = tpu.matmul %193, %23, %cst_39 {dimension_numbers = #tpu.dot_dimension_numbers<[1], [0], [0], [1], [0, 0, 1, 1], [], []>} : vector<8x128xf32>, vector<128x512xf32>, vector<8x512xf32> -> vector<8x512xf32>
    %196 = arith.addf %194, %195 : vector<8x512xf32>
    %197 = vector.extract_strided_slice %196 {offsets = [0, 0], sizes = [8, 128], strides = [1, 1]} : vector<8x512xf32> to vector<8x128xf32>
    %198 = arith.negf %197 : vector<8x128xf32>
    %199 = math.exp %198 : vector<8x128xf32>
    %cst_40 = arith.constant 1.000000e+00 : f32
    %200 = vector.broadcast %cst_40 : f32 to vector<8x128xf32>
    %201 = arith.addf %200, %199 : vector<8x128xf32>
    %202 = arith.divf %200, %201 : vector<8x128xf32>
    %203 = vector.extract_strided_slice %196 {offsets = [0, 128], sizes = [8, 128], strides = [1, 1]} : vector<8x512xf32> to vector<8x128xf32>
    %204 = arith.negf %203 : vector<8x128xf32>
    %205 = math.exp %204 : vector<8x128xf32>
    %cst_41 = arith.constant 1.000000e+00 : f32
    %206 = vector.broadcast %cst_41 : f32 to vector<8x128xf32>
    %207 = arith.addf %206, %205 : vector<8x128xf32>
    %208 = arith.divf %206, %207 : vector<8x128xf32>
    %209 = vector.extract_strided_slice %196 {offsets = [0, 256], sizes = [8, 128], strides = [1, 1]} : vector<8x512xf32> to vector<8x128xf32>
    %210 = math.tanh %209 : vector<8x128xf32>
    %211 = vector.extract_strided_slice %196 {offsets = [0, 384], sizes = [8, 128], strides = [1, 1]} : vector<8x512xf32> to vector<8x128xf32>
    %212 = arith.negf %211 : vector<8x128xf32>
    %213 = math.exp %212 : vector<8x128xf32>
    %cst_42 = arith.constant 1.000000e+00 : f32
    %214 = vector.broadcast %cst_42 : f32 to vector<8x128xf32>
    %215 = arith.addf %214, %213 : vector<8x128xf32>
    %216 = arith.divf %214, %215 : vector<8x128xf32>
    %217 = arith.mulf %208, %191 : vector<8x128xf32>
    %218 = arith.mulf %202, %210 : vector<8x128xf32>
    %219 = arith.addf %217, %218 : vector<8x128xf32>
    %220 = math.tanh %219 : vector<8x128xf32>
    %221 = arith.mulf %216, %220 : vector<8x128xf32>
    %222 = vector.extract_strided_slice %22 {offsets = [56, 0], sizes = [8, 512], strides = [1, 1]} : vector<64x512xf32> to vector<8x512xf32>
    %cst_43 = arith.constant dense<0.000000e+00> : vector<8x512xf32>
    %223 = tpu.matmul %221, %23, %cst_43 {dimension_numbers = #tpu.dot_dimension_numbers<[1], [0], [0], [1], [0, 0, 1, 1], [], []>} : vector<8x128xf32>, vector<128x512xf32>, vector<8x512xf32> -> vector<8x512xf32>
    %224 = arith.addf %222, %223 : vector<8x512xf32>
    %225 = vector.extract_strided_slice %224 {offsets = [0, 0], sizes = [8, 128], strides = [1, 1]} : vector<8x512xf32> to vector<8x128xf32>
    %226 = arith.negf %225 : vector<8x128xf32>
    %227 = math.exp %226 : vector<8x128xf32>
    %cst_44 = arith.constant 1.000000e+00 : f32
    %228 = vector.broadcast %cst_44 : f32 to vector<8x128xf32>
    %229 = arith.addf %228, %227 : vector<8x128xf32>
    %230 = arith.divf %228, %229 : vector<8x128xf32>
    %231 = vector.extract_strided_slice %224 {offsets = [0, 128], sizes = [8, 128], strides = [1, 1]} : vector<8x512xf32> to vector<8x128xf32>
    %232 = arith.negf %231 : vector<8x128xf32>
    %233 = math.exp %232 : vector<8x128xf32>
    %cst_45 = arith.constant 1.000000e+00 : f32
    %234 = vector.broadcast %cst_45 : f32 to vector<8x128xf32>
    %235 = arith.addf %234, %233 : vector<8x128xf32>
    %236 = arith.divf %234, %235 : vector<8x128xf32>
    %237 = vector.extract_strided_slice %224 {offsets = [0, 256], sizes = [8, 128], strides = [1, 1]} : vector<8x512xf32> to vector<8x128xf32>
    %238 = math.tanh %237 : vector<8x128xf32>
    %239 = vector.extract_strided_slice %224 {offsets = [0, 384], sizes = [8, 128], strides = [1, 1]} : vector<8x512xf32> to vector<8x128xf32>
    %240 = arith.negf %239 : vector<8x128xf32>
    %241 = math.exp %240 : vector<8x128xf32>
    %cst_46 = arith.constant 1.000000e+00 : f32
    %242 = vector.broadcast %cst_46 : f32 to vector<8x128xf32>
    %243 = arith.addf %242, %241 : vector<8x128xf32>
    %244 = arith.divf %242, %243 : vector<8x128xf32>
    %245 = arith.mulf %236, %219 : vector<8x128xf32>
    %246 = arith.mulf %230, %238 : vector<8x128xf32>
    %247 = arith.addf %245, %246 : vector<8x128xf32>
    %248 = math.tanh %247 : vector<8x128xf32>
    %249 = arith.mulf %244, %248 : vector<8x128xf32>
    %c0_47 = arith.constant 0 : index
    %c0_48 = arith.constant 0 : index
    %250 = vector.load %arg6[%c0_47, %c0_48] : memref<8x128xf32, #tpu.memory_space<vmem>>, vector<8x128xf32>
    tpu.vector_store %arg6[%c0_47, %c0_48], %249 {strides = array<i32>} : memref<8x128xf32, #tpu.memory_space<vmem>>, vector<8x128xf32>,
    return
  }
}

module attributes {stable_mosaic.version = 11 : i64} {
  func.func @social_decoder_kernel(%arg0: i32, %arg1: memref<8x8x8x128xf32, #tpu.memory_space<vmem>>, %arg2: memref<8x128xf32, #tpu.memory_space<vmem>>, %arg3: memref<128x32xf32, #tpu.memory_space<vmem>>, %arg4: memref<1x32xf32, #tpu.memory_space<vmem>>, %arg5: memref<3x3x128x128xf32, #tpu.memory_space<vmem>>, %arg6: memref<1x128xf32, #tpu.memory_space<vmem>>, %arg7: memref<3x3x128x16xf32, #tpu.memory_space<vmem>>, %arg8: memref<1x16xf32, #tpu.memory_space<vmem>>, %arg9: memref<176x512xf32, #tpu.memory_space<vmem>>, %arg10: memref<128x512xf32, #tpu.memory_space<vmem>>, %arg11: memref<1x512xf32, #tpu.memory_space<vmem>>, %arg12: memref<128x128xf32, #tpu.memory_space<vmem>>, %arg13: memref<1x128xf32, #tpu.memory_space<vmem>>, %arg14: memref<6x8x128xf32, #tpu.memory_space<vmem>>) attributes {dimension_semantics = [#tpu.dimension_semantics<parallel>], iteration_bounds = array<i64: 1>, scalar_prefetch = 0 : i64, scratch_operands = 0 : i64, tpu.core_type = #tpu.core_type<tc>, window_params = [{transform_indices = @transform_0, window_bounds = array<i64: 8, 8, 8, 128>}, {transform_indices = @transform_1, window_bounds = array<i64: 8, 128>}, {pipeline_mode = #tpu.pipeline_mode<synchronous>, transform_indices = @transform_2, window_bounds = array<i64: 128, 32>}, {pipeline_mode = #tpu.pipeline_mode<synchronous>, transform_indices = @transform_3, window_bounds = array<i64: 1, 32>}, {pipeline_mode = #tpu.pipeline_mode<synchronous>, transform_indices = @transform_4, window_bounds = array<i64: 3, 3, 128, 128>}, {pipeline_mode = #tpu.pipeline_mode<synchronous>, transform_indices = @transform_5, window_bounds = array<i64: 1, 128>}, {pipeline_mode = #tpu.pipeline_mode<synchronous>, transform_indices = @transform_6, window_bounds = array<i64: 3, 3, 128, 16>}, {pipeline_mode = #tpu.pipeline_mode<synchronous>, transform_indices = @transform_7, window_bounds = array<i64: 1, 16>}, {pipeline_mode = #tpu.pipeline_mode<synchronous>, transform_indices = @transform_8, window_bounds = array<i64: 176, 512>}, {pipeline_mode = #tpu.pipeline_mode<synchronous>, transform_indices = @transform_9, window_bounds = array<i64: 128, 512>}, {pipeline_mode = #tpu.pipeline_mode<synchronous>, transform_indices = @transform_10, window_bounds = array<i64: 1, 512>}, {pipeline_mode = #tpu.pipeline_mode<synchronous>, transform_indices = @transform_11, window_bounds = array<i64: 128, 128>}, {pipeline_mode = #tpu.pipeline_mode<synchronous>, transform_indices = @transform_12, window_bounds = array<i64: 1, 128>}, {transform_indices = @transform_13, window_bounds = array<i64: 6, 8, 128>}]} {
    %cst = arith.constant 0.000000e+00 : f32
    %0 = vector.broadcast %cst : f32 to vector<288x128xf32>
    %c0 = arith.constant 0 : index
    %c0_0 = arith.constant 0 : index
    %c0_1 = arith.constant 0 : index
    %c0_2 = arith.constant 0 : index
    %1 = vector.load %arg1[%c0, %c0_0, %c0_1, %c0_2] : memref<8x8x8x128xf32, #tpu.memory_space<vmem>>, vector<6x6x8x128xf32>
    %2 = vector.shape_cast %1 : vector<6x6x8x128xf32> to vector<288x128xf32>
    %c0_3 = arith.constant 0 : index
    %c0_4 = arith.constant 0 : index
    %c0_5 = arith.constant 0 : index
    %c0_6 = arith.constant 0 : index
    %3 = vector.load %arg5[%c0_3, %c0_4, %c0_5, %c0_6] : memref<3x3x128x128xf32, #tpu.memory_space<vmem>>, vector<1x1x128x128xf32>
    %4 = vector.shape_cast %3 : vector<1x1x128x128xf32> to vector<128x128xf32>
    %cst_7 = arith.constant dense<0.000000e+00> : vector<288x128xf32>
    %5 = tpu.matmul %2, %4, %cst_7 {dimension_numbers = #tpu.dot_dimension_numbers<[1], [0], [0], [1], [0, 0, 1, 1], [], []>} : vector<288x128xf32>, vector<128x128xf32>, vector<288x128xf32> -> vector<288x128xf32>
    %6 = arith.addf %0, %5 : vector<288x128xf32>
    %c0_8 = arith.constant 0 : index
    %c1 = arith.constant 1 : index
    %c0_9 = arith.constant 0 : index
    %c0_10 = arith.constant 0 : index
    %7 = vector.load %arg1[%c0_8, %c1, %c0_9, %c0_10] : memref<8x8x8x128xf32, #tpu.memory_space<vmem>>, vector<6x6x8x128xf32>
    %8 = vector.shape_cast %7 : vector<6x6x8x128xf32> to vector<288x128xf32>
    %c0_11 = arith.constant 0 : index
    %c1_12 = arith.constant 1 : index
    %c0_13 = arith.constant 0 : index
    %c0_14 = arith.constant 0 : index
    %9 = vector.load %arg5[%c0_11, %c1_12, %c0_13, %c0_14] : memref<3x3x128x128xf32, #tpu.memory_space<vmem>>, vector<1x1x128x128xf32>
    %10 = vector.shape_cast %9 : vector<1x1x128x128xf32> to vector<128x128xf32>
    %cst_15 = arith.constant dense<0.000000e+00> : vector<288x128xf32>
    %11 = tpu.matmul %8, %10, %cst_15 {dimension_numbers = #tpu.dot_dimension_numbers<[1], [0], [0], [1], [0, 0, 1, 1], [], []>} : vector<288x128xf32>, vector<128x128xf32>, vector<288x128xf32> -> vector<288x128xf32>
    %12 = arith.addf %6, %11 : vector<288x128xf32>
    %c0_16 = arith.constant 0 : index
    %c2 = arith.constant 2 : index
    %c0_17 = arith.constant 0 : index
    %c0_18 = arith.constant 0 : index
    %13 = vector.load %arg1[%c0_16, %c2, %c0_17, %c0_18] : memref<8x8x8x128xf32, #tpu.memory_space<vmem>>, vector<6x6x8x128xf32>
    %14 = vector.shape_cast %13 : vector<6x6x8x128xf32> to vector<288x128xf32>
    %c0_19 = arith.constant 0 : index
    %c2_20 = arith.constant 2 : index
    %c0_21 = arith.constant 0 : index
    %c0_22 = arith.constant 0 : index
    %15 = vector.load %arg5[%c0_19, %c2_20, %c0_21, %c0_22] : memref<3x3x128x128xf32, #tpu.memory_space<vmem>>, vector<1x1x128x128xf32>
    %16 = vector.shape_cast %15 : vector<1x1x128x128xf32> to vector<128x128xf32>
    %cst_23 = arith.constant dense<0.000000e+00> : vector<288x128xf32>
    %17 = tpu.matmul %14, %16, %cst_23 {dimension_numbers = #tpu.dot_dimension_numbers<[1], [0], [0], [1], [0, 0, 1, 1], [], []>} : vector<288x128xf32>, vector<128x128xf32>, vector<288x128xf32> -> vector<288x128xf32>
    %18 = arith.addf %12, %17 : vector<288x128xf32>
    %c1_24 = arith.constant 1 : index
    %c0_25 = arith.constant 0 : index
    %c0_26 = arith.constant 0 : index
    %c0_27 = arith.constant 0 : index
    %19 = vector.load %arg1[%c1_24, %c0_25, %c0_26, %c0_27] : memref<8x8x8x128xf32, #tpu.memory_space<vmem>>, vector<6x6x8x128xf32>
    %20 = vector.shape_cast %19 : vector<6x6x8x128xf32> to vector<288x128xf32>
    %c1_28 = arith.constant 1 : index
    %c0_29 = arith.constant 0 : index
    %c0_30 = arith.constant 0 : index
    %c0_31 = arith.constant 0 : index
    %21 = vector.load %arg5[%c1_28, %c0_29, %c0_30, %c0_31] : memref<3x3x128x128xf32, #tpu.memory_space<vmem>>, vector<1x1x128x128xf32>
    %22 = vector.shape_cast %21 : vector<1x1x128x128xf32> to vector<128x128xf32>
    %cst_32 = arith.constant dense<0.000000e+00> : vector<288x128xf32>
    %23 = tpu.matmul %20, %22, %cst_32 {dimension_numbers = #tpu.dot_dimension_numbers<[1], [0], [0], [1], [0, 0, 1, 1], [], []>} : vector<288x128xf32>, vector<128x128xf32>, vector<288x128xf32> -> vector<288x128xf32>
    %24 = arith.addf %18, %23 : vector<288x128xf32>
    %c1_33 = arith.constant 1 : index
    %c1_34 = arith.constant 1 : index
    %c0_35 = arith.constant 0 : index
    %c0_36 = arith.constant 0 : index
    %25 = vector.load %arg1[%c1_33, %c1_34, %c0_35, %c0_36] : memref<8x8x8x128xf32, #tpu.memory_space<vmem>>, vector<6x6x8x128xf32>
    %26 = vector.shape_cast %25 : vector<6x6x8x128xf32> to vector<288x128xf32>
    %c1_37 = arith.constant 1 : index
    %c1_38 = arith.constant 1 : index
    %c0_39 = arith.constant 0 : index
    %c0_40 = arith.constant 0 : index
    %27 = vector.load %arg5[%c1_37, %c1_38, %c0_39, %c0_40] : memref<3x3x128x128xf32, #tpu.memory_space<vmem>>, vector<1x1x128x128xf32>
    %28 = vector.shape_cast %27 : vector<1x1x128x128xf32> to vector<128x128xf32>
    %cst_41 = arith.constant dense<0.000000e+00> : vector<288x128xf32>
    %29 = tpu.matmul %26, %28, %cst_41 {dimension_numbers = #tpu.dot_dimension_numbers<[1], [0], [0], [1], [0, 0, 1, 1], [], []>} : vector<288x128xf32>, vector<128x128xf32>, vector<288x128xf32> -> vector<288x128xf32>
    %30 = arith.addf %24, %29 : vector<288x128xf32>
    %c1_42 = arith.constant 1 : index
    %c2_43 = arith.constant 2 : index
    %c0_44 = arith.constant 0 : index
    %c0_45 = arith.constant 0 : index
    %31 = vector.load %arg1[%c1_42, %c2_43, %c0_44, %c0_45] : memref<8x8x8x128xf32, #tpu.memory_space<vmem>>, vector<6x6x8x128xf32>
    %32 = vector.shape_cast %31 : vector<6x6x8x128xf32> to vector<288x128xf32>
    %c1_46 = arith.constant 1 : index
    %c2_47 = arith.constant 2 : index
    %c0_48 = arith.constant 0 : index
    %c0_49 = arith.constant 0 : index
    %33 = vector.load %arg5[%c1_46, %c2_47, %c0_48, %c0_49] : memref<3x3x128x128xf32, #tpu.memory_space<vmem>>, vector<1x1x128x128xf32>
    %34 = vector.shape_cast %33 : vector<1x1x128x128xf32> to vector<128x128xf32>
    %cst_50 = arith.constant dense<0.000000e+00> : vector<288x128xf32>
    %35 = tpu.matmul %32, %34, %cst_50 {dimension_numbers = #tpu.dot_dimension_numbers<[1], [0], [0], [1], [0, 0, 1, 1], [], []>} : vector<288x128xf32>, vector<128x128xf32>, vector<288x128xf32> -> vector<288x128xf32>
    %36 = arith.addf %30, %35 : vector<288x128xf32>
    %c2_51 = arith.constant 2 : index
    %c0_52 = arith.constant 0 : index
    %c0_53 = arith.constant 0 : index
    %c0_54 = arith.constant 0 : index
    %37 = vector.load %arg1[%c2_51, %c0_52, %c0_53, %c0_54] : memref<8x8x8x128xf32, #tpu.memory_space<vmem>>, vector<6x6x8x128xf32>
    %38 = vector.shape_cast %37 : vector<6x6x8x128xf32> to vector<288x128xf32>
    %c2_55 = arith.constant 2 : index
    %c0_56 = arith.constant 0 : index
    %c0_57 = arith.constant 0 : index
    %c0_58 = arith.constant 0 : index
    %39 = vector.load %arg5[%c2_55, %c0_56, %c0_57, %c0_58] : memref<3x3x128x128xf32, #tpu.memory_space<vmem>>, vector<1x1x128x128xf32>
    %40 = vector.shape_cast %39 : vector<1x1x128x128xf32> to vector<128x128xf32>
    %cst_59 = arith.constant dense<0.000000e+00> : vector<288x128xf32>
    %41 = tpu.matmul %38, %40, %cst_59 {dimension_numbers = #tpu.dot_dimension_numbers<[1], [0], [0], [1], [0, 0, 1, 1], [], []>} : vector<288x128xf32>, vector<128x128xf32>, vector<288x128xf32> -> vector<288x128xf32>
    %42 = arith.addf %36, %41 : vector<288x128xf32>
    %c2_60 = arith.constant 2 : index
    %c1_61 = arith.constant 1 : index
    %c0_62 = arith.constant 0 : index
    %c0_63 = arith.constant 0 : index
    %43 = vector.load %arg1[%c2_60, %c1_61, %c0_62, %c0_63] : memref<8x8x8x128xf32, #tpu.memory_space<vmem>>, vector<6x6x8x128xf32>
    %44 = vector.shape_cast %43 : vector<6x6x8x128xf32> to vector<288x128xf32>
    %c2_64 = arith.constant 2 : index
    %c1_65 = arith.constant 1 : index
    %c0_66 = arith.constant 0 : index
    %c0_67 = arith.constant 0 : index
    %45 = vector.load %arg5[%c2_64, %c1_65, %c0_66, %c0_67] : memref<3x3x128x128xf32, #tpu.memory_space<vmem>>, vector<1x1x128x128xf32>
    %46 = vector.shape_cast %45 : vector<1x1x128x128xf32> to vector<128x128xf32>
    %cst_68 = arith.constant dense<0.000000e+00> : vector<288x128xf32>
    %47 = tpu.matmul %44, %46, %cst_68 {dimension_numbers = #tpu.dot_dimension_numbers<[1], [0], [0], [1], [0, 0, 1, 1], [], []>} : vector<288x128xf32>, vector<128x128xf32>, vector<288x128xf32> -> vector<288x128xf32>
    %48 = arith.addf %42, %47 : vector<288x128xf32>
    %c2_69 = arith.constant 2 : index
    %c2_70 = arith.constant 2 : index
    %c0_71 = arith.constant 0 : index
    %c0_72 = arith.constant 0 : index
    %49 = vector.load %arg1[%c2_69, %c2_70, %c0_71, %c0_72] : memref<8x8x8x128xf32, #tpu.memory_space<vmem>>, vector<6x6x8x128xf32>
    %50 = vector.shape_cast %49 : vector<6x6x8x128xf32> to vector<288x128xf32>
    %c2_73 = arith.constant 2 : index
    %c2_74 = arith.constant 2 : index
    %c0_75 = arith.constant 0 : index
    %c0_76 = arith.constant 0 : index
    %51 = vector.load %arg5[%c2_73, %c2_74, %c0_75, %c0_76] : memref<3x3x128x128xf32, #tpu.memory_space<vmem>>, vector<1x1x128x128xf32>
    %52 = vector.shape_cast %51 : vector<1x1x128x128xf32> to vector<128x128xf32>
    %cst_77 = arith.constant dense<0.000000e+00> : vector<288x128xf32>
    %53 = tpu.matmul %50, %52, %cst_77 {dimension_numbers = #tpu.dot_dimension_numbers<[1], [0], [0], [1], [0, 0, 1, 1], [], []>} : vector<288x128xf32>, vector<128x128xf32>, vector<288x128xf32> -> vector<288x128xf32>
    %54 = arith.addf %48, %53 : vector<288x128xf32>
    %c0_78 = arith.constant 0 : index
    %c0_79 = arith.constant 0 : index
    %55 = vector.load %arg6[%c0_78, %c0_79] : memref<1x128xf32, #tpu.memory_space<vmem>>, vector<1x128xf32>
    %56 = vector.broadcast %55 : vector<1x128xf32> to vector<288x128xf32>
    %57 = arith.addf %54, %56 : vector<288x128xf32>
    %cst_80 = arith.constant 1.000000e-01 : f32
    %58 = vector.broadcast %cst_80 : f32 to vector<288x128xf32>
    %59 = arith.mulf %58, %57 : vector<288x128xf32>
    %60 = arith.maximumf %57, %59 : vector<288x128xf32>
    %61 = vector.shape_cast %60 : vector<288x128xf32> to vector<6x6x8x128xf32>
    %cst_81 = arith.constant 0.000000e+00 : f32
    %62 = vector.broadcast %cst_81 : f32 to vector<128x16xf32>
    %63 = vector.extract_strided_slice %61 {offsets = [0, 0, 0, 0], sizes = [4, 4, 8, 128], strides = [1, 1, 1, 1]} : vector<6x6x8x128xf32> to vector<4x4x8x128xf32>
    %64 = vector.shape_cast %63 : vector<4x4x8x128xf32> to vector<128x128xf32>
    %c0_82 = arith.constant 0 : index
    %c0_83 = arith.constant 0 : index
    %c0_84 = arith.constant 0 : index
    %c0_85 = arith.constant 0 : index
    %65 = vector.load %arg7[%c0_82, %c0_83, %c0_84, %c0_85] : memref<3x3x128x16xf32, #tpu.memory_space<vmem>>, vector<1x1x128x16xf32>
    %66 = vector.shape_cast %65 : vector<1x1x128x16xf32> to vector<128x16xf32>
    %cst_86 = arith.constant dense<0.000000e+00> : vector<128x16xf32>
    %67 = tpu.matmul %64, %66, %cst_86 {dimension_numbers = #tpu.dot_dimension_numbers<[1], [0], [0], [1], [0, 0, 1, 1], [], []>} : vector<128x128xf32>, vector<128x16xf32>, vector<128x16xf32> -> vector<128x16xf32>
    %68 = arith.addf %62, %67 : vector<128x16xf32>
    %69 = vector.extract_strided_slice %61 {offsets = [0, 1, 0, 0], sizes = [4, 4, 8, 128], strides = [1, 1, 1, 1]} : vector<6x6x8x128xf32> to vector<4x4x8x128xf32>
    %70 = vector.shape_cast %69 : vector<4x4x8x128xf32> to vector<128x128xf32>
    %c0_87 = arith.constant 0 : index
    %c1_88 = arith.constant 1 : index
    %c0_89 = arith.constant 0 : index
    %c0_90 = arith.constant 0 : index
    %71 = vector.load %arg7[%c0_87, %c1_88, %c0_89, %c0_90] : memref<3x3x128x16xf32, #tpu.memory_space<vmem>>, vector<1x1x128x16xf32>
    %72 = vector.shape_cast %71 : vector<1x1x128x16xf32> to vector<128x16xf32>
    %cst_91 = arith.constant dense<0.000000e+00> : vector<128x16xf32>
    %73 = tpu.matmul %70, %72, %cst_91 {dimension_numbers = #tpu.dot_dimension_numbers<[1], [0], [0], [1], [0, 0, 1, 1], [], []>} : vector<128x128xf32>, vector<128x16xf32>, vector<128x16xf32> -> vector<128x16xf32>
    %74 = arith.addf %68, %73 : vector<128x16xf32>
    %75 = vector.extract_strided_slice %61 {offsets = [0, 2, 0, 0], sizes = [4, 4, 8, 128], strides = [1, 1, 1, 1]} : vector<6x6x8x128xf32> to vector<4x4x8x128xf32>
    %76 = vector.shape_cast %75 : vector<4x4x8x128xf32> to vector<128x128xf32>
    %c0_92 = arith.constant 0 : index
    %c2_93 = arith.constant 2 : index
    %c0_94 = arith.constant 0 : index
    %c0_95 = arith.constant 0 : index
    %77 = vector.load %arg7[%c0_92, %c2_93, %c0_94, %c0_95] : memref<3x3x128x16xf32, #tpu.memory_space<vmem>>, vector<1x1x128x16xf32>
    %78 = vector.shape_cast %77 : vector<1x1x128x16xf32> to vector<128x16xf32>
    %cst_96 = arith.constant dense<0.000000e+00> : vector<128x16xf32>
    %79 = tpu.matmul %76, %78, %cst_96 {dimension_numbers = #tpu.dot_dimension_numbers<[1], [0], [0], [1], [0, 0, 1, 1], [], []>} : vector<128x128xf32>, vector<128x16xf32>, vector<128x16xf32> -> vector<128x16xf32>
    %80 = arith.addf %74, %79 : vector<128x16xf32>
    %81 = vector.extract_strided_slice %61 {offsets = [1, 0, 0, 0], sizes = [4, 4, 8, 128], strides = [1, 1, 1, 1]} : vector<6x6x8x128xf32> to vector<4x4x8x128xf32>
    %82 = vector.shape_cast %81 : vector<4x4x8x128xf32> to vector<128x128xf32>
    %c1_97 = arith.constant 1 : index
    %c0_98 = arith.constant 0 : index
    %c0_99 = arith.constant 0 : index
    %c0_100 = arith.constant 0 : index
    %83 = vector.load %arg7[%c1_97, %c0_98, %c0_99, %c0_100] : memref<3x3x128x16xf32, #tpu.memory_space<vmem>>, vector<1x1x128x16xf32>
    %84 = vector.shape_cast %83 : vector<1x1x128x16xf32> to vector<128x16xf32>
    %cst_101 = arith.constant dense<0.000000e+00> : vector<128x16xf32>
    %85 = tpu.matmul %82, %84, %cst_101 {dimension_numbers = #tpu.dot_dimension_numbers<[1], [0], [0], [1], [0, 0, 1, 1], [], []>} : vector<128x128xf32>, vector<128x16xf32>, vector<128x16xf32> -> vector<128x16xf32>
    %86 = arith.addf %80, %85 : vector<128x16xf32>
    %87 = vector.extract_strided_slice %61 {offsets = [1, 1, 0, 0], sizes = [4, 4, 8, 128], strides = [1, 1, 1, 1]} : vector<6x6x8x128xf32> to vector<4x4x8x128xf32>
    %88 = vector.shape_cast %87 : vector<4x4x8x128xf32> to vector<128x128xf32>
    %c1_102 = arith.constant 1 : index
    %c1_103 = arith.constant 1 : index
    %c0_104 = arith.constant 0 : index
    %c0_105 = arith.constant 0 : index
    %89 = vector.load %arg7[%c1_102, %c1_103, %c0_104, %c0_105] : memref<3x3x128x16xf32, #tpu.memory_space<vmem>>, vector<1x1x128x16xf32>
    %90 = vector.shape_cast %89 : vector<1x1x128x16xf32> to vector<128x16xf32>
    %cst_106 = arith.constant dense<0.000000e+00> : vector<128x16xf32>
    %91 = tpu.matmul %88, %90, %cst_106 {dimension_numbers = #tpu.dot_dimension_numbers<[1], [0], [0], [1], [0, 0, 1, 1], [], []>} : vector<128x128xf32>, vector<128x16xf32>, vector<128x16xf32> -> vector<128x16xf32>
    %92 = arith.addf %86, %91 : vector<128x16xf32>
    %93 = vector.extract_strided_slice %61 {offsets = [1, 2, 0, 0], sizes = [4, 4, 8, 128], strides = [1, 1, 1, 1]} : vector<6x6x8x128xf32> to vector<4x4x8x128xf32>
    %94 = vector.shape_cast %93 : vector<4x4x8x128xf32> to vector<128x128xf32>
    %c1_107 = arith.constant 1 : index
    %c2_108 = arith.constant 2 : index
    %c0_109 = arith.constant 0 : index
    %c0_110 = arith.constant 0 : index
    %95 = vector.load %arg7[%c1_107, %c2_108, %c0_109, %c0_110] : memref<3x3x128x16xf32, #tpu.memory_space<vmem>>, vector<1x1x128x16xf32>
    %96 = vector.shape_cast %95 : vector<1x1x128x16xf32> to vector<128x16xf32>
    %cst_111 = arith.constant dense<0.000000e+00> : vector<128x16xf32>
    %97 = tpu.matmul %94, %96, %cst_111 {dimension_numbers = #tpu.dot_dimension_numbers<[1], [0], [0], [1], [0, 0, 1, 1], [], []>} : vector<128x128xf32>, vector<128x16xf32>, vector<128x16xf32> -> vector<128x16xf32>
    %98 = arith.addf %92, %97 : vector<128x16xf32>
    %99 = vector.extract_strided_slice %61 {offsets = [2, 0, 0, 0], sizes = [4, 4, 8, 128], strides = [1, 1, 1, 1]} : vector<6x6x8x128xf32> to vector<4x4x8x128xf32>
    %100 = vector.shape_cast %99 : vector<4x4x8x128xf32> to vector<128x128xf32>
    %c2_112 = arith.constant 2 : index
    %c0_113 = arith.constant 0 : index
    %c0_114 = arith.constant 0 : index
    %c0_115 = arith.constant 0 : index
    %101 = vector.load %arg7[%c2_112, %c0_113, %c0_114, %c0_115] : memref<3x3x128x16xf32, #tpu.memory_space<vmem>>, vector<1x1x128x16xf32>
    %102 = vector.shape_cast %101 : vector<1x1x128x16xf32> to vector<128x16xf32>
    %cst_116 = arith.constant dense<0.000000e+00> : vector<128x16xf32>
    %103 = tpu.matmul %100, %102, %cst_116 {dimension_numbers = #tpu.dot_dimension_numbers<[1], [0], [0], [1], [0, 0, 1, 1], [], []>} : vector<128x128xf32>, vector<128x16xf32>, vector<128x16xf32> -> vector<128x16xf32>
    %104 = arith.addf %98, %103 : vector<128x16xf32>
    %105 = vector.extract_strided_slice %61 {offsets = [2, 1, 0, 0], sizes = [4, 4, 8, 128], strides = [1, 1, 1, 1]} : vector<6x6x8x128xf32> to vector<4x4x8x128xf32>
    %106 = vector.shape_cast %105 : vector<4x4x8x128xf32> to vector<128x128xf32>
    %c2_117 = arith.constant 2 : index
    %c1_118 = arith.constant 1 : index
    %c0_119 = arith.constant 0 : index
    %c0_120 = arith.constant 0 : index
    %107 = vector.load %arg7[%c2_117, %c1_118, %c0_119, %c0_120] : memref<3x3x128x16xf32, #tpu.memory_space<vmem>>, vector<1x1x128x16xf32>
    %108 = vector.shape_cast %107 : vector<1x1x128x16xf32> to vector<128x16xf32>
    %cst_121 = arith.constant dense<0.000000e+00> : vector<128x16xf32>
    %109 = tpu.matmul %106, %108, %cst_121 {dimension_numbers = #tpu.dot_dimension_numbers<[1], [0], [0], [1], [0, 0, 1, 1], [], []>} : vector<128x128xf32>, vector<128x16xf32>, vector<128x16xf32> -> vector<128x16xf32>
    %110 = arith.addf %104, %109 : vector<128x16xf32>
    %111 = vector.extract_strided_slice %61 {offsets = [2, 2, 0, 0], sizes = [4, 4, 8, 128], strides = [1, 1, 1, 1]} : vector<6x6x8x128xf32> to vector<4x4x8x128xf32>
    %112 = vector.shape_cast %111 : vector<4x4x8x128xf32> to vector<128x128xf32>
    %c2_122 = arith.constant 2 : index
    %c2_123 = arith.constant 2 : index
    %c0_124 = arith.constant 0 : index
    %c0_125 = arith.constant 0 : index
    %113 = vector.load %arg7[%c2_122, %c2_123, %c0_124, %c0_125] : memref<3x3x128x16xf32, #tpu.memory_space<vmem>>, vector<1x1x128x16xf32>
    %114 = vector.shape_cast %113 : vector<1x1x128x16xf32> to vector<128x16xf32>
    %cst_126 = arith.constant dense<0.000000e+00> : vector<128x16xf32>
    %115 = tpu.matmul %112, %114, %cst_126 {dimension_numbers = #tpu.dot_dimension_numbers<[1], [0], [0], [1], [0, 0, 1, 1], [], []>} : vector<128x128xf32>, vector<128x16xf32>, vector<128x16xf32> -> vector<128x16xf32>
    %116 = arith.addf %110, %115 : vector<128x16xf32>
    %c0_127 = arith.constant 0 : index
    %c0_128 = arith.constant 0 : index
    %117 = vector.load %arg8[%c0_127, %c0_128] : memref<1x16xf32, #tpu.memory_space<vmem>>, vector<1x16xf32>
    %118 = vector.broadcast %117 : vector<1x16xf32> to vector<128x16xf32>
    %119 = arith.addf %116, %118 : vector<128x16xf32>
    %cst_129 = arith.constant 1.000000e-01 : f32
    %120 = vector.broadcast %cst_129 : f32 to vector<128x16xf32>
    %121 = arith.mulf %120, %119 : vector<128x16xf32>
    %122 = arith.maximumf %119, %121 : vector<128x16xf32>
    %123 = vector.shape_cast %122 : vector<128x16xf32> to vector<4x4x8x16xf32>
    %124 = vector.extract_strided_slice %123 {offsets = [0, 0, 0, 0], sizes = [4, 3, 8, 16], strides = [1, 1, 1, 1]} : vector<4x4x8x16xf32> to vector<4x3x8x16xf32>
    %125 = vector.extract_strided_slice %123 {offsets = [0, 1, 0, 0], sizes = [4, 3, 8, 16], strides = [1, 1, 1, 1]} : vector<4x4x8x16xf32> to vector<4x3x8x16xf32>
    %126 = arith.maximumf %124, %125 : vector<4x3x8x16xf32>
    %127 = vector.extract_strided_slice %126 {offsets = [0, 0, 0, 0], sizes = [3, 3, 8, 16], strides = [1, 1, 1, 1]} : vector<4x3x8x16xf32> to vector<3x3x8x16xf32>
    %128 = vector.extract_strided_slice %126 {offsets = [1, 0, 0, 0], sizes = [3, 3, 8, 16], strides = [1, 1, 1, 1]} : vector<4x3x8x16xf32> to vector<3x3x8x16xf32>
    %129 = arith.maximumf %127, %128 : vector<3x3x8x16xf32>
    %c0_130 = arith.constant 0 : index
    %c0_131 = arith.constant 0 : index
    %130 = vector.load %arg2[%c0_130, %c0_131] : memref<8x128xf32, #tpu.memory_space<vmem>>, vector<8x128xf32>
    %c0_132 = arith.constant 0 : index
    %c0_133 = arith.constant 0 : index
    %131 = vector.load %arg3[%c0_132, %c0_133] : memref<128x32xf32, #tpu.memory_space<vmem>>, vector<128x32xf32>
    %cst_134 = arith.constant dense<0.000000e+00> : vector<8x32xf32>
    %132 = tpu.matmul %130, %131, %cst_134 {dimension_numbers = #tpu.dot_dimension_numbers<[1], [0], [0], [1], [0, 0, 1, 1], [], []>} : vector<8x128xf32>, vector<128x32xf32>, vector<8x32xf32> -> vector<8x32xf32>
    %c0_135 = arith.constant 0 : index
    %c0_136 = arith.constant 0 : index
    %133 = vector.load %arg4[%c0_135, %c0_136] : memref<1x32xf32, #tpu.memory_space<vmem>>, vector<1x32xf32>
    %134 = vector.broadcast %133 : vector<1x32xf32> to vector<8x32xf32>
    %135 = arith.addf %132, %134 : vector<8x32xf32>
    %cst_137 = arith.constant 1.000000e-01 : f32
    %136 = vector.broadcast %cst_137 : f32 to vector<8x32xf32>
    %137 = arith.mulf %136, %135 : vector<8x32xf32>
    %138 = arith.maximumf %135, %137 : vector<8x32xf32>
    %139 = vector.extract_strided_slice %129 {offsets = [0, 0, 0, 0], sizes = [1, 1, 8, 16], strides = [1, 1, 1, 1]} : vector<3x3x8x16xf32> to vector<1x1x8x16xf32>
    %140 = vector.shape_cast %139 : vector<1x1x8x16xf32> to vector<8x16xf32>
    %141 = vector.extract_strided_slice %129 {offsets = [0, 1, 0, 0], sizes = [1, 1, 8, 16], strides = [1, 1, 1, 1]} : vector<3x3x8x16xf32> to vector<1x1x8x16xf32>
    %142 = vector.shape_cast %141 : vector<1x1x8x16xf32> to vector<8x16xf32>
    %143 = vector.extract_strided_slice %129 {offsets = [0, 2, 0, 0], sizes = [1, 1, 8, 16], strides = [1, 1, 1, 1]} : vector<3x3x8x16xf32> to vector<1x1x8x16xf32>
    %144 = vector.shape_cast %143 : vector<1x1x8x16xf32> to vector<8x16xf32>
    %145 = vector.extract_strided_slice %129 {offsets = [1, 0, 0, 0], sizes = [1, 1, 8, 16], strides = [1, 1, 1, 1]} : vector<3x3x8x16xf32> to vector<1x1x8x16xf32>
    %146 = vector.shape_cast %145 : vector<1x1x8x16xf32> to vector<8x16xf32>
    %147 = vector.extract_strided_slice %129 {offsets = [1, 1, 0, 0], sizes = [1, 1, 8, 16], strides = [1, 1, 1, 1]} : vector<3x3x8x16xf32> to vector<1x1x8x16xf32>
    %148 = vector.shape_cast %147 : vector<1x1x8x16xf32> to vector<8x16xf32>
    %149 = vector.extract_strided_slice %129 {offsets = [1, 2, 0, 0], sizes = [1, 1, 8, 16], strides = [1, 1, 1, 1]} : vector<3x3x8x16xf32> to vector<1x1x8x16xf32>
    %150 = vector.shape_cast %149 : vector<1x1x8x16xf32> to vector<8x16xf32>
    %151 = vector.extract_strided_slice %129 {offsets = [2, 0, 0, 0], sizes = [1, 1, 8, 16], strides = [1, 1, 1, 1]} : vector<3x3x8x16xf32> to vector<1x1x8x16xf32>
    %152 = vector.shape_cast %151 : vector<1x1x8x16xf32> to vector<8x16xf32>
    %153 = vector.extract_strided_slice %129 {offsets = [2, 1, 0, 0], sizes = [1, 1, 8, 16], strides = [1, 1, 1, 1]} : vector<3x3x8x16xf32> to vector<1x1x8x16xf32>
    %154 = vector.shape_cast %153 : vector<1x1x8x16xf32> to vector<8x16xf32>
    %155 = vector.extract_strided_slice %129 {offsets = [2, 2, 0, 0], sizes = [1, 1, 8, 16], strides = [1, 1, 1, 1]} : vector<3x3x8x16xf32> to vector<1x1x8x16xf32>
    %156 = vector.shape_cast %155 : vector<1x1x8x16xf32> to vector<8x16xf32>
    %157 = tpu.concatenate %140, %142, %144, %146, %148, %150, %152, %154, %156, %138 in 1 : vector<8x16xf32>, vector<8x16xf32>, vector<8x16xf32>, vector<8x16xf32>, vector<8x16xf32>, vector<8x16xf32>, vector<8x16xf32>, vector<8x16xf32>, vector<8x16xf32>, vector<8x32xf32> -> vector<8x176xf32>
    %c0_138 = arith.constant 0 : index
    %c0_139 = arith.constant 0 : index
    %158 = vector.load %arg9[%c0_138, %c0_139] : memref<176x512xf32, #tpu.memory_space<vmem>>, vector<176x512xf32>
    %cst_140 = arith.constant dense<0.000000e+00> : vector<8x512xf32>
    %159 = tpu.matmul %157, %158, %cst_140 {dimension_numbers = #tpu.dot_dimension_numbers<[1], [0], [0], [1], [0, 0, 1, 1], [], []>} : vector<8x176xf32>, vector<176x512xf32>, vector<8x512xf32> -> vector<8x512xf32>
    %c0_141 = arith.constant 0 : index
    %c0_142 = arith.constant 0 : index
    %160 = vector.load %arg11[%c0_141, %c0_142] : memref<1x512xf32, #tpu.memory_space<vmem>>, vector<1x512xf32>
    %161 = vector.broadcast %160 : vector<1x512xf32> to vector<8x512xf32>
    %162 = arith.addf %159, %161 : vector<8x512xf32>
    %c0_143 = arith.constant 0 : index
    %c0_144 = arith.constant 0 : index
    %163 = vector.load %arg10[%c0_143, %c0_144] : memref<128x512xf32, #tpu.memory_space<vmem>>, vector<128x512xf32>
    %cst_145 = arith.constant 0.000000e+00 : f32
    %164 = vector.broadcast %cst_145 : f32 to vector<8x128xf32>
    %cst_146 = arith.constant 0.000000e+00 : f32
    %165 = vector.broadcast %cst_146 : f32 to vector<8x128xf32>
    %cst_147 = arith.constant dense<0.000000e+00> : vector<8x512xf32>
    %166 = tpu.matmul %164, %163, %cst_147 {dimension_numbers = #tpu.dot_dimension_numbers<[1], [0], [0], [1], [0, 0, 1, 1], [], []>} : vector<8x128xf32>, vector<128x512xf32>, vector<8x512xf32> -> vector<8x512xf32>
    %167 = arith.addf %162, %166 : vector<8x512xf32>
    %168 = vector.extract_strided_slice %167 {offsets = [0, 0], sizes = [8, 128], strides = [1, 1]} : vector<8x512xf32> to vector<8x128xf32>
    %169 = arith.negf %168 : vector<8x128xf32>
    %170 = math.exp %169 : vector<8x128xf32>
    %cst_148 = arith.constant 1.000000e+00 : f32
    %171 = vector.broadcast %cst_148 : f32 to vector<8x128xf32>
    %172 = arith.addf %171, %170 : vector<8x128xf32>
    %173 = arith.divf %171, %172 : vector<8x128xf32>
    %174 = vector.extract_strided_slice %167 {offsets = [0, 128], sizes = [8, 128], strides = [1, 1]} : vector<8x512xf32> to vector<8x128xf32>
    %175 = arith.negf %174 : vector<8x128xf32>
    %176 = math.exp %175 : vector<8x128xf32>
    %cst_149 = arith.constant 1.000000e+00 : f32
    %177 = vector.broadcast %cst_149 : f32 to vector<8x128xf32>
    %178 = arith.addf %177, %176 : vector<8x128xf32>
    %179 = arith.divf %177, %178 : vector<8x128xf32>
    %180 = vector.extract_strided_slice %167 {offsets = [0, 256], sizes = [8, 128], strides = [1, 1]} : vector<8x512xf32> to vector<8x128xf32>
    %181 = math.tanh %180 : vector<8x128xf32>
    %182 = vector.extract_strided_slice %167 {offsets = [0, 384], sizes = [8, 128], strides = [1, 1]} : vector<8x512xf32> to vector<8x128xf32>
    %183 = arith.negf %182 : vector<8x128xf32>
    %184 = math.exp %183 : vector<8x128xf32>
    %cst_150 = arith.constant 1.000000e+00 : f32
    %185 = vector.broadcast %cst_150 : f32 to vector<8x128xf32>
    %186 = arith.addf %185, %184 : vector<8x128xf32>
    %187 = arith.divf %185, %186 : vector<8x128xf32>
    %188 = arith.mulf %179, %165 : vector<8x128xf32>
    %189 = arith.mulf %173, %181 : vector<8x128xf32>
    %190 = arith.addf %188, %189 : vector<8x128xf32>
    %191 = math.tanh %190 : vector<8x128xf32>
    %192 = arith.mulf %187, %191 : vector<8x128xf32>
    %cst_151 = arith.constant dense<0.000000e+00> : vector<8x512xf32>
    %193 = tpu.matmul %192, %163, %cst_151 {dimension_numbers = #tpu.dot_dimension_numbers<[1], [0], [0], [1], [0, 0, 1, 1], [], []>} : vector<8x128xf32>, vector<128x512xf32>, vector<8x512xf32> -> vector<8x512xf32>
    %194 = arith.addf %162, %193 : vector<8x512xf32>
    %195 = vector.extract_strided_slice %194 {offsets = [0, 0], sizes = [8, 128], strides = [1, 1]} : vector<8x512xf32> to vector<8x128xf32>
    %196 = arith.negf %195 : vector<8x128xf32>
    %197 = math.exp %196 : vector<8x128xf32>
    %cst_152 = arith.constant 1.000000e+00 : f32
    %198 = vector.broadcast %cst_152 : f32 to vector<8x128xf32>
    %199 = arith.addf %198, %197 : vector<8x128xf32>
    %200 = arith.divf %198, %199 : vector<8x128xf32>
    %201 = vector.extract_strided_slice %194 {offsets = [0, 128], sizes = [8, 128], strides = [1, 1]} : vector<8x512xf32> to vector<8x128xf32>
    %202 = arith.negf %201 : vector<8x128xf32>
    %203 = math.exp %202 : vector<8x128xf32>
    %cst_153 = arith.constant 1.000000e+00 : f32
    %204 = vector.broadcast %cst_153 : f32 to vector<8x128xf32>
    %205 = arith.addf %204, %203 : vector<8x128xf32>
    %206 = arith.divf %204, %205 : vector<8x128xf32>
    %207 = vector.extract_strided_slice %194 {offsets = [0, 256], sizes = [8, 128], strides = [1, 1]} : vector<8x512xf32> to vector<8x128xf32>
    %208 = math.tanh %207 : vector<8x128xf32>
    %209 = vector.extract_strided_slice %194 {offsets = [0, 384], sizes = [8, 128], strides = [1, 1]} : vector<8x512xf32> to vector<8x128xf32>
    %210 = arith.negf %209 : vector<8x128xf32>
    %211 = math.exp %210 : vector<8x128xf32>
    %cst_154 = arith.constant 1.000000e+00 : f32
    %212 = vector.broadcast %cst_154 : f32 to vector<8x128xf32>
    %213 = arith.addf %212, %211 : vector<8x128xf32>
    %214 = arith.divf %212, %213 : vector<8x128xf32>
    %215 = arith.mulf %206, %190 : vector<8x128xf32>
    %216 = arith.mulf %200, %208 : vector<8x128xf32>
    %217 = arith.addf %215, %216 : vector<8x128xf32>
    %218 = math.tanh %217 : vector<8x128xf32>
    %219 = arith.mulf %214, %218 : vector<8x128xf32>
    %cst_155 = arith.constant dense<0.000000e+00> : vector<8x512xf32>
    %220 = tpu.matmul %219, %163, %cst_155 {dimension_numbers = #tpu.dot_dimension_numbers<[1], [0], [0], [1], [0, 0, 1, 1], [], []>} : vector<8x128xf32>, vector<128x512xf32>, vector<8x512xf32> -> vector<8x512xf32>
    %221 = arith.addf %162, %220 : vector<8x512xf32>
    %222 = vector.extract_strided_slice %221 {offsets = [0, 0], sizes = [8, 128], strides = [1, 1]} : vector<8x512xf32> to vector<8x128xf32>
    %223 = arith.negf %222 : vector<8x128xf32>
    %224 = math.exp %223 : vector<8x128xf32>
    %cst_156 = arith.constant 1.000000e+00 : f32
    %225 = vector.broadcast %cst_156 : f32 to vector<8x128xf32>
    %226 = arith.addf %225, %224 : vector<8x128xf32>
    %227 = arith.divf %225, %226 : vector<8x128xf32>
    %228 = vector.extract_strided_slice %221 {offsets = [0, 128], sizes = [8, 128], strides = [1, 1]} : vector<8x512xf32> to vector<8x128xf32>
    %229 = arith.negf %228 : vector<8x128xf32>
    %230 = math.exp %229 : vector<8x128xf32>
    %cst_157 = arith.constant 1.000000e+00 : f32
    %231 = vector.broadcast %cst_157 : f32 to vector<8x128xf32>
    %232 = arith.addf %231, %230 : vector<8x128xf32>
    %233 = arith.divf %231, %232 : vector<8x128xf32>
    %234 = vector.extract_strided_slice %221 {offsets = [0, 256], sizes = [8, 128], strides = [1, 1]} : vector<8x512xf32> to vector<8x128xf32>
    %235 = math.tanh %234 : vector<8x128xf32>
    %236 = vector.extract_strided_slice %221 {offsets = [0, 384], sizes = [8, 128], strides = [1, 1]} : vector<8x512xf32> to vector<8x128xf32>
    %237 = arith.negf %236 : vector<8x128xf32>
    %238 = math.exp %237 : vector<8x128xf32>
    %cst_158 = arith.constant 1.000000e+00 : f32
    %239 = vector.broadcast %cst_158 : f32 to vector<8x128xf32>
    %240 = arith.addf %239, %238 : vector<8x128xf32>
    %241 = arith.divf %239, %240 : vector<8x128xf32>
    %242 = arith.mulf %233, %217 : vector<8x128xf32>
    %243 = arith.mulf %227, %235 : vector<8x128xf32>
    %244 = arith.addf %242, %243 : vector<8x128xf32>
    %245 = math.tanh %244 : vector<8x128xf32>
    %246 = arith.mulf %241, %245 : vector<8x128xf32>
    %cst_159 = arith.constant dense<0.000000e+00> : vector<8x512xf32>
    %247 = tpu.matmul %246, %163, %cst_159 {dimension_numbers = #tpu.dot_dimension_numbers<[1], [0], [0], [1], [0, 0, 1, 1], [], []>} : vector<8x128xf32>, vector<128x512xf32>, vector<8x512xf32> -> vector<8x512xf32>
    %248 = arith.addf %162, %247 : vector<8x512xf32>
    %249 = vector.extract_strided_slice %248 {offsets = [0, 0], sizes = [8, 128], strides = [1, 1]} : vector<8x512xf32> to vector<8x128xf32>
    %250 = arith.negf %249 : vector<8x128xf32>
    %251 = math.exp %250 : vector<8x128xf32>
    %cst_160 = arith.constant 1.000000e+00 : f32
    %252 = vector.broadcast %cst_160 : f32 to vector<8x128xf32>
    %253 = arith.addf %252, %251 : vector<8x128xf32>
    %254 = arith.divf %252, %253 : vector<8x128xf32>
    %255 = vector.extract_strided_slice %248 {offsets = [0, 128], sizes = [8, 128], strides = [1, 1]} : vector<8x512xf32> to vector<8x128xf32>
    %256 = arith.negf %255 : vector<8x128xf32>
    %257 = math.exp %256 : vector<8x128xf32>
    %cst_161 = arith.constant 1.000000e+00 : f32
    %258 = vector.broadcast %cst_161 : f32 to vector<8x128xf32>
    %259 = arith.addf %258, %257 : vector<8x128xf32>
    %260 = arith.divf %258, %259 : vector<8x128xf32>
    %261 = vector.extract_strided_slice %248 {offsets = [0, 256], sizes = [8, 128], strides = [1, 1]} : vector<8x512xf32> to vector<8x128xf32>
    %262 = math.tanh %261 : vector<8x128xf32>
    %263 = vector.extract_strided_slice %248 {offsets = [0, 384], sizes = [8, 128], strides = [1, 1]} : vector<8x512xf32> to vector<8x128xf32>
    %264 = arith.negf %263 : vector<8x128xf32>
    %265 = math.exp %264 : vector<8x128xf32>
    %cst_162 = arith.constant 1.000000e+00 : f32
    %266 = vector.broadcast %cst_162 : f32 to vector<8x128xf32>
    %267 = arith.addf %266, %265 : vector<8x128xf32>
    %268 = arith.divf %266, %267 : vector<8x128xf32>
    %269 = arith.mulf %260, %244 : vector<8x128xf32>
    %270 = arith.mulf %254, %262 : vector<8x128xf32>
    %271 = arith.addf %269, %270 : vector<8x128xf32>
    %272 = math.tanh %271 : vector<8x128xf32>
    %273 = arith.mulf %268, %272 : vector<8x128xf32>
    %cst_163 = arith.constant dense<0.000000e+00> : vector<8x512xf32>
    %274 = tpu.matmul %273, %163, %cst_163 {dimension_numbers = #tpu.dot_dimension_numbers<[1], [0], [0], [1], [0, 0, 1, 1], [], []>} : vector<8x128xf32>, vector<128x512xf32>, vector<8x512xf32> -> vector<8x512xf32>
    %275 = arith.addf %162, %274 : vector<8x512xf32>
    %276 = vector.extract_strided_slice %275 {offsets = [0, 0], sizes = [8, 128], strides = [1, 1]} : vector<8x512xf32> to vector<8x128xf32>
    %277 = arith.negf %276 : vector<8x128xf32>
    %278 = math.exp %277 : vector<8x128xf32>
    %cst_164 = arith.constant 1.000000e+00 : f32
    %279 = vector.broadcast %cst_164 : f32 to vector<8x128xf32>
    %280 = arith.addf %279, %278 : vector<8x128xf32>
    %281 = arith.divf %279, %280 : vector<8x128xf32>
    %282 = vector.extract_strided_slice %275 {offsets = [0, 128], sizes = [8, 128], strides = [1, 1]} : vector<8x512xf32> to vector<8x128xf32>
    %283 = arith.negf %282 : vector<8x128xf32>
    %284 = math.exp %283 : vector<8x128xf32>
    %cst_165 = arith.constant 1.000000e+00 : f32
    %285 = vector.broadcast %cst_165 : f32 to vector<8x128xf32>
    %286 = arith.addf %285, %284 : vector<8x128xf32>
    %287 = arith.divf %285, %286 : vector<8x128xf32>
    %288 = vector.extract_strided_slice %275 {offsets = [0, 256], sizes = [8, 128], strides = [1, 1]} : vector<8x512xf32> to vector<8x128xf32>
    %289 = math.tanh %288 : vector<8x128xf32>
    %290 = vector.extract_strided_slice %275 {offsets = [0, 384], sizes = [8, 128], strides = [1, 1]} : vector<8x512xf32> to vector<8x128xf32>
    %291 = arith.negf %290 : vector<8x128xf32>
    %292 = math.exp %291 : vector<8x128xf32>
    %cst_166 = arith.constant 1.000000e+00 : f32
    %293 = vector.broadcast %cst_166 : f32 to vector<8x128xf32>
    %294 = arith.addf %293, %292 : vector<8x128xf32>
    %295 = arith.divf %293, %294 : vector<8x128xf32>
    %296 = arith.mulf %287, %271 : vector<8x128xf32>
    %297 = arith.mulf %281, %289 : vector<8x128xf32>
    %298 = arith.addf %296, %297 : vector<8x128xf32>
    %299 = math.tanh %298 : vector<8x128xf32>
    %300 = arith.mulf %295, %299 : vector<8x128xf32>
    %cst_167 = arith.constant dense<0.000000e+00> : vector<8x512xf32>
    %301 = tpu.matmul %300, %163, %cst_167 {dimension_numbers = #tpu.dot_dimension_numbers<[1], [0], [0], [1], [0, 0, 1, 1], [], []>} : vector<8x128xf32>, vector<128x512xf32>, vector<8x512xf32> -> vector<8x512xf32>
    %302 = arith.addf %162, %301 : vector<8x512xf32>
    %303 = vector.extract_strided_slice %302 {offsets = [0, 0], sizes = [8, 128], strides = [1, 1]} : vector<8x512xf32> to vector<8x128xf32>
    %304 = arith.negf %303 : vector<8x128xf32>
    %305 = math.exp %304 : vector<8x128xf32>
    %cst_168 = arith.constant 1.000000e+00 : f32
    %306 = vector.broadcast %cst_168 : f32 to vector<8x128xf32>
    %307 = arith.addf %306, %305 : vector<8x128xf32>
    %308 = arith.divf %306, %307 : vector<8x128xf32>
    %309 = vector.extract_strided_slice %302 {offsets = [0, 128], sizes = [8, 128], strides = [1, 1]} : vector<8x512xf32> to vector<8x128xf32>
    %310 = arith.negf %309 : vector<8x128xf32>
    %311 = math.exp %310 : vector<8x128xf32>
    %cst_169 = arith.constant 1.000000e+00 : f32
    %312 = vector.broadcast %cst_169 : f32 to vector<8x128xf32>
    %313 = arith.addf %312, %311 : vector<8x128xf32>
    %314 = arith.divf %312, %313 : vector<8x128xf32>
    %315 = vector.extract_strided_slice %302 {offsets = [0, 256], sizes = [8, 128], strides = [1, 1]} : vector<8x512xf32> to vector<8x128xf32>
    %316 = math.tanh %315 : vector<8x128xf32>
    %317 = vector.extract_strided_slice %302 {offsets = [0, 384], sizes = [8, 128], strides = [1, 1]} : vector<8x512xf32> to vector<8x128xf32>
    %318 = arith.negf %317 : vector<8x128xf32>
    %319 = math.exp %318 : vector<8x128xf32>
    %cst_170 = arith.constant 1.000000e+00 : f32
    %320 = vector.broadcast %cst_170 : f32 to vector<8x128xf32>
    %321 = arith.addf %320, %319 : vector<8x128xf32>
    %322 = arith.divf %320, %321 : vector<8x128xf32>
    %323 = arith.mulf %314, %298 : vector<8x128xf32>
    %324 = arith.mulf %308, %316 : vector<8x128xf32>
    %325 = arith.addf %323, %324 : vector<8x128xf32>
    %326 = math.tanh %325 : vector<8x128xf32>
    %327 = arith.mulf %322, %326 : vector<8x128xf32>
    %328 = tpu.concatenate %192, %219, %246, %273, %300, %327 in 0 : vector<8x128xf32>, vector<8x128xf32>, vector<8x128xf32>, vector<8x128xf32>, vector<8x128xf32>, vector<8x128xf32> -> vector<48x128xf32>
    %c0_171 = arith.constant 0 : index
    %c0_172 = arith.constant 0 : index
    %329 = vector.load %arg12[%c0_171, %c0_172] : memref<128x128xf32, #tpu.memory_space<vmem>>, vector<128x128xf32>
    %cst_173 = arith.constant dense<0.000000e+00> : vector<48x128xf32>
    %330 = tpu.matmul %328, %329, %cst_173 {dimension_numbers = #tpu.dot_dimension_numbers<[1], [0], [0], [1], [0, 0, 1, 1], [], []>} : vector<48x128xf32>, vector<128x128xf32>, vector<48x128xf32> -> vector<48x128xf32>
    %c0_174 = arith.constant 0 : index
    %c0_175 = arith.constant 0 : index
    %331 = vector.load %arg13[%c0_174, %c0_175] : memref<1x128xf32, #tpu.memory_space<vmem>>, vector<1x128xf32>
    %332 = vector.broadcast %331 : vector<1x128xf32> to vector<48x128xf32>
    %333 = arith.addf %330, %332 : vector<48x128xf32>
    %334 = tpu.iota {dimensions = array<i32: 1>} : vector<48x128xi32>
    %c2_i32 = arith.constant 2 : i32
    %335 = vector.broadcast %c2_i32 : i32 to vector<48x128xi32>
    %336 = arith.cmpi slt, %334, %335 : vector<48x128xi32>
    %c4_i32 = arith.constant 4 : i32
    %337 = vector.broadcast %c4_i32 : i32 to vector<48x128xi32>
    %338 = arith.cmpi slt, %334, %337 : vector<48x128xi32>
    %339 = math.exp %333 : vector<48x128xf32>
    %340 = math.tanh %333 : vector<48x128xf32>
    %341 = arith.select %338, %339, %340 : vector<48x128xi1>, vector<48x128xf32>
    %342 = arith.select %336, %333, %341 : vector<48x128xi1>, vector<48x128xf32>
    %343 = vector.extract_strided_slice %342 {offsets = [0, 0], sizes = [8, 128], strides = [1, 1]} : vector<48x128xf32> to vector<8x128xf32>
    %c0_176 = arith.constant 0 : index
    %c0_177 = arith.constant 0 : index
    %c0_178 = arith.constant 0 : index
    %344 = vector.load %arg14[%c0_176, %c0_177, %c0_178] : memref<6x8x128xf32, #tpu.memory_space<vmem>>, vector<1x8x128xf32>
    %345 = vector.shape_cast %344 : vector<1x8x128xf32> to vector<8x128xf32>
    %346 = vector.shape_cast %343 : vector<8x128xf32> to vector<1x8x128xf32>
    tpu.vector_store %arg14[%c0_176, %c0_177, %c0_178], %346 {strides = array<i32>} : memref<6x8x128xf32, #tpu.memory_space<vmem>>, vector<1x8x128xf32>,
    %347 = vector.extract_strided_slice %342 {offsets = [8, 0], sizes = [8, 128], strides = [1, 1]} : vector<48x128xf32> to vector<8x128xf32>
    %c1_179 = arith.constant 1 : index
    %c0_180 = arith.constant 0 : index
    %c0_181 = arith.constant 0 : index
    %348 = vector.load %arg14[%c1_179, %c0_180, %c0_181] : memref<6x8x128xf32, #tpu.memory_space<vmem>>, vector<1x8x128xf32>
    %349 = vector.shape_cast %348 : vector<1x8x128xf32> to vector<8x128xf32>
    %350 = vector.shape_cast %347 : vector<8x128xf32> to vector<1x8x128xf32>
    tpu.vector_store %arg14[%c1_179, %c0_180, %c0_181], %350 {strides = array<i32>} : memref<6x8x128xf32, #tpu.memory_space<vmem>>, vector<1x8x128xf32>,
    %351 = vector.extract_strided_slice %342 {offsets = [16, 0], sizes = [8, 128], strides = [1, 1]} : vector<48x128xf32> to vector<8x128xf32>
    %c2_182 = arith.constant 2 : index
    %c0_183 = arith.constant 0 : index
    %c0_184 = arith.constant 0 : index
    %352 = vector.load %arg14[%c2_182, %c0_183, %c0_184] : memref<6x8x128xf32, #tpu.memory_space<vmem>>, vector<1x8x128xf32>
    %353 = vector.shape_cast %352 : vector<1x8x128xf32> to vector<8x128xf32>
    %354 = vector.shape_cast %351 : vector<8x128xf32> to vector<1x8x128xf32>
    tpu.vector_store %arg14[%c2_182, %c0_183, %c0_184], %354 {strides = array<i32>} : memref<6x8x128xf32, #tpu.memory_space<vmem>>, vector<1x8x128xf32>,
    %355 = vector.extract_strided_slice %342 {offsets = [24, 0], sizes = [8, 128], strides = [1, 1]} : vector<48x128xf32> to vector<8x128xf32>
    %c3 = arith.constant 3 : index
    %c0_185 = arith.constant 0 : index
    %c0_186 = arith.constant 0 : index
    %356 = vector.load %arg14[%c3, %c0_185, %c0_186] : memref<6x8x128xf32, #tpu.memory_space<vmem>>, vector<1x8x128xf32>
    %357 = vector.shape_cast %356 : vector<1x8x128xf32> to vector<8x128xf32>
    %358 = vector.shape_cast %355 : vector<8x128xf32> to vector<1x8x128xf32>
    tpu.vector_store %arg14[%c3, %c0_185, %c0_186], %358 {strides = array<i32>} : memref<6x8x128xf32, #tpu.memory_space<vmem>>, vector<1x8x128xf32>,
    %359 = vector.extract_strided_slice %342 {offsets = [32, 0], sizes = [8, 128], strides = [1, 1]} : vector<48x128xf32> to vector<8x128xf32>
    %c4 = arith.constant 4 : index
    %c0_187 = arith.constant 0 : index
    %c0_188 = arith.constant 0 : index
    %360 = vector.load %arg14[%c4, %c0_187, %c0_188] : memref<6x8x128xf32, #tpu.memory_space<vmem>>, vector<1x8x128xf32>
    %361 = vector.shape_cast %360 : vector<1x8x128xf32> to vector<8x128xf32>
    %362 = vector.shape_cast %359 : vector<8x128xf32> to vector<1x8x128xf32>
    tpu.vector_store %arg14[%c4, %c0_187, %c0_188], %362 {strides = array<i32>} : memref<6x8x128xf32, #tpu.memory_space<vmem>>, vector<1x8x128xf32>,
    %363 = vector.extract_strided_slice %342 {offsets = [40, 0], sizes = [8, 128], strides = [1, 1]} : vector<48x128xf32> to vector<8x128xf32>
    %c5 = arith.constant 5 : index
    %c0_189 = arith.constant 0 : index
    %c0_190 = arith.constant 0 : index
    %364 = vector.load %arg14[%c5, %c0_189, %c0_190] : memref<6x8x128xf32, #tpu.memory_space<vmem>>, vector<1x8x128xf32>
    %365 = vector.shape_cast %364 : vector<1x8x128xf32> to vector<8x128xf32>
    %366 = vector.shape_cast %363 : vector<8x128xf32> to vector<1x8x128xf32>
    tpu.vector_store %arg14[%c5, %c0_189, %c0_190], %366 {strides = array<i32>} : memref<6x8x128xf32, #tpu.memory_space<vmem>>, vector<1x8x128xf32>,
    return
  }
  func.func @transform_0(%arg0: i32) -> (i32, i32, i32, i32) {
    %c0_i32 = arith.constant 0 : i32
    %c0_i32_0 = arith.constant 0 : i32
    %c0_i32_1 = arith.constant 0 : i32
    %c0_i32_2 = arith.constant 0 : i32
    return %c0_i32, %c0_i32_0, %arg0, %c0_i32_1 : i32, i32, i32, i32
  }
  func.func @transform_1(%arg0: i32) -> (i32, i32) {
    %c0_i32 = arith.constant 0 : i32
    %c0_i32_0 = arith.constant 0 : i32
    return %arg0, %c0_i32 : i32, i32
  }
  func.func @transform_2(%arg0: i32) -> (i32, i32) {
    %c0_i32 = arith.constant 0 : i32
    %c0_i32_0 = arith.constant 0 : i32
    %c0_i32_1 = arith.constant 0 : i32
    return %c0_i32, %c0_i32_0 : i32, i32
  }
  func.func @transform_3(%arg0: i32) -> (i32, i32) {
    %c0_i32 = arith.constant 0 : i32
    %c0_i32_0 = arith.constant 0 : i32
    %c0_i32_1 = arith.constant 0 : i32
    return %c0_i32, %c0_i32_0 : i32, i32
  }
  func.func @transform_4(%arg0: i32) -> (i32, i32, i32, i32) {
    %c0_i32 = arith.constant 0 : i32
    %c0_i32_0 = arith.constant 0 : i32
    %c0_i32_1 = arith.constant 0 : i32
    %c0_i32_2 = arith.constant 0 : i32
    %c0_i32_3 = arith.constant 0 : i32
    return %c0_i32, %c0_i32_0, %c0_i32_1, %c0_i32_2 : i32, i32, i32, i32
  }
  func.func @transform_5(%arg0: i32) -> (i32, i32) {
    %c0_i32 = arith.constant 0 : i32
    %c0_i32_0 = arith.constant 0 : i32
    %c0_i32_1 = arith.constant 0 : i32
    return %c0_i32, %c0_i32_0 : i32, i32
  }
  func.func @transform_6(%arg0: i32) -> (i32, i32, i32, i32) {
    %c0_i32 = arith.constant 0 : i32
    %c0_i32_0 = arith.constant 0 : i32
    %c0_i32_1 = arith.constant 0 : i32
    %c0_i32_2 = arith.constant 0 : i32
    %c0_i32_3 = arith.constant 0 : i32
    return %c0_i32, %c0_i32_0, %c0_i32_1, %c0_i32_2 : i32, i32, i32, i32
  }
  func.func @transform_7(%arg0: i32) -> (i32, i32) {
    %c0_i32 = arith.constant 0 : i32
    %c0_i32_0 = arith.constant 0 : i32
    %c0_i32_1 = arith.constant 0 : i32
    return %c0_i32, %c0_i32_0 : i32, i32
  }
  func.func @transform_8(%arg0: i32) -> (i32, i32) {
    %c0_i32 = arith.constant 0 : i32
    %c0_i32_0 = arith.constant 0 : i32
    %c0_i32_1 = arith.constant 0 : i32
    return %c0_i32, %c0_i32_0 : i32, i32
  }
  func.func @transform_9(%arg0: i32) -> (i32, i32) {
    %c0_i32 = arith.constant 0 : i32
    %c0_i32_0 = arith.constant 0 : i32
    %c0_i32_1 = arith.constant 0 : i32
    return %c0_i32, %c0_i32_0 : i32, i32
  }
  func.func @transform_10(%arg0: i32) -> (i32, i32) {
    %c0_i32 = arith.constant 0 : i32
    %c0_i32_0 = arith.constant 0 : i32
    %c0_i32_1 = arith.constant 0 : i32
    return %c0_i32, %c0_i32_0 : i32, i32
  }
  func.func @transform_11(%arg0: i32) -> (i32, i32) {
    %c0_i32 = arith.constant 0 : i32
    %c0_i32_0 = arith.constant 0 : i32
    %c0_i32_1 = arith.constant 0 : i32
    return %c0_i32, %c0_i32_0 : i32, i32
  }
  func.func @transform_12(%arg0: i32) -> (i32, i32) {
    %c0_i32 = arith.constant 0 : i32
    %c0_i32_0 = arith.constant 0 : i32
    %c0_i32_1 = arith.constant 0 : i32
    return %c0_i32, %c0_i32_0 : i32, i32
  }
  func.func @transform_13(%arg0: i32) -> (i32, i32, i32) {
    %c0_i32 = arith.constant 0 : i32
    %c0_i32_0 = arith.constant 0 : i32
    %c0_i32_1 = arith.constant 0 : i32
    return %c0_i32, %arg0, %c0_i32_0 : i32, i32, i32
  }
}

</mosaic_0001>

<bundles_post_ra>
// kernel: social_conv_lstm_forward.2
= control target key start
LH: loop header
LB: loop body
LE: loop exit
PB: predicated region body
PF: predicated region fallthrough
CT: control target
= control target key end

     0   :  { %11 = vsyncpa [#allocation3], 0  ;;  %s2169_s21 = smov [#allocation2]   ;;  %s3288_s0 = inlined_call_operand.vmem [shape: f32[64,2], index: 0, kind: input, shape index: {}]   ;;  %s3289_s1 = inlined_call_operand.vmem [shape: f32[2,32], index: 1, kind: input, shape index: {}]   ;;  %s3290_s2 = inlined_call_operand.vmem [shape: f32[1,32], index: 2, kind: input, shape index: {}]   ;;  %s3291_s3 = inlined_call_operand.vmem [shape: f32[32,512], index: 3, kind: input, shape index: {}]   ;;  %s3292_s4 = inlined_call_operand.hbm [shape: f32[128,512], index: 4, kind: input, shape index: {}]   ;;  %s3293_s5 = inlined_call_operand.vmem [shape: f32[1,512], index: 5, kind: input, shape index: {}]   ;;  %s3294_s6 = inlined_call_operand.vmem [shape: f32[8,128], index: 6, kind: output, shape index: {}]  }
   0x1   :  { %s25_s22 = sshll.u32 %s2169_s21, 4  ;;  %s26_s22 = int_to_ptr.vmem [resolvable:$true] %s25_s22 }
   0x2   :  { %s2155_s23 = scalar_lea.vmem %s26_s22, 8192  ;;  %p2160_p1 = scmp.lt.s32.totalorder %s26_s22, %s26_s22 }
   0x3   :  { %p2156_p0 = scmp.ne.s32.totalorder %s26_s22, %s2155_s23  ;;  %p2161_p2 = scmp.lt.s32.totalorder %s2155_s23, %s2155_s23 }
   0x5   :  { %p2162_p3 = por %p2161_p2, %p2160_p1 }
   0x7   :  { %p2163_p4 = pnand %p2162_p3, %p2156_p0 }
   0x9   :  { %2166 = shalt.err (!%p2163_p4)
}
   0xa   :  { %s2170_s24 = smov 512   ;;  %s2171_s25 = smov 32  }
   0xb   :  { %31 = dma.hbm_to_vmem [thread:$0]  %s3292_s4, 8192, %s26_s22, [#allocation3], %s2170_s24, %s2170_s24, %s2171_s25  }
   0xc   :  { %2167 = dma.done.wait [#allocation3], 8192  }
   0xd   :  { %2168 = vsyncadd [#allocation3], 4294959104  ;;  %v2172_v0 = vmov 0   ;;  %v38_v1 = vld [vmem:[%s3288_s0 + $0x8] sm:$0xff]  ;;  %v37_v2 = vld [vmem:[%s3288_s0] sm:$0xff]  ;;  %v2173_v6 = vmov 1  }
   0xe   :  { %1952 = vset.pattern.permute.xlu1 %v2172_v0  ;;  %1950 = vset.pattern.permute.xlu0 %v2172_v0  ;;  %v195_v3 = vld [vmem:[%s3291_s3 + $0x68] sm:$0xff]  ;;  %v194_v4 = vld [vmem:[%s3291_s3 + $0x60] sm:$0xff]  ;;  %v197_v5 = vld [vmem:[%s3291_s3 + $0x78] sm:$0xff]  ;;  %v3297_v24 = vmov 0.0   ;;  %vm220_vm0 = vcmask 261120  }
   0xf   :  { %53 = vperm.xlu1 %1952, %v38_v1   ;;  %48 = vperm.xlu0 %1950, %v37_v2   ;;  %v191_v7 = vld [vmem:[%s3291_s3 + $0x48] sm:$0xff]  ;;  %v196_v8 = vld [vmem:[%s3291_s3 + $0x70] sm:$0xff]  ;;  %v190_v9 = vld [vmem:[%s3291_s3 + $0x40] sm:$0xff] }
  0x10   :  { %269 = vmatprep.subr.mxu0 %v195_v3  ;;  %v193_v10 = vld [vmem:[%s3291_s3 + $0x58] sm:$0xff]  ;;  %v39_v11 = vld [vmem:[%s3288_s0 + $0x10] sm:$0xff]  ;;  %382 = vmatprep.subr.mxu1 %v197_v5  ;;  %v187_v12 = vld [vmem:[%s3291_s3 + $0x28] sm:$0xff] }
  0x11   :  { %270 = vmatpush1.msra.mxu0 %v194_v4  ;;  %383 = vmatpush1.msra.mxu1 %v196_v8  ;;  %v192_v13 = vld [vmem:[%s3291_s3 + $0x50] sm:$0xff]  ;;  %v186_v14 = vld [vmem:[%s3291_s3 + $0x20] sm:$0xff]  ;;  %v189_v15 = vld [vmem:[%s3291_s3 + $0x38] sm:$0xff] }
  0x12   :  { %271 = vmatprep.subr.mxu0 %v191_v7  ;;  %384 = vmatprep.subr.mxu1 %v193_v10  ;;  %v183_v16 = vld [vmem:[%s3291_s3 + $0x8] sm:$0xff]  ;;  %v40_v17 = vld [vmem:[%s3288_s0 + $0x18] sm:$0xff]  ;;  %v188_v18 = vld [vmem:[%s3291_s3 + $0x30] sm:$0xff] }
  0x13   :  { %1953 = vset.pattern.permute.xlu1 %v2173_v6  ;;  %1951 = vset.pattern.permute.xlu0 %v2173_v6  ;;  %v182_v19 = vld [vmem:[%s3291_s3] sm:$0xff]  ;;  %v185_v20 = vld [vmem:[%s3291_s3 + $0x18] sm:$0xff]  ;;  %v184_v21 = vld [vmem:[%s3291_s3 + $0x10] sm:$0xff] }
  0x14   :  { %104 = vperm.xlu1 %1953, %v38_v1   ;;  %100 = vperm.xlu0 %1951, %v37_v2   ;;  %v41_v22 = vld [vmem:[%s3288_s0 + $0x20] sm:$0xff]  ;;  %v2276_v23 = vld [vmem:[#allocation2 + $0x1e8] sm:$0xff]  ;;  %v2279_v25 = vld [vmem:[#allocation2 + $0x1f8] sm:$0xff] }
  0x15   :  { %272 = vmatpush1.msra.mxu0 %v190_v9  ;;  %385 = vmatpush1.msra.mxu1 %v192_v13  ;;  %3383 = vst [vmem:[#allocation5_spill] sm:$0xff] %v2276_v23  ;;  %3384 = vst [vmem:[#allocation6_spill] sm:$0xff] %v2279_v25  ;;  %v42_v26 = vld [vmem:[%s3288_s0 + $0x28] sm:$0xff]  ;;  %v43_v27 = vld [vmem:[%s3288_s0 + $0x30] sm:$0xff] }
  0x16   :  { %273 = vmatprep.subr.mxu0 %v187_v12  ;;  %386 = vmatprep.subr.mxu1 %v189_v15  ;;  %v44_v28 = vld [vmem:[%s3288_s0 + $0x38] sm:$0xff]  ;;  %v2296_v31 = vld [vmem:[%s3289_s1] ss:$0 sm:$0xff]  ;;  %v2301_v32 = vld [vmem:[%s3289_s1 + $0x1] ss:$0 sm:$0xff] }
  0x17   :  { %274 = vmatpush1.msra.mxu0 %v186_v14  ;;  %387 = vmatpush1.msra.mxu1 %v188_v18  ;;  %v2310_v39 = vld [vmem:[%s3290_s2] ss:$0 sm:$0xff]  ;;  %v2318_v54 = vld [vmem:[#allocation2 + $0x1f0] sm:$0xff]  ;;  %v2322_v58 = vld [vmem:[#allocation2 + $0x1c8] sm:$0xff] }
  0x18   :  { %1954 = vset.pattern.permute.xlu1 %v2172_v0  ;;  %108 = vperm.xlu0 %1951, %v39_v11   ;;  %v2316_v53 = vld [vmem:[#allocation2 + $0x1e0] sm:$0xff]  ;;  %v2324_v59 = vld [vmem:[#allocation2 + $0x1d8] sm:$0xff]  ;;  %v2333_v62 = vld [vmem:[#allocation2 + $0x1a8] sm:$0xff] }
  0x19   :  { %58 = vperm.xlu1 %1954, %v39_v11   ;;  %275 = vmatprep.subr.mxu0 %v183_v16  ;;  %v2328_v60 = vld [vmem:[#allocation2 + $0x1c0] sm:$0xff]  ;;  %v2337_v1 = vld [vmem:[#allocation2 + $0x1d0] sm:$0xff]  ;;  %v2345_v5 = vld [vmem:[#allocation2 + $0x1b8] sm:$0xff] }
  0x1a   :  { %276 = vmatpush1.msra.mxu0 %v182_v19  ;;  %388 = vmatprep.subr.mxu1 %v185_v20  ;;  %v2341_v4 = vld [vmem:[#allocation2 + $0x1a0] sm:$0xff]  ;;  %v2347_v6 = vld [vmem:[#allocation2 + $0x188] sm:$0xff]  ;;  %v2353_v10 = vld [vmem:[#allocation2 + $0x1b0] sm:$0xff] }
  0x1b   :  { %309 = vmatprep.mubr.f32.mxu0 %v3297_v24  ;;  %389 = vmatpush1.msra.mxu1 %v184_v21  ;;  %v2355_v11 = vld [vmem:[#allocation2 + $0x180] sm:$0xff]  ;;  %v2359_v12 = vld [vmem:[#allocation2 + $0x198] sm:$0xff]  ;;  %v2364_v14 = vld [vmem:[#allocation2 + $0x168] sm:$0xff] }
  0x1c   :  { %112 = vperm.xlu0 %1951, %v40_v17   ;;  %422 = vmatprep.mubr.f32.mxu1 %v3297_v24  ;;  %v2372_v20 = vld [vmem:[#allocation2 + $0x160] sm:$0xff]  ;;  %v2376_v21 = vld [vmem:[#allocation2 + $0x178] sm:$0xff] }
  0x1d   :  { %63 = vperm.xlu1 %1954, %v40_v17   ;;  %535 = vmatprep.subr.mxu0 %v2276_v23  ;;  %v2368_v17 = vld [vmem:[#allocation2 + $0x190] sm:$0xff] }
  0x1e   :  { %606 = vmatprep.subr.mxu1 %v2279_v25 }
  0x20   :  { %116 = vperm.xlu0 %1951, %v41_v22  }
  0x21   :  { %68 = vperm.xlu1 %1954, %v41_v22   ;;  %v2378_v22 = vld [vmem:[#allocation2 + $0x148] sm:$0xff] }
  0x24   :  { %120 = vperm.xlu0 %1951, %v42_v26  }
  0x25   :  { %73 = vperm.xlu1 %1954, %v42_v26  }
  0x28   :  { %124 = vperm.xlu0 %1951, %v43_v27  }
  0x29   :  { %78 = vperm.xlu1 %1954, %v43_v27  }
  0x2c   :  { %128 = vperm.xlu0 %1951, %v44_v28  }
  0x2d   :  { %83 = vperm.xlu1 %1954, %v44_v28  }
  0x8a   :  { %v49_v29 = vpop.permute.xlu0 %48  ;;  %v54_v30 = vpop.permute.xlu1 %53 }
  0x8b   :  { %v90_v35 = vmul.f32 %v2296_v31, %v49_v29  ;;  %v91_v36 = vmul.f32 %v2296_v31, %v54_v30  ;;  %v2384_v29 = vld [vmem:[#allocation2 + $0x170] sm:$0xff]  ;;  %v2386_v30 = vld [vmem:[#allocation2 + $0x140] sm:$0xff] }
  0x8f   :  { %v105_v33 = vpop.permute.xlu1 %104  ;;  %v101_v34 = vpop.permute.xlu0 %100 }
  0x90   :  { %v136_v37 = vmul.f32 %v2301_v32, %v105_v33  ;;  %v135_v38 = vmul.f32 %v2301_v32, %v101_v34  ;;  %v2390_v33 = vld [vmem:[#allocation2 + $0x158] sm:$0xff] }
  0x92   :  { %v144_v40 = vadd.f32 %v136_v37, %v91_v36  ;;  %v143_v41 = vadd.f32 %v135_v38, %v90_v35  ;;  %v2395_v35 = vld [vmem:[#allocation2 + $0x128] sm:$0xff]  ;;  %v2399_v38 = vld [vmem:[#allocation2 + $0x150] sm:$0xff] }
  0x93   :  { %v109_v42 = vpop.permute.xlu0 %108 }
  0x94   :  { %v158_v43 = vadd.f32 %v2310_v39, %v143_v41  ;;  %v137_v44 = vmul.f32 %v2301_v32, %v109_v42  ;;  %v59_v45 = vpop.permute.xlu1 %58  ;;  %v159_v46 = vadd.f32 %v2310_v39, %v144_v40  ;;  %v2403_v42 = vld [vmem:[#allocation2 + $0x120] sm:$0xff] }
  0x95   :  { %v92_v47 = vmul.f32 %v2296_v31, %v59_v45 }
  0x96   :  { %v166_v48 = vmul.f32 0.1, %v158_v43  ;;  %v167_v55 = vmul.f32 0.1, %v159_v46 }
  0x97   :  { %v145_v49 = vadd.f32 %v137_v44, %v92_v47  ;;  %v113_v50 = vpop.permute.xlu0 %112  ;;  %v2409_v44 = vld [vmem:[#allocation2 + $0x108] sm:$0xff] }
  0x98   :  { %v174_v51 = vmax.f32 %v158_v43, %v166_v48  ;;  %v64_v52 = vpop.permute.xlu1 %63  ;;  %v138_v56 = vmul.f32 %v2301_v32, %v113_v50  ;;  %v175_v2 = vmax.f32 %v159_v46, %v167_v55  ;;  %v2407_v43 = vld [vmem:[#allocation2 + $0x138] sm:$0xff]  ;;  %v2415_v48 = vld [vmem:[#allocation2 + $0x130] sm:$0xff] }
  0x99   :  { %v93_v57 = vmul.f32 %v2296_v31, %v64_v52  ;;  %v160_v61 = vadd.f32 %v2310_v39, %v145_v49  ;;  %v2417_v49 = vld [vmem:[#allocation2 + $0x100] sm:$0xff]  ;;  %v2421_v50 = vld [vmem:[#allocation2 + $0x118] sm:$0xff]  ;;  %v2426_v52 = vld [vmem:[#allocation2 + $0xe8] sm:$0xff] }
  0x9a   :  { %1904 = vmatmul.mubr.msk.f32.vlgmr.msra.gmra.mxu0 %vm220_vm0, %v174_v51  ;;  %1912 = vmatmul.mubr.msk.f32.vlgmr.msra.gmra.mxu1 %vm220_vm0, %v174_v51 }
  0x9b   :  { %536 = vmatpush1.msra.mxu0 %v2316_v53  ;;  %607 = vmatpush1.msra.mxu1 %v2318_v54  ;;  %v117_v63 = vpop.permute.xlu0 %116  ;;  %v146_v3 = vadd.f32 %v138_v56, %v93_v57  ;;  %v168_v7 = vmul.f32 0.1, %v160_v61  ;;  %v2430_v57 = vld [vmem:[#allocation2 + $0x110] sm:$0xff] }
  0x9c   :  { %537 = vmatprep.subr.mxu0 %v2322_v58  ;;  %v69_v0 = vpop.permute.xlu1 %68  ;;  %608 = vmatprep.subr.mxu1 %v2324_v59  ;;  %v139_v8 = vmul.f32 %v2301_v32, %v117_v63 }
  0x9d   :  { %538 = vmatpush1.msra.mxu0 %v2328_v60  ;;  %315 = vmatprep.mubr.f32.mxu0 %v3297_v24  ;;  %v94_v9 = vmul.f32 %v2296_v31, %v69_v0  ;;  %v161_v13 = vadd.f32 %v2310_v39, %v146_v3  ;;  %v176_v18 = vmax.f32 %v160_v61, %v168_v7  ;;  %v2434_v0 = vld [vmem:[#allocation2 + $0xe0] sm:$0xff]  ;;  %v2440_v3 = vld [vmem:[#allocation2 + $0xc8] sm:$0xff] }
  0x9e   :  { %428 = vmatprep.mubr.f32.mxu1 %v3297_v24  ;;  %539 = vmatprep.subr.mxu0 %v2333_v62 }
  0x9f   :  { %609 = vmatpush1.msra.mxu1 %v2337_v1  ;;  %1905 = vmatmul.mubr.msk.f32.gmra.mxu0 %vm220_vm0, %v175_v2  ;;  %v121_v15 = vpop.permute.xlu0 %120  ;;  %v147_v19 = vadd.f32 %v139_v8, %v94_v9  ;;  %v169_v26 = vmul.f32 0.1, %v161_v13 }
  0xa0   :  { %1913 = vmatmul.mubr.msk.f32.gmra.mxu1 %vm220_vm0, %v175_v2  ;;  %540 = vmatpush1.msra.mxu0 %v2341_v4  ;;  %v74_v16 = vpop.permute.xlu1 %73  ;;  %v140_v27 = vmul.f32 %v2301_v32, %v121_v15  ;;  %v2438_v2 = vld [vmem:[#allocation2 + $0xf8] sm:$0xff]  ;;  %v2448_v15 = vld [vmem:[#allocation2 + $0xc0] sm:$0xff] }
  0xa1   :  { %610 = vmatprep.subr.mxu1 %v2345_v5  ;;  %541 = vmatprep.subr.mxu0 %v2347_v6  ;;  %v95_v28 = vmul.f32 %v2296_v31, %v74_v16  ;;  %v162_v34 = vadd.f32 %v2310_v39, %v147_v19  ;;  %v177_v40 = vmax.f32 %v161_v13, %v169_v26  ;;  %v2446_v13 = vld [vmem:[#allocation2 + $0xf0] sm:$0xff]  ;;  %v2452_v16 = vld [vmem:[#allocation2 + $0xd8] sm:$0xff] }
  0xa2   :  { %611 = vmatpush1.msra.mxu1 %v2353_v10  ;;  %542 = vmatpush1.msra.mxu0 %v2355_v11 }
  0xa3   :  { %612 = vmatprep.subr.mxu1 %v2359_v12  ;;  %321 = vmatprep.mubr.f32.mxu0 %v3297_v24  ;;  %v125_v36 = vpop.permute.xlu0 %124  ;;  %v148_v41 = vadd.f32 %v140_v27, %v95_v28  ;;  %v170_v45 = vmul.f32 0.1, %v162_v34  ;;  %v2465_v27 = vld [vmem:[#allocation2 + $0xa0] sm:$0xff]  ;;  %v2469_v28 = vld [vmem:[#allocation2 + $0xb8] sm:$0xff] }
  0xa4   :  { %434 = vmatprep.mubr.f32.mxu1 %v3297_v24  ;;  %543 = vmatprep.subr.mxu0 %v2364_v14  ;;  %v79_v37 = vpop.permute.xlu1 %78  ;;  %v141_v46 = vmul.f32 %v2301_v32, %v125_v36 }
  0xa5   :  { %613 = vmatpush1.msra.mxu1 %v2368_v17  ;;  %1906 = vmatmul.mubr.msk.f32.gmra.mxu0 %vm220_vm0, %v176_v18  ;;  %v96_v47 = vmul.f32 %v2296_v31, %v79_v37  ;;  %v163_v51 = vadd.f32 %v2310_v39, %v148_v41  ;;  %v178_v61 = vmax.f32 %v162_v34, %v170_v45  ;;  %v2471_v34 = vld [vmem:[#allocation2 + $0x88] sm:$0xff]  ;;  %v2475_v37 = vld [vmem:[#allocation2 + $0xb0] sm:$0xff]  ;;  %v2481_v41 = vld [vmem:[#allocation2 + $0x98] sm:$0xff] }
  0xa6   :  { %1914 = vmatmul.mubr.msk.f32.gmra.mxu1 %vm220_vm0, %v176_v18  ;;  %544 = vmatpush1.msra.mxu0 %v2372_v20  ;;  %3385 = vst [vmem:[#allocation7_spill] sm:$0xff] %v2471_v34  ;;  %3387 = vst [vmem:[#allocation9_spill] sm:$0xff] %v2481_v41 }
  0xa7   :  { %614 = vmatprep.subr.mxu1 %v2376_v21  ;;  %545 = vmatprep.subr.mxu0 %v2378_v22  ;;  %v129_v55 = vpop.permute.xlu0 %128  ;;  %v149_v63 = vadd.f32 %v141_v46, %v96_v47  ;;  %v171_v7 = vmul.f32 0.1, %v163_v51  ;;  %v2486_v46 = vld [vmem:[#allocation2 + $0x68] sm:$0xff]  ;;  %v2490_v47 = vld [vmem:[#allocation2 + $0x90] sm:$0xff] }
  0xa8   :  { %615 = vmatpush1.msra.mxu1 %v2384_v29  ;;  %546 = vmatpush1.msra.mxu0 %v2386_v30  ;;  %v84_v56 = vpop.permute.xlu1 %83  ;;  %v142_v8 = vmul.f32 %v2301_v32, %v129_v55  ;;  %v2461_v32 = vld [vmem:[#allocation2 + $0xd0] sm:$0xff]  ;;  %3388 = vst [vmem:[#allocation10_spill] sm:$0xff] %v2486_v46  ;;  %3389 = vst [vmem:[#allocation11_spill] sm:$0xff] %v2490_v47  ;;  %v2494_v55 = vld [vmem:[#allocation2 + $0x60] sm:$0xff] }
  0xa9   :  { %616 = vmatprep.subr.mxu1 %v2390_v33  ;;  %327 = vmatprep.mubr.f32.mxu0 %v3297_v24  ;;  %v97_v9 = vmul.f32 %v2296_v31, %v84_v56  ;;  %v164_v18 = vadd.f32 %v2310_v39, %v149_v63  ;;  %v2457_v31 = vld [vmem:[#allocation2 + $0xa8] sm:$0xff]  ;;  %v179_v19 = vmax.f32 %v163_v51, %v171_v7  ;;  %v2504_v63 = vld [vmem:[#allocation2 + $0x70] sm:$0xff]  ;;  %v2506_v7 = vld [vmem:[#allocation2 + $0x40] sm:$0xff] }
  0xaa   :  { %440 = vmatprep.mubr.f32.mxu1 %v3297_v24  ;;  %547 = vmatprep.subr.mxu0 %v2395_v35  ;;  %3390 = vst [vmem:[#allocation12_spill] sm:$0xff] %v2494_v55  ;;  %v2500_v56 = vld [vmem:[#allocation2 + $0x48] sm:$0xff]  ;;  %3393 = vst [vmem:[#allocation15_spill] sm:$0xff] %v2504_v63 }
  0xab   :  { %617 = vmatpush1.msra.mxu1 %v2399_v38  ;;  %1907 = vmatmul.mubr.msk.f32.gmra.mxu0 %vm220_vm0, %v177_v40  ;;  %v150_v26 = vadd.f32 %v142_v8, %v97_v9  ;;  %v172_v36 = vmul.f32 0.1, %v164_v18  ;;  %3392 = vst [vmem:[#allocation14_spill] sm:$0xff] %v2500_v56  ;;  %3394 = vst [vmem:[#allocation16_spill] sm:$0xff] %v2506_v7  ;;  %v2510_v8 = vld [vmem:[#allocation2 + $0x58] sm:$0xff]  ;;  %v2514_v9 = vld [vmem:[#allocation2 + $0x28] sm:$0xff] }
  0xac   :  { %1915 = vmatmul.mubr.msk.f32.gmra.mxu1 %vm220_vm0, %v177_v40  ;;  %548 = vmatpush1.msra.mxu0 %v2403_v42  ;;  %v2477_v40 = vld [vmem:[#allocation2 + $0x80] sm:$0xff]  ;;  %3395 = vst [vmem:[#allocation17_spill] sm:$0xff] %v2510_v8  ;;  %3396 = vst [vmem:[#allocation18_spill] sm:$0xff] %v2514_v9 }
  0xad   :  { %618 = vmatprep.subr.mxu1 %v2407_v43  ;;  %549 = vmatprep.subr.mxu0 %v2409_v44  ;;  %3386 = vst [vmem:[#allocation8_spill] sm:$0xff] %v2477_v40  ;;  %v165_v45 = vadd.f32 %v2310_v39, %v150_v26  ;;  %v180_v51 = vmax.f32 %v164_v18, %v172_v36  ;;  %v2498_v39 = vld [vmem:[#allocation2 + $0x78] sm:$0xff]  ;;  %v2518_v18 = vld [vmem:[#allocation2 + $0x50] sm:$0xff]  ;;  %v2522_v26 = vld [vmem:[#allocation2 + $0x20] sm:$0xff] }
  0xae   :  { %619 = vmatpush1.msra.mxu1 %v2415_v48  ;;  %550 = vmatpush1.msra.mxu0 %v2417_v49  ;;  %3391 = vst [vmem:[#allocation13_spill] sm:$0xff] %v2498_v39  ;;  %3397 = vst [vmem:[#allocation19_spill] sm:$0xff] %v2518_v18  ;;  %v2526_v36 = vld [vmem:[#allocation2 + $0x38] sm:$0xff] }
  0xaf   :  { %620 = vmatprep.subr.mxu1 %v2421_v50  ;;  %333 = vmatprep.mubr.f32.mxu0 %v3297_v24  ;;  %3398 = vst [vmem:[#allocation20_spill] sm:$0xff] %v2522_v26  ;;  %3399 = vst [vmem:[#allocation21_spill] sm:$0xff] %v2526_v36 }
  0xb0   :  { %446 = vmatprep.mubr.f32.mxu1 %v3297_v24  ;;  %551 = vmatprep.subr.mxu0 %v2426_v52 }
  0xb1   :  { %621 = vmatpush1.msra.mxu1 %v2430_v57  ;;  %1908 = vmatmul.mubr.msk.f32.gmra.mxu0 %vm220_vm0, %v178_v61 }
  0xb2   :  { %1916 = vmatmul.mubr.msk.f32.gmra.mxu1 %vm220_vm0, %v178_v61  ;;  %552 = vmatpush1.msra.mxu0 %v2434_v0  ;;  %v173_v61 = vmul.f32 0.1, %v165_v45 }
  0xb3   :  { %622 = vmatprep.subr.mxu1 %v2438_v2  ;;  %553 = vmatprep.subr.mxu0 %v2440_v3 }
  0xb4   :  { %623 = vmatpush1.msra.mxu1 %v2446_v13  ;;  %554 = vmatpush1.msra.mxu0 %v2448_v15 }
  0xb5   :  { %624 = vmatprep.subr.mxu1 %v2452_v16  ;;  %339 = vmatprep.mubr.f32.mxu0 %v3297_v24 }
  0xb6   :  { %452 = vmatprep.mubr.f32.mxu1 %v3297_v24  ;;  %555 = vmatprep.subr.mxu0 %v2457_v31 }
  0xb7   :  { %625 = vmatpush1.msra.mxu1 %v2461_v32  ;;  %1909 = vmatmul.mubr.msk.f32.gmra.mxu0 %vm220_vm0, %v179_v19 }
  0xb8   :  { %1917 = vmatmul.mubr.msk.f32.gmra.mxu1 %vm220_vm0, %v179_v19  ;;  %556 = vmatpush1.msra.mxu0 %v2465_v27  ;;  %v181_v19 = vmax.f32 %v165_v45, %v173_v61  ;;  %v2534_v45 = vld [vmem:[#allocation2] sm:$0xff]  ;;  %v2538_v61 = vld [vmem:[#allocation2 + $0x18] sm:$0xff] }
  0xb9   :  { %626 = vmatprep.subr.mxu1 %v2469_v28  ;;  %557 = vmatprep.subr.mxu0 %v2471_v34  ;;  %3402 = vst [vmem:[#allocation24_spill] sm:$0xff] %v2534_v45  ;;  %3403 = vst [vmem:[#allocation25_spill] sm:$0xff] %v2538_v61 }
  0xba   :  { %627 = vmatpush1.msra.mxu1 %v2475_v37  ;;  %558 = vmatpush1.msra.mxu0 %v2477_v40 }
  0xbb   :  { %628 = vmatprep.subr.mxu1 %v2481_v41  ;;  %345 = vmatprep.mubr.f32.mxu0 %v3297_v24 }
  0xbc   :  { %458 = vmatprep.mubr.f32.mxu1 %v3297_v24  ;;  %559 = vmatprep.subr.mxu0 %v2486_v46 }
  0xbd   :  { %629 = vmatpush1.msra.mxu1 %v2490_v47  ;;  %1910 = vmatmul.mubr.msk.f32.gmra.mxu0 %vm220_vm0, %v180_v51 }
  0xbe   :  { %1918 = vmatmul.mubr.msk.f32.gmra.mxu1 %vm220_vm0, %v180_v51  ;;  %560 = vmatpush1.msra.mxu0 %v2494_v55  ;;  %v2528_v51 = vld [vmem:[#allocation2 + $0x8] sm:$0xff] }
  0xbf   :  { %630 = vmatprep.subr.mxu1 %v2498_v39  ;;  %561 = vmatprep.subr.mxu0 %v2500_v56  ;;  %3400 = vst [vmem:[#allocation22_spill] sm:$0xff] %v2528_v51 }
  0xc0   :  { %631 = vmatpush1.msra.mxu1 %v2504_v63  ;;  %562 = vmatpush1.msra.mxu0 %v2506_v7  ;;  %v2532_v7 = vld [vmem:[#allocation2 + $0x30] sm:$0xff] }
  0xc1   :  { %632 = vmatprep.subr.mxu1 %v2510_v8  ;;  %351 = vmatprep.mubr.f32.mxu0 %v3297_v24  ;;  %3401 = vst [vmem:[#allocation23_spill] sm:$0xff] %v2532_v7 }
  0xc2   :  { %464 = vmatprep.mubr.f32.mxu1 %v3297_v24  ;;  %563 = vmatprep.subr.mxu0 %v2514_v9  ;;  %v2542_v24 = vld [vmem:[#allocation2 + $0x10] sm:$0xff]  ;;  %v3405_v9 = vmov 0.0  }
  0xc3   :  { %633 = vmatpush1.msra.mxu1 %v2518_v18  ;;  %1911 = vmatmul.mubr.msk.f32.gmra.mxu0 %vm220_vm0, %v181_v19  ;;  %3404 = vst [vmem:[#allocation26_spill] sm:$0xff] %v2542_v24 }
  0xc4   :  { %1919 = vmatmul.mubr.msk.f32.gmra.mxu1 %vm220_vm0, %v181_v19  ;;  %564 = vmatpush1.msra.mxu0 %v2522_v26  ;;  %v3406_v19 = vld [vmem:[#allocation16_spill] sm:$0xff] }
  0xc5   :  { %634 = vmatprep.subr.mxu1 %v2526_v36  ;;  %565 = vmatprep.subr.mxu0 %v2528_v51 }
  0xc6   :  { %635 = vmatpush1.msra.mxu1 %v2532_v7  ;;  %566 = vmatpush1.msra.mxu0 %v2534_v45 }
  0xc7   :  { %636 = vmatprep.subr.mxu1 %v2538_v61  ;;  %599 = vmatprep.mubr.f32.mxu0 %v3405_v9 }
  0xc8   :  { %637 = vmatpush1.msra.mxu1 %v2542_v24  ;;  %670 = vmatprep.mubr.f32.mxu1 %v3405_v9 }
  0xc9   :  { %600 = vmatmul.mubr.f32.vlgmr.msra.gmra.mxu0 %v3405_v9  ;;  %671 = vmatmul.mubr.f32.vlgmr.msra.gmra.mxu1 %v3405_v9 }
  0xca   :  { %705 = vmatprep.subr.mxu0 %v2276_v23  ;;  %776 = vmatprep.subr.mxu1 %v2279_v25 }
  0xcb   :  { %706 = vmatpush1.msra.mxu0 %v2316_v53  ;;  %777 = vmatpush1.msra.mxu1 %v2318_v54 }
  0xcc   :  { %707 = vmatprep.subr.mxu0 %v2322_v58  ;;  %778 = vmatprep.subr.mxu1 %v2324_v59 }
  0xcd   :  { %708 = vmatpush1.msra.mxu0 %v2328_v60  ;;  %779 = vmatpush1.msra.mxu1 %v2337_v1 }
  0xce   :  { %709 = vmatprep.subr.mxu0 %v2333_v62  ;;  %780 = vmatprep.subr.mxu1 %v2345_v5 }
  0xcf   :  { %710 = vmatpush1.msra.mxu0 %v2341_v4  ;;  %781 = vmatpush1.msra.mxu1 %v2353_v10 }
  0xd0   :  { %711 = vmatprep.subr.mxu0 %v2347_v6  ;;  %782 = vmatprep.subr.mxu1 %v2359_v12 }
  0xd1   :  { %712 = vmatpush1.msra.mxu0 %v2355_v11  ;;  %783 = vmatpush1.msra.mxu1 %v2368_v17 }
  0xd2   :  { %713 = vmatprep.subr.mxu0 %v2364_v14  ;;  %784 = vmatprep.subr.mxu1 %v2376_v21 }
  0xd3   :  { %714 = vmatpush1.msra.mxu0 %v2372_v20  ;;  %785 = vmatpush1.msra.mxu1 %v2384_v29 }
  0xd4   :  { %715 = vmatprep.subr.mxu0 %v2378_v22  ;;  %786 = vmatprep.subr.mxu1 %v2390_v33 }
  0xd5   :  { %716 = vmatpush1.msra.mxu0 %v2386_v30  ;;  %787 = vmatpush1.msra.mxu1 %v2399_v38 }
  0xd6   :  { %717 = vmatprep.subr.mxu0 %v2395_v35  ;;  %788 = vmatprep.subr.mxu1 %v2407_v43 }
  0xd7   :  { %718 = vmatpush1.msra.mxu0 %v2403_v42  ;;  %789 = vmatpush1.msra.mxu1 %v2415_v48 }
  0xd8   :  { %719 = vmatprep.subr.mxu0 %v2409_v44  ;;  %790 = vmatprep.subr.mxu1 %v2421_v50 }
  0xd9   :  { %720 = vmatpush1.msra.mxu0 %v2417_v49  ;;  %791 = vmatpush1.msra.mxu1 %v2430_v57 }
  0xda   :  { %721 = vmatprep.subr.mxu0 %v2426_v52  ;;  %792 = vmatprep.subr.mxu1 %v2438_v2 }
  0xdb   :  { %722 = vmatpush1.msra.mxu0 %v2434_v0  ;;  %793 = vmatpush1.msra.mxu1 %v2446_v13 }
  0xdc   :  { %723 = vmatprep.subr.mxu0 %v2440_v3  ;;  %794 = vmatprep.subr.mxu1 %v2452_v16 }
  0xdd   :  { %724 = vmatpush1.msra.mxu0 %v2448_v15  ;;  %795 = vmatpush1.msra.mxu1 %v2461_v32 }
  0xde   :  { %725 = vmatprep.subr.mxu0 %v2457_v31  ;;  %796 = vmatprep.subr.mxu1 %v2469_v28 }
  0xdf   :  { %726 = vmatpush1.msra.mxu0 %v2465_v27  ;;  %797 = vmatpush1.msra.mxu1 %v2475_v37 }
  0xe0   :  { %727 = vmatprep.subr.mxu0 %v2471_v34  ;;  %798 = vmatprep.subr.mxu1 %v2481_v41  ;;  %v3407_v41 = vld [vmem:[#allocation18_spill] sm:$0xff] }
  0xe1   :  { %728 = vmatpush1.msra.mxu0 %v2477_v40  ;;  %799 = vmatpush1.msra.mxu1 %v2490_v47 }
  0xe2   :  { %729 = vmatprep.subr.mxu0 %v2486_v46  ;;  %800 = vmatprep.subr.mxu1 %v2498_v39 }
  0xe3   :  { %730 = vmatpush1.msra.mxu0 %v2494_v55  ;;  %801 = vmatpush1.msra.mxu1 %v2504_v63 }
  0xe4   :  { %731 = vmatprep.subr.mxu0 %v2500_v56  ;;  %802 = vmatprep.subr.mxu1 %v2510_v8 }
  0xe5   :  { %732 = vmatpush1.msra.mxu0 %v3406_v19  ;;  %803 = vmatpush1.msra.mxu1 %v2518_v18 }
  0xe6   :  { %733 = vmatprep.subr.mxu0 %v3407_v41  ;;  %804 = vmatprep.subr.mxu1 %v2526_v36  ;;  %v200_v36 = vlaneseq }
  0xe7   :  { %734 = vmatpush1.msra.mxu0 %v2522_v26  ;;  %805 = vmatpush1.msra.mxu1 %v2532_v7 }
  0xe8   :  { %735 = vmatprep.subr.mxu0 %v2528_v51  ;;  %806 = vmatprep.subr.mxu1 %v2538_v61  ;;  %v201_v26 = vshrl.u32 %v200_v36, 7 }
  0xe9   :  { %736 = vmatpush1.msra.mxu0 %v2534_v45  ;;  %769 = vmatprep.mubr.f32.mxu0 %v3405_v9  ;;  %v198_v45 = vld [vmem:[%s3293_s5] sm:$0xf] }
  0xea   :  { %807 = vmatpush1.msra.mxu1 %v2542_v24  ;;  %840 = vmatprep.mubr.f32.mxu1 %v3405_v9  ;;  %v202_v41 = vsub.s32 0, %v201_v26  ;;  %v210_v61 = vsub.s32 2, %v201_v26  ;;  %v206_v18 = vsub.s32 1, %v201_v26 }
  0xeb   :  { %875 = vmatprep.subr.mxu0 %v2276_v23  ;;  %946 = vmatprep.subr.mxu1 %v2279_v25  ;;  %v214_v23 = vsub.s32 3, %v201_v26 }
  0xec   :  { %v203_v19 = vrot.slane %v198_v45, %v202_v41  ;;  %v2631_v25 = vrot.slane %v198_v45, %v210_v61  ;;  %v207_v8 = vrot.slane %v198_v45, %v206_v18 }
  0xed   :  { %v2635_v55 = vrot.slane %v198_v45, %v214_v23 }
 0x15a   :  { %v2620_v7 = vpop.f32.mrf.mxu0  ;;  %v2622_v51 = vpop.f32.mrf.mxu1 }
 0x15c   :  { %v2627_v24 = vpop.f32.mrf.mxu0  ;;  %v2629_v9 = vpop.f32.mrf.mxu1 }
 0x15f   :  { %v317_v36 = vpop.f32.mrf.mxu0 }
 0x160   :  { %v2633_v56 = vadd.f32 %v317_v36, %v203_v19  ;;  %v430_v63 = vpop.f32.mrf.mxu1 }
 0x161   :  { %v2638_v39 = vadd.f32 %v430_v63, %v2631_v25  ;;  %v319_v46 = vpop.f32.mrf.mxu0 }
 0x162   :  { %3408 = vst [vmem:[#allocation27_spill] sm:$0xff] %v2633_v56  ;;  %v2640_v47 = vadd.f32 %v319_v46, %v207_v8  ;;  %v432_v40 = vpop.f32.mrf.mxu1 }
 0x163   :  { %3409 = vst [vmem:[#allocation28_spill] sm:$0xff] %v2638_v39  ;;  %v2643_v34 = vadd.f32 %v432_v40, %v2635_v55 }
 0x164   :  { %3410 = vst [vmem:[#allocation29_spill] sm:$0xff] %v2640_v47 }
 0x165   :  { %3411 = vst [vmem:[#allocation30_spill] sm:$0xff] %v2643_v34  ;;  %v323_v41 = vpop.f32.mrf.mxu0 }
 0x166   :  { %v2645_v26 = vadd.f32 %v323_v41, %v203_v19  ;;  %v436_v61 = vpop.f32.mrf.mxu1 }
 0x167   :  { %v2648_v18 = vadd.f32 %v436_v61, %v2631_v25  ;;  %v325_v36 = vpop.f32.mrf.mxu0 }
 0x168   :  { %3412 = vst [vmem:[#allocation31_spill] sm:$0xff] %v2645_v26  ;;  %v2650_v23 = vadd.f32 %v325_v36, %v207_v8  ;;  %v438_v45 = vpop.f32.mrf.mxu1 }
 0x169   :  { %3413 = vst [vmem:[#allocation32_spill] sm:$0xff] %v2648_v18  ;;  %v2653_v63 = vadd.f32 %v438_v45, %v2635_v55 }
 0x16a   :  { %3414 = vst [vmem:[#allocation33_spill] sm:$0xff] %v2650_v23 }
 0x16b   :  { %3415 = vst [vmem:[#allocation34_spill] sm:$0xff] %v2653_v63  ;;  %v329_v46 = vpop.f32.mrf.mxu0 }
 0x16c   :  { %v2655_v39 = vadd.f32 %v329_v46, %v203_v19  ;;  %v442_v47 = vpop.f32.mrf.mxu1 }
 0x16d   :  { %v2658_v40 = vadd.f32 %v442_v47, %v2631_v25  ;;  %v331_v41 = vpop.f32.mrf.mxu0 }
 0x16e   :  { %3416 = vst [vmem:[#allocation35_spill] sm:$0xff] %v2655_v39  ;;  %v2660_v26 = vadd.f32 %v331_v41, %v207_v8  ;;  %v444_v34 = vpop.f32.mrf.mxu1 }
 0x16f   :  { %3417 = vst [vmem:[#allocation36_spill] sm:$0xff] %v2658_v40  ;;  %v2663_v61 = vadd.f32 %v444_v34, %v2635_v55 }
 0x170   :  { %3418 = vst [vmem:[#allocation37_spill] sm:$0xff] %v2660_v26 }
 0x171   :  { %3419 = vst [vmem:[#allocation38_spill] sm:$0xff] %v2663_v61  ;;  %v335_v36 = vpop.f32.mrf.mxu0 }
 0x172   :  { %v2665_v18 = vadd.f32 %v335_v36, %v203_v19  ;;  %v448_v23 = vpop.f32.mrf.mxu1 }
 0x173   :  { %v2668_v45 = vadd.f32 %v448_v23, %v2631_v25  ;;  %v337_v46 = vpop.f32.mrf.mxu0 }
 0x174   :  { %3420 = vst [vmem:[#allocation39_spill] sm:$0xff] %v2665_v18  ;;  %v2670_v39 = vadd.f32 %v337_v46, %v207_v8  ;;  %v450_v63 = vpop.f32.mrf.mxu1 }
 0x175   :  { %3421 = vst [vmem:[#allocation40_spill] sm:$0xff] %v2668_v45  ;;  %v2673_v47 = vadd.f32 %v450_v63, %v2635_v55 }
 0x176   :  { %3422 = vst [vmem:[#allocation41_spill] sm:$0xff] %v2670_v39 }
 0x177   :  { %3423 = vst [vmem:[#allocation42_spill] sm:$0xff] %v2673_v47  ;;  %v341_v41 = vpop.f32.mrf.mxu0 }
 0x178   :  { %v2675_v40 = vadd.f32 %v341_v41, %v203_v19  ;;  %v454_v26 = vpop.f32.mrf.mxu1 }
 0x179   :  { %v2678_v34 = vadd.f32 %v454_v26, %v2631_v25  ;;  %v343_v36 = vpop.f32.mrf.mxu0 }
 0x17a   :  { %3424 = vst [vmem:[#allocation43_spill] sm:$0xff] %v2675_v40  ;;  %v2680_v18 = vadd.f32 %v343_v36, %v207_v8  ;;  %v456_v61 = vpop.f32.mrf.mxu1 }
 0x17b   :  { %3425 = vst [vmem:[#allocation44_spill] sm:$0xff] %v2678_v34  ;;  %v2683_v23 = vadd.f32 %v456_v61, %v2635_v55 }
 0x17c   :  { %3426 = vst [vmem:[#allocation45_spill] sm:$0xff] %v2680_v18 }
 0x17d   :  { %3427 = vst [vmem:[#allocation46_spill] sm:$0xff] %v2683_v23  ;;  %v347_v46 = vpop.f32.mrf.mxu0 }
 0x17e   :  { %v2685_v45 = vadd.f32 %v347_v46, %v203_v19  ;;  %v460_v39 = vpop.f32.mrf.mxu1 }
 0x17f   :  { %v2688_v63 = vadd.f32 %v460_v39, %v2631_v25  ;;  %v349_v41 = vpop.f32.mrf.mxu0 }
 0x180   :  { %3428 = vst [vmem:[#allocation47_spill] sm:$0xff] %v2685_v45  ;;  %v2690_v40 = vadd.f32 %v349_v41, %v207_v8  ;;  %v462_v47 = vpop.f32.mrf.mxu1  ;;  %v312_v41 = vadd.f32 %v2620_v7, %v203_v19 }
 0x181   :  { %3429 = vst [vmem:[#allocation48_spill] sm:$0xff] %v2688_v63  ;;  %v2693_v26 = vadd.f32 %v462_v47, %v2635_v55  ;;  %v314_v47 = vadd.f32 %v2627_v24, %v207_v8 }
 0x182   :  { %3430 = vst [vmem:[#allocation49_spill] sm:$0xff] %v2690_v40 }
 0x183   :  { %3431 = vst [vmem:[#allocation50_spill] sm:$0xff] %v2693_v26  ;;  %v353_v36 = vpop.f32.mrf.mxu0 }
 0x184   :  { %v2695_v34 = vadd.f32 %v353_v36, %v203_v19  ;;  %v466_v18 = vpop.f32.mrf.mxu1 }
 0x185   :  { %v2698_v61 = vadd.f32 %v466_v18, %v2631_v25  ;;  %v355_v46 = vpop.f32.mrf.mxu0 }
 0x186   :  { %3432 = vst [vmem:[#allocation51_spill] sm:$0xff] %v2695_v34  ;;  %v2700_v45 = vadd.f32 %v355_v46, %v207_v8  ;;  %v468_v23 = vpop.f32.mrf.mxu1  ;;  %v427_v46 = vadd.f32 %v2629_v9, %v2635_v55 }
 0x187   :  { %3433 = vst [vmem:[#allocation52_spill] sm:$0xff] %v2698_v61  ;;  %v2703_v39 = vadd.f32 %v468_v23, %v2635_v55  ;;  %v425_v23 = vadd.f32 %v2622_v51, %v2631_v25 }
 0x188   :  { %3434 = vst [vmem:[#allocation53_spill] sm:$0xff] %v2700_v45 }
 0x189   :  { %3435 = vst [vmem:[#allocation54_spill] sm:$0xff] %v2703_v39  ;;  %v601_v63 = vpop.f32.mrf.mxu0  ;;  %v672_v56 = vpop.f32.mrf.mxu1 }
 0x18a   :  { %v677_v26 = vadd.f32 %v601_v63, %v312_v41  ;;  %v679_v39 = vadd.f32 %v672_v56, %v425_v23  ;;  %v3441_v23 = vld [vmem:[#allocation13_spill] sm:$0xff] }
 0x18b   :  { %v603_v40 = vpop.f32.mrf.mxu0  ;;  %v674_v61 = vpop.f32.mrf.mxu1 }
 0x18c   :  { %v1920_v36 = vmul.f32 -1.442695, %v677_v26  ;;  %v678_v34 = vadd.f32 %v603_v40, %v314_v47  ;;  %v680_v45 = vadd.f32 %v674_v61, %v427_v46  ;;  %v3440_v46 = vld [vmem:[#allocation10_spill] sm:$0xff] }
 0x18e   :  { %1955 = vpow2.f32 %v1920_v36  ;;  %v1921_v18 = vmul.f32 -1.442695, %v678_v34  ;;  %v1922_v7 = vmul.f32 -1.442695, %v680_v45  ;;  %v3436_v45 = vld [vmem:[#allocation7_spill] sm:$0xff]  ;;  %v3438_v36 = vld [vmem:[#allocation8_spill] sm:$0xff] }
 0x190   :  { %1957 = vpow2.f32 %v1921_v18  ;;  %v3439_v18 = vld [vmem:[#allocation11_spill] sm:$0xff] }
 0x191   :  { %1959 = vpow2.f32 %v1922_v7  ;;  %v3442_v7 = vld [vmem:[#allocation12_spill] sm:$0xff] }
 0x19b   :  { %v1956_v19 = vpop.eup %1955 }
 0x19c   :  { %v684_v24 = vadd.f32 1.0, %v1956_v19  ;;  %v3443_v19 = vld [vmem:[#allocation15_spill] sm:$0xff] }
 0x19d   :  { %v1958_v8 = vpop.eup %1957 }
 0x19e   :  { %1961 = vrcp.f32 %v684_v24  ;;  %v690_v40 = vadd.f32 1.0, %v1958_v8  ;;  %v1960_v34 = vpop.eup %1959  ;;  %v3444_v24 = vld [vmem:[#allocation14_spill] sm:$0xff]  ;;  %v3445_v8 = vld [vmem:[#allocation17_spill] sm:$0xff] }
 0x19f   :  { %1963 = vtanh.f32 %v679_v39  ;;  %v697_v47 = vadd.f32 1.0, %v1960_v34  ;;  %v3437_v39 = vld [vmem:[#allocation9_spill] sm:$0xff]  ;;  %v3447_v34 = vld [vmem:[#allocation19_spill] sm:$0xff] }
 0x1a0   :  { %1965 = vrcp.f32 %v690_v40  ;;  %v3446_v40 = vld [vmem:[#allocation16_spill] sm:$0xff] }
 0x1a1   :  { %1967 = vrcp.f32 %v697_v47  ;;  %v3451_v47 = vld [vmem:[#allocation23_spill] sm:$0xff] }
 0x1ab   :  { %v1962_v63 = vpop.eup %1961 }
 0x1ac   :  { %v1964_v26 = vpop.eup %1963 }
 0x1ad   :  { %v1966_v41 = vpop.eup %1965  ;;  %v701_v9 = vmul.f32 %v1964_v26, %v1962_v63  ;;  %v3448_v63 = vld [vmem:[#allocation18_spill] sm:$0xff]  ;;  %v3449_v26 = vld [vmem:[#allocation21_spill] sm:$0xff] }
 0x1ae   :  { %v700_v55 = vmul.f32 0.0, %v1966_v41  ;;  %v1968_v25 = vpop.eup %1967  ;;  %v3450_v41 = vld [vmem:[#allocation20_spill] sm:$0xff] }
 0x1b0   :  { %v2711_v61 = vadd.f32 %v701_v9, %v700_v55  ;;  %v3452_v55 = vld [vmem:[#allocation22_spill] sm:$0xff]  ;;  %v3453_v9 = vld [vmem:[#allocation25_spill] sm:$0xff] }
 0x1b2   :  { %1969 = vtanh.f32 %v2711_v61 }
 0x1bf   :  { %v1970_v56 = vpop.eup %1969 }
 0x1c0   :  { %v704_v51 = vmul.f32 %v1970_v56, %v1968_v25  ;;  %v3454_v25 = vld [vmem:[#allocation24_spill] sm:$0xff]  ;;  %v3455_v56 = vmov 0.0  }
 0x1c2   :  { %770 = vmatmul.mubr.f32.vlgmr.msra.gmra.mxu0 %v704_v51  ;;  %841 = vmatmul.mubr.f32.vlgmr.msra.gmra.mxu1 %v704_v51  ;;  %v3456_v51 = vld [vmem:[#allocation26_spill] sm:$0xff] }
 0x1c3   :  { %876 = vmatpush1.msra.mxu0 %v2316_v53  ;;  %947 = vmatpush1.msra.mxu1 %v2318_v54 }
 0x1c4   :  { %877 = vmatprep.subr.mxu0 %v2322_v58  ;;  %948 = vmatprep.subr.mxu1 %v2324_v59 }
 0x1c5   :  { %878 = vmatpush1.msra.mxu0 %v2328_v60  ;;  %949 = vmatpush1.msra.mxu1 %v2337_v1 }
 0x1c6   :  { %879 = vmatprep.subr.mxu0 %v2333_v62  ;;  %950 = vmatprep.subr.mxu1 %v2345_v5 }
 0x1c7   :  { %880 = vmatpush1.msra.mxu0 %v2341_v4  ;;  %951 = vmatpush1.msra.mxu1 %v2353_v10 }
 0x1c8   :  { %881 = vmatprep.subr.mxu0 %v2347_v6  ;;  %952 = vmatprep.subr.mxu1 %v2359_v12 }
 0x1c9   :  { %882 = vmatpush1.msra.mxu0 %v2355_v11  ;;  %953 = vmatpush1.msra.mxu1 %v2368_v17 }
 0x1ca   :  { %883 = vmatprep.subr.mxu0 %v2364_v14  ;;  %954 = vmatprep.subr.mxu1 %v2376_v21 }
 0x1cb   :  { %884 = vmatpush1.msra.mxu0 %v2372_v20  ;;  %955 = vmatpush1.msra.mxu1 %v2384_v29 }
 0x1cc   :  { %885 = vmatprep.subr.mxu0 %v2378_v22  ;;  %956 = vmatprep.subr.mxu1 %v2390_v33 }
 0x1cd   :  { %886 = vmatpush1.msra.mxu0 %v2386_v30  ;;  %957 = vmatpush1.msra.mxu1 %v2399_v38 }
 0x1ce   :  { %887 = vmatprep.subr.mxu0 %v2395_v35  ;;  %958 = vmatprep.subr.mxu1 %v2407_v43 }
 0x1cf   :  { %888 = vmatpush1.msra.mxu0 %v2403_v42  ;;  %959 = vmatpush1.msra.mxu1 %v2415_v48 }
 0x1d0   :  { %889 = vmatprep.subr.mxu0 %v2409_v44  ;;  %960 = vmatprep.subr.mxu1 %v2421_v50 }
 0x1d1   :  { %890 = vmatpush1.msra.mxu0 %v2417_v49  ;;  %961 = vmatpush1.msra.mxu1 %v2430_v57 }
 0x1d2   :  { %891 = vmatprep.subr.mxu0 %v2426_v52  ;;  %962 = vmatprep.subr.mxu1 %v2438_v2 }
 0x1d3   :  { %892 = vmatpush1.msra.mxu0 %v2434_v0  ;;  %963 = vmatpush1.msra.mxu1 %v2446_v13 }
 0x1d4   :  { %893 = vmatprep.subr.mxu0 %v2440_v3  ;;  %964 = vmatprep.subr.mxu1 %v2452_v16 }
 0x1d5   :  { %894 = vmatpush1.msra.mxu0 %v2448_v15  ;;  %965 = vmatpush1.msra.mxu1 %v2461_v32 }
 0x1d6   :  { %895 = vmatprep.subr.mxu0 %v2457_v31  ;;  %966 = vmatprep.subr.mxu1 %v2469_v28 }
 0x1d7   :  { %896 = vmatpush1.msra.mxu0 %v2465_v27  ;;  %967 = vmatpush1.msra.mxu1 %v2475_v37 }
 0x1d8   :  { %897 = vmatprep.subr.mxu0 %v3436_v45  ;;  %968 = vmatprep.subr.mxu1 %v3437_v39 }
 0x1d9   :  { %898 = vmatpush1.msra.mxu0 %v3438_v36  ;;  %969 = vmatpush1.msra.mxu1 %v3439_v18 }
 0x1da   :  { %899 = vmatprep.subr.mxu0 %v3440_v46  ;;  %970 = vmatprep.subr.mxu1 %v3441_v23  ;;  %v3462_v23 = vld [vmem:[#allocation28_spill] sm:$0xff] }
 0x1db   :  { %900 = vmatpush1.msra.mxu0 %v3442_v7  ;;  %971 = vmatpush1.msra.mxu1 %v3443_v19  ;;  %v3461_v7 = vld [vmem:[#allocation30_spill] sm:$0xff] }
 0x1dc   :  { %901 = vmatprep.subr.mxu0 %v3444_v24  ;;  %972 = vmatprep.subr.mxu1 %v3445_v8 }
 0x1dd   :  { %902 = vmatpush1.msra.mxu0 %v3446_v40  ;;  %973 = vmatpush1.msra.mxu1 %v3447_v34  ;;  %v3457_v34 = vld [vmem:[#allocation5_spill] sm:$0xff] }
 0x1de   :  { %903 = vmatprep.subr.mxu0 %v3448_v63  ;;  %974 = vmatprep.subr.mxu1 %v3449_v26  ;;  %v3458_v63 = vld [vmem:[#allocation6_spill] sm:$0xff] }
 0x1df   :  { %904 = vmatpush1.msra.mxu0 %v3450_v41  ;;  %975 = vmatpush1.msra.mxu1 %v3451_v47  ;;  %v3459_v41 = vld [vmem:[#allocation27_spill] sm:$0xff] }
 0x1e0   :  { %905 = vmatprep.subr.mxu0 %v3452_v55  ;;  %976 = vmatprep.subr.mxu1 %v3453_v9  ;;  %v3460_v55 = vld [vmem:[#allocation29_spill] sm:$0xff] }
 0x1e1   :  { %906 = vmatpush1.msra.mxu0 %v3454_v25  ;;  %939 = vmatprep.mubr.f32.mxu0 %v3455_v56 }
 0x1e2   :  { %977 = vmatpush1.msra.mxu1 %v3456_v51  ;;  %1010 = vmatprep.mubr.f32.mxu1 %v3455_v56 }
 0x1e3   :  { %1045 = vmatprep.subr.mxu0 %v3457_v34  ;;  %1116 = vmatprep.subr.mxu1 %v3458_v63 }
 0x282   :  { %v771_v26 = vpop.f32.mrf.mxu0  ;;  %v842_v9 = vpop.f32.mrf.mxu1 }
 0x283   :  { %v847_v40 = vadd.f32 %v771_v26, %v3459_v41  ;;  %v849_v56 = vadd.f32 %v842_v9, %v3462_v23 }
 0x284   :  { %v773_v47 = vpop.f32.mrf.mxu0  ;;  %v844_v19 = vpop.f32.mrf.mxu1 }
 0x285   :  { %v1923_v8 = vmul.f32 -1.442695, %v847_v40  ;;  %v848_v24 = vadd.f32 %v773_v47, %v3460_v55  ;;  %v850_v51 = vadd.f32 %v844_v19, %v3461_v7 }
 0x287   :  { %1971 = vpow2.f32 %v1923_v8  ;;  %v1924_v25 = vmul.f32 -1.442695, %v848_v24  ;;  %v1925_v46 = vmul.f32 -1.442695, %v850_v51 }
 0x289   :  { %1973 = vpow2.f32 %v1924_v25 }
 0x28a   :  { %1975 = vtanh.f32 %v849_v56 }
 0x28b   :  { %1977 = vpow2.f32 %v1925_v46  ;;  %v3486_v46 = vld [vmem:[#allocation32_spill] sm:$0xff] }
 0x294   :  { %v1972_v34 = vpop.eup %1971 }
 0x295   :  { %v854_v18 = vadd.f32 1.0, %v1972_v34 }
 0x296   :  { %v1974_v63 = vpop.eup %1973 }
 0x297   :  { %1979 = vrcp.f32 %v854_v18  ;;  %v860_v26 = vadd.f32 1.0, %v1974_v63  ;;  %v1976_v40 = vpop.eup %1975 }
 0x298   :  { %v1978_v41 = vpop.eup %1977 }
 0x299   :  { %1981 = vrcp.f32 %v860_v26  ;;  %v867_v55 = vadd.f32 1.0, %v1978_v41 }
 0x29b   :  { %1983 = vrcp.f32 %v867_v55 }
 0x2a4   :  { %v1980_v8 = vpop.eup %1979 }
 0x2a5   :  { %v871_v47 = vmul.f32 %v1980_v8, %v1976_v40 }
 0x2a6   :  { %v1982_v24 = vpop.eup %1981 }
 0x2a7   :  { %v870_v25 = vmul.f32 %v1982_v24, %v2711_v61  ;;  %v3485_v61 = vld [vmem:[#allocation34_spill] sm:$0xff] }
 0x2a8   :  { %v1984_v23 = vpop.eup %1983 }
 0x2a9   :  { %v2785_v7 = vadd.f32 %v871_v47, %v870_v25 }
 0x2ab   :  { %1985 = vtanh.f32 %v2785_v7 }
 0x2b8   :  { %v1986_v19 = vpop.eup %1985 }
 0x2b9   :  { %v874_v9 = vmul.f32 %v1986_v19, %v1984_v23 }
 0x2bb   :  { %940 = vmatmul.mubr.f32.vlgmr.msra.gmra.mxu0 %v874_v9  ;;  %1011 = vmatmul.mubr.f32.vlgmr.msra.gmra.mxu1 %v874_v9 }
 0x2bc   :  { %1046 = vmatpush1.msra.mxu0 %v2316_v53  ;;  %1117 = vmatpush1.msra.mxu1 %v2318_v54  ;;  %v3463_v53 = vld [vmem:[#allocation11_spill] sm:$0xff]  ;;  %v3464_v54 = vld [vmem:[#allocation10_spill] sm:$0xff] }
 0x2bd   :  { %1047 = vmatprep.subr.mxu0 %v2322_v58  ;;  %1118 = vmatprep.subr.mxu1 %v2324_v59  ;;  %v3465_v58 = vld [vmem:[#allocation13_spill] sm:$0xff]  ;;  %v3466_v59 = vld [vmem:[#allocation12_spill] sm:$0xff] }
 0x2be   :  { %1048 = vmatpush1.msra.mxu0 %v2328_v60  ;;  %1119 = vmatpush1.msra.mxu1 %v2337_v1  ;;  %v3467_v60 = vld [vmem:[#allocation15_spill] sm:$0xff]  ;;  %v3469_v1 = vld [vmem:[#allocation17_spill] sm:$0xff] }
 0x2bf   :  { %1049 = vmatprep.subr.mxu0 %v2333_v62  ;;  %1120 = vmatprep.subr.mxu1 %v2345_v5  ;;  %v3468_v62 = vld [vmem:[#allocation14_spill] sm:$0xff]  ;;  %v3471_v5 = vld [vmem:[#allocation19_spill] sm:$0xff] }
 0x2c0   :  { %1050 = vmatpush1.msra.mxu0 %v2341_v4  ;;  %1121 = vmatpush1.msra.mxu1 %v2353_v10  ;;  %v3470_v4 = vld [vmem:[#allocation16_spill] sm:$0xff]  ;;  %v3473_v10 = vld [vmem:[#allocation21_spill] sm:$0xff] }
 0x2c1   :  { %1051 = vmatprep.subr.mxu0 %v2347_v6  ;;  %1122 = vmatprep.subr.mxu1 %v2359_v12  ;;  %v3472_v6 = vld [vmem:[#allocation18_spill] sm:$0xff]  ;;  %v3475_v12 = vld [vmem:[#allocation23_spill] sm:$0xff] }
 0x2c2   :  { %1052 = vmatpush1.msra.mxu0 %v2355_v11  ;;  %1123 = vmatpush1.msra.mxu1 %v2368_v17  ;;  %v3474_v11 = vld [vmem:[#allocation20_spill] sm:$0xff]  ;;  %v3477_v17 = vld [vmem:[#allocation25_spill] sm:$0xff] }
 0x2c3   :  { %1053 = vmatprep.subr.mxu0 %v2364_v14  ;;  %1124 = vmatprep.subr.mxu1 %v2376_v21  ;;  %v3476_v14 = vld [vmem:[#allocation22_spill] sm:$0xff]  ;;  %v3479_v21 = vmov 0.0  }
 0x2c4   :  { %1054 = vmatpush1.msra.mxu0 %v2372_v20  ;;  %1125 = vmatpush1.msra.mxu1 %v2384_v29  ;;  %v3478_v20 = vld [vmem:[#allocation24_spill] sm:$0xff]  ;;  %v2852_v29 = vld [vmem:[#allocation2 + $0x1e8] sm:$0xff] }
 0x2c5   :  { %1055 = vmatprep.subr.mxu0 %v2378_v22  ;;  %1126 = vmatprep.subr.mxu1 %v2390_v33  ;;  %v3480_v22 = vld [vmem:[#allocation26_spill] sm:$0xff]  ;;  %3481 = vst [vmem:[#allocation7_spill] sm:$0xff] %v2852_v29 }
 0x2c6   :  { %1056 = vmatpush1.msra.mxu0 %v2386_v30  ;;  %1127 = vmatpush1.msra.mxu1 %v2399_v38  ;;  %v2855_v30 = vld [vmem:[#allocation2 + $0x1f8] sm:$0xff] }
 0x2c7   :  { %1057 = vmatprep.subr.mxu0 %v2395_v35  ;;  %1128 = vmatprep.subr.mxu1 %v2407_v43  ;;  %3482 = vst [vmem:[#allocation9_spill] sm:$0xff] %v2855_v30  ;;  %v3483_v35 = vld [vmem:[#allocation31_spill] sm:$0xff] }
 0x2c8   :  { %1058 = vmatpush1.msra.mxu0 %v2403_v42  ;;  %1129 = vmatpush1.msra.mxu1 %v2415_v48 }
 0x2c9   :  { %1059 = vmatprep.subr.mxu0 %v2409_v44  ;;  %1130 = vmatprep.subr.mxu1 %v2421_v50  ;;  %v3484_v44 = vld [vmem:[#allocation33_spill] sm:$0xff] }
 0x2ca   :  { %1060 = vmatpush1.msra.mxu0 %v2417_v49  ;;  %1131 = vmatpush1.msra.mxu1 %v2430_v57 }
 0x2cb   :  { %1061 = vmatprep.subr.mxu0 %v2426_v52  ;;  %1132 = vmatprep.subr.mxu1 %v2438_v2 }
 0x2cc   :  { %1062 = vmatpush1.msra.mxu0 %v2434_v0  ;;  %1133 = vmatpush1.msra.mxu1 %v2446_v13 }
 0x2cd   :  { %1063 = vmatprep.subr.mxu0 %v2440_v3  ;;  %1134 = vmatprep.subr.mxu1 %v2452_v16 }
 0x2ce   :  { %1064 = vmatpush1.msra.mxu0 %v2448_v15  ;;  %1135 = vmatpush1.msra.mxu1 %v2461_v32 }
 0x2cf   :  { %1065 = vmatprep.subr.mxu0 %v2457_v31  ;;  %1136 = vmatprep.subr.mxu1 %v2469_v28 }
 0x2d0   :  { %1066 = vmatpush1.msra.mxu0 %v2465_v27  ;;  %1137 = vmatpush1.msra.mxu1 %v2475_v37 }
 0x2d1   :  { %1067 = vmatprep.subr.mxu0 %v3436_v45  ;;  %1138 = vmatprep.subr.mxu1 %v3437_v39 }
 0x2d2   :  { %1068 = vmatpush1.msra.mxu0 %v3438_v36  ;;  %1139 = vmatpush1.msra.mxu1 %v3463_v53 }
 0x2d3   :  { %1069 = vmatprep.subr.mxu0 %v3464_v54  ;;  %1140 = vmatprep.subr.mxu1 %v3465_v58 }
 0x2d4   :  { %1070 = vmatpush1.msra.mxu0 %v3466_v59  ;;  %1141 = vmatpush1.msra.mxu1 %v3467_v60 }
 0x2d5   :  { %1071 = vmatprep.subr.mxu0 %v3468_v62  ;;  %1142 = vmatprep.subr.mxu1 %v3469_v1 }
 0x2d6   :  { %1072 = vmatpush1.msra.mxu0 %v3470_v4  ;;  %1143 = vmatpush1.msra.mxu1 %v3471_v5 }
 0x2d7   :  { %1073 = vmatprep.subr.mxu0 %v3472_v6  ;;  %1144 = vmatprep.subr.mxu1 %v3473_v10 }
 0x2d8   :  { %1074 = vmatpush1.msra.mxu0 %v3474_v11  ;;  %1145 = vmatpush1.msra.mxu1 %v3475_v12 }
 0x2d9   :  { %1075 = vmatprep.subr.mxu0 %v3476_v14  ;;  %1146 = vmatprep.subr.mxu1 %v3477_v17 }
 0x2da   :  { %1076 = vmatpush1.msra.mxu0 %v3478_v20  ;;  %1109 = vmatprep.mubr.f32.mxu0 %v3479_v21 }
 0x2db   :  { %1147 = vmatpush1.msra.mxu1 %v3480_v22  ;;  %1180 = vmatprep.mubr.f32.mxu1 %v3479_v21 }
 0x2dc   :  { %1215 = vmatprep.subr.mxu0 %v2852_v29  ;;  %1286 = vmatprep.subr.mxu1 %v2855_v30 }
 0x37b   :  { %v941_v33 = vpop.f32.mrf.mxu0  ;;  %v1012_v49 = vpop.f32.mrf.mxu1 }
 0x37c   :  { %v1017_v38 = vadd.f32 %v941_v33, %v3483_v35  ;;  %v1019_v56 = vadd.f32 %v1012_v49, %v3486_v46  ;;  %v2884_v49 = vld [vmem:[#allocation2 + $0x1a8] sm:$0xff]  ;;  %v2899_v46 = vld [vmem:[#allocation2 + $0x198] sm:$0xff] }
 0x37d   :  { %v943_v42 = vpop.f32.mrf.mxu0  ;;  %v1014_v52 = vpop.f32.mrf.mxu1 }
 0x37e   :  { %v1926_v43 = vmul.f32 -1.442695, %v1017_v38  ;;  %v1018_v48 = vadd.f32 %v943_v42, %v3484_v44  ;;  %v1020_v18 = vadd.f32 %v1014_v52, %v3485_v61  ;;  %v2866_v38 = vld [vmem:[#allocation2 + $0x1e0] sm:$0xff]  ;;  %v2869_v42 = vld [vmem:[#allocation2 + $0x1f0] sm:$0xff] }
 0x37f   :  { %v2878_v44 = vld [vmem:[#allocation2 + $0x1c0] sm:$0xff]  ;;  %v2893_v61 = vld [vmem:[#allocation2 + $0x1b0] sm:$0xff] }
 0x380   :  { %1987 = vpow2.f32 %v1926_v43  ;;  %v1927_v50 = vmul.f32 -1.442695, %v1018_v48  ;;  %v1928_v51 = vmul.f32 -1.442695, %v1020_v18  ;;  %v2872_v43 = vld [vmem:[#allocation2 + $0x1c8] sm:$0xff]  ;;  %v2881_v48 = vld [vmem:[#allocation2 + $0x1d0] sm:$0xff] }
 0x381   :  { %v2890_v52 = vld [vmem:[#allocation2 + $0x1a0] sm:$0xff]  ;;  %v2896_v18 = vld [vmem:[#allocation2 + $0x188] sm:$0xff] }
 0x382   :  { %1989 = vpow2.f32 %v1927_v50  ;;  %v2887_v50 = vld [vmem:[#allocation2 + $0x1b8] sm:$0xff] }
 0x383   :  { %1991 = vtanh.f32 %v1019_v56  ;;  %v2902_v56 = vld [vmem:[#allocation2 + $0x180] sm:$0xff] }
 0x384   :  { %1993 = vpow2.f32 %v1928_v51  ;;  %v2905_v51 = vld [vmem:[#allocation2 + $0x190] sm:$0xff] }
 0x38d   :  { %v1988_v34 = vpop.eup %1987 }
 0x38e   :  { %v1024_v63 = vadd.f32 1.0, %v1988_v34  ;;  %v2908_v34 = vld [vmem:[#allocation2 + $0x168] sm:$0xff] }
 0x38f   :  { %v1990_v26 = vpop.eup %1989 }
 0x390   :  { %1995 = vrcp.f32 %v1024_v63  ;;  %v1030_v40 = vadd.f32 1.0, %v1990_v26  ;;  %v1992_v41 = vpop.eup %1991  ;;  %v2911_v63 = vld [vmem:[#allocation2 + $0x178] sm:$0xff]  ;;  %v2914_v26 = vld [vmem:[#allocation2 + $0x160] sm:$0xff] }
 0x391   :  { %v1994_v8 = vpop.eup %1993 }
 0x392   :  { %1997 = vrcp.f32 %v1030_v40  ;;  %v1037_v25 = vadd.f32 1.0, %v1994_v8  ;;  %v2917_v40 = vld [vmem:[#allocation2 + $0x170] sm:$0xff]  ;;  %v2923_v8 = vld [vmem:[#allocation2 + $0x158] sm:$0xff] }
 0x394   :  { %1999 = vrcp.f32 %v1037_v25  ;;  %v2935_v25 = vld [vmem:[#allocation2 + $0x138] sm:$0xff] }
 0x395   :  { %3488 = vst [vmem:[#allocation5_spill] sm:$0xff] %v2935_v25 }
 0x39d   :  { %v1996_v47 = vpop.eup %1995 }
 0x39e   :  { %v1041_v24 = vmul.f32 %v1996_v47, %v1992_v41  ;;  %v2920_v41 = vld [vmem:[#allocation2 + $0x148] sm:$0xff]  ;;  %v2926_v47 = vld [vmem:[#allocation2 + $0x140] sm:$0xff] }
 0x39f   :  { %v1998_v55 = vpop.eup %1997 }
 0x3a0   :  { %v1040_v23 = vmul.f32 %v1998_v55, %v2785_v7  ;;  %v2875_v7 = vld [vmem:[#allocation2 + $0x1d8] sm:$0xff]  ;;  %v2932_v55 = vld [vmem:[#allocation2 + $0x128] sm:$0xff] }
 0x3a1   :  { %v2000_v9 = vpop.eup %1999  ;;  %3487 = vst [vmem:[#allocation8_spill] sm:$0xff] %v2932_v55 }
 0x3a2   :  { %v2863_v19 = vadd.f32 %v1041_v24, %v1040_v23  ;;  %v2929_v24 = vld [vmem:[#allocation2 + $0x150] sm:$0xff]  ;;  %v2938_v23 = vld [vmem:[#allocation2 + $0x120] sm:$0xff] }
 0x3a4   :  { %2001 = vtanh.f32 %v2863_v19 }
 0x3b1   :  { %v2002_v33 = vpop.eup %2001 }
 0x3b2   :  { %v1044_v35 = vmul.f32 %v2002_v33, %v2000_v9  ;;  %v2941_v9 = vld [vmem:[#allocation2 + $0x130] sm:$0xff]  ;;  %v2944_v33 = vld [vmem:[#allocation2 + $0x108] sm:$0xff] }
 0x3b4   :  { %1110 = vmatmul.mubr.f32.vlgmr.msra.gmra.mxu0 %v1044_v35  ;;  %1181 = vmatmul.mubr.f32.vlgmr.msra.gmra.mxu1 %v1044_v35  ;;  %v2947_v35 = vld [vmem:[#allocation2 + $0x118] sm:$0xff] }
 0x3b5   :  { %1216 = vmatpush1.msra.mxu0 %v2866_v38  ;;  %1287 = vmatpush1.msra.mxu1 %v2869_v42 }
 0x3b6   :  { %1217 = vmatprep.subr.mxu0 %v2872_v43  ;;  %1288 = vmatprep.subr.mxu1 %v2875_v7 }
 0x3b7   :  { %1218 = vmatpush1.msra.mxu0 %v2878_v44  ;;  %1289 = vmatpush1.msra.mxu1 %v2881_v48 }
 0x3b8   :  { %1219 = vmatprep.subr.mxu0 %v2884_v49  ;;  %1290 = vmatprep.subr.mxu1 %v2887_v50 }
 0x3b9   :  { %1220 = vmatpush1.msra.mxu0 %v2890_v52  ;;  %1291 = vmatpush1.msra.mxu1 %v2893_v61 }
 0x3ba   :  { %1221 = vmatprep.subr.mxu0 %v2896_v18  ;;  %1292 = vmatprep.subr.mxu1 %v2899_v46 }
 0x3bb   :  { %1222 = vmatpush1.msra.mxu0 %v2902_v56  ;;  %1293 = vmatpush1.msra.mxu1 %v2905_v51 }
 0x3bc   :  { %1223 = vmatprep.subr.mxu0 %v2908_v34  ;;  %1294 = vmatprep.subr.mxu1 %v2911_v63 }
 0x3bd   :  { %1224 = vmatpush1.msra.mxu0 %v2914_v26  ;;  %1295 = vmatpush1.msra.mxu1 %v2917_v40 }
 0x3be   :  { %1225 = vmatprep.subr.mxu0 %v2920_v41  ;;  %1296 = vmatprep.subr.mxu1 %v2923_v8 }
 0x3bf   :  { %1226 = vmatpush1.msra.mxu0 %v2926_v47  ;;  %1297 = vmatpush1.msra.mxu1 %v2929_v24 }
 0x3c0   :  { %1227 = vmatprep.subr.mxu0 %v2932_v55  ;;  %1298 = vmatprep.subr.mxu1 %v2935_v25  ;;  %v2950_v55 = vld [vmem:[#allocation2 + $0x100] sm:$0xff]  ;;  %v2954_v25 = vld [vmem:[#allocation2 + $0xe8] sm:$0xff] }
 0x3c1   :  { %1228 = vmatpush1.msra.mxu0 %v2938_v23  ;;  %1299 = vmatpush1.msra.mxu1 %v2941_v9 }
 0x3c2   :  { %1229 = vmatprep.subr.mxu0 %v2944_v33  ;;  %1300 = vmatprep.subr.mxu1 %v2947_v35 }
 0x3c3   :  { %1230 = vmatpush1.msra.mxu0 %v2950_v55  ;;  %1301 = vmatpush1.msra.mxu1 %v2430_v57 }
 0x3c4   :  { %1231 = vmatprep.subr.mxu0 %v2954_v25  ;;  %1302 = vmatprep.subr.mxu1 %v2438_v2 }
 0x3c5   :  { %1232 = vmatpush1.msra.mxu0 %v2434_v0  ;;  %1303 = vmatpush1.msra.mxu1 %v2446_v13  ;;  %v3489_v0 = vld [vmem:[#allocation35_spill] sm:$0xff] }
 0x3c6   :  { %1233 = vmatprep.subr.mxu0 %v2440_v3  ;;  %1304 = vmatprep.subr.mxu1 %v2452_v16 }
 0x3c7   :  { %1234 = vmatpush1.msra.mxu0 %v2448_v15  ;;  %1305 = vmatpush1.msra.mxu1 %v2461_v32  ;;  %v3490_v15 = vld [vmem:[#allocation37_spill] sm:$0xff] }
 0x3c8   :  { %1235 = vmatprep.subr.mxu0 %v2457_v31  ;;  %1306 = vmatprep.subr.mxu1 %v2469_v28  ;;  %v3491_v28 = vld [vmem:[#allocation38_spill] sm:$0xff] }
 0x3c9   :  { %1236 = vmatpush1.msra.mxu0 %v2465_v27  ;;  %1307 = vmatpush1.msra.mxu1 %v2475_v37 }
 0x3ca   :  { %1237 = vmatprep.subr.mxu0 %v3436_v45  ;;  %1308 = vmatprep.subr.mxu1 %v3437_v39  ;;  %v3492_v45 = vld [vmem:[#allocation36_spill] sm:$0xff] }
 0x3cb   :  { %1238 = vmatpush1.msra.mxu0 %v3438_v36  ;;  %1309 = vmatpush1.msra.mxu1 %v3463_v53 }
 0x3cc   :  { %1239 = vmatprep.subr.mxu0 %v3464_v54  ;;  %1310 = vmatprep.subr.mxu1 %v3465_v58 }
 0x3cd   :  { %1240 = vmatpush1.msra.mxu0 %v3466_v59  ;;  %1311 = vmatpush1.msra.mxu1 %v3467_v60 }
 0x3ce   :  { %1241 = vmatprep.subr.mxu0 %v3468_v62  ;;  %1312 = vmatprep.subr.mxu1 %v3469_v1 }
 0x3cf   :  { %1242 = vmatpush1.msra.mxu0 %v3470_v4  ;;  %1313 = vmatpush1.msra.mxu1 %v3471_v5 }
 0x3d0   :  { %1243 = vmatprep.subr.mxu0 %v3472_v6  ;;  %1314 = vmatprep.subr.mxu1 %v3473_v10 }
 0x3d1   :  { %1244 = vmatpush1.msra.mxu0 %v3474_v11  ;;  %1315 = vmatpush1.msra.mxu1 %v3475_v12 }
 0x3d2   :  { %1245 = vmatprep.subr.mxu0 %v3476_v14  ;;  %1316 = vmatprep.subr.mxu1 %v3477_v17 }
 0x3d3   :  { %1246 = vmatpush1.msra.mxu0 %v3478_v20  ;;  %1279 = vmatprep.mubr.f32.mxu0 %v3479_v21  ;;  %v3493_v20 = vld [vmem:[#allocation8_spill] sm:$0xff] }
 0x3d4   :  { %1317 = vmatpush1.msra.mxu1 %v3480_v22  ;;  %1350 = vmatprep.mubr.f32.mxu1 %v3479_v21  ;;  %v3494_v22 = vld [vmem:[#allocation5_spill] sm:$0xff] }
 0x3d5   :  { %1385 = vmatprep.subr.mxu0 %v2852_v29  ;;  %1456 = vmatprep.subr.mxu1 %v2855_v30 }
 0x474   :  { %v1111_v57 = vpop.f32.mrf.mxu0  ;;  %v1182_v31 = vpop.f32.mrf.mxu1 }
 0x475   :  { %v1187_v2 = vadd.f32 %v1111_v57, %v3489_v0  ;;  %v1189_v39 = vadd.f32 %v1182_v31, %v3492_v45  ;;  %v3033_v57 = vld [vmem:[#allocation2 + $0xf8] sm:$0xff]  ;;  %v3036_v0 = vld [vmem:[#allocation2 + $0xe0] sm:$0xff]  ;;  %v3054_v31 = vld [vmem:[#allocation2 + $0xa8] sm:$0xff] }
 0x476   :  { %v1113_v3 = vpop.f32.mrf.mxu0  ;;  %v1184_v27 = vpop.f32.mrf.mxu1  ;;  %v3069_v45 = vld [vmem:[#allocation2 + $0x98] sm:$0xff] }
 0x477   :  { %v1929_v13 = vmul.f32 -1.442695, %v1187_v2  ;;  %v1188_v16 = vadd.f32 %v1113_v3, %v3490_v15  ;;  %v1190_v37 = vadd.f32 %v1184_v27, %v3491_v28  ;;  %v3039_v2 = vld [vmem:[#allocation2 + $0xf0] sm:$0xff]  ;;  %v3042_v3 = vld [vmem:[#allocation2 + $0xc8] sm:$0xff]  ;;  %v3048_v15 = vld [vmem:[#allocation2 + $0xc0] sm:$0xff] }
 0x478   :  { %v3060_v27 = vld [vmem:[#allocation2 + $0xa0] sm:$0xff]  ;;  %v3063_v28 = vld [vmem:[#allocation2 + $0xb0] sm:$0xff] }
 0x479   :  { %2003 = vpow2.f32 %v1929_v13  ;;  %v1930_v32 = vmul.f32 -1.442695, %v1188_v16  ;;  %v1931_v36 = vmul.f32 -1.442695, %v1190_v37  ;;  %v3045_v13 = vld [vmem:[#allocation2 + $0xd8] sm:$0xff]  ;;  %v3051_v16 = vld [vmem:[#allocation2 + $0xd0] sm:$0xff] }
 0x47a   :  { %v3066_v37 = vld [vmem:[#allocation2 + $0x88] sm:$0xff] }
 0x47b   :  { %2005 = vpow2.f32 %v1930_v32  ;;  %v3057_v32 = vld [vmem:[#allocation2 + $0xb8] sm:$0xff] }
 0x47c   :  { %2007 = vtanh.f32 %v1189_v39  ;;  %v3072_v39 = vld [vmem:[#allocation2 + $0x80] sm:$0xff] }
 0x47d   :  { %2009 = vpow2.f32 %v1931_v36  ;;  %v3075_v36 = vld [vmem:[#allocation2 + $0x90] sm:$0xff] }
 0x47e   :  { %3495 = vst [vmem:[#allocation6_spill] sm:$0xff] %v3075_v36 }
 0x486   :  { %v2004_v53 = vpop.eup %2003 }
 0x487   :  { %v1194_v54 = vadd.f32 1.0, %v2004_v53  ;;  %v3078_v53 = vld [vmem:[#allocation2 + $0x68] sm:$0xff] }
 0x488   :  { %v2006_v58 = vpop.eup %2005  ;;  %3496 = vst [vmem:[#allocation27_spill] sm:$0xff] %v3078_v53 }
 0x489   :  { %2011 = vrcp.f32 %v1194_v54  ;;  %v1200_v59 = vadd.f32 1.0, %v2006_v58  ;;  %v2008_v60 = vpop.eup %2007  ;;  %v3081_v54 = vld [vmem:[#allocation2 + $0x78] sm:$0xff]  ;;  %v3084_v58 = vld [vmem:[#allocation2 + $0x60] sm:$0xff] }
 0x48a   :  { %v2010_v62 = vpop.eup %2009  ;;  %3497 = vst [vmem:[#allocation29_spill] sm:$0xff] %v3081_v54  ;;  %3498 = vst [vmem:[#allocation30_spill] sm:$0xff] %v3084_v58 }
 0x48b   :  { %2013 = vrcp.f32 %v1200_v59  ;;  %v1207_v6 = vadd.f32 1.0, %v2010_v62  ;;  %v3087_v59 = vld [vmem:[#allocation2 + $0x70] sm:$0xff]  ;;  %v3093_v62 = vld [vmem:[#allocation2 + $0x58] sm:$0xff] }
 0x48c   :  { %3499 = vst [vmem:[#allocation28_spill] sm:$0xff] %v3087_v59  ;;  %3501 = vst [vmem:[#allocation10_spill] sm:$0xff] %v3093_v62 }
 0x48d   :  { %2015 = vrcp.f32 %v1207_v6  ;;  %v3105_v6 = vld [vmem:[#allocation2 + $0x38] sm:$0xff] }
 0x48e   :  { %3505 = vst [vmem:[#allocation14_spill] sm:$0xff] %v3105_v6 }
 0x496   :  { %v2012_v1 = vpop.eup %2011 }
 0x497   :  { %v1211_v4 = vmul.f32 %v2012_v1, %v2008_v60  ;;  %v3090_v60 = vld [vmem:[#allocation2 + $0x48] sm:$0xff]  ;;  %v3096_v1 = vld [vmem:[#allocation2 + $0x40] sm:$0xff] }
 0x498   :  { %v2014_v5 = vpop.eup %2013  ;;  %3500 = vst [vmem:[#allocation11_spill] sm:$0xff] %v3090_v60  ;;  %3502 = vst [vmem:[#allocation13_spill] sm:$0xff] %v3096_v1 }
 0x499   :  { %v1210_v10 = vmul.f32 %v2014_v5, %v2863_v19  ;;  %v3029_v19 = vld [vmem:[#allocation2 + $0x110] sm:$0xff]  ;;  %v3102_v5 = vld [vmem:[#allocation2 + $0x28] sm:$0xff] }
 0x49a   :  { %v2016_v12 = vpop.eup %2015  ;;  %3504 = vst [vmem:[#allocation15_spill] sm:$0xff] %v3102_v5 }
 0x49b   :  { %v2997_v11 = vadd.f32 %v1211_v4, %v1210_v10  ;;  %v3099_v4 = vld [vmem:[#allocation2 + $0x50] sm:$0xff]  ;;  %v3108_v10 = vld [vmem:[#allocation2 + $0x20] sm:$0xff] }
 0x49c   :  { %3503 = vst [vmem:[#allocation12_spill] sm:$0xff] %v3099_v4  ;;  %3506 = vst [vmem:[#allocation17_spill] sm:$0xff] %v3108_v10 }
 0x49d   :  { %2017 = vtanh.f32 %v2997_v11 }
 0x4aa   :  { %v2018_v14 = vpop.eup %2017 }
 0x4ab   :  { %v1214_v17 = vmul.f32 %v2018_v14, %v2016_v12  ;;  %v3111_v12 = vld [vmem:[#allocation2 + $0x30] sm:$0xff]  ;;  %v3114_v14 = vld [vmem:[#allocation2 + $0x8] sm:$0xff] }
 0x4ac   :  { %3507 = vst [vmem:[#allocation16_spill] sm:$0xff] %v3111_v12  ;;  %3508 = vst [vmem:[#allocation19_spill] sm:$0xff] %v3114_v14 }
 0x4ad   :  { %1280 = vmatmul.mubr.f32.vlgmr.msra.gmra.mxu0 %v1214_v17  ;;  %1351 = vmatmul.mubr.f32.vlgmr.msra.gmra.mxu1 %v1214_v17  ;;  %v3117_v17 = vld [vmem:[#allocation2 + $0x18] sm:$0xff] }
 0x4ae   :  { %1386 = vmatpush1.msra.mxu0 %v2866_v38  ;;  %1457 = vmatpush1.msra.mxu1 %v2869_v42  ;;  %3509 = vst [vmem:[#allocation18_spill] sm:$0xff] %v3117_v17 }
 0x4af   :  { %1387 = vmatprep.subr.mxu0 %v2872_v43  ;;  %1458 = vmatprep.subr.mxu1 %v2875_v7 }
 0x4b0   :  { %1388 = vmatpush1.msra.mxu0 %v2878_v44  ;;  %1459 = vmatpush1.msra.mxu1 %v2881_v48 }
 0x4b1   :  { %1389 = vmatprep.subr.mxu0 %v2884_v49  ;;  %1460 = vmatprep.subr.mxu1 %v2887_v50 }
 0x4b2   :  { %1390 = vmatpush1.msra.mxu0 %v2890_v52  ;;  %1461 = vmatpush1.msra.mxu1 %v2893_v61 }
 0x4b3   :  { %1391 = vmatprep.subr.mxu0 %v2896_v18  ;;  %1462 = vmatprep.subr.mxu1 %v2899_v46 }
 0x4b4   :  { %1392 = vmatpush1.msra.mxu0 %v2902_v56  ;;  %1463 = vmatpush1.msra.mxu1 %v2905_v51 }
 0x4b5   :  { %1393 = vmatprep.subr.mxu0 %v2908_v34  ;;  %1464 = vmatprep.subr.mxu1 %v2911_v63 }
 0x4b6   :  { %1394 = vmatpush1.msra.mxu0 %v2914_v26  ;;  %1465 = vmatpush1.msra.mxu1 %v2917_v40 }
 0x4b7   :  { %1395 = vmatprep.subr.mxu0 %v2920_v41  ;;  %1466 = vmatprep.subr.mxu1 %v2923_v8 }
 0x4b8   :  { %1396 = vmatpush1.msra.mxu0 %v2926_v47  ;;  %1467 = vmatpush1.msra.mxu1 %v2929_v24 }
 0x4b9   :  { %1397 = vmatprep.subr.mxu0 %v3493_v20  ;;  %1468 = vmatprep.subr.mxu1 %v3494_v22 }
 0x4ba   :  { %1398 = vmatpush1.msra.mxu0 %v2938_v23  ;;  %1469 = vmatpush1.msra.mxu1 %v2941_v9 }
 0x4bb   :  { %1399 = vmatprep.subr.mxu0 %v2944_v33  ;;  %1470 = vmatprep.subr.mxu1 %v2947_v35 }
 0x4bc   :  { %1400 = vmatpush1.msra.mxu0 %v2950_v55  ;;  %1471 = vmatpush1.msra.mxu1 %v3029_v19 }
 0x4bd   :  { %1401 = vmatprep.subr.mxu0 %v2954_v25  ;;  %1472 = vmatprep.subr.mxu1 %v3033_v57 }
 0x4be   :  { %1402 = vmatpush1.msra.mxu0 %v3036_v0  ;;  %1473 = vmatpush1.msra.mxu1 %v3039_v2 }
 0x4bf   :  { %1403 = vmatprep.subr.mxu0 %v3042_v3  ;;  %1474 = vmatprep.subr.mxu1 %v3045_v13 }
 0x4c0   :  { %1404 = vmatpush1.msra.mxu0 %v3048_v15  ;;  %1475 = vmatpush1.msra.mxu1 %v3051_v16 }
 0x4c1   :  { %1405 = vmatprep.subr.mxu0 %v3054_v31  ;;  %1476 = vmatprep.subr.mxu1 %v3057_v32 }
 0x4c2   :  { %1406 = vmatpush1.msra.mxu0 %v3060_v27  ;;  %1477 = vmatpush1.msra.mxu1 %v3063_v28 }
 0x4c3   :  { %1407 = vmatprep.subr.mxu0 %v3066_v37  ;;  %1478 = vmatprep.subr.mxu1 %v3069_v45 }
 0x4c4   :  { %1408 = vmatpush1.msra.mxu0 %v3072_v39  ;;  %1479 = vmatpush1.msra.mxu1 %v3075_v36 }
 0x4c5   :  { %1409 = vmatprep.subr.mxu0 %v3078_v53  ;;  %1480 = vmatprep.subr.mxu1 %v3081_v54  ;;  %v3515_v54 = vld [vmem:[#allocation40_spill] sm:$0xff] }
 0x4c6   :  { %1410 = vmatpush1.msra.mxu0 %v3084_v58  ;;  %1481 = vmatpush1.msra.mxu1 %v3087_v59  ;;  %v3514_v58 = vld [vmem:[#allocation42_spill] sm:$0xff] }
 0x4c7   :  { %1411 = vmatprep.subr.mxu0 %v3090_v60  ;;  %1482 = vmatprep.subr.mxu1 %v3093_v62 }
 0x4c8   :  { %1412 = vmatpush1.msra.mxu0 %v3096_v1  ;;  %1483 = vmatpush1.msra.mxu1 %v3099_v4  ;;  %v3513_v1 = vld [vmem:[#allocation41_spill] sm:$0xff] }
 0x4c9   :  { %1413 = vmatprep.subr.mxu0 %v3102_v5  ;;  %1484 = vmatprep.subr.mxu1 %v3105_v6  ;;  %v3120_v5 = vld [vmem:[#allocation2] sm:$0xff]  ;;  %v3124_v6 = vld [vmem:[#allocation2 + $0x10] sm:$0xff] }
 0x4ca   :  { %1414 = vmatpush1.msra.mxu0 %v3108_v10  ;;  %1485 = vmatpush1.msra.mxu1 %v3111_v12  ;;  %3510 = vst [vmem:[#allocation21_spill] sm:$0xff] %v3120_v5  ;;  %3511 = vst [vmem:[#allocation20_spill] sm:$0xff] %v3124_v6  ;;  %v3512_v12 = vld [vmem:[#allocation39_spill] sm:$0xff] }
 0x4cb   :  { %1415 = vmatprep.subr.mxu0 %v3114_v14  ;;  %1486 = vmatprep.subr.mxu1 %v3117_v17 }
 0x4cc   :  { %1416 = vmatpush1.msra.mxu0 %v3120_v5  ;;  %1449 = vmatprep.mubr.f32.mxu0 %v3479_v21 }
 0x4cd   :  { %1487 = vmatpush1.msra.mxu1 %v3124_v6  ;;  %1520 = vmatprep.mubr.f32.mxu1 %v3479_v21 }
 0x4ce   :  { %1555 = vmatprep.subr.mxu0 %v2852_v29  ;;  %1626 = vmatprep.subr.mxu1 %v2855_v30 }
 0x56d   :  { %v1281_v14 = vpop.f32.mrf.mxu0  ;;  %v1352_v5 = vpop.f32.mrf.mxu1 }
 0x56e   :  { %v1357_v10 = vadd.f32 %v1281_v14, %v3512_v12  ;;  %v1359_v21 = vadd.f32 %v1352_v5, %v3515_v54  ;;  %v3521_v5 = vld [vmem:[#allocation11_spill] sm:$0xff] }
 0x56f   :  { %v1283_v17 = vpop.f32.mrf.mxu0  ;;  %v1354_v59 = vpop.f32.mrf.mxu1 }
 0x570   :  { %v1932_v4 = vmul.f32 -1.442695, %v1357_v10  ;;  %v1358_v62 = vadd.f32 %v1283_v17, %v3513_v1  ;;  %v1360_v6 = vadd.f32 %v1354_v59, %v3514_v58  ;;  %v3520_v59 = vld [vmem:[#allocation28_spill] sm:$0xff] }
 0x572   :  { %2019 = vpow2.f32 %v1932_v4  ;;  %v1933_v60 = vmul.f32 -1.442695, %v1358_v62  ;;  %v1934_v53 = vmul.f32 -1.442695, %v1360_v6  ;;  %v3522_v6 = vld [vmem:[#allocation10_spill] sm:$0xff] }
 0x574   :  { %2021 = vpow2.f32 %v1933_v60 }
 0x575   :  { %2023 = vtanh.f32 %v1359_v21 }
 0x576   :  { %2025 = vpow2.f32 %v1934_v53  ;;  %v3519_v53 = vld [vmem:[#allocation30_spill] sm:$0xff] }
 0x57f   :  { %v2020_v29 = vpop.eup %2019 }
 0x580   :  { %v1364_v36 = vadd.f32 1.0, %v2020_v29 }
 0x581   :  { %v2022_v30 = vpop.eup %2021 }
 0x582   :  { %2027 = vrcp.f32 %v1364_v36  ;;  %v1370_v12 = vadd.f32 1.0, %v2022_v30  ;;  %v2024_v10 = vpop.eup %2023  ;;  %v3516_v30 = vld [vmem:[#allocation6_spill] sm:$0xff]  ;;  %v3518_v36 = vld [vmem:[#allocation29_spill] sm:$0xff] }
 0x583   :  { %v2026_v1 = vpop.eup %2025 }
 0x584   :  { %2029 = vrcp.f32 %v1370_v12  ;;  %v1377_v60 = vadd.f32 1.0, %v2026_v1  ;;  %v3523_v12 = vld [vmem:[#allocation13_spill] sm:$0xff]  ;;  %v3525_v1 = vld [vmem:[#allocation15_spill] sm:$0xff] }
 0x586   :  { %2031 = vrcp.f32 %v1377_v60  ;;  %v3529_v60 = vld [vmem:[#allocation19_spill] sm:$0xff] }
 0x58f   :  { %v2028_v4 = vpop.eup %2027 }
 0x590   :  { %v1381_v14 = vmul.f32 %v2028_v4, %v2024_v10  ;;  %v3524_v10 = vld [vmem:[#allocation12_spill] sm:$0xff]  ;;  %v3526_v4 = vld [vmem:[#allocation14_spill] sm:$0xff] }
 0x591   :  { %v2030_v62 = vpop.eup %2029 }
 0x592   :  { %v1380_v17 = vmul.f32 %v2030_v62, %v2997_v11  ;;  %v3517_v11 = vld [vmem:[#allocation27_spill] sm:$0xff]  ;;  %v3528_v62 = vld [vmem:[#allocation16_spill] sm:$0xff] }
 0x593   :  { %v2032_v29 = vpop.eup %2031 }
 0x594   :  { %v3135_v58 = vadd.f32 %v1381_v14, %v1380_v17  ;;  %v3527_v14 = vld [vmem:[#allocation17_spill] sm:$0xff]  ;;  %v3530_v17 = vld [vmem:[#allocation18_spill] sm:$0xff] }
 0x596   :  { %2033 = vtanh.f32 %v3135_v58 }
 0x5a3   :  { %v2034_v21 = vpop.eup %2033 }
 0x5a4   :  { %v1384_v54 = vmul.f32 %v2034_v21, %v2032_v29  ;;  %v3531_v29 = vld [vmem:[#allocation21_spill] sm:$0xff]  ;;  %v3532_v21 = vmov 0.0  }
 0x5a6   :  { %1450 = vmatmul.mubr.f32.vlgmr.msra.gmra.mxu0 %v1384_v54  ;;  %1521 = vmatmul.mubr.f32.vlgmr.msra.gmra.mxu1 %v1384_v54  ;;  %v3533_v54 = vld [vmem:[#allocation20_spill] sm:$0xff] }
 0x5a7   :  { %1556 = vmatpush1.msra.mxu0 %v2866_v38  ;;  %1627 = vmatpush1.msra.mxu1 %v2869_v42 }
 0x5a8   :  { %1557 = vmatprep.subr.mxu0 %v2872_v43  ;;  %1628 = vmatprep.subr.mxu1 %v2875_v7 }
 0x5a9   :  { %1558 = vmatpush1.msra.mxu0 %v2878_v44  ;;  %1629 = vmatpush1.msra.mxu1 %v2881_v48 }
 0x5aa   :  { %1559 = vmatprep.subr.mxu0 %v2884_v49  ;;  %1630 = vmatprep.subr.mxu1 %v2887_v50 }
 0x5ab   :  { %1560 = vmatpush1.msra.mxu0 %v2890_v52  ;;  %1631 = vmatpush1.msra.mxu1 %v2893_v61 }
 0x5ac   :  { %1561 = vmatprep.subr.mxu0 %v2896_v18  ;;  %1632 = vmatprep.subr.mxu1 %v2899_v46 }
 0x5ad   :  { %1562 = vmatpush1.msra.mxu0 %v2902_v56  ;;  %1633 = vmatpush1.msra.mxu1 %v2905_v51 }
 0x5ae   :  { %1563 = vmatprep.subr.mxu0 %v2908_v34  ;;  %1634 = vmatprep.subr.mxu1 %v2911_v63 }
 0x5af   :  { %1564 = vmatpush1.msra.mxu0 %v2914_v26  ;;  %1635 = vmatpush1.msra.mxu1 %v2917_v40 }
 0x5b0   :  { %1565 = vmatprep.subr.mxu0 %v2920_v41  ;;  %1636 = vmatprep.subr.mxu1 %v2923_v8 }
 0x5b1   :  { %1566 = vmatpush1.msra.mxu0 %v2926_v47  ;;  %1637 = vmatpush1.msra.mxu1 %v2929_v24 }
 0x5b2   :  { %1567 = vmatprep.subr.mxu0 %v3493_v20  ;;  %1638 = vmatprep.subr.mxu1 %v3494_v22 }
 0x5b3   :  { %1568 = vmatpush1.msra.mxu0 %v2938_v23  ;;  %1639 = vmatpush1.msra.mxu1 %v2941_v9 }
 0x5b4   :  { %1569 = vmatprep.subr.mxu0 %v2944_v33  ;;  %1640 = vmatprep.subr.mxu1 %v2947_v35 }
 0x5b5   :  { %1570 = vmatpush1.msra.mxu0 %v2950_v55  ;;  %1641 = vmatpush1.msra.mxu1 %v3029_v19 }
 0x5b6   :  { %1571 = vmatprep.subr.mxu0 %v2954_v25  ;;  %1642 = vmatprep.subr.mxu1 %v3033_v57 }
 0x5b7   :  { %1572 = vmatpush1.msra.mxu0 %v3036_v0  ;;  %1643 = vmatpush1.msra.mxu1 %v3039_v2 }
 0x5b8   :  { %1573 = vmatprep.subr.mxu0 %v3042_v3  ;;  %1644 = vmatprep.subr.mxu1 %v3045_v13 }
 0x5b9   :  { %1574 = vmatpush1.msra.mxu0 %v3048_v15  ;;  %1645 = vmatpush1.msra.mxu1 %v3051_v16 }
 0x5ba   :  { %1575 = vmatprep.subr.mxu0 %v3054_v31  ;;  %1646 = vmatprep.subr.mxu1 %v3057_v32 }
 0x5bb   :  { %1576 = vmatpush1.msra.mxu0 %v3060_v27  ;;  %1647 = vmatpush1.msra.mxu1 %v3063_v28 }
 0x5bc   :  { %1577 = vmatprep.subr.mxu0 %v3066_v37  ;;  %1648 = vmatprep.subr.mxu1 %v3069_v45 }
 0x5bd   :  { %1578 = vmatpush1.msra.mxu0 %v3072_v39  ;;  %1649 = vmatpush1.msra.mxu1 %v3516_v30 }
 0x5be   :  { %1579 = vmatprep.subr.mxu0 %v3517_v11  ;;  %1650 = vmatprep.subr.mxu1 %v3518_v36  ;;  %v3539_v36 = vld [vmem:[#allocation44_spill] sm:$0xff] }
 0x5bf   :  { %1580 = vmatpush1.msra.mxu0 %v3519_v53  ;;  %1651 = vmatpush1.msra.mxu1 %v3520_v59  ;;  %v3538_v53 = vld [vmem:[#allocation46_spill] sm:$0xff] }
 0x5c0   :  { %1581 = vmatprep.subr.mxu0 %v3521_v5  ;;  %1652 = vmatprep.subr.mxu1 %v3522_v6 }
 0x5c1   :  { %1582 = vmatpush1.msra.mxu0 %v3523_v12  ;;  %1653 = vmatpush1.msra.mxu1 %v3524_v10  ;;  %v3534_v10 = vld [vmem:[#allocation7_spill] sm:$0xff] }
 0x5c2   :  { %1583 = vmatprep.subr.mxu0 %v3525_v1  ;;  %1654 = vmatprep.subr.mxu1 %v3526_v4  ;;  %v3535_v1 = vld [vmem:[#allocation9_spill] sm:$0xff] }
 0x5c3   :  { %1584 = vmatpush1.msra.mxu0 %v3527_v14  ;;  %1655 = vmatpush1.msra.mxu1 %v3528_v62  ;;  %v3536_v14 = vld [vmem:[#allocation43_spill] sm:$0xff] }
 0x5c4   :  { %1585 = vmatprep.subr.mxu0 %v3529_v60  ;;  %1656 = vmatprep.subr.mxu1 %v3530_v17  ;;  %v3537_v60 = vld [vmem:[#allocation45_spill] sm:$0xff] }
 0x5c5   :  { %1586 = vmatpush1.msra.mxu0 %v3531_v29  ;;  %1619 = vmatprep.mubr.f32.mxu0 %v3532_v21 }
 0x5c6   :  { %1657 = vmatpush1.msra.mxu1 %v3533_v54  ;;  %1690 = vmatprep.mubr.f32.mxu1 %v3532_v21 }
 0x5c7   :  { %1725 = vmatprep.subr.mxu0 %v3534_v10  ;;  %1796 = vmatprep.subr.mxu1 %v3535_v1 }
 0x666   :  { %v1451_v4 = vpop.f32.mrf.mxu0  ;;  %v1522_v17 = vpop.f32.mrf.mxu1 }
 0x667   :  { %v1527_v12 = vadd.f32 %v1451_v4, %v3536_v14  ;;  %v1529_v21 = vadd.f32 %v1522_v17, %v3539_v36 }
 0x668   :  { %v1453_v62 = vpop.f32.mrf.mxu0  ;;  %v1524_v59 = vpop.f32.mrf.mxu1 }
 0x669   :  { %v1935_v6 = vmul.f32 -1.442695, %v1527_v12  ;;  %v1528_v5 = vadd.f32 %v1453_v62, %v3537_v60  ;;  %v1530_v54 = vadd.f32 %v1524_v59, %v3538_v53 }
 0x66b   :  { %2035 = vpow2.f32 %v1935_v6  ;;  %v1936_v29 = vmul.f32 -1.442695, %v1528_v5  ;;  %v1937_v11 = vmul.f32 -1.442695, %v1530_v54  ;;  %v3562_v54 = vld [vmem:[#allocation51_spill] sm:$0xff] }
 0x66d   :  { %2037 = vpow2.f32 %v1936_v29 }
 0x66e   :  { %2039 = vtanh.f32 %v1529_v21 }
 0x66f   :  { %2041 = vpow2.f32 %v1937_v11 }
 0x678   :  { %v2036_v10 = vpop.eup %2035 }
 0x679   :  { %v1534_v30 = vadd.f32 1.0, %v2036_v10 }
 0x67a   :  { %v2038_v1 = vpop.eup %2037 }
 0x67b   :  { %2043 = vrcp.f32 %v1534_v30  ;;  %v1540_v4 = vadd.f32 1.0, %v2038_v1  ;;  %v2040_v12 = vpop.eup %2039 }
 0x67c   :  { %v2042_v14 = vpop.eup %2041 }
 0x67d   :  { %2045 = vrcp.f32 %v1540_v4  ;;  %v1547_v60 = vadd.f32 1.0, %v2042_v14 }
 0x67f   :  { %2047 = vrcp.f32 %v1547_v60  ;;  %v3564_v60 = vld [vmem:[#allocation54_spill] sm:$0xff] }
 0x688   :  { %v2044_v6 = vpop.eup %2043 }
 0x689   :  { %v1551_v62 = vmul.f32 %v2044_v6, %v2040_v12  ;;  %v3563_v12 = vld [vmem:[#allocation53_spill] sm:$0xff] }
 0x68a   :  { %v2046_v5 = vpop.eup %2045 }
 0x68b   :  { %v1550_v29 = vmul.f32 %v2046_v5, %v3135_v58 }
 0x68c   :  { %v2048_v36 = vpop.eup %2047 }
 0x68d   :  { %v3209_v53 = vadd.f32 %v1551_v62, %v1550_v29 }
 0x68f   :  { %2049 = vtanh.f32 %v3209_v53 }
 0x69c   :  { %v2050_v59 = vpop.eup %2049 }
 0x69d   :  { %v1554_v17 = vmul.f32 %v2050_v59, %v2048_v36 }
 0x69f   :  { %1620 = vmatmul.mubr.f32.vlgmr.msra.gmra.mxu0 %v1554_v17  ;;  %1691 = vmatmul.mubr.f32.vlgmr.msra.gmra.mxu1 %v1554_v17 }
 0x6a0   :  { %1726 = vmatpush1.msra.mxu0 %v2866_v38  ;;  %1797 = vmatpush1.msra.mxu1 %v2869_v42  ;;  %v3540_v38 = vld [vmem:[#allocation6_spill] sm:$0xff]  ;;  %v3541_v42 = vld [vmem:[#allocation27_spill] sm:$0xff] }
 0x6a1   :  { %1727 = vmatprep.subr.mxu0 %v2872_v43  ;;  %1798 = vmatprep.subr.mxu1 %v2875_v7  ;;  %v3542_v43 = vld [vmem:[#allocation29_spill] sm:$0xff]  ;;  %v3543_v7 = vld [vmem:[#allocation30_spill] sm:$0xff] }
 0x6a2   :  { %1728 = vmatpush1.msra.mxu0 %v2878_v44  ;;  %1799 = vmatpush1.msra.mxu1 %v2881_v48  ;;  %v3544_v44 = vld [vmem:[#allocation28_spill] sm:$0xff]  ;;  %v3545_v48 = vld [vmem:[#allocation11_spill] sm:$0xff] }
 0x6a3   :  { %1729 = vmatprep.subr.mxu0 %v2884_v49  ;;  %1800 = vmatprep.subr.mxu1 %v2887_v50  ;;  %v3546_v49 = vld [vmem:[#allocation10_spill] sm:$0xff]  ;;  %v3547_v50 = vld [vmem:[#allocation13_spill] sm:$0xff] }
 0x6a4   :  { %1730 = vmatpush1.msra.mxu0 %v2890_v52  ;;  %1801 = vmatpush1.msra.mxu1 %v2893_v61  ;;  %v3548_v52 = vld [vmem:[#allocation12_spill] sm:$0xff]  ;;  %v3549_v61 = vld [vmem:[#allocation15_spill] sm:$0xff] }
 0x6a5   :  { %1731 = vmatprep.subr.mxu0 %v2896_v18  ;;  %1802 = vmatprep.subr.mxu1 %v2899_v46  ;;  %v3550_v18 = vld [vmem:[#allocation14_spill] sm:$0xff]  ;;  %v3551_v46 = vld [vmem:[#allocation17_spill] sm:$0xff] }
 0x6a6   :  { %1732 = vmatpush1.msra.mxu0 %v2902_v56  ;;  %1803 = vmatpush1.msra.mxu1 %v2905_v51  ;;  %v3552_v56 = vld [vmem:[#allocation16_spill] sm:$0xff]  ;;  %v3553_v51 = vld [vmem:[#allocation19_spill] sm:$0xff] }
 0x6a7   :  { %1733 = vmatprep.subr.mxu0 %v2908_v34  ;;  %1804 = vmatprep.subr.mxu1 %v2911_v63  ;;  %v3554_v34 = vld [vmem:[#allocation18_spill] sm:$0xff]  ;;  %v3555_v63 = vld [vmem:[#allocation21_spill] sm:$0xff] }
 0x6a8   :  { %1734 = vmatpush1.msra.mxu0 %v2914_v26  ;;  %1805 = vmatpush1.msra.mxu1 %v2917_v40  ;;  %v3556_v26 = vmov 0.0   ;;  %v3557_v40 = vld [vmem:[#allocation20_spill] sm:$0xff] }
 0x6a9   :  { %1735 = vmatprep.subr.mxu0 %v2920_v41  ;;  %1806 = vmatprep.subr.mxu1 %v2923_v8  ;;  %v3558_v8 = vld [vmem:[#allocation47_spill] sm:$0xff] }
 0x6aa   :  { %1736 = vmatpush1.msra.mxu0 %v2926_v47  ;;  %1807 = vmatpush1.msra.mxu1 %v2929_v24 }
 0x6ab   :  { %1737 = vmatprep.subr.mxu0 %v3493_v20  ;;  %1808 = vmatprep.subr.mxu1 %v3494_v22  ;;  %v3560_v20 = vld [vmem:[#allocation50_spill] sm:$0xff] }
 0x6ac   :  { %1738 = vmatpush1.msra.mxu0 %v2938_v23  ;;  %1809 = vmatpush1.msra.mxu1 %v2941_v9 }
 0x6ad   :  { %1739 = vmatprep.subr.mxu0 %v2944_v33  ;;  %1810 = vmatprep.subr.mxu1 %v2947_v35 }
 0x6ae   :  { %1740 = vmatpush1.msra.mxu0 %v2950_v55  ;;  %1811 = vmatpush1.msra.mxu1 %v3029_v19  ;;  %v3561_v19 = vld [vmem:[#allocation48_spill] sm:$0xff] }
 0x6af   :  { %1741 = vmatprep.subr.mxu0 %v2954_v25  ;;  %1812 = vmatprep.subr.mxu1 %v3033_v57  ;;  %v3559_v25 = vld [vmem:[#allocation49_spill] sm:$0xff] }
 0x6b0   :  { %1742 = vmatpush1.msra.mxu0 %v3036_v0  ;;  %1813 = vmatpush1.msra.mxu1 %v3039_v2 }
 0x6b1   :  { %1743 = vmatprep.subr.mxu0 %v3042_v3  ;;  %1814 = vmatprep.subr.mxu1 %v3045_v13 }
 0x6b2   :  { %1744 = vmatpush1.msra.mxu0 %v3048_v15  ;;  %1815 = vmatpush1.msra.mxu1 %v3051_v16 }
 0x6b3   :  { %1745 = vmatprep.subr.mxu0 %v3054_v31  ;;  %1816 = vmatprep.subr.mxu1 %v3057_v32 }
 0x6b4   :  { %1746 = vmatpush1.msra.mxu0 %v3060_v27  ;;  %1817 = vmatpush1.msra.mxu1 %v3063_v28 }
 0x6b5   :  { %1747 = vmatprep.subr.mxu0 %v3066_v37  ;;  %1818 = vmatprep.subr.mxu1 %v3069_v45 }
 0x6b6   :  { %1748 = vmatpush1.msra.mxu0 %v3072_v39  ;;  %1819 = vmatpush1.msra.mxu1 %v3540_v38 }
 0x6b7   :  { %1749 = vmatprep.subr.mxu0 %v3541_v42  ;;  %1820 = vmatprep.subr.mxu1 %v3542_v43 }
 0x6b8   :  { %1750 = vmatpush1.msra.mxu0 %v3543_v7  ;;  %1821 = vmatpush1.msra.mxu1 %v3544_v44 }
 0x6b9   :  { %1751 = vmatprep.subr.mxu0 %v3545_v48  ;;  %1822 = vmatprep.subr.mxu1 %v3546_v49 }
 0x6ba   :  { %1752 = vmatpush1.msra.mxu0 %v3547_v50  ;;  %1823 = vmatpush1.msra.mxu1 %v3548_v52 }
 0x6bb   :  { %1753 = vmatprep.subr.mxu0 %v3549_v61  ;;  %1824 = vmatprep.subr.mxu1 %v3550_v18 }
 0x6bc   :  { %1754 = vmatpush1.msra.mxu0 %v3551_v46  ;;  %1825 = vmatpush1.msra.mxu1 %v3552_v56 }
 0x6bd   :  { %1755 = vmatprep.subr.mxu0 %v3553_v51  ;;  %1826 = vmatprep.subr.mxu1 %v3554_v34 }
 0x6be   :  { %1756 = vmatpush1.msra.mxu0 %v3555_v63  ;;  %1789 = vmatprep.mubr.f32.mxu0 %v3556_v26 }
 0x6bf   :  { %1827 = vmatpush1.msra.mxu1 %v3557_v40  ;;  %1860 = vmatprep.mubr.f32.mxu1 %v3556_v26 }
 0x75f   :  { %v1621_v41 = vpop.f32.mrf.mxu0  ;;  %v1692_v9 = vpop.f32.mrf.mxu1 }
 0x760   :  { %v1697_v47 = vadd.f32 %v1621_v41, %v3558_v8  ;;  %v1699_v57 = vadd.f32 %v1692_v9, %v3561_v19 }
 0x761   :  { %v1623_v24 = vpop.f32.mrf.mxu0  ;;  %v1694_v35 = vpop.f32.mrf.mxu1 }
 0x762   :  { %v1938_v55 = vmul.f32 -1.442695, %v1697_v47  ;;  %v1698_v23 = vadd.f32 %v1623_v24, %v3559_v25  ;;  %v1700_v22 = vadd.f32 %v1694_v35, %v3560_v20 }
 0x764   :  { %2051 = vpow2.f32 %v1938_v55  ;;  %v1939_v33 = vmul.f32 -1.442695, %v1698_v23  ;;  %v1940_v0 = vmul.f32 -1.442695, %v1700_v22 }
 0x766   :  { %2053 = vpow2.f32 %v1939_v33 }
 0x767   :  { %2055 = vtanh.f32 %v1699_v57 }
 0x768   :  { %2057 = vpow2.f32 %v1940_v0 }
 0x771   :  { %v2052_v2 = vpop.eup %2051 }
 0x772   :  { %v1704_v3 = vadd.f32 1.0, %v2052_v2 }
 0x773   :  { %v2054_v13 = vpop.eup %2053 }
 0x774   :  { %2059 = vrcp.f32 %v1704_v3  ;;  %v1710_v15 = vadd.f32 1.0, %v2054_v13  ;;  %v2056_v16 = vpop.eup %2055 }
 0x775   :  { %v2058_v31 = vpop.eup %2057 }
 0x776   :  { %2061 = vrcp.f32 %v1710_v15  ;;  %v1717_v37 = vadd.f32 1.0, %v2058_v31 }
 0x778   :  { %2063 = vrcp.f32 %v1717_v37 }
 0x781   :  { %v2060_v32 = vpop.eup %2059 }
 0x782   :  { %v1721_v27 = vmul.f32 %v2060_v32, %v2056_v16 }
 0x783   :  { %v2062_v28 = vpop.eup %2061 }
 0x784   :  { %v1720_v45 = vmul.f32 %v2062_v28, %v3209_v53  ;;  %v3565_v53 = vld [vmem:[#allocation52_spill] sm:$0xff] }
 0x785   :  { %v2064_v58 = vpop.eup %2063 }
 0x786   :  { %v1722_v39 = vadd.f32 %v1721_v27, %v1720_v45 }
 0x788   :  { %2065 = vtanh.f32 %v1722_v39 }
 0x795   :  { %v2066_v30 = vpop.eup %2065 }
 0x796   :  { %v1724_v11 = vmul.f32 %v2066_v30, %v2064_v58 }
 0x798   :  { %1790 = vmatmul.mubr.f32.vlgmr.msra.gmra.mxu0 %v1724_v11  ;;  %1861 = vmatmul.mubr.f32.vlgmr.msra.gmra.mxu1 %v1724_v11 }
 0x858   :  { %v1791_v21 = vpop.f32.mrf.mxu0  ;;  %v1862_v6 = vpop.f32.mrf.mxu1 }
 0x859   :  { %v1867_v10 = vadd.f32 %v1791_v21, %v3562_v54  ;;  %v1869_v36 = vadd.f32 %v1862_v6, %v3565_v53 }
 0x85a   :  { %v1793_v1 = vpop.f32.mrf.mxu0  ;;  %v1864_v5 = vpop.f32.mrf.mxu1 }
 0x85b   :  { %v1941_v4 = vmul.f32 -1.442695, %v1867_v10  ;;  %v1868_v14 = vadd.f32 %v1793_v1, %v3563_v12  ;;  %v1870_v29 = vadd.f32 %v1864_v5, %v3564_v60 }
 0x85d   :  { %2067 = vpow2.f32 %v1941_v4  ;;  %v1942_v62 = vmul.f32 -1.442695, %v1868_v14  ;;  %v1943_v59 = vmul.f32 -1.442695, %v1870_v29 }
 0x85f   :  { %2069 = vpow2.f32 %v1942_v62 }
 0x860   :  { %2071 = vtanh.f32 %v1869_v36 }
 0x861   :  { %2073 = vpow2.f32 %v1943_v59 }
 0x86a   :  { %v2068_v17 = vpop.eup %2067 }
 0x86b   :  { %v1874_v38 = vadd.f32 1.0, %v2068_v17 }
 0x86c   :  { %v2070_v42 = vpop.eup %2069 }
 0x86d   :  { %2075 = vrcp.f32 %v1874_v38  ;;  %v1880_v43 = vadd.f32 1.0, %v2070_v42  ;;  %v2072_v7 = vpop.eup %2071 }
 0x86e   :  { %v2074_v44 = vpop.eup %2073 }
 0x86f   :  { %2077 = vrcp.f32 %v1880_v43  ;;  %v1887_v52 = vadd.f32 1.0, %v2074_v44 }
 0x871   :  { %2079 = vrcp.f32 %v1887_v52 }
 0x87a   :  { %v2076_v48 = vpop.eup %2075 }
 0x87b   :  { %v1891_v49 = vmul.f32 %v2076_v48, %v2072_v7 }
 0x87c   :  { %v2078_v50 = vpop.eup %2077 }
 0x87d   :  { %v1890_v61 = vmul.f32 %v2078_v50, %v1722_v39 }
 0x87e   :  { %v2080_v46 = vpop.eup %2079 }
 0x87f   :  { %v1892_v18 = vadd.f32 %v1891_v49, %v1890_v61 }
 0x881   :  { %2081 = vtanh.f32 %v1892_v18 }
 0x88e   :  { %v2082_v56 = vpop.eup %2081 }
 0x88f   :  { %v1894_v51 = vmul.f32 %v2082_v56, %v2080_v46 }
 0x891   :  { %1895 = vst [vmem:[%s3294_s6] sm:$0xff] %v1894_v51 }
 0x892   :  { %1900 = vsyncpa [#allocation3], 1 }

// kernel: social_conv_lstm_forward.3
= control target key start
LH: loop header
LB: loop body
LE: loop exit
PB: predicated region body
PF: predicated region fallthrough
CT: control target
= control target key end

     0   :  { %vm9301_vm0 = vmmov 0   ;;  %s9302_s24 = smov 16   ;;  %s9305_s19 = smov 64   ;;  %vm4873_vm1 = vcmask 130048   ;;  %vm4875_vm2 = vcmask 261120   ;;  %vm4877_vm3 = vcmask 392192   ;;  %s13606_s4 = inlined_call_operand.vmem [shape: f32[3,3,128,128], index: 4, kind: input, shape index: {}]   ;;  %s13607_s0 = inlined_call_operand.vmem [shape: f32[8,8,8,128], index: 0, kind: input, shape index: {}]   ;;  %s13608_s6 = inlined_call_operand.vmem [shape: f32[3,3,128,16], index: 6, kind: input, shape index: {}]   ;;  %s13609_s5 = inlined_call_operand.vmem [shape: f32[1,128], index: 5, kind: input, shape index: {}]   ;;  %s13610_s2 = inlined_call_operand.vmem [shape: f32[128,32], index: 2, kind: input, shape index: {}]   ;;  %s13611_s1 = inlined_call_operand.vmem [shape: f32[8,128], index: 1, kind: input, shape index: {}]   ;;  %s13612_s8 = inlined_call_operand.vmem [shape: f32[176,512], index: 8, kind: input, shape index: {}]   ;;  %s13613_s7 = inlined_call_operand.vmem [shape: f32[1,16], index: 7, kind: input, shape index: {}]   ;;  %s13614_s3 = inlined_call_operand.vmem [shape: f32[1,32], index: 3, kind: input, shape index: {}]   ;;  %s13615_s9 = inlined_call_operand.vmem [shape: f32[128,512], index: 9, kind: input, shape index: {}]   ;;  %s13616_s10 = inlined_call_operand.vmem [shape: f32[1,512], index: 10, kind: input, shape index: {}]   ;;  %s13617_s11 = inlined_call_operand.vmem [shape: f32[128,128], index: 11, kind: input, shape index: {}]   ;;  %s13618_s12 = inlined_call_operand.vmem [shape: f32[1,128], index: 12, kind: input, shape index: {}]   ;;  %s13619_s13 = inlined_call_operand.vmem [shape: f32[6,8,128], index: 13, kind: output, shape index: {}]  }
   0x1   :  { %v6445_v0 = vld [vmem:[%s13606_s4 + $0xf8] sm:$0xff]  ;;  %v6444_v2 = vld [vmem:[%s13606_s4 + $0xf0] sm:$0xff]  ;;  %v6443_v4 = vld [vmem:[%s13606_s4 + $0xe8] sm:$0xff]  ;;  %s9307_s20 = smov 96   ;;  %vm4879_vm4 = vcmask 523264   ;;  %vm4881_vm5 = vcmask 654336  }
   0x2   :  { %v95_v1 = vld [vmem:[%s13606_s4 + $0x78] sm:$0xff]  ;;  %7762 = vmatprep.subr.mxu0 %v6445_v0  ;;  %v94_v3 = vld [vmem:[%s13606_s4 + $0x70] sm:$0xff]  ;;  %v93_v5 = vld [vmem:[%s13606_s4 + $0x68] sm:$0xff]  ;;  %vm4883_vm6 = vcmask 785408   ;;  %vm4885_vm7 = vcmask 916480  }
   0x3   :  { %7848 = vmatprep.subr.mxu1 %v95_v1  ;;  %7763 = vmatpush3.msra.mxu0 %v6445_v0  ;;  %v6442_v6 = vld [vmem:[%s13606_s4 + $0xe0] sm:$0xff]  ;;  %v6441_v8 = vld [vmem:[%s13606_s4 + $0xd8] sm:$0xff]  ;;  %v6440_v10 = vld [vmem:[%s13606_s4 + $0xd0] sm:$0xff] }
   0x4   :  { %7849 = vmatpush3.msra.mxu1 %v95_v1  ;;  %7764 = vmatprep.subr.mxu0 %v6444_v2  ;;  %v92_v7 = vld [vmem:[%s13606_s4 + $0x60] sm:$0xff]  ;;  %v91_v9 = vld [vmem:[%s13606_s4 + $0x58] sm:$0xff]  ;;  %v90_v11 = vld [vmem:[%s13606_s4 + $0x50] sm:$0xff] }
   0x5   :  { %7850 = vmatprep.subr.mxu1 %v94_v3  ;;  %7765 = vmatpush3.msra.mxu0 %v6444_v2  ;;  %v6439_v12 = vld [vmem:[%s13606_s4 + $0xc8] sm:$0xff]  ;;  %v6438_v14 = vld [vmem:[%s13606_s4 + $0xc0] sm:$0xff]  ;;  %v6437_v16 = vld [vmem:[%s13606_s4 + $0xb8] sm:$0xff] }
   0x6   :  { %7851 = vmatpush3.msra.mxu1 %v94_v3  ;;  %7766 = vmatprep.subr.mxu0 %v6443_v4  ;;  %v89_v13 = vld [vmem:[%s13606_s4 + $0x48] sm:$0xff]  ;;  %v88_v15 = vld [vmem:[%s13606_s4 + $0x40] sm:$0xff]  ;;  %v87_v17 = vld [vmem:[%s13606_s4 + $0x38] sm:$0xff] }
   0x7   :  { %7852 = vmatprep.subr.mxu1 %v93_v5  ;;  %7767 = vmatpush3.msra.mxu0 %v6443_v4  ;;  %v6436_v18 = vld [vmem:[%s13606_s4 + $0xb0] sm:$0xff]  ;;  %v6435_v20 = vld [vmem:[%s13606_s4 + $0xa8] sm:$0xff]  ;;  %v6434_v22 = vld [vmem:[%s13606_s4 + $0xa0] sm:$0xff] }
   0x8   :  { %7853 = vmatpush3.msra.mxu1 %v93_v5  ;;  %7768 = vmatprep.subr.mxu0 %v6442_v6  ;;  %v86_v19 = vld [vmem:[%s13606_s4 + $0x30] sm:$0xff]  ;;  %v85_v21 = vld [vmem:[%s13606_s4 + $0x28] sm:$0xff]  ;;  %v84_v23 = vld [vmem:[%s13606_s4 + $0x20] sm:$0xff] }
   0x9   :  { %7854 = vmatprep.subr.mxu1 %v92_v7  ;;  %7769 = vmatpush3.msra.mxu0 %v6442_v6  ;;  %v6433_v24 = vld [vmem:[%s13606_s4 + $0x98] sm:$0xff]  ;;  %v6432_v26 = vld [vmem:[%s13606_s4 + $0x90] sm:$0xff]  ;;  %v6431_v28 = vld [vmem:[%s13606_s4 + $0x88] sm:$0xff] }
   0xa   :  { %7855 = vmatpush3.msra.mxu1 %v92_v7  ;;  %7770 = vmatprep.subr.mxu0 %v6441_v8  ;;  %v83_v25 = vld [vmem:[%s13606_s4 + $0x18] sm:$0xff]  ;;  %v82_v27 = vld [vmem:[%s13606_s4 + $0x10] sm:$0xff]  ;;  %v81_v29 = vld [vmem:[%s13606_s4 + $0x8] sm:$0xff] }
   0xb   :  { %7856 = vmatprep.subr.mxu1 %v91_v9  ;;  %7771 = vmatpush3.msra.mxu0 %v6441_v8  ;;  %v6430_v30 = vld [vmem:[%s13606_s4 + $0x80] sm:$0xff]  ;;  %v6394_v32 = vld [vmem:[%s13607_s0 + $0x8] sm:$0xff]  ;;  %v9484_v34 = vld [vmem:[%s13607_s0 + $0x10] sm:$0xff] }
   0xc   :  { %7857 = vmatpush3.msra.mxu1 %v91_v9  ;;  %7772 = vmatprep.subr.mxu0 %v6440_v10  ;;  %v80_v31 = vld [vmem:[%s13606_s4] sm:$0xff]  ;;  %v6497_v35 = vld [vmem:[%s13606_s4 + $0x178] sm:$0xff]  ;;  %v6496_v37 = vld [vmem:[%s13606_s4 + $0x170] sm:$0xff] }
   0xd   :  { %7858 = vmatprep.subr.mxu1 %v90_v11  ;;  %7773 = vmatpush3.msra.mxu0 %v6440_v10  ;;  %v44_v33 = vld [vmem:[%s13607_s0] sm:$0xff]  ;;  %v9492_v36 = vld [vmem:[%s13607_s0 + $0x18] sm:$0xff]  ;;  %v9511_v40 = vld [vmem:[%s13607_s0 + $0x28] sm:$0xff] }
   0xe   :  { %7859 = vmatpush3.msra.mxu1 %v90_v11  ;;  %7774 = vmatprep.subr.mxu0 %v6439_v12  ;;  %v6549_v38 = vld [vmem:[%s13606_s4 + $0x1f8] sm:$0xff]  ;;  %v9505_v39 = vld [vmem:[%s13607_s0 + $0x20] sm:$0xff]  ;;  %v6495_v41 = vld [vmem:[%s13606_s4 + $0x168] sm:$0xff] }
   0xf   :  { %7860 = vmatprep.subr.mxu1 %v89_v13  ;;  %7775 = vmatpush3.msra.mxu0 %v6439_v12  ;;  %v9522_v42 = vld [vmem:[%s13607_s0 + $0x30] sm:$0xff]  ;;  %v9528_v43 = vld [vmem:[%s13607_s0 + $0x48] sm:$0xff]  ;;  %v9533_v44 = vld [vmem:[%s13607_s0 + $0x40] sm:$0xff] }
  0x10   :  { %7861 = vmatpush3.msra.mxu1 %v89_v13  ;;  %7776 = vmatprep.subr.mxu0 %v6438_v14  ;;  %v6494_v45 = vld [vmem:[%s13606_s4 + $0x160] sm:$0xff]  ;;  %v6548_v46 = vld [vmem:[%s13606_s4 + $0x1f0] sm:$0xff]  ;;  %v9553_v48 = vld [vmem:[%s13607_s0 + $0x58] sm:$0xff] }
  0x11   :  { %7862 = vmatprep.subr.mxu1 %v88_v15  ;;  %7777 = vmatpush3.msra.mxu0 %v6438_v14  ;;  %v9548_v47 = vld [vmem:[%s13607_s0 + $0x50] sm:$0xff]  ;;  %v6493_v49 = vld [vmem:[%s13606_s4 + $0x158] sm:$0xff]  ;;  %v6547_v50 = vld [vmem:[%s13606_s4 + $0x1e8] sm:$0xff] }
  0x12   :  { %7863 = vmatpush3.msra.mxu1 %v88_v15  ;;  %7778 = vmatprep.subr.mxu0 %v6437_v16  ;;  %v9568_v51 = vld [vmem:[%s13607_s0 + $0x60] sm:$0xff]  ;;  %v9573_v52 = vld [vmem:[%s13607_s0 + $0x68] sm:$0xff]  ;;  %v6492_v53 = vld [vmem:[%s13606_s4 + $0x150] sm:$0xff] }
  0x13   :  { %7864 = vmatprep.subr.mxu1 %v87_v17  ;;  %7779 = vmatpush3.msra.mxu0 %v6437_v16  ;;  %v6546_v54 = vld [vmem:[%s13606_s4 + $0x1e0] sm:$0xff]  ;;  %v9588_v55 = vld [vmem:[%s13607_s0 + $0x70] sm:$0xff]  ;;  %v9593_v56 = vld [vmem:[%s13607_s0 + $0x88] sm:$0xff] }
  0x14   :  { %7865 = vmatpush3.msra.mxu1 %v87_v17  ;;  %7780 = vmatprep.subr.mxu0 %v6436_v18  ;;  %v9598_v57 = vld [vmem:[%s13607_s0 + $0x80] sm:$0xff]  ;;  %v6491_v58 = vld [vmem:[%s13606_s4 + $0x148] sm:$0xff]  ;;  %v6545_v59 = vld [vmem:[%s13606_s4 + $0x1d8] sm:$0xff] }
  0x15   :  { %7866 = vmatprep.subr.mxu1 %v86_v19  ;;  %7781 = vmatpush3.msra.mxu0 %v6436_v18  ;;  %v9613_v60 = vld [vmem:[%s13607_s0 + $0x90] sm:$0xff]  ;;  %v9618_v61 = vld [vmem:[%s13607_s0 + $0x98] sm:$0xff]  ;;  %v6490_v62 = vld [vmem:[%s13606_s4 + $0x140] sm:$0xff] }
  0x16   :  { %7867 = vmatpush3.msra.mxu1 %v86_v19  ;;  %7782 = vmatprep.subr.mxu0 %v6435_v20  ;;  %v6544_v63 = vld [vmem:[%s13606_s4 + $0x1d0] sm:$0xff]  ;;  %v9633_v0 = vld [vmem:[%s13607_s0 + $0xa0] sm:$0xff]  ;;  %v9638_v1 = vld [vmem:[%s13607_s0 + $0xa8] sm:$0xff] }
  0x17   :  { %7868 = vmatprep.subr.mxu1 %v85_v21  ;;  %7783 = vmatpush3.msra.mxu0 %v6435_v20  ;;  %v6489_v2 = vld [vmem:[%s13606_s4 + $0x138] sm:$0xff]  ;;  %v6543_v3 = vld [vmem:[%s13606_s4 + $0x1c8] sm:$0xff]  ;;  %v9653_v4 = vld [vmem:[%s13607_s0 + $0xb0] sm:$0xff] }
  0x18   :  { %7869 = vmatpush3.msra.mxu1 %v85_v21  ;;  %7784 = vmatprep.subr.mxu0 %v6434_v22  ;;  %v9658_v5 = vld [vmem:[%s13607_s0 + $0xc8] sm:$0xff]  ;;  %v9663_v6 = vld [vmem:[%s13607_s0 + $0xc0] sm:$0xff]  ;;  %v6488_v7 = vld [vmem:[%s13606_s4 + $0x130] sm:$0xff] }
  0x19   :  { %7870 = vmatprep.subr.mxu1 %v84_v23  ;;  %7785 = vmatpush3.msra.mxu0 %v6434_v22  ;;  %v6542_v8 = vld [vmem:[%s13606_s4 + $0x1c0] sm:$0xff]  ;;  %v9678_v9 = vld [vmem:[%s13607_s0 + $0xd0] sm:$0xff]  ;;  %v9683_v10 = vld [vmem:[%s13607_s0 + $0xd8] sm:$0xff] }
  0x1a   :  { %7871 = vmatpush3.msra.mxu1 %v84_v23  ;;  %7786 = vmatprep.subr.mxu0 %v6433_v24  ;;  %v6487_v11 = vld [vmem:[%s13606_s4 + $0x128] sm:$0xff]  ;;  %v6541_v12 = vld [vmem:[%s13606_s4 + $0x1b8] sm:$0xff]  ;;  %v9698_v13 = vld [vmem:[%s13607_s0 + $0xe0] sm:$0xff] }
  0x1b   :  { %7872 = vmatprep.subr.mxu1 %v83_v25  ;;  %7787 = vmatpush3.msra.mxu0 %v6433_v24  ;;  %v9703_v14 = vld [vmem:[%s13607_s0 + $0xe8] sm:$0xff]  ;;  %v6486_v15 = vld [vmem:[%s13606_s4 + $0x120] sm:$0xff]  ;;  %v6540_v16 = vld [vmem:[%s13606_s4 + $0x1b0] sm:$0xff] }
  0x1c   :  { %7873 = vmatpush3.msra.mxu1 %v83_v25  ;;  %7788 = vmatprep.subr.mxu0 %v6432_v26  ;;  %v9718_v17 = vld [vmem:[%s13607_s0 + $0xf0] sm:$0xff]  ;;  %v9723_v18 = vld [vmem:[%s13607_s0 + $0x108] sm:$0xff]  ;;  %v9728_v19 = vld [vmem:[%s13607_s0 + $0x100] sm:$0xff] }
  0x1d   :  { %7874 = vmatprep.subr.mxu1 %v82_v27  ;;  %7789 = vmatpush3.msra.mxu0 %v6432_v26  ;;  %v6485_v20 = vld [vmem:[%s13606_s4 + $0x118] sm:$0xff]  ;;  %v6539_v21 = vld [vmem:[%s13606_s4 + $0x1a8] sm:$0xff]  ;;  %v9743_v22 = vld [vmem:[%s13607_s0 + $0x110] sm:$0xff] }
  0x1e   :  { %7875 = vmatpush3.msra.mxu1 %v82_v27  ;;  %7790 = vmatprep.subr.mxu0 %v6431_v28  ;;  %v9748_v23 = vld [vmem:[%s13607_s0 + $0x118] sm:$0xff]  ;;  %v6484_v24 = vld [vmem:[%s13606_s4 + $0x110] sm:$0xff]  ;;  %v6538_v25 = vld [vmem:[%s13606_s4 + $0x1a0] sm:$0xff] }
  0x1f   :  { %7876 = vmatprep.subr.mxu1 %v81_v29  ;;  %7791 = vmatpush3.msra.mxu0 %v6431_v28  ;;  %v9763_v26 = vld [vmem:[%s13607_s0 + $0x120] sm:$0xff]  ;;  %v9768_v27 = vld [vmem:[%s13607_s0 + $0x128] sm:$0xff] }
  0x20   :  { %7877 = vmatpush3.msra.mxu1 %v81_v29  ;;  %7792 = vmatprep.subr.mxu0 %v6430_v30  ;;  %v6483_v28 = vld [vmem:[%s13606_s4 + $0x108] sm:$0xff]  ;;  %v6537_v29 = vld [vmem:[%s13606_s4 + $0x198] sm:$0xff] }
  0x21   :  { %7878 = vmatprep.subr.mxu1 %v80_v31  ;;  %7793 = vmatpush3.msra.mxu0 %v6430_v30  ;;  %v9783_v30 = vld [vmem:[%s13607_s0 + $0x130] sm:$0xff] }
  0x22   :  { %7794 = vmatprep.mubr.f32.mxu0 %v6394_v32  ;;  %7879 = vmatpush3.msra.mxu1 %v80_v31  ;;  %v9788_v31 = vld [vmem:[%s13607_s0 + $0x148] sm:$0xff] }
  0x23   :  { %7880 = vmatprep.mubr.f32.mxu1 %v44_v33  ;;  %7795 = vmatmul.mubr.f32.vlgmr.msra.gmra.mxu0 %v9484_v34  ;;  %v6482_v33 = vld [vmem:[%s13606_s4 + $0x100] sm:$0xff] }
  0x24   :  { %7881 = vmatmul.mubr.f32.vlgmr.msra.gmra.mxu1 %v6394_v32  ;;  %7934 = vmatprep.subr.mxu0 %v6497_v35  ;;  %v9793_v32 = vld [vmem:[%s13607_s0 + $0x140] sm:$0xff] }
  0x25   :  { %7797 = vmatprep.mubr.f32.mxu0 %v9492_v36  ;;  %7935 = vmatpush3.msra.mxu0 %v6497_v35  ;;  %v6536_v35 = vld [vmem:[%s13606_s4 + $0x190] sm:$0xff] }
  0x26   :  { %7883 = vmatprep.mubr.f32.mxu1 %v9484_v34  ;;  %7936 = vmatprep.subr.mxu0 %v6496_v37 }
  0x27   :  { %8020 = vmatprep.subr.mxu1 %v6549_v38  ;;  %7798 = vmatmul.mubr.f32.gmra.mxu0 %v9505_v39 }
  0x28   :  { %7884 = vmatmul.mubr.f32.gmra.mxu1 %v9492_v36  ;;  %7937 = vmatpush3.msra.mxu0 %v6496_v37  ;;  %v9808_v37 = vld [vmem:[%s13607_s0 + $0x150] sm:$0xff] }
  0x29   :  { %7800 = vmatprep.mubr.f32.mxu0 %v9511_v40  ;;  %7886 = vmatprep.mubr.f32.mxu1 %v9505_v39 }
  0x2a   :  { %7938 = vmatprep.subr.mxu0 %v6495_v41  ;;  %8021 = vmatpush3.msra.mxu1 %v6549_v38  ;;  %v9813_v38 = vld [vmem:[%s13607_s0 + $0x158] sm:$0xff] }
  0x2b   :  { %7939 = vmatpush3.msra.mxu0 %v6495_v41  ;;  %8022 = vmatprep.subr.mxu1 %v6548_v46  ;;  %v6535_v41 = vld [vmem:[%s13606_s4 + $0x188] sm:$0xff] }
  0x2c   :  { %7801 = vmatmul.mubr.f32.gmra.mxu0 %v9522_v42  ;;  %7887 = vmatmul.mubr.f32.gmra.mxu1 %v9511_v40 }
  0x2d   :  { %7803 = vmatprep.mubr.f32.mxu0 %v9528_v43  ;;  %7889 = vmatprep.mubr.f32.mxu1 %v9533_v44 }
  0x2e   :  { %7940 = vmatprep.subr.mxu0 %v6494_v45  ;;  %8023 = vmatpush3.msra.mxu1 %v6548_v46  ;;  %v9828_v46 = vld [vmem:[%s13607_s0 + $0x160] sm:$0xff] }
  0x2f   :  { %7941 = vmatpush3.msra.mxu0 %v6494_v45  ;;  %8024 = vmatprep.subr.mxu1 %v6547_v50  ;;  %v6601_v45 = vld [vmem:[%s13606_s4 + $0x278] sm:$0xff] }
  0x30   :  { %7804 = vmatmul.mubr.f32.gmra.mxu0 %v9548_v47  ;;  %7890 = vmatmul.mubr.f32.gmra.mxu1 %v9528_v43 }
  0x31   :  { %7806 = vmatprep.mubr.f32.mxu0 %v9553_v48  ;;  %7892 = vmatprep.mubr.f32.mxu1 %v9548_v47 }
  0x32   :  { %7942 = vmatprep.subr.mxu0 %v6493_v49  ;;  %8025 = vmatpush3.msra.mxu1 %v6547_v50  ;;  %v6534_v50 = vld [vmem:[%s13606_s4 + $0x180] sm:$0xff] }
  0x33   :  { %7943 = vmatpush3.msra.mxu0 %v6493_v49  ;;  %8026 = vmatprep.subr.mxu1 %v6546_v54  ;;  %v9833_v49 = vld [vmem:[%s13607_s0 + $0x168] sm:$0xff] }
  0x34   :  { %7807 = vmatmul.mubr.f32.gmra.mxu0 %v9568_v51  ;;  %7893 = vmatmul.mubr.f32.gmra.mxu1 %v9553_v48 }
  0x35   :  { %7809 = vmatprep.mubr.f32.mxu0 %v9573_v52  ;;  %7895 = vmatprep.mubr.f32.mxu1 %v9568_v51 }
  0x36   :  { %7944 = vmatprep.subr.mxu0 %v6492_v53  ;;  %8027 = vmatpush3.msra.mxu1 %v6546_v54  ;;  %v6653_v54 = vld [vmem:[%s13606_s4 + $0x2f8] sm:$0xff] }
  0x37   :  { %7945 = vmatpush3.msra.mxu0 %v6492_v53  ;;  %8028 = vmatprep.subr.mxu1 %v6545_v59  ;;  %v9845_v53 = vld [vmem:[%s13607_s0 + $0x170] sm:$0xff] }
  0x38   :  { %7810 = vmatmul.mubr.f32.gmra.mxu0 %v9588_v55  ;;  %7896 = vmatmul.mubr.f32.gmra.mxu1 %v9573_v52 }
  0x39   :  { %7812 = vmatprep.mubr.f32.mxu0 %v9593_v56  ;;  %7898 = vmatprep.mubr.f32.mxu1 %v9598_v57 }
  0x3a   :  { %7946 = vmatprep.subr.mxu0 %v6491_v58  ;;  %8029 = vmatpush3.msra.mxu1 %v6545_v59  ;;  %v6650_v59 = vld [vmem:[%s13606_s4 + $0x2e0] sm:$0xff] }
  0x3b   :  { %7947 = vmatpush3.msra.mxu0 %v6491_v58  ;;  %8030 = vmatprep.subr.mxu1 %v6544_v63  ;;  %v6600_v58 = vld [vmem:[%s13606_s4 + $0x270] sm:$0xff] }
  0x3c   :  { %7813 = vmatmul.mubr.f32.gmra.mxu0 %v9613_v60  ;;  %7899 = vmatmul.mubr.f32.gmra.mxu1 %v9593_v56 }
  0x3d   :  { %7815 = vmatprep.mubr.f32.mxu0 %v9618_v61  ;;  %7901 = vmatprep.mubr.f32.mxu1 %v9613_v60 }
  0x3e   :  { %7948 = vmatprep.subr.mxu0 %v6490_v62  ;;  %8031 = vmatpush3.msra.mxu1 %v6544_v63  ;;  %v9905_v63 = vld [vmem:[%s13607_s0 + $0x78] sm:$0xff] }
  0x3f   :  { %7949 = vmatpush3.msra.mxu0 %v6490_v62  ;;  %8032 = vmatprep.subr.mxu1 %v6543_v3  ;;  %v6649_v62 = vld [vmem:[%s13606_s4 + $0x2d8] sm:$0xff] }
  0x40   :  { %7816 = vmatmul.mubr.f32.gmra.mxu0 %v9633_v0  ;;  %7902 = vmatmul.mubr.f32.gmra.mxu1 %v9618_v61 }
  0x41   :  { %7818 = vmatprep.mubr.f32.mxu0 %v9638_v1  ;;  %7904 = vmatprep.mubr.f32.mxu1 %v9633_v0 }
  0x42   :  { %7950 = vmatprep.subr.mxu0 %v6489_v2  ;;  %8033 = vmatpush3.msra.mxu1 %v6543_v3  ;;  %v6648_v3 = vld [vmem:[%s13606_s4 + $0x2d0] sm:$0xff] }
  0x43   :  { %7951 = vmatpush3.msra.mxu0 %v6489_v2  ;;  %8034 = vmatprep.subr.mxu1 %v6542_v8  ;;  %v6595_v2 = vld [vmem:[%s13606_s4 + $0x248] sm:$0xff] }
  0x44   :  { %7819 = vmatmul.mubr.f32.gmra.mxu0 %v9653_v4  ;;  %7905 = vmatmul.mubr.f32.gmra.mxu1 %v9638_v1 }
  0x45   :  { %7821 = vmatprep.mubr.f32.mxu0 %v9658_v5  ;;  %7907 = vmatprep.mubr.f32.mxu1 %v9663_v6 }
  0x46   :  { %7952 = vmatprep.subr.mxu0 %v6488_v7  ;;  %8035 = vmatpush3.msra.mxu1 %v6542_v8  ;;  %v6647_v8 = vld [vmem:[%s13606_s4 + $0x2c8] sm:$0xff] }
  0x47   :  { %7953 = vmatpush3.msra.mxu0 %v6488_v7  ;;  %8036 = vmatprep.subr.mxu1 %v6541_v12  ;;  %v6594_v7 = vld [vmem:[%s13606_s4 + $0x240] sm:$0xff] }
  0x48   :  { %7822 = vmatmul.mubr.f32.gmra.mxu0 %v9678_v9  ;;  %7908 = vmatmul.mubr.f32.gmra.mxu1 %v9658_v5 }
  0x49   :  { %7824 = vmatprep.mubr.f32.mxu0 %v9683_v10  ;;  %7910 = vmatprep.mubr.f32.mxu1 %v9678_v9 }
  0x4a   :  { %7954 = vmatprep.subr.mxu0 %v6487_v11  ;;  %8037 = vmatpush3.msra.mxu1 %v6541_v12  ;;  %v9940_v12 = vld [vmem:[%s13607_s0 + $0xb8] sm:$0xff] }
  0x4b   :  { %7955 = vmatpush3.msra.mxu0 %v6487_v11  ;;  %8038 = vmatprep.subr.mxu1 %v6540_v16  ;;  %v6646_v11 = vld [vmem:[%s13606_s4 + $0x2c0] sm:$0xff] }
  0x4c   :  { %7825 = vmatmul.mubr.f32.gmra.mxu0 %v9698_v13  ;;  %7911 = vmatmul.mubr.f32.gmra.mxu1 %v9683_v10 }
  0x4d   :  { %7827 = vmatprep.mubr.f32.mxu0 %v9703_v14  ;;  %7913 = vmatprep.mubr.f32.mxu1 %v9698_v13 }
  0x4e   :  { %7956 = vmatprep.subr.mxu0 %v6486_v15  ;;  %8039 = vmatpush3.msra.mxu1 %v6540_v16  ;;  %v6645_v16 = vld [vmem:[%s13606_s4 + $0x2b8] sm:$0xff] }
  0x4f   :  { %7957 = vmatpush3.msra.mxu0 %v6486_v15  ;;  %8040 = vmatprep.subr.mxu1 %v6539_v21  ;;  %v6592_v15 = vld [vmem:[%s13606_s4 + $0x230] sm:$0xff] }
  0x50   :  { %7828 = vmatmul.mubr.f32.gmra.mxu0 %v9718_v17  ;;  %7914 = vmatmul.mubr.f32.gmra.mxu1 %v9703_v14 }
  0x51   :  { %7830 = vmatprep.mubr.f32.mxu0 %v9723_v18  ;;  %7916 = vmatprep.mubr.f32.mxu1 %v9728_v19 }
  0x52   :  { %7958 = vmatprep.subr.mxu0 %v6485_v20  ;;  %8041 = vmatpush3.msra.mxu1 %v6539_v21  ;;  %v6644_v21 = vld [vmem:[%s13606_s4 + $0x2b0] sm:$0xff] }
  0x53   :  { %7959 = vmatpush3.msra.mxu0 %v6485_v20  ;;  %8042 = vmatprep.subr.mxu1 %v6538_v25  ;;  %v6591_v20 = vld [vmem:[%s13606_s4 + $0x228] sm:$0xff] }
  0x54   :  { %7831 = vmatmul.mubr.f32.gmra.mxu0 %v9743_v22  ;;  %7917 = vmatmul.mubr.f32.gmra.mxu1 %v9723_v18 }
  0x55   :  { %7833 = vmatprep.mubr.f32.mxu0 %v9748_v23  ;;  %7919 = vmatprep.mubr.f32.mxu1 %v9743_v22 }
  0x56   :  { %7960 = vmatprep.subr.mxu0 %v6484_v24  ;;  %8043 = vmatpush3.msra.mxu1 %v6538_v25  ;;  %v9975_v25 = vld [vmem:[%s13607_s0 + $0xf8] sm:$0xff] }
  0x57   :  { %7961 = vmatpush3.msra.mxu0 %v6484_v24  ;;  %8044 = vmatprep.subr.mxu1 %v6537_v29  ;;  %v6643_v24 = vld [vmem:[%s13606_s4 + $0x2a8] sm:$0xff] }
  0x58   :  { %7834 = vmatmul.mubr.f32.gmra.mxu0 %v9763_v26  ;;  %7920 = vmatmul.mubr.f32.gmra.mxu1 %v9748_v23 }
  0x59   :  { %7836 = vmatprep.mubr.f32.mxu0 %v9768_v27  ;;  %7922 = vmatprep.mubr.f32.mxu1 %v9763_v26 }
  0x5a   :  { %7962 = vmatprep.subr.mxu0 %v6483_v28  ;;  %8045 = vmatpush3.msra.mxu1 %v6537_v29  ;;  %v6642_v29 = vld [vmem:[%s13606_s4 + $0x2a0] sm:$0xff] }
  0x5b   :  { %7963 = vmatpush3.msra.mxu0 %v6483_v28  ;;  %8046 = vmatprep.subr.mxu1 %v6536_v35  ;;  %v6589_v28 = vld [vmem:[%s13606_s4 + $0x218] sm:$0xff] }
  0x5c   :  { %7837 = vmatmul.mubr.f32.gmra.mxu0 %v9783_v30  ;;  %7923 = vmatmul.mubr.f32.gmra.mxu1 %v9768_v27 }
  0x5d   :  { %7839 = vmatprep.mubr.f32.mxu0 %v9788_v31  ;;  %7925 = vmatprep.mubr.f32.mxu1 %v9793_v32 }
  0x5e   :  { %7964 = vmatprep.subr.mxu0 %v6482_v33  ;;  %8047 = vmatpush3.msra.mxu1 %v6536_v35  ;;  %v6641_v35 = vld [vmem:[%s13606_s4 + $0x298] sm:$0xff] }
  0x5f   :  { %7965 = vmatpush3.msra.mxu0 %v6482_v33  ;;  %8048 = vmatprep.subr.mxu1 %v6535_v41  ;;  %v6588_v33 = vld [vmem:[%s13606_s4 + $0x210] sm:$0xff] }
  0x60   :  { %7840 = vmatmul.mubr.f32.gmra.mxu0 %v9808_v37  ;;  %7926 = vmatmul.mubr.f32.gmra.mxu1 %v9788_v31 }
  0x61   :  { %7842 = vmatprep.mubr.f32.mxu0 %v9813_v38  ;;  %7928 = vmatprep.mubr.f32.mxu1 %v9808_v37 }
  0x62   :  { %8106 = vmatprep.subr.mxu0 %v6601_v45  ;;  %8049 = vmatpush3.msra.mxu1 %v6535_v41  ;;  %v6640_v41 = vld [vmem:[%s13606_s4 + $0x290] sm:$0xff] }
  0x63   :  { %8050 = vmatprep.subr.mxu1 %v6534_v50 }
  0x64   :  { %7843 = vmatmul.mubr.f32.gmra.mxu0 %v9828_v46  ;;  %7929 = vmatmul.mubr.f32.gmra.mxu1 %v9813_v38 }
  0x65   :  { %7845 = vmatprep.mubr.f32.mxu0 %v9833_v49  ;;  %7931 = vmatprep.mubr.f32.mxu1 %v9828_v46 }
  0x66   :  { %8051 = vmatpush3.msra.mxu1 %v6534_v50  ;;  %v6528_v50 = vld [vmem:[%s13607_s0 + $0x180] sm:$0xff] }
  0x67   :  { %8192 = vmatprep.subr.mxu1 %v6653_v54 }
  0x68   :  { %7846 = vmatmul.mubr.f32.gmra.mxu0 %v9845_v53  ;;  %7932 = vmatmul.mubr.f32.gmra.mxu1 %v9833_v49 }
  0x69   :  { %7966 = vmatprep.mubr.f32.mxu0 %v9484_v34  ;;  %8052 = vmatprep.mubr.f32.mxu1 %v9533_v44  ;;  %v6599_v34 = vld [vmem:[%s13606_s4 + $0x268] sm:$0xff]  ;;  %v6652_v44 = vld [vmem:[%s13606_s4 + $0x2f0] sm:$0xff] }
  0x6c   :  { %7967 = vmatmul.mubr.f32.vlgmr.msra.gmra.mxu0 %v9492_v36  ;;  %8053 = vmatmul.mubr.f32.vlgmr.msra.gmra.mxu1 %v9528_v43  ;;  %v6451_v36 = vld [vmem:[%s13607_s0 + $0x38] sm:$0xff] }
  0x6d   :  { %8107 = vmatpush3.msra.mxu0 %v6601_v45  ;;  %7969 = vmatprep.mubr.f32.mxu0 %v9505_v39  ;;  %v6598_v39 = vld [vmem:[%s13606_s4 + $0x260] sm:$0xff]  ;;  %v10010_v45 = vld [vmem:[%s13607_s0 + $0x138] sm:$0xff] }
  0x6e   :  { %8055 = vmatprep.mubr.f32.mxu1 %v9548_v47  ;;  %8108 = vmatprep.subr.mxu0 %v6600_v58 }
  0x6f   :  { %8109 = vmatpush3.msra.mxu0 %v6600_v58  ;;  %8193 = vmatpush3.msra.mxu1 %v6653_v54  ;;  %v6586_v54 = vld [vmem:[%s13606_s4 + $0x200] sm:$0xff]  ;;  %v6639_v58 = vld [vmem:[%s13606_s4 + $0x288] sm:$0xff] }
  0x70   :  { %7970 = vmatmul.mubr.f32.gmra.mxu0 %v9511_v40  ;;  %8056 = vmatmul.mubr.f32.gmra.mxu1 %v9553_v48  ;;  %v6651_v40 = vld [vmem:[%s13606_s4 + $0x2e8] sm:$0xff] }
  0x71   :  { %7972 = vmatprep.mubr.f32.mxu0 %v9522_v42  ;;  %8058 = vmatprep.mubr.f32.mxu1 %v9568_v51  ;;  %v6597_v42 = vld [vmem:[%s13606_s4 + $0x258] sm:$0xff] }
  0x72   :  { %8110 = vmatprep.subr.mxu0 %v6599_v34  ;;  %8194 = vmatprep.subr.mxu1 %v6652_v44 }
  0x73   :  { %8111 = vmatpush3.msra.mxu0 %v6599_v34  ;;  %8195 = vmatpush3.msra.mxu1 %v6652_v44  ;;  %v10028_v34 = vld [vmem:[%s13607_s0 + $0x188] sm:$0xff]  ;;  %v10033_v44 = vld [vmem:[%s13607_s0 + $0x190] sm:$0xff] }
  0x74   :  { %7973 = vmatmul.mubr.f32.gmra.mxu0 %v6451_v36  ;;  %8059 = vmatmul.mubr.f32.gmra.mxu1 %v9573_v52  ;;  %v6638_v36 = vld [vmem:[%s13606_s4 + $0x280] sm:$0xff] }
  0x75   :  { %7975 = vmatprep.mubr.f32.mxu0 %v9548_v47  ;;  %8061 = vmatprep.mubr.f32.mxu1 %v9598_v57  ;;  %v6596_v57 = vld [vmem:[%s13606_s4 + $0x250] sm:$0xff] }
  0x76   :  { %8112 = vmatprep.subr.mxu0 %v6598_v39  ;;  %8196 = vmatprep.subr.mxu1 %v6651_v40 }
  0x77   :  { %8113 = vmatpush3.msra.mxu0 %v6598_v39  ;;  %8197 = vmatpush3.msra.mxu1 %v6651_v40  ;;  %v6705_v39 = vld [vmem:[%s13606_s4 + $0x378] sm:$0xff] }
  0x78   :  { %7976 = vmatmul.mubr.f32.gmra.mxu0 %v9553_v48  ;;  %8062 = vmatmul.mubr.f32.gmra.mxu1 %v9593_v56  ;;  %v10048_v40 = vld [vmem:[%s13607_s0 + $0x198] sm:$0xff] }
  0x79   :  { %7978 = vmatprep.mubr.f32.mxu0 %v9568_v51  ;;  %8064 = vmatprep.mubr.f32.mxu1 %v9613_v60 }
  0x7a   :  { %8114 = vmatprep.subr.mxu0 %v6597_v42  ;;  %8198 = vmatprep.subr.mxu1 %v6650_v59 }
  0x7b   :  { %8115 = vmatpush3.msra.mxu0 %v6597_v42  ;;  %8199 = vmatpush3.msra.mxu1 %v6650_v59  ;;  %v10053_v42 = vld [vmem:[%s13607_s0 + $0x1a0] sm:$0xff]  ;;  %v6757_v59 = vld [vmem:[%s13606_s4 + $0x3f8] sm:$0xff] }
  0x7c   :  { %7979 = vmatmul.mubr.f32.gmra.mxu0 %v9573_v52  ;;  %8065 = vmatmul.mubr.f32.gmra.mxu1 %v9618_v61 }
  0x7d   :  { %7981 = vmatprep.mubr.f32.mxu0 %v9588_v55  ;;  %8067 = vmatprep.mubr.f32.mxu1 %v9633_v0 }
  0x7e   :  { %8116 = vmatprep.subr.mxu0 %v6596_v57  ;;  %8200 = vmatprep.subr.mxu1 %v6649_v62 }
  0x7f   :  { %8117 = vmatpush3.msra.mxu0 %v6596_v57  ;;  %8201 = vmatpush3.msra.mxu1 %v6649_v62  ;;  %v10064_v57 = vld [vmem:[%s13607_s0 + $0x178] sm:$0xff]  ;;  %v10070_v62 = vld [vmem:[%s13607_s0 + $0x1a8] sm:$0xff] }
  0x80   :  { %7982 = vmatmul.mubr.f32.gmra.mxu0 %v9905_v63  ;;  %8068 = vmatmul.mubr.f32.gmra.mxu1 %v9638_v1 }
  0x81   :  { %7984 = vmatprep.mubr.f32.mxu0 %v9613_v60  ;;  %8070 = vmatprep.mubr.f32.mxu1 %v9663_v6  ;;  %v6593_v6 = vld [vmem:[%s13606_s4 + $0x238] sm:$0xff] }
  0x82   :  { %8118 = vmatprep.subr.mxu0 %v6595_v2  ;;  %8202 = vmatprep.subr.mxu1 %v6648_v3 }
  0x83   :  { %8119 = vmatpush3.msra.mxu0 %v6595_v2  ;;  %8203 = vmatpush3.msra.mxu1 %v6648_v3  ;;  %v6704_v2 = vld [vmem:[%s13606_s4 + $0x370] sm:$0xff] }
  0x84   :  { %7985 = vmatmul.mubr.f32.gmra.mxu0 %v9618_v61  ;;  %8071 = vmatmul.mubr.f32.gmra.mxu1 %v9658_v5  ;;  %v6756_v3 = vld [vmem:[%s13606_s4 + $0x3f0] sm:$0xff] }
  0x85   :  { %7987 = vmatprep.mubr.f32.mxu0 %v9633_v0  ;;  %8073 = vmatprep.mubr.f32.mxu1 %v9678_v9 }
  0x86   :  { %8120 = vmatprep.subr.mxu0 %v6594_v7  ;;  %8204 = vmatprep.subr.mxu1 %v6647_v8 }
  0x87   :  { %8121 = vmatpush3.msra.mxu0 %v6594_v7  ;;  %8205 = vmatpush3.msra.mxu1 %v6647_v8 }
  0x88   :  { %7988 = vmatmul.mubr.f32.gmra.mxu0 %v9638_v1  ;;  %8074 = vmatmul.mubr.f32.gmra.mxu1 %v9683_v10 }
  0x89   :  { %7990 = vmatprep.mubr.f32.mxu0 %v9653_v4  ;;  %8076 = vmatprep.mubr.f32.mxu1 %v9698_v13 }
  0x8a   :  { %8122 = vmatprep.subr.mxu0 %v6593_v6  ;;  %8206 = vmatprep.subr.mxu1 %v6646_v11 }
  0x8b   :  { %8123 = vmatpush3.msra.mxu0 %v6593_v6  ;;  %8207 = vmatpush3.msra.mxu1 %v6646_v11  ;;  %v6691_v11 = vld [vmem:[%s13606_s4 + $0x308] sm:$0xff] }
  0x8c   :  { %7991 = vmatmul.mubr.f32.gmra.mxu0 %v9940_v12  ;;  %8077 = vmatmul.mubr.f32.gmra.mxu1 %v9703_v14 }
  0x8d   :  { %7993 = vmatprep.mubr.f32.mxu0 %v9678_v9  ;;  %8079 = vmatprep.mubr.f32.mxu1 %v9728_v19  ;;  %v6590_v19 = vld [vmem:[%s13606_s4 + $0x220] sm:$0xff] }
  0x8e   :  { %8124 = vmatprep.subr.mxu0 %v6592_v15  ;;  %8208 = vmatprep.subr.mxu1 %v6645_v16 }
  0x8f   :  { %8125 = vmatpush3.msra.mxu0 %v6592_v15  ;;  %8209 = vmatpush3.msra.mxu1 %v6645_v16 }
  0x90   :  { %7994 = vmatmul.mubr.f32.gmra.mxu0 %v9683_v10  ;;  %8080 = vmatmul.mubr.f32.gmra.mxu1 %v9723_v18 }
  0x91   :  { %7996 = vmatprep.mubr.f32.mxu0 %v9698_v13  ;;  %8082 = vmatprep.mubr.f32.mxu1 %v9743_v22 }
  0x92   :  { %8126 = vmatprep.subr.mxu0 %v6591_v20  ;;  %8210 = vmatprep.subr.mxu1 %v6644_v21 }
  0x93   :  { %8127 = vmatpush3.msra.mxu0 %v6591_v20  ;;  %8211 = vmatpush3.msra.mxu1 %v6644_v21 }
  0x94   :  { %7997 = vmatmul.mubr.f32.gmra.mxu0 %v9703_v14  ;;  %8083 = vmatmul.mubr.f32.gmra.mxu1 %v9748_v23 }
  0x95   :  { %7999 = vmatprep.mubr.f32.mxu0 %v9718_v17  ;;  %8085 = vmatprep.mubr.f32.mxu1 %v9763_v26 }
  0x96   :  { %8128 = vmatprep.subr.mxu0 %v6590_v19  ;;  %8212 = vmatprep.subr.mxu1 %v6643_v24 }
  0x97   :  { %8129 = vmatpush3.msra.mxu0 %v6590_v19  ;;  %8213 = vmatpush3.msra.mxu1 %v6643_v24  ;;  %v6690_v19 = vld [vmem:[%s13606_s4 + $0x300] sm:$0xff] }
  0x98   :  { %8000 = vmatmul.mubr.f32.gmra.mxu0 %v9975_v25  ;;  %8086 = vmatmul.mubr.f32.gmra.mxu1 %v9768_v27 }
  0x99   :  { %8002 = vmatprep.mubr.f32.mxu0 %v9743_v22  ;;  %8088 = vmatprep.mubr.f32.mxu1 %v9793_v32  ;;  %v6587_v32 = vld [vmem:[%s13606_s4 + $0x208] sm:$0xff] }
  0x9a   :  { %8130 = vmatprep.subr.mxu0 %v6589_v28  ;;  %8214 = vmatprep.subr.mxu1 %v6642_v29 }
  0x9b   :  { %8131 = vmatpush3.msra.mxu0 %v6589_v28  ;;  %8215 = vmatpush3.msra.mxu1 %v6642_v29 }
  0x9c   :  { %8003 = vmatmul.mubr.f32.gmra.mxu0 %v9748_v23  ;;  %8089 = vmatmul.mubr.f32.gmra.mxu1 %v9788_v31 }
  0x9d   :  { %8005 = vmatprep.mubr.f32.mxu0 %v9763_v26  ;;  %8091 = vmatprep.mubr.f32.mxu1 %v9808_v37 }
  0x9e   :  { %8132 = vmatprep.subr.mxu0 %v6588_v33  ;;  %8216 = vmatprep.subr.mxu1 %v6641_v35 }
  0x9f   :  { %8133 = vmatpush3.msra.mxu0 %v6588_v33  ;;  %8217 = vmatpush3.msra.mxu1 %v6641_v35  ;;  %v6809_v35 = vld [vmem:[%s13606_s4 + $0x478] sm:$0xff] }
  0xa0   :  { %8006 = vmatmul.mubr.f32.gmra.mxu0 %v9768_v27  ;;  %8092 = vmatmul.mubr.f32.gmra.mxu1 %v9813_v38 }
  0xa1   :  { %8008 = vmatprep.mubr.f32.mxu0 %v9783_v30  ;;  %8094 = vmatprep.mubr.f32.mxu1 %v9828_v46 }
  0xa2   :  { %8134 = vmatprep.subr.mxu0 %v6587_v32  ;;  %8218 = vmatprep.subr.mxu1 %v6640_v41 }
  0xa3   :  { %8135 = vmatpush3.msra.mxu0 %v6587_v32  ;;  %8219 = vmatpush3.msra.mxu1 %v6640_v41 }
  0xa4   :  { %8009 = vmatmul.mubr.f32.gmra.mxu0 %v10010_v45  ;;  %8095 = vmatmul.mubr.f32.gmra.mxu1 %v9833_v49 }
  0xa5   :  { %8011 = vmatprep.mubr.f32.mxu0 %v9808_v37  ;;  %8097 = vmatprep.mubr.f32.mxu1 %v6528_v50 }
  0xa6   :  { %8136 = vmatprep.subr.mxu0 %v6586_v54  ;;  %8220 = vmatprep.subr.mxu1 %v6639_v58 }
  0xa7   :  { %8137 = vmatpush3.msra.mxu0 %v6586_v54  ;;  %8221 = vmatpush3.msra.mxu1 %v6639_v58  ;;  %v10250_v58 = vld [vmem:[%s13607_s0 + $0x1b0] sm:$0xff] }
  0xa8   :  { %8012 = vmatmul.mubr.f32.gmra.mxu0 %v9813_v38  ;;  %8098 = vmatmul.mubr.f32.gmra.mxu1 %v10028_v34 }
  0xa9   :  { %8014 = vmatprep.mubr.f32.mxu0 %v9828_v46  ;;  %8100 = vmatprep.mubr.f32.mxu1 %v10033_v44 }
  0xaa   :  { %8222 = vmatprep.subr.mxu1 %v6638_v36  ;;  %8278 = vmatprep.subr.mxu0 %v6705_v39 }
  0xab   :  { %8223 = vmatpush3.msra.mxu1 %v6638_v36 }
  0xac   :  { %8015 = vmatmul.mubr.f32.gmra.mxu0 %v9833_v49  ;;  %8101 = vmatmul.mubr.f32.gmra.mxu1 %v10048_v40 }
  0xad   :  { %8017 = vmatprep.mubr.f32.mxu0 %v9845_v53  ;;  %8103 = vmatprep.mubr.f32.mxu1 %v10053_v42 }
  0xae   :  { %8364 = vmatprep.subr.mxu1 %v6757_v59 }
  0xb0   :  { %8018 = vmatmul.mubr.f32.gmra.mxu0 %v10064_v57  ;;  %8104 = vmatmul.mubr.f32.gmra.mxu1 %v10070_v62 }
  0xb1   :  { %8138 = vmatprep.mubr.f32.mxu0 %v9528_v43  ;;  %8224 = vmatprep.mubr.f32.mxu1 %v9548_v47  ;;  %v6703_v43 = vld [vmem:[%s13606_s4 + $0x368] sm:$0xff] }
  0xb4   :  { %8139 = vmatmul.mubr.f32.vlgmr.msra.gmra.mxu0 %v9548_v47  ;;  %8225 = vmatmul.mubr.f32.vlgmr.msra.gmra.mxu1 %v9553_v48  ;;  %v6702_v47 = vld [vmem:[%s13606_s4 + $0x360] sm:$0xff] }
  0xb5   :  { %8279 = vmatpush3.msra.mxu0 %v6705_v39  ;;  %8141 = vmatprep.mubr.f32.mxu0 %v9553_v48  ;;  %v6755_v48 = vld [vmem:[%s13606_s4 + $0x3e8] sm:$0xff] }
  0xb6   :  { %8227 = vmatprep.mubr.f32.mxu1 %v9568_v51  ;;  %8280 = vmatprep.subr.mxu0 %v6704_v2 }
  0xb7   :  { %8281 = vmatpush3.msra.mxu0 %v6704_v2  ;;  %8365 = vmatpush3.msra.mxu1 %v6757_v59  ;;  %v6654_v2 = vld [vmem:[%s13607_s0 + $0x80] sm:$0xff] }
  0xb8   :  { %8142 = vmatmul.mubr.f32.gmra.mxu0 %v9568_v51  ;;  %8228 = vmatmul.mubr.f32.gmra.mxu1 %v9573_v52  ;;  %v6701_v51 = vld [vmem:[%s13606_s4 + $0x358] sm:$0xff] }
  0xb9   :  { %8144 = vmatprep.mubr.f32.mxu0 %v9573_v52  ;;  %8230 = vmatprep.mubr.f32.mxu1 %v9588_v55  ;;  %v6754_v52 = vld [vmem:[%s13606_s4 + $0x3e0] sm:$0xff] }
  0xba   :  { %8282 = vmatprep.subr.mxu0 %v6703_v43  ;;  %8366 = vmatprep.subr.mxu1 %v6756_v3 }
  0xbb   :  { %8283 = vmatpush3.msra.mxu0 %v6703_v43  ;;  %8367 = vmatpush3.msra.mxu1 %v6756_v3 }
  0xbc   :  { %8145 = vmatmul.mubr.f32.gmra.mxu0 %v9588_v55  ;;  %8231 = vmatmul.mubr.f32.gmra.mxu1 %v9905_v63  ;;  %v6700_v55 = vld [vmem:[%s13606_s4 + $0x350] sm:$0xff] }
  0xbd   :  { %8147 = vmatprep.mubr.f32.mxu0 %v9593_v56  ;;  %8233 = vmatprep.mubr.f32.mxu1 %v9613_v60  ;;  %v6753_v56 = vld [vmem:[%s13606_s4 + $0x3d8] sm:$0xff] }
  0xbe   :  { %8284 = vmatprep.subr.mxu0 %v6702_v47  ;;  %8368 = vmatprep.subr.mxu1 %v6755_v48 }
  0xbf   :  { %8285 = vmatpush3.msra.mxu0 %v6702_v47  ;;  %8369 = vmatpush3.msra.mxu1 %v6755_v48  ;;  %v10280_v48 = vld [vmem:[%s13607_s0 + $0x90] sm:$0xff] }
  0xc0   :  { %8148 = vmatmul.mubr.f32.gmra.mxu0 %v9613_v60  ;;  %8234 = vmatmul.mubr.f32.gmra.mxu1 %v9618_v61  ;;  %v6699_v60 = vld [vmem:[%s13606_s4 + $0x348] sm:$0xff] }
  0xc1   :  { %8150 = vmatprep.mubr.f32.mxu0 %v9618_v61  ;;  %8236 = vmatprep.mubr.f32.mxu1 %v9633_v0  ;;  %v6752_v61 = vld [vmem:[%s13606_s4 + $0x3d0] sm:$0xff] }
  0xc2   :  { %8286 = vmatprep.subr.mxu0 %v6701_v51  ;;  %8370 = vmatprep.subr.mxu1 %v6754_v52 }
  0xc3   :  { %8287 = vmatpush3.msra.mxu0 %v6701_v51  ;;  %8371 = vmatpush3.msra.mxu1 %v6754_v52 }
  0xc4   :  { %8151 = vmatmul.mubr.f32.gmra.mxu0 %v9633_v0  ;;  %8237 = vmatmul.mubr.f32.gmra.mxu1 %v9638_v1  ;;  %v6698_v0 = vld [vmem:[%s13606_s4 + $0x340] sm:$0xff] }
  0xc5   :  { %8153 = vmatprep.mubr.f32.mxu0 %v9638_v1  ;;  %8239 = vmatprep.mubr.f32.mxu1 %v9653_v4  ;;  %v6751_v1 = vld [vmem:[%s13606_s4 + $0x3c8] sm:$0xff] }
  0xc6   :  { %8288 = vmatprep.subr.mxu0 %v6700_v55  ;;  %8372 = vmatprep.subr.mxu1 %v6753_v56 }
  0xc7   :  { %8289 = vmatpush3.msra.mxu0 %v6700_v55  ;;  %8373 = vmatpush3.msra.mxu1 %v6753_v56  ;;  %v10287_v56 = vld [vmem:[%s13607_s0 + $0x98] sm:$0xff] }
  0xc8   :  { %8154 = vmatmul.mubr.f32.gmra.mxu0 %v9653_v4  ;;  %8240 = vmatmul.mubr.f32.gmra.mxu1 %v9940_v12  ;;  %v6697_v4 = vld [vmem:[%s13606_s4 + $0x338] sm:$0xff] }
  0xc9   :  { %8156 = vmatprep.mubr.f32.mxu0 %v9658_v5  ;;  %8242 = vmatprep.mubr.f32.mxu1 %v9678_v9  ;;  %v6750_v5 = vld [vmem:[%s13606_s4 + $0x3c0] sm:$0xff] }
  0xca   :  { %8290 = vmatprep.subr.mxu0 %v6699_v60  ;;  %8374 = vmatprep.subr.mxu1 %v6752_v61 }
  0xcb   :  { %8291 = vmatpush3.msra.mxu0 %v6699_v60  ;;  %8375 = vmatpush3.msra.mxu1 %v6752_v61  ;;  %v6808_v60 = vld [vmem:[%s13606_s4 + $0x470] sm:$0xff] }
  0xcc   :  { %8157 = vmatmul.mubr.f32.gmra.mxu0 %v9678_v9  ;;  %8243 = vmatmul.mubr.f32.gmra.mxu1 %v9683_v10  ;;  %v6696_v9 = vld [vmem:[%s13606_s4 + $0x330] sm:$0xff] }
  0xcd   :  { %8159 = vmatprep.mubr.f32.mxu0 %v9683_v10  ;;  %8245 = vmatprep.mubr.f32.mxu1 %v9698_v13  ;;  %v6749_v10 = vld [vmem:[%s13606_s4 + $0x3b8] sm:$0xff] }
  0xce   :  { %8292 = vmatprep.subr.mxu0 %v6698_v0  ;;  %8376 = vmatprep.subr.mxu1 %v6751_v1 }
  0xcf   :  { %8293 = vmatpush3.msra.mxu0 %v6698_v0  ;;  %8377 = vmatpush3.msra.mxu1 %v6751_v1 }
  0xd0   :  { %8160 = vmatmul.mubr.f32.gmra.mxu0 %v9698_v13  ;;  %8246 = vmatmul.mubr.f32.gmra.mxu1 %v9703_v14  ;;  %v6695_v13 = vld [vmem:[%s13606_s4 + $0x328] sm:$0xff] }
  0xd1   :  { %8162 = vmatprep.mubr.f32.mxu0 %v9703_v14  ;;  %8248 = vmatprep.mubr.f32.mxu1 %v9718_v17  ;;  %v6748_v14 = vld [vmem:[%s13606_s4 + $0x3b0] sm:$0xff] }
  0xd2   :  { %8294 = vmatprep.subr.mxu0 %v6697_v4  ;;  %8378 = vmatprep.subr.mxu1 %v6750_v5 }
  0xd3   :  { %8295 = vmatpush3.msra.mxu0 %v6697_v4  ;;  %8379 = vmatpush3.msra.mxu1 %v6750_v5  ;;  %v10299_v4 = vld [vmem:[%s13607_s0 + $0xa0] sm:$0xff] }
  0xd4   :  { %8163 = vmatmul.mubr.f32.gmra.mxu0 %v9718_v17  ;;  %8249 = vmatmul.mubr.f32.gmra.mxu1 %v9975_v25  ;;  %v6694_v17 = vld [vmem:[%s13606_s4 + $0x320] sm:$0xff] }
  0xd5   :  { %8165 = vmatprep.mubr.f32.mxu0 %v9723_v18  ;;  %8251 = vmatprep.mubr.f32.mxu1 %v9743_v22  ;;  %v6747_v18 = vld [vmem:[%s13606_s4 + $0x3a8] sm:$0xff] }
  0xd6   :  { %8296 = vmatprep.subr.mxu0 %v6696_v9  ;;  %8380 = vmatprep.subr.mxu1 %v6749_v10 }
  0xd7   :  { %8297 = vmatpush3.msra.mxu0 %v6696_v9  ;;  %8381 = vmatpush3.msra.mxu1 %v6749_v10  ;;  %v10305_v10 = vld [vmem:[%s13607_s0 + $0xa8] sm:$0xff] }
  0xd8   :  { %8166 = vmatmul.mubr.f32.gmra.mxu0 %v9743_v22  ;;  %8252 = vmatmul.mubr.f32.gmra.mxu1 %v9748_v23  ;;  %v6693_v22 = vld [vmem:[%s13606_s4 + $0x318] sm:$0xff] }
  0xd9   :  { %8168 = vmatprep.mubr.f32.mxu0 %v9748_v23  ;;  %8254 = vmatprep.mubr.f32.mxu1 %v9763_v26  ;;  %v6746_v23 = vld [vmem:[%s13606_s4 + $0x3a0] sm:$0xff] }
  0xda   :  { %8298 = vmatprep.subr.mxu0 %v6695_v13  ;;  %8382 = vmatprep.subr.mxu1 %v6748_v14 }
  0xdb   :  { %8299 = vmatpush3.msra.mxu0 %v6695_v13  ;;  %8383 = vmatpush3.msra.mxu1 %v6748_v14  ;;  %v6807_v14 = vld [vmem:[%s13606_s4 + $0x468] sm:$0xff] }
  0xdc   :  { %8169 = vmatmul.mubr.f32.gmra.mxu0 %v9763_v26  ;;  %8255 = vmatmul.mubr.f32.gmra.mxu1 %v9768_v27  ;;  %v6692_v26 = vld [vmem:[%s13606_s4 + $0x310] sm:$0xff] }
  0xdd   :  { %8171 = vmatprep.mubr.f32.mxu0 %v9768_v27  ;;  %8257 = vmatprep.mubr.f32.mxu1 %v9783_v30  ;;  %v6745_v27 = vld [vmem:[%s13606_s4 + $0x398] sm:$0xff] }
  0xde   :  { %8300 = vmatprep.subr.mxu0 %v6694_v17  ;;  %8384 = vmatprep.subr.mxu1 %v6747_v18 }
  0xdf   :  { %8301 = vmatpush3.msra.mxu0 %v6694_v17  ;;  %8385 = vmatpush3.msra.mxu1 %v6747_v18 }
  0xe0   :  { %8172 = vmatmul.mubr.f32.gmra.mxu0 %v9783_v30  ;;  %8258 = vmatmul.mubr.f32.gmra.mxu1 %v10010_v45 }
  0xe1   :  { %8174 = vmatprep.mubr.f32.mxu0 %v9788_v31  ;;  %8260 = vmatprep.mubr.f32.mxu1 %v9808_v37 }
  0xe2   :  { %8302 = vmatprep.subr.mxu0 %v6693_v22  ;;  %8386 = vmatprep.subr.mxu1 %v6746_v23 }
  0xe3   :  { %8303 = vmatpush3.msra.mxu0 %v6693_v22  ;;  %8387 = vmatpush3.msra.mxu1 %v6746_v23  ;;  %v7796_v63 = vpop.f32.mrf.mxu0  ;;  %v10321_v23 = vld [vmem:[%s13607_s0 + $0xb0] sm:$0xff] }
  0xe4   :  { %v7882_v30 = vpop.f32.mrf.mxu1  ;;  %8175 = vmatmul.mubr.f32.gmra.mxu0 %v9808_v37  ;;  %8261 = vmatmul.mubr.f32.gmra.mxu1 %v9813_v38  ;;  %v6744_v37 = vld [vmem:[%s13606_s4 + $0x390] sm:$0xff] }
  0xe5   :  { %v10201_v31 = vadd.f32 %v7882_v30, %v7796_v63  ;;  %8177 = vmatprep.mubr.f32.mxu0 %v9813_v38  ;;  %8263 = vmatprep.mubr.f32.mxu1 %v9828_v46  ;;  %v216_v7 = vpop.f32.mrf.mxu0  ;;  %v6660_v63 = vld [vmem:[%s13607_s0 + $0xc0] sm:$0xff]  ;;  %v6661_v30 = vld [vmem:[%s13607_s0 + $0xc8] sm:$0xff] }
  0xe6   :  { %v461_v8 = vpop.f32.mrf.mxu1  ;;  %8304 = vmatprep.subr.mxu0 %v6692_v26  ;;  %8388 = vmatprep.subr.mxu1 %v6745_v27 }
  0xe7   :  { %v10205_v6 = vadd.f32 %v461_v8, %v216_v7  ;;  %8305 = vmatpush3.msra.mxu0 %v6692_v26  ;;  %8389 = vmatpush3.msra.mxu1 %v6745_v27  ;;  %v7799_v12 = vpop.f32.mrf.mxu0  ;;  %v6806_v8 = vld [vmem:[%s13606_s4 + $0x460] sm:$0xff] }
  0xe8   :  { %v7885_v38 = vpop.f32.mrf.mxu1  ;;  %8178 = vmatmul.mubr.f32.gmra.mxu0 %v9828_v46  ;;  %8264 = vmatmul.mubr.f32.gmra.mxu1 %v9833_v49  ;;  %v6743_v46 = vld [vmem:[%s13606_s4 + $0x388] sm:$0xff] }
  0xe9   :  { %v10215_v15 = vadd.f32 %v7885_v38, %v7799_v12  ;;  %8180 = vmatprep.mubr.f32.mxu0 %v9833_v49  ;;  %8266 = vmatprep.mubr.f32.mxu1 %v9845_v53  ;;  %v226_v16 = vpop.f32.mrf.mxu0  ;;  %v10341_v38 = vld [vmem:[%s13607_s0 + $0xd0] sm:$0xff] }
  0xea   :  { %v471_v20 = vpop.f32.mrf.mxu1  ;;  %8306 = vmatprep.subr.mxu0 %v6691_v11  ;;  %8390 = vmatprep.subr.mxu1 %v6744_v37 }
  0xeb   :  { %v10219_v21 = vadd.f32 %v471_v20, %v226_v16  ;;  %8307 = vmatpush3.msra.mxu0 %v6691_v11  ;;  %8391 = vmatpush3.msra.mxu1 %v6744_v37 }
  0xec   :  { %v7802_v24 = vpop.f32.mrf.mxu0  ;;  %v7888_v49 = vpop.f32.mrf.mxu1  ;;  %8181 = vmatmul.mubr.f32.gmra.mxu0 %v9845_v53  ;;  %8267 = vmatmul.mubr.f32.gmra.mxu1 %v10064_v57  ;;  %v6742_v53 = vld [vmem:[%s13606_s4 + $0x380] sm:$0xff] }
  0xed   :  { %v10229_v25 = vadd.f32 %v7888_v49, %v7802_v24  ;;  %8183 = vmatprep.mubr.f32.mxu0 %v10028_v34  ;;  %8269 = vmatprep.mubr.f32.mxu1 %v10033_v44  ;;  %v6805_v24 = vld [vmem:[%s13606_s4 + $0x458] sm:$0xff] }
  0xee   :  { %v236_v28 = vpop.f32.mrf.mxu0  ;;  %v481_v29 = vpop.f32.mrf.mxu1  ;;  %8308 = vmatprep.subr.mxu0 %v6690_v19  ;;  %8392 = vmatprep.subr.mxu1 %v6743_v46 }
  0xef   :  { %v10233_v33 = vadd.f32 %v481_v29, %v236_v28  ;;  %8309 = vmatpush3.msra.mxu0 %v6690_v19  ;;  %8393 = vmatpush3.msra.mxu1 %v6743_v46  ;;  %v10346_v19 = vld [vmem:[%s13607_s0 + $0xd8] sm:$0xff] }
  0xf0   :  { %v7805_v32 = vpop.f32.mrf.mxu0  ;;  %v7891_v41 = vpop.f32.mrf.mxu1  ;;  %8184 = vmatmul.mubr.f32.gmra.mxu0 %v10033_v44  ;;  %8270 = vmatmul.mubr.f32.gmra.mxu1 %v10048_v40 }
  0xf1   :  { %v10243_v45 = vadd.f32 %v7891_v41, %v7805_v32  ;;  %8186 = vmatprep.mubr.f32.mxu0 %v10048_v40  ;;  %8272 = vmatprep.mubr.f32.mxu1 %v10053_v42  ;;  %v10263_v40 = vld [vmem:[%s13607_s0 + $0x1b8] sm:$0xff]  ;;  %v10366_v41 = vld [vmem:[%s13607_s0 + $0xe8] sm:$0xff] }
  0xf2   :  { %v246_v50 = vpop.f32.mrf.mxu0  ;;  %v491_v54 = vpop.f32.mrf.mxu1  ;;  %8394 = vmatprep.subr.mxu1 %v6742_v53  ;;  %8450 = vmatprep.subr.mxu0 %v6809_v35  ;;  %13683 = vst [vmem:[#allocation2_spill] sm:$0xff] %v10263_v40 }
  0xf3   :  { %v10252_v34 = vadd.f32 %v491_v54, %v246_v50  ;;  %8395 = vmatpush3.msra.mxu1 %v6742_v53  ;;  %v10361_v53 = vld [vmem:[%s13607_s0 + $0xe0] sm:$0xff]  ;;  %v6804_v54 = vld [vmem:[%s13606_s4 + $0x450] sm:$0xff] }
  0xf4   :  { %v7808_v44 = vpop.f32.mrf.mxu0  ;;  %v7894_v36 = vpop.f32.mrf.mxu1  ;;  %8187 = vmatmul.mubr.f32.gmra.mxu0 %v10053_v42  ;;  %8273 = vmatmul.mubr.f32.gmra.mxu1 %v10070_v62  ;;  %v6655_v42 = vld [vmem:[%s13607_s0 + $0x88] sm:$0xff] }
  0xf5   :  { %v10256_v39 = vadd.f32 %v7894_v36, %v7808_v44  ;;  %8189 = vmatprep.mubr.f32.mxu0 %v10070_v62  ;;  %8275 = vmatprep.mubr.f32.mxu1 %v10250_v58 }
  0xf6   :  { %v256_v59 = vpop.f32.mrf.mxu0  ;;  %v501_v57 = vpop.f32.mrf.mxu1 }
  0xf7   :  { %v10271_v43 = vadd.f32 %v501_v57, %v256_v59  ;;  %v10382_v57 = vld [vmem:[%s13607_s0 + $0xf0] sm:$0xff] }
  0xf8   :  { %v7811_v62 = vpop.f32.mrf.mxu0  ;;  %v7897_v3 = vpop.f32.mrf.mxu1  ;;  %8190 = vmatmul.mubr.f32.gmra.mxu0 %v10250_v58  ;;  %8276 = vmatmul.mubr.f32.gmra.mxu1 %v10263_v40  ;;  %v10535_v40 = vld [vmem:[%s13607_s0 + $0x198] sm:$0xff] }
  0xf9   :  { %v10275_v47 = vadd.f32 %v7897_v3, %v7811_v62  ;;  %8310 = vmatprep.mubr.f32.mxu0 %v6654_v2  ;;  %8396 = vmatprep.mubr.f32.mxu1 %v6655_v42  ;;  %v6666_v62 = vld [vmem:[%s13607_s0 + $0x100] sm:$0xff]  ;;  %v6667_v3 = vld [vmem:[%s13607_s0 + $0x108] sm:$0xff] }
  0xfa   :  { %v266_v51 = vpop.f32.mrf.mxu0  ;;  %v511_v52 = vpop.f32.mrf.mxu1 }
  0xfb   :  { %v10282_v55 = vadd.f32 %v511_v52, %v266_v51  ;;  %v6803_v52 = vld [vmem:[%s13606_s4 + $0x448] sm:$0xff] }
  0xfc   :  { %v7814_v61 = vpop.f32.mrf.mxu0  ;;  %v7900_v0 = vpop.f32.mrf.mxu1  ;;  %8311 = vmatmul.mubr.f32.vlgmr.msra.gmra.mxu0 %v6655_v42  ;;  %8397 = vmatmul.mubr.f32.vlgmr.msra.gmra.mxu1 %v10280_v48 }
  0xfd   :  { %v10293_v1 = vadd.f32 %v7900_v0, %v7814_v61  ;;  %8451 = vmatpush3.msra.mxu0 %v6809_v35  ;;  %8313 = vmatprep.mubr.f32.mxu0 %v10280_v48 }
  0xfe   :  { %v276_v5 = vpop.f32.mrf.mxu0  ;;  %v521_v9 = vpop.f32.mrf.mxu1  ;;  %8399 = vmatprep.mubr.f32.mxu1 %v10287_v56  ;;  %8452 = vmatprep.subr.mxu0 %v6808_v60 }
  0xff   :  { %v10307_v13 = vadd.f32 %v521_v9, %v276_v5  ;;  %8453 = vmatpush3.msra.mxu0 %v6808_v60  ;;  %v10402_v5 = vld [vmem:[%s13607_s0 + $0x110] sm:$0xff] }
 0x100   :  { %v7817_v17 = vpop.f32.mrf.mxu0  ;;  %v7903_v18 = vpop.f32.mrf.mxu1  ;;  %8314 = vmatmul.mubr.f32.gmra.mxu0 %v10287_v56  ;;  %8400 = vmatmul.mubr.f32.gmra.mxu1 %v10299_v4 }
 0x101   :  { %v10314_v22 = vadd.f32 %v7903_v18, %v7817_v17  ;;  %8316 = vmatprep.mubr.f32.mxu0 %v10299_v4  ;;  %8402 = vmatprep.mubr.f32.mxu1 %v10305_v10  ;;  %v10407_v17 = vld [vmem:[%s13607_s0 + $0x118] sm:$0xff] }
 0x102   :  { %v286_v26 = vpop.f32.mrf.mxu0  ;;  %v531_v27 = vpop.f32.mrf.mxu1  ;;  %8454 = vmatprep.subr.mxu0 %v6807_v14 }
 0x103   :  { %v10329_v7 = vadd.f32 %v531_v27, %v286_v26  ;;  %8455 = vmatpush3.msra.mxu0 %v6807_v14  ;;  %v6802_v26 = vld [vmem:[%s13606_s4 + $0x440] sm:$0xff] }
 0x104   :  { %v7820_v11 = vpop.f32.mrf.mxu0  ;;  %v7906_v37 = vpop.f32.mrf.mxu1  ;;  %8317 = vmatmul.mubr.f32.gmra.mxu0 %v10305_v10  ;;  %8403 = vmatmul.mubr.f32.gmra.mxu1 %v10321_v23 }
 0x105   :  { %v10336_v12 = vadd.f32 %v7906_v37, %v7820_v11  ;;  %8319 = vmatprep.mubr.f32.mxu0 %v6660_v63  ;;  %8405 = vmatprep.mubr.f32.mxu1 %v6661_v30 }
 0x106   :  { %v296_v16 = vpop.f32.mrf.mxu0  ;;  %v541_v20 = vpop.f32.mrf.mxu1  ;;  %8456 = vmatprep.subr.mxu0 %v6806_v8 }
 0x107   :  { %v10348_v46 = vadd.f32 %v541_v20, %v296_v16  ;;  %8457 = vmatpush3.msra.mxu0 %v6806_v8  ;;  %v10422_v8 = vld [vmem:[%s13607_s0 + $0x120] sm:$0xff]  ;;  %v10427_v16 = vld [vmem:[%s13607_s0 + $0x128] sm:$0xff] }
 0x108   :  { %v7823_v49 = vpop.f32.mrf.mxu0  ;;  %v7909_v28 = vpop.f32.mrf.mxu1  ;;  %8320 = vmatmul.mubr.f32.gmra.mxu0 %v6661_v30  ;;  %8406 = vmatmul.mubr.f32.gmra.mxu1 %v10341_v38 }
 0x109   :  { %v10354_v29 = vadd.f32 %v7909_v28, %v7823_v49  ;;  %8322 = vmatprep.mubr.f32.mxu0 %v10341_v38  ;;  %8408 = vmatprep.mubr.f32.mxu1 %v10346_v19 }
 0x10a   :  { %v306_v35 = vpop.f32.mrf.mxu0  ;;  %v551_v32 = vpop.f32.mrf.mxu1  ;;  %8458 = vmatprep.subr.mxu0 %v6805_v24 }
 0x10b   :  { %v10368_v50 = vadd.f32 %v551_v32, %v306_v35  ;;  %8459 = vmatpush3.msra.mxu0 %v6805_v24  ;;  %v6801_v24 = vld [vmem:[%s13606_s4 + $0x438] sm:$0xff]  ;;  %v10443_v32 = vld [vmem:[%s13607_s0 + $0x130] sm:$0xff] }
 0x10c   :  { %v7826_v44 = vpop.f32.mrf.mxu0  ;;  %v7912_v36 = vpop.f32.mrf.mxu1  ;;  %8323 = vmatmul.mubr.f32.gmra.mxu0 %v10346_v19  ;;  %8409 = vmatmul.mubr.f32.gmra.mxu1 %v10361_v53 }
 0x10d   :  { %v10375_v59 = vadd.f32 %v7912_v36, %v7826_v44  ;;  %8325 = vmatprep.mubr.f32.mxu0 %v10361_v53  ;;  %8411 = vmatprep.mubr.f32.mxu1 %v10366_v41  ;;  %v6672_v36 = vld [vmem:[%s13607_s0 + $0x140] sm:$0xff] }
 0x10e   :  { %v316_v2 = vpop.f32.mrf.mxu0  ;;  %v561_v42 = vpop.f32.mrf.mxu1  ;;  %8460 = vmatprep.subr.mxu0 %v6804_v54 }
 0x10f   :  { %v10390_v51 = vadd.f32 %v561_v42, %v316_v2  ;;  %8461 = vmatpush3.msra.mxu0 %v6804_v54  ;;  %v6673_v2 = vld [vmem:[%s13607_s0 + $0x148] sm:$0xff] }
 0x110   :  { %v7829_v60 = vpop.f32.mrf.mxu0  ;;  %v7915_v61 = vpop.f32.mrf.mxu1  ;;  %8326 = vmatmul.mubr.f32.gmra.mxu0 %v10366_v41  ;;  %8412 = vmatmul.mubr.f32.gmra.mxu1 %v10382_v57 }
 0x111   :  { %v10397_v0 = vadd.f32 %v7915_v61, %v7829_v60  ;;  %8328 = vmatprep.mubr.f32.mxu0 %v6666_v62  ;;  %8414 = vmatprep.mubr.f32.mxu1 %v6667_v3  ;;  %v6800_v62 = vld [vmem:[%s13606_s4 + $0x430] sm:$0xff] }
 0x112   :  { %v326_v9 = vpop.f32.mrf.mxu0  ;;  %v571_v14 = vpop.f32.mrf.mxu1  ;;  %8462 = vmatprep.subr.mxu0 %v6803_v52  ;;  %v10463_v61 = vld [vmem:[%s13607_s0 + $0x150] sm:$0xff] }
 0x113   :  { %v10409_v18 = vadd.f32 %v571_v14, %v326_v9  ;;  %8463 = vmatpush3.msra.mxu0 %v6803_v52 }
 0x114   :  { %v7832_v27 = vpop.f32.mrf.mxu0  ;;  %v7918_v63 = vpop.f32.mrf.mxu1  ;;  %8329 = vmatmul.mubr.f32.gmra.mxu0 %v6667_v3  ;;  %8415 = vmatmul.mubr.f32.gmra.mxu1 %v10402_v5 }
 0x115   :  { %v10415_v30 = vadd.f32 %v7918_v63, %v7832_v27  ;;  %8331 = vmatprep.mubr.f32.mxu0 %v10402_v5  ;;  %8417 = vmatprep.mubr.f32.mxu1 %v10407_v17  ;;  %v6799_v63 = vld [vmem:[%s13606_s4 + $0x428] sm:$0xff] }
 0x116   :  { %v336_v11 = vpop.f32.mrf.mxu0  ;;  %v581_v37 = vpop.f32.mrf.mxu1  ;;  %8464 = vmatprep.subr.mxu0 %v6802_v26 }
 0x117   :  { %v10429_v20 = vadd.f32 %v581_v37, %v336_v11  ;;  %8465 = vmatpush3.msra.mxu0 %v6802_v26  ;;  %v10468_v26 = vld [vmem:[%s13607_s0 + $0x158] sm:$0xff] }
 0x118   :  { %v7835_v49 = vpop.f32.mrf.mxu0  ;;  %v7921_v28 = vpop.f32.mrf.mxu1  ;;  %8332 = vmatmul.mubr.f32.gmra.mxu0 %v10407_v17  ;;  %8418 = vmatmul.mubr.f32.gmra.mxu1 %v10422_v8 }
 0x119   :  { %v10436_v35 = vadd.f32 %v7921_v28, %v7835_v49  ;;  %8334 = vmatprep.mubr.f32.mxu0 %v10422_v8  ;;  %8420 = vmatprep.mubr.f32.mxu1 %v10427_v16  ;;  %v10483_v49 = vld [vmem:[%s13607_s0 + $0x160] sm:$0xff] }
 0x11a   :  { %v346_v54 = vpop.f32.mrf.mxu0  ;;  %v591_v44 = vpop.f32.mrf.mxu1  ;;  %8466 = vmatprep.subr.mxu0 %v6801_v24 }
 0x11b   :  { %v10451_v42 = vadd.f32 %v591_v44, %v346_v54  ;;  %8467 = vmatpush3.msra.mxu0 %v6801_v24  ;;  %v10488_v44 = vld [vmem:[%s13607_s0 + $0x168] sm:$0xff] }
 0x11c   :  { %v7838_v3 = vpop.f32.mrf.mxu0  ;;  %v7924_v52 = vpop.f32.mrf.mxu1  ;;  %8335 = vmatmul.mubr.f32.gmra.mxu0 %v10427_v16  ;;  %8421 = vmatmul.mubr.f32.gmra.mxu1 %v10443_v32 }
 0x11d   :  { %v10458_v60 = vadd.f32 %v7924_v52, %v7838_v3  ;;  %8337 = vmatprep.mubr.f32.mxu0 %v6672_v36  ;;  %8423 = vmatprep.mubr.f32.mxu1 %v6673_v2 }
 0x11e   :  { %v356_v9 = vpop.f32.mrf.mxu0  ;;  %v601_v14 = vpop.f32.mrf.mxu1  ;;  %8468 = vmatprep.subr.mxu0 %v6800_v62 }
 0x11f   :  { %v10470_v27 = vadd.f32 %v601_v14, %v356_v9  ;;  %8469 = vmatpush3.msra.mxu0 %v6800_v62  ;;  %v10504_v9 = vld [vmem:[%s13607_s0 + $0x170] sm:$0xff] }
 0x120   :  { %v7841_v11 = vpop.f32.mrf.mxu0  ;;  %v7927_v37 = vpop.f32.mrf.mxu1  ;;  %8338 = vmatmul.mubr.f32.gmra.mxu0 %v6673_v2  ;;  %8424 = vmatmul.mubr.f32.gmra.mxu1 %v10463_v61  ;;  %v6798_v2 = vld [vmem:[%s13606_s4 + $0x420] sm:$0xff]  ;;  %13685 = vst [vmem:[#allocation4_spill] sm:$0xff] %v10504_v9 }
 0x121   :  { %v10476_v24 = vadd.f32 %v7927_v37, %v7841_v11  ;;  %8340 = vmatprep.mubr.f32.mxu0 %v10463_v61  ;;  %8426 = vmatprep.mubr.f32.mxu1 %v10468_v26  ;;  %v6678_v11 = vld [vmem:[%s13607_s0 + $0x180] sm:$0xff]  ;;  %v6679_v37 = vld [vmem:[%s13607_s0 + $0x188] sm:$0xff] }
 0x122   :  { %v366_v28 = vpop.f32.mrf.mxu0  ;;  %v611_v54 = vpop.f32.mrf.mxu1  ;;  %8470 = vmatprep.subr.mxu0 %v6799_v63 }
 0x123   :  { %v10490_v36 = vadd.f32 %v611_v54, %v366_v28  ;;  %8471 = vmatpush3.msra.mxu0 %v6799_v63  ;;  %v6797_v28 = vld [vmem:[%s13606_s4 + $0x418] sm:$0xff] }
 0x124   :  { %v7844_v62 = vpop.f32.mrf.mxu0  ;;  %v7930_v3 = vpop.f32.mrf.mxu1  ;;  %8341 = vmatmul.mubr.f32.gmra.mxu0 %v10468_v26  ;;  %8427 = vmatmul.mubr.f32.gmra.mxu1 %v10483_v49 }
 0x125   :  { %v10497_v52 = vadd.f32 %v7930_v3, %v7844_v62  ;;  %8343 = vmatprep.mubr.f32.mxu0 %v10483_v49  ;;  %8429 = vmatprep.mubr.f32.mxu1 %v10488_v44 }
 0x126   :  { %v10506_v14 = vpop.f32.mrf.mxu0  ;;  %v10508_v63 = vpop.f32.mrf.mxu1  ;;  %8472 = vmatprep.subr.mxu0 %v6798_v2 }
 0x127   :  { %13684 = vst [vmem:[#allocation3_spill] sm:$0xff] %v10497_v52  ;;  %13686 = vst [vmem:[#allocation5_spill] sm:$0xff] %v10506_v14  ;;  %8473 = vmatpush3.msra.mxu0 %v6798_v2 }
 0x128   :  { %13687 = vst [vmem:[#allocation6_spill] sm:$0xff] %v10508_v63  ;;  %v7847_v54 = vpop.f32.mrf.mxu0  ;;  %v7933_v62 = vpop.f32.mrf.mxu1  ;;  %8344 = vmatmul.mubr.f32.gmra.mxu0 %v10488_v44  ;;  %8430 = vmatmul.mubr.f32.gmra.mxu1 %v10504_v9  ;;  %v10526_v63 = vld [vmem:[%s13607_s0 + $0x190] sm:$0xff] }
 0x129   :  { %v10521_v3 = vadd.f32 %v7933_v62, %v7847_v54  ;;  %8346 = vmatprep.mubr.f32.mxu0 %v6678_v11  ;;  %8432 = vmatprep.mubr.f32.mxu1 %v6679_v37  ;;  %13689 = vst [vmem:[#allocation8_spill] sm:$0xff] %v10526_v63  ;;  %v6796_v11 = vld [vmem:[%s13606_s4 + $0x410] sm:$0xff] }
 0x12a   :  { %v10528_v2 = vpop.f32.mrf.mxu0  ;;  %v10530_v14 = vpop.f32.mrf.mxu1  ;;  %8474 = vmatprep.subr.mxu0 %v6797_v28 }
 0x12b   :  { %13688 = vst [vmem:[#allocation7_spill] sm:$0xff] %v10521_v3  ;;  %13690 = vst [vmem:[#allocation9_spill] sm:$0xff] %v10528_v2  ;;  %8475 = vmatpush3.msra.mxu0 %v6797_v28 }
 0x12c   :  { %13691 = vst [vmem:[#allocation10_spill] sm:$0xff] %v10530_v14  ;;  %v7968_v54 = vpop.f32.mrf.mxu0  ;;  %8347 = vmatmul.mubr.f32.gmra.mxu0 %v6679_v37  ;;  %v8054_v62 = vpop.f32.mrf.mxu1  ;;  %8433 = vmatmul.mubr.f32.gmra.mxu1 %v10526_v63  ;;  %v10547_v14 = vld [vmem:[%s13607_s0 + $0x1a0] sm:$0xff]  ;;  %v10554_v37 = vld [vmem:[%s13607_s0 + $0x1a8] sm:$0xff] }
 0x12d   :  { %v940_v2 = vadd.f32 %v7968_v54, %v10201_v31  ;;  %8349 = vmatprep.mubr.f32.mxu0 %v10526_v63  ;;  %8435 = vmatprep.mubr.f32.mxu1 %v10535_v40  ;;  %13692 = vst [vmem:[#allocation11_spill] sm:$0xff] %v10547_v14  ;;  %v6795_v63 = vld [vmem:[%s13606_s4 + $0x408] sm:$0xff] }
 0x12e   :  { %v760_v28 = vpop.f32.mrf.mxu0  ;;  %v10549_v3 = vpop.f32.mrf.mxu1  ;;  %8476 = vmatprep.subr.mxu0 %v6796_v11 }
 0x12f   :  { %13693 = vst [vmem:[#allocation12_spill] sm:$0xff] %v10549_v3  ;;  %v10557_v31 = vadd.f32 %v760_v28, %v10205_v6  ;;  %v10559_v54 = vadd.f32 %v8054_v62, %v940_v2  ;;  %8477 = vmatpush3.msra.mxu0 %v6796_v11  ;;  %v6684_v11 = vld [vmem:[%s13607_s0 + $0x1c0] sm:$0xff]  ;;  %v6685_v62 = vld [vmem:[%s13607_s0 + $0x1c8] sm:$0xff] }
 0x130   :  { %v7971_v9 = vpop.f32.mrf.mxu0  ;;  %8350 = vmatmul.mubr.f32.gmra.mxu0 %v10535_v40  ;;  %v8057_v3 = vpop.f32.mrf.mxu1  ;;  %8436 = vmatmul.mubr.f32.gmra.mxu1 %v10547_v14 }
 0x131   :  { %13694 = vst [vmem:[#allocation13_spill] sm:$0xff] %v10557_v31  ;;  %v942_v52 = vadd.f32 %v7971_v9, %v10215_v15  ;;  %8352 = vmatprep.mubr.f32.mxu0 %v10547_v14  ;;  %8438 = vmatprep.mubr.f32.mxu1 %v10554_v37  ;;  %v6794_v9 = vld [vmem:[%s13606_s4 + $0x400] sm:$0xff] }
 0x132   :  { %v770_v6 = vpop.f32.mrf.mxu0  ;;  %v10569_v2 = vpop.f32.mrf.mxu1  ;;  %8478 = vmatprep.subr.mxu0 %v6795_v63 }
 0x133   :  { %13695 = vst [vmem:[#allocation14_spill] sm:$0xff] %v10569_v2  ;;  %v10578_v28 = vadd.f32 %v770_v6, %v10219_v21  ;;  %v10580_v15 = vadd.f32 %v8057_v3, %v942_v52  ;;  %8479 = vmatpush3.msra.mxu0 %v6795_v63  ;;  %v10591_v21 = vld [vmem:[%s13607_s0 + $0x1d0] sm:$0xff]  ;;  %v10598_v3 = vld [vmem:[%s13607_s0 + $0x1d8] sm:$0xff] }
 0x134   :  { %v7974_v31 = vpop.f32.mrf.mxu0  ;;  %8353 = vmatmul.mubr.f32.gmra.mxu0 %v10554_v37  ;;  %v8060_v2 = vpop.f32.mrf.mxu1  ;;  %8439 = vmatmul.mubr.f32.gmra.mxu1 %v10250_v58 }
 0x135   :  { %13696 = vst [vmem:[#allocation15_spill] sm:$0xff] %v10578_v28  ;;  %v944_v14 = vadd.f32 %v7974_v31, %v10229_v25  ;;  %8355 = vmatprep.mubr.f32.mxu0 %v6684_v11  ;;  %8441 = vmatprep.mubr.f32.mxu1 %v6685_v62 }
 0x136   :  { %v780_v52 = vpop.f32.mrf.mxu0  ;;  %v10593_v63 = vpop.f32.mrf.mxu1  ;;  %8480 = vmatprep.subr.mxu0 %v6794_v9 }
 0x137   :  { %13697 = vst [vmem:[#allocation16_spill] sm:$0xff] %v10593_v63  ;;  %v10601_v6 = vadd.f32 %v780_v52, %v10233_v33  ;;  %v10603_v25 = vadd.f32 %v8060_v2, %v944_v14  ;;  %8481 = vmatpush3.msra.mxu0 %v6794_v9  ;;  %v10612_v63 = vld [vmem:[%s13607_s0 + $0x1e0] sm:$0xff]  ;;  %v10619_v2 = vld [vmem:[%s13607_s0 + $0x1e8] sm:$0xff] }
 0x138   :  { %v7977_v31 = vpop.f32.mrf.mxu0  ;;  %8356 = vmatmul.mubr.f32.gmra.mxu0 %v6685_v62  ;;  %v8063_v11 = vpop.f32.mrf.mxu1  ;;  %8442 = vmatmul.mubr.f32.gmra.mxu1 %v10591_v21  ;;  %13699 = vst [vmem:[#allocation18_spill] sm:$0xff] %v10612_v63 }
 0x139   :  { %13698 = vst [vmem:[#allocation17_spill] sm:$0xff] %v10601_v6  ;;  %v946_v28 = vadd.f32 %v7977_v31, %v10243_v45  ;;  %8358 = vmatprep.mubr.f32.mxu0 %v10591_v21  ;;  %8444 = vmatprep.mubr.f32.mxu1 %v10598_v3 }
 0x13a   :  { %v790_v33 = vpop.f32.mrf.mxu0  ;;  %v10614_v14 = vpop.f32.mrf.mxu1 }
 0x13b   :  { %13700 = vst [vmem:[#allocation19_spill] sm:$0xff] %v10614_v14  ;;  %v10622_v62 = vadd.f32 %v790_v33, %v10252_v34  ;;  %v10624_v45 = vadd.f32 %v8063_v11, %v946_v28  ;;  %v10634_v14 = vld [vmem:[%s13607_s0 + $0x1f0] sm:$0xff] }
 0x13c   :  { %v7980_v9 = vpop.f32.mrf.mxu0  ;;  %8359 = vmatmul.mubr.f32.gmra.mxu0 %v10598_v3  ;;  %v8066_v52 = vpop.f32.mrf.mxu1  ;;  %8445 = vmatmul.mubr.f32.gmra.mxu1 %v10612_v63 }
 0x13d   :  { %13701 = vst [vmem:[#allocation20_spill] sm:$0xff] %v10622_v62  ;;  %v948_v31 = vadd.f32 %v7980_v9, %v10256_v39  ;;  %8361 = vmatprep.mubr.f32.mxu0 %v10612_v63  ;;  %8447 = vmatprep.mubr.f32.mxu1 %v10619_v2 }
 0x13e   :  { %v800_v34 = vpop.f32.mrf.mxu0  ;;  %v10636_v28 = vpop.f32.mrf.mxu1 }
 0x13f   :  { %13702 = vst [vmem:[#allocation21_spill] sm:$0xff] %v10636_v28  ;;  %v10639_v11 = vadd.f32 %v800_v34, %v10271_v43  ;;  %v10641_v33 = vadd.f32 %v8066_v52, %v948_v31 }
 0x140   :  { %v7983_v62 = vpop.f32.mrf.mxu0  ;;  %8362 = vmatmul.mubr.f32.gmra.mxu0 %v10619_v2  ;;  %v8069_v39 = vpop.f32.mrf.mxu1  ;;  %8448 = vmatmul.mubr.f32.gmra.mxu1 %v10634_v14 }
 0x141   :  { %13703 = vst [vmem:[#allocation22_spill] sm:$0xff] %v10639_v11  ;;  %v950_v9 = vadd.f32 %v7983_v62, %v10275_v47  ;;  %8482 = vmatprep.mubr.f32.mxu0 %v10280_v48 }
 0x142   :  { %v810_v6 = vpop.f32.mrf.mxu0  ;;  %v10647_v63 = vpop.f32.mrf.mxu1 }
 0x143   :  { %13704 = vst [vmem:[#allocation23_spill] sm:$0xff] %v10647_v63  ;;  %v10650_v28 = vadd.f32 %v810_v6, %v10282_v55  ;;  %v10652_v43 = vadd.f32 %v8069_v39, %v950_v9 }
 0x144   :  { %v7986_v52 = vpop.f32.mrf.mxu0  ;;  %8483 = vmatmul.mubr.f32.vlgmr.msra.gmra.mxu0 %v10287_v56  ;;  %v8072_v31 = vpop.f32.mrf.mxu1  ;;  %v6763_v56 = vld [vmem:[%s13607_s0 + $0xb8] sm:$0xff] }
 0x145   :  { %13705 = vst [vmem:[#allocation24_spill] sm:$0xff] %v10650_v28  ;;  %v952_v34 = vadd.f32 %v7986_v52, %v10293_v1  ;;  %8485 = vmatprep.mubr.f32.mxu0 %v10299_v4 }
 0x146   :  { %v820_v11 = vpop.f32.mrf.mxu0  ;;  %v10657_v47 = vpop.f32.mrf.mxu1 }
 0x147   :  { %13706 = vst [vmem:[#allocation25_spill] sm:$0xff] %v10657_v47  ;;  %v10660_v48 = vadd.f32 %v820_v11, %v10307_v13  ;;  %v10662_v62 = vadd.f32 %v8072_v31, %v952_v34 }
 0x148   :  { %v7989_v55 = vpop.f32.mrf.mxu0  ;;  %8486 = vmatmul.mubr.f32.gmra.mxu0 %v10305_v10  ;;  %v8075_v6 = vpop.f32.mrf.mxu1 }
 0x149   :  { %13707 = vst [vmem:[#allocation26_spill] sm:$0xff] %v10660_v48  ;;  %v954_v39 = vadd.f32 %v7989_v55, %v10314_v22  ;;  %8488 = vmatprep.mubr.f32.mxu0 %v10321_v23 }
 0x14a   :  { %v830_v1 = vpop.f32.mrf.mxu0  ;;  %v10670_v4 = vpop.f32.mrf.mxu1 }
 0x14b   :  { %13708 = vst [vmem:[#allocation27_spill] sm:$0xff] %v10670_v4  ;;  %v10673_v13 = vadd.f32 %v830_v1, %v10329_v7  ;;  %v10675_v11 = vadd.f32 %v8075_v6, %v954_v39 }
 0x14c   :  { %v7992_v9 = vpop.f32.mrf.mxu0  ;;  %8489 = vmatmul.mubr.f32.gmra.mxu0 %v6763_v56  ;;  %v8078_v10 = vpop.f32.mrf.mxu1 }
 0x14d   :  { %13709 = vst [vmem:[#allocation28_spill] sm:$0xff] %v10673_v13  ;;  %v956_v52 = vadd.f32 %v7992_v9, %v10336_v12  ;;  %8491 = vmatprep.mubr.f32.mxu0 %v10341_v38 }
 0x14e   :  { %v840_v22 = vpop.f32.mrf.mxu0  ;;  %v10679_v23 = vpop.f32.mrf.mxu1 }
 0x14f   :  { %13710 = vst [vmem:[#allocation29_spill] sm:$0xff] %v10679_v23  ;;  %v10682_v31 = vadd.f32 %v840_v22, %v10348_v46  ;;  %v10684_v34 = vadd.f32 %v8078_v10, %v956_v52 }
 0x150   :  { %v7995_v55 = vpop.f32.mrf.mxu0  ;;  %8492 = vmatmul.mubr.f32.gmra.mxu0 %v10346_v19  ;;  %v8081_v7 = vpop.f32.mrf.mxu1  ;;  %v6769_v19 = vld [vmem:[%s13607_s0 + $0xf8] sm:$0xff] }
 0x151   :  { %13711 = vst [vmem:[#allocation30_spill] sm:$0xff] %v10682_v31  ;;  %v958_v6 = vadd.f32 %v7995_v55, %v10354_v29  ;;  %8494 = vmatprep.mubr.f32.mxu0 %v10361_v53 }
 0x152   :  { %v850_v39 = vpop.f32.mrf.mxu0  ;;  %v10689_v12 = vpop.f32.mrf.mxu1 }
 0x153   :  { %13712 = vst [vmem:[#allocation31_spill] sm:$0xff] %v10689_v12  ;;  %v10692_v38 = vadd.f32 %v850_v39, %v10368_v50  ;;  %v10694_v56 = vadd.f32 %v8081_v7, %v958_v6 }
 0x154   :  { %v7998_v46 = vpop.f32.mrf.mxu0  ;;  %8495 = vmatmul.mubr.f32.gmra.mxu0 %v10366_v41  ;;  %v8084_v1 = vpop.f32.mrf.mxu1 }
 0x155   :  { %13713 = vst [vmem:[#allocation32_spill] sm:$0xff] %v10692_v38  ;;  %v960_v9 = vadd.f32 %v7998_v46, %v10375_v59  ;;  %8497 = vmatprep.mubr.f32.mxu0 %v10382_v57  ;;  %v6826_v59 = vld [vmem:[%s13608_s6 + $0xf8] sm:$0xff] }
 0x156   :  { %v860_v29 = vpop.f32.mrf.mxu0  ;;  %v10702_v53 = vpop.f32.mrf.mxu1  ;;  %8536 = vmatprep.subr.mxu1 %v6826_v59 }
 0x157   :  { %13714 = vst [vmem:[#allocation33_spill] sm:$0xff] %v10702_v53  ;;  %v10705_v50 = vadd.f32 %v860_v29, %v10390_v51  ;;  %v10707_v10 = vadd.f32 %v8084_v1, %v960_v9  ;;  %8537 = vmatpush3.msra.mxu1 %v6826_v59 }
 0x158   :  { %v8001_v52 = vpop.f32.mrf.mxu0  ;;  %8498 = vmatmul.mubr.f32.gmra.mxu0 %v6769_v19  ;;  %v8087_v41 = vpop.f32.mrf.mxu1  ;;  %v6775_v19 = vld [vmem:[%s13607_s0 + $0x138] sm:$0xff] }
 0x159   :  { %13715 = vst [vmem:[#allocation34_spill] sm:$0xff] %v10705_v50  ;;  %v962_v57 = vadd.f32 %v8001_v52, %v10397_v0  ;;  %8500 = vmatprep.mubr.f32.mxu0 %v10402_v5  ;;  %v6825_v0 = vld [vmem:[%s13608_s6 + $0xf0] sm:$0xff] }
 0x15a   :  { %v870_v22 = vpop.f32.mrf.mxu0  ;;  %v10714_v55 = vpop.f32.mrf.mxu1  ;;  %8538 = vmatprep.subr.mxu1 %v6825_v0 }
 0x15b   :  { %13716 = vst [vmem:[#allocation35_spill] sm:$0xff] %v10714_v55  ;;  %v10717_v51 = vadd.f32 %v870_v22, %v10409_v18  ;;  %v10719_v7 = vadd.f32 %v8087_v41, %v962_v57  ;;  %8539 = vmatpush3.msra.mxu1 %v6825_v0  ;;  %v6823_v57 = vld [vmem:[%s13608_s6 + $0xe0] sm:$0xff]  ;;  %v6822_v0 = vld [vmem:[%s13608_s6 + $0xd8] sm:$0xff] }
 0x15c   :  { %v8004_v6 = vpop.f32.mrf.mxu0  ;;  %8501 = vmatmul.mubr.f32.gmra.mxu0 %v10407_v17  ;;  %v8090_v39 = vpop.f32.mrf.mxu1 }
 0x15d   :  { %13717 = vst [vmem:[#allocation36_spill] sm:$0xff] %v10717_v51  ;;  %v964_v46 = vadd.f32 %v8004_v6, %v10415_v30  ;;  %8503 = vmatprep.mubr.f32.mxu0 %v10422_v8 }
 0x15e   :  { %v880_v5 = vpop.f32.mrf.mxu0  ;;  %v10727_v1 = vpop.f32.mrf.mxu1 }
 0x15f   :  { %v10730_v18 = vadd.f32 %v880_v5, %v10429_v20  ;;  %v10732_v9 = vadd.f32 %v8090_v39, %v964_v46  ;;  %v6824_v20 = vld [vmem:[%s13608_s6 + $0xe8] sm:$0xff] }
 0x160   :  { %v8007_v17 = vpop.f32.mrf.mxu0  ;;  %8504 = vmatmul.mubr.f32.gmra.mxu0 %v10427_v16  ;;  %v8093_v30 = vpop.f32.mrf.mxu1  ;;  %8540 = vmatprep.subr.mxu1 %v6824_v20 }
 0x161   :  { %v966_v8 = vadd.f32 %v8007_v17, %v10436_v35  ;;  %8506 = vmatprep.mubr.f32.mxu0 %v10443_v32  ;;  %8541 = vmatpush3.msra.mxu1 %v6824_v20  ;;  %v6781_v20 = vld [vmem:[%s13607_s0 + $0x178] sm:$0xff] }
 0x162   :  { %v890_v29 = vpop.f32.mrf.mxu0  ;;  %v10743_v52 = vpop.f32.mrf.mxu1  ;;  %8542 = vmatprep.subr.mxu1 %v6823_v57 }
 0x163   :  { %v10746_v41 = vadd.f32 %v890_v29, %v10451_v42  ;;  %v10748_v16 = vadd.f32 %v8093_v30, %v966_v8  ;;  %8543 = vmatpush3.msra.mxu1 %v6823_v57  ;;  %v13718_v8 = vld [vmem:[#allocation3_spill] sm:$0xff] }
 0x164   :  { %v8010_v35 = vpop.f32.mrf.mxu0  ;;  %8507 = vmatmul.mubr.f32.gmra.mxu0 %v6775_v19  ;;  %v8096_v32 = vpop.f32.mrf.mxu1  ;;  %8544 = vmatprep.subr.mxu1 %v6822_v0  ;;  %v13719_v19 = vld [vmem:[#allocation4_spill] sm:$0xff]  ;;  %v13720_v57 = vld [vmem:[#allocation7_spill] sm:$0xff] }
 0x165   :  { %v968_v59 = vadd.f32 %v8010_v35, %v10458_v60  ;;  %8509 = vmatprep.mubr.f32.mxu0 %v10463_v61  ;;  %8545 = vmatpush3.msra.mxu1 %v6822_v0 }
 0x166   :  { %v900_v22 = vpop.f32.mrf.mxu0  ;;  %v10755_v6 = vpop.f32.mrf.mxu1 }
 0x167   :  { %v10758_v42 = vadd.f32 %v900_v22, %v10470_v27  ;;  %v10760_v39 = vadd.f32 %v8096_v32, %v968_v59  ;;  %v6821_v32 = vld [vmem:[%s13608_s6 + $0xd0] sm:$0xff] }
 0x168   :  { %v8013_v46 = vpop.f32.mrf.mxu0  ;;  %8510 = vmatmul.mubr.f32.gmra.mxu0 %v10468_v26  ;;  %v8099_v60 = vpop.f32.mrf.mxu1  ;;  %8546 = vmatprep.subr.mxu1 %v6821_v32 }
 0x169   :  { %v970_v61 = vadd.f32 %v8013_v46, %v10476_v24  ;;  %8512 = vmatprep.mubr.f32.mxu0 %v10483_v49  ;;  %v13721_v46 = vld [vmem:[#allocation8_spill] sm:$0xff]  ;;  %8547 = vmatpush3.msra.mxu1 %v6821_v32 }
 0x16a   :  { %v910_v5 = vpop.f32.mrf.mxu0  ;;  %v10768_v17 = vpop.f32.mrf.mxu1 }
 0x16b   :  { %v10771_v27 = vadd.f32 %v910_v5, %v10490_v36  ;;  %v10773_v30 = vadd.f32 %v8099_v60, %v970_v61  ;;  %v6820_v5 = vld [vmem:[%s13608_s6 + $0xc8] sm:$0xff] }
 0x16c   :  { %v8016_v26 = vpop.f32.mrf.mxu0  ;;  %8513 = vmatmul.mubr.f32.gmra.mxu0 %v10488_v44  ;;  %v8102_v24 = vpop.f32.mrf.mxu1  ;;  %8548 = vmatprep.subr.mxu1 %v6820_v5 }
 0x16d   :  { %v972_v49 = vadd.f32 %v8016_v26, %v13718_v8  ;;  %8515 = vmatprep.mubr.f32.mxu0 %v13719_v19  ;;  %8549 = vmatpush3.msra.mxu1 %v6820_v5  ;;  %v6818_v5 = vld [vmem:[%s13608_s6 + $0xb8] sm:$0xff] }
 0x16e   :  { %v10781_v29 = vpop.f32.mrf.mxu0  ;;  %v10783_v35 = vpop.f32.mrf.mxu1 }
 0x16f   :  { %v10785_v36 = vadd.f32 %v8102_v24, %v972_v49  ;;  %v13722_v49 = vld [vmem:[#allocation11_spill] sm:$0xff] }
 0x170   :  { %v8019_v44 = vpop.f32.mrf.mxu0  ;;  %8516 = vmatmul.mubr.f32.gmra.mxu0 %v6781_v20  ;;  %v8105_v59 = vpop.f32.mrf.mxu1 }
 0x171   :  { %v974_v22 = vadd.f32 %v8019_v44, %v13720_v57  ;;  %8518 = vmatprep.mubr.f32.mxu0 %v13721_v46  ;;  %v6819_v44 = vld [vmem:[%s13608_s6 + $0xc0] sm:$0xff] }
 0x172   :  { %v10792_v60 = vpop.f32.mrf.mxu0  ;;  %v10794_v61 = vpop.f32.mrf.mxu1  ;;  %8550 = vmatprep.subr.mxu1 %v6819_v44 }
 0x173   :  { %v10796_v0 = vadd.f32 %v8105_v59, %v974_v22  ;;  %8551 = vmatpush3.msra.mxu1 %v6819_v44 }
 0x174   :  { %v8140_v26 = vpop.f32.mrf.mxu0  ;;  %8519 = vmatmul.mubr.f32.gmra.mxu0 %v10535_v40  ;;  %v8226_v24 = vpop.f32.mrf.mxu1  ;;  %8552 = vmatprep.subr.mxu1 %v6818_v5 }
 0x175   :  { %v1610_v8 = vadd.f32 %v8140_v26, %v10559_v54  ;;  %8521 = vmatprep.mubr.f32.mxu0 %v13722_v49  ;;  %8553 = vmatpush3.msra.mxu1 %v6818_v5  ;;  %v13726_v5 = vld [vmem:[#allocation18_spill] sm:$0xff] }
 0x176   :  { %v10804_v19 = vpop.f32.mrf.mxu0  ;;  %v10806_v20 = vpop.f32.mrf.mxu1 }
 0x177   :  { %13723 = vst [vmem:[#allocation3_spill] sm:$0xff] %v10804_v19  ;;  %13724 = vst [vmem:[#allocation4_spill] sm:$0xff] %v10806_v20  ;;  %v10808_v32 = vadd.f32 %v8226_v24, %v1610_v8  ;;  %v13725_v24 = vld [vmem:[#allocation2_spill] sm:$0xff]  ;;  %v6857_v8 = vld [vmem:[%s13608_s6 + $0x1f0] sm:$0xff] }
 0x178   :  { %v8143_v59 = vpop.f32.mrf.mxu0  ;;  %8522 = vmatmul.mubr.f32.gmra.mxu0 %v10554_v37  ;;  %v8229_v40 = vpop.f32.mrf.mxu1  ;;  %v6858_v37 = vld [vmem:[%s13608_s6 + $0x1f8] sm:$0xff] }
 0x179   :  { %v1612_v54 = vadd.f32 %v8143_v59, %v10580_v15  ;;  %8524 = vmatprep.mubr.f32.mxu0 %v10250_v58  ;;  %8704 = vmatprep.subr.mxu0 %v6858_v37 }
 0x17a   :  { %v10816_v57 = vpop.f32.mrf.mxu0  ;;  %v10818_v22 = vpop.f32.mrf.mxu1  ;;  %8705 = vmatpush3.msra.mxu0 %v6858_v37  ;;  %v6855_v37 = vld [vmem:[%s13608_s6 + $0x1e0] sm:$0xff] }
 0x17b   :  { %v10820_v46 = vadd.f32 %v8229_v40, %v1612_v54  ;;  %v6856_v40 = vld [vmem:[%s13608_s6 + $0x1e8] sm:$0xff]  ;;  %8706 = vmatprep.subr.mxu0 %v6857_v8 }
 0x17c   :  { %v8146_v26 = vpop.f32.mrf.mxu0  ;;  %8525 = vmatmul.mubr.f32.gmra.mxu0 %v13725_v24  ;;  %v8232_v15 = vpop.f32.mrf.mxu1 }
 0x17d   :  { %v1614_v58 = vadd.f32 %v8146_v26, %v10603_v25  ;;  %8527 = vmatprep.mubr.f32.mxu0 %v10591_v21  ;;  %8707 = vmatpush3.msra.mxu0 %v6857_v8  ;;  %v6817_v26 = vld [vmem:[%s13608_s6 + $0xb0] sm:$0xff] }
 0x17e   :  { %v10834_v49 = vpop.f32.mrf.mxu0  ;;  %v10836_v44 = vpop.f32.mrf.mxu1  ;;  %8554 = vmatprep.subr.mxu1 %v6817_v26  ;;  %8708 = vmatprep.subr.mxu0 %v6856_v40 }
 0x17f   :  { %v10838_v59 = vadd.f32 %v8232_v15, %v1614_v58  ;;  %8555 = vmatpush3.msra.mxu1 %v6817_v26  ;;  %8709 = vmatpush3.msra.mxu0 %v6856_v40 }
 0x180   :  { %v8149_v25 = vpop.f32.mrf.mxu0  ;;  %8528 = vmatmul.mubr.f32.gmra.mxu0 %v10598_v3  ;;  %v8235_v21 = vpop.f32.mrf.mxu1  ;;  %8710 = vmatprep.subr.mxu0 %v6855_v37 }
 0x181   :  { %v1616_v54 = vadd.f32 %v8149_v25, %v10624_v45  ;;  %8530 = vmatprep.mubr.f32.mxu0 %v13726_v5  ;;  %v6854_v45 = vld [vmem:[%s13608_s6 + $0x1d8] sm:$0xff]  ;;  %8711 = vmatpush3.msra.mxu0 %v6855_v37  ;;  %v6816_v5 = vld [vmem:[%s13608_s6 + $0xa8] sm:$0xff] }
 0x182   :  { %v10852_v24 = vpop.f32.mrf.mxu0  ;;  %v10854_v15 = vpop.f32.mrf.mxu1  ;;  %8712 = vmatprep.subr.mxu0 %v6854_v45  ;;  %8556 = vmatprep.subr.mxu1 %v6816_v5  ;;  %v6852_v37 = vld [vmem:[%s13608_s6 + $0x1c8] sm:$0xff] }
 0x183   :  { %13727 = vst [vmem:[#allocation7_spill] sm:$0xff] %v10854_v15  ;;  %v10856_v3 = vadd.f32 %v8235_v21, %v1616_v54  ;;  %v6793_v21 = vld [vmem:[%s13607_s0 + $0x1f8] sm:$0xff]  ;;  %8713 = vmatpush3.msra.mxu0 %v6854_v45  ;;  %8557 = vmatpush3.msra.mxu1 %v6816_v5  ;;  %v6851_v45 = vld [vmem:[%s13608_s6 + $0x1c0] sm:$0xff] }
 0x184   :  { %v8152_v58 = vpop.f32.mrf.mxu0  ;;  %8531 = vmatmul.mubr.f32.gmra.mxu0 %v10619_v2  ;;  %v8238_v8 = vpop.f32.mrf.mxu1  ;;  %v6853_v2 = vld [vmem:[%s13608_s6 + $0x1d0] sm:$0xff] }
 0x185   :  { %v1618_v25 = vadd.f32 %v8152_v58, %v10641_v33  ;;  %8533 = vmatprep.mubr.f32.mxu0 %v10634_v14  ;;  %v6815_v58 = vld [vmem:[%s13608_s6 + $0xa0] sm:$0xff]  ;;  %8714 = vmatprep.subr.mxu0 %v6853_v2 }
 0x186   :  { %v10867_v54 = vpop.f32.mrf.mxu0  ;;  %v10869_v40 = vpop.f32.mrf.mxu1  ;;  %8558 = vmatprep.subr.mxu1 %v6815_v58  ;;  %8715 = vmatpush3.msra.mxu0 %v6853_v2  ;;  %v6850_v2 = vld [vmem:[%s13608_s6 + $0x1b8] sm:$0xff] }
 0x187   :  { %13728 = vst [vmem:[#allocation8_spill] sm:$0xff] %v10867_v54  ;;  %13729 = vst [vmem:[#allocation11_spill] sm:$0xff] %v10869_v40  ;;  %v10877_v33 = vadd.f32 %v8238_v8, %v1618_v25  ;;  %8559 = vmatpush3.msra.mxu1 %v6815_v58  ;;  %8716 = vmatprep.subr.mxu0 %v6852_v37  ;;  %v6813_v58 = vld [vmem:[%s13608_s6 + $0x90] sm:$0xff] }
 0x188   :  { %v8155_v14 = vpop.f32.mrf.mxu0  ;;  %8534 = vmatmul.mubr.f32.gmra.mxu0 %v6793_v21  ;;  %v8241_v26 = vpop.f32.mrf.mxu1  ;;  %v6814_v21 = vld [vmem:[%s13608_s6 + $0x98] sm:$0xff] }
 0x189   :  { %v1620_v20 = vadd.f32 %v8155_v14, %v10652_v43  ;;  %8560 = vmatprep.subr.mxu1 %v6814_v21  ;;  %8717 = vmatpush3.msra.mxu0 %v6852_v37  ;;  %v6849_v37 = vld [vmem:[%s13608_s6 + $0x1b0] sm:$0xff] }
 0x18a   :  { %v10886_v8 = vpop.f32.mrf.mxu0  ;;  %v10888_v25 = vpop.f32.mrf.mxu1  ;;  %8561 = vmatpush3.msra.mxu1 %v6814_v21  ;;  %8718 = vmatprep.subr.mxu0 %v6851_v45  ;;  %v6812_v21 = vld [vmem:[%s13608_s6 + $0x88] sm:$0xff] }
 0x18b   :  { %13730 = vst [vmem:[#allocation2_spill] sm:$0xff] %v10886_v8  ;;  %13731 = vst [vmem:[#allocation18_spill] sm:$0xff] %v10888_v25  ;;  %v10896_v5 = vadd.f32 %v8241_v26, %v1620_v20  ;;  %8562 = vmatprep.subr.mxu1 %v6813_v58  ;;  %8719 = vmatpush3.msra.mxu0 %v6851_v45  ;;  %v6848_v45 = vld [vmem:[%s13608_s6 + $0x1a8] sm:$0xff] }
 0x18c   :  { %v8158_v43 = vpop.f32.mrf.mxu0  ;;  %v8244_v14 = vpop.f32.mrf.mxu1  ;;  %8563 = vmatpush3.msra.mxu1 %v6813_v58  ;;  %8720 = vmatprep.subr.mxu0 %v6850_v2  ;;  %v6811_v58 = vld [vmem:[%s13608_s6 + $0x80] sm:$0xff] }
 0x18d   :  { %v1622_v55 = vadd.f32 %v8158_v43, %v10662_v62  ;;  %8564 = vmatprep.subr.mxu1 %v6812_v21  ;;  %8721 = vmatpush3.msra.mxu0 %v6850_v2  ;;  %v6847_v2 = vld [vmem:[%s13608_s6 + $0x1a0] sm:$0xff] }
 0x18e   :  { %v10905_v20 = vpop.f32.mrf.mxu0  ;;  %v10907_v26 = vpop.f32.mrf.mxu1  ;;  %8565 = vmatpush3.msra.mxu1 %v6812_v21  ;;  %8722 = vmatprep.subr.mxu0 %v6849_v37 }
 0x18f   :  { %13732 = vst [vmem:[#allocation37_spill] sm:$0xff] %v10905_v20  ;;  %13733 = vst [vmem:[#allocation38_spill] sm:$0xff] %v10907_v26  ;;  %v10915_v51 = vadd.f32 %v8244_v14, %v1622_v55  ;;  %8566 = vmatprep.subr.mxu1 %v6811_v58  ;;  %8723 = vmatpush3.msra.mxu0 %v6849_v37 }
 0x190   :  { %v8161_v62 = vpop.f32.mrf.mxu0  ;;  %v8247_v43 = vpop.f32.mrf.mxu1  ;;  %8567 = vmatpush3.msra.mxu1 %v6811_v58  ;;  %8724 = vmatprep.subr.mxu0 %v6848_v45 }
 0x191   :  { %v1624_v19 = vadd.f32 %v8161_v62, %v10675_v11  ;;  %8725 = vmatpush3.msra.mxu0 %v6848_v45  ;;  %v6846_v11 = vld [vmem:[%s13608_s6 + $0x198] sm:$0xff] }
 0x192   :  { %v10924_v55 = vpop.f32.mrf.mxu0  ;;  %v10926_v14 = vpop.f32.mrf.mxu1  ;;  %8726 = vmatprep.subr.mxu0 %v6847_v2 }
 0x193   :  { %13734 = vst [vmem:[#allocation39_spill] sm:$0xff] %v10924_v55  ;;  %13735 = vst [vmem:[#allocation40_spill] sm:$0xff] %v10926_v14  ;;  %v10931_v21 = vadd.f32 %v8247_v43, %v1624_v19  ;;  %8727 = vmatpush3.msra.mxu0 %v6847_v2  ;;  %v6845_v19 = vld [vmem:[%s13608_s6 + $0x190] sm:$0xff] }
 0x194   :  { %v8164_v53 = vpop.f32.mrf.mxu0  ;;  %v8250_v50 = vpop.f32.mrf.mxu1  ;;  %8728 = vmatprep.subr.mxu0 %v6846_v11 }
 0x195   :  { %v1626_v62 = vadd.f32 %v8164_v53, %v10684_v34  ;;  %8729 = vmatpush3.msra.mxu0 %v6846_v11  ;;  %v6844_v34 = vld [vmem:[%s13608_s6 + $0x188] sm:$0xff] }
 0x196   :  { %v10937_v12 = vpop.f32.mrf.mxu0  ;;  %v10939_v37 = vpop.f32.mrf.mxu1  ;;  %8730 = vmatprep.subr.mxu0 %v6845_v19 }
 0x197   :  { %13736 = vst [vmem:[#allocation41_spill] sm:$0xff] %v10937_v12  ;;  %13737 = vst [vmem:[#allocation42_spill] sm:$0xff] %v10939_v37  ;;  %v10944_v43 = vadd.f32 %v8250_v50, %v1626_v62  ;;  %8731 = vmatpush3.msra.mxu0 %v6845_v19  ;;  %v6843_v50 = vld [vmem:[%s13608_s6 + $0x180] sm:$0xff]  ;;  %v10967_v19 = vld [vmem:[%s13608_s6 + $0x78] sm:$0xff] }
 0x198   :  { %v8167_v45 = vpop.f32.mrf.mxu0  ;;  %v8253_v58 = vpop.f32.mrf.mxu1  ;;  %8732 = vmatprep.subr.mxu0 %v6844_v34  ;;  %13742 = vst [vmem:[#allocation47_spill] sm:$0xff] %v10967_v19  ;;  %8592 = vmatprep.subr.mxu1 %v10967_v19 }
 0x199   :  { %v1628_v53 = vadd.f32 %v8167_v45, %v10694_v56  ;;  %8733 = vmatpush3.msra.mxu0 %v6844_v34 }
 0x19a   :  { %v10950_v38 = vpop.f32.mrf.mxu0  ;;  %v10952_v2 = vpop.f32.mrf.mxu1  ;;  %8734 = vmatprep.subr.mxu0 %v6843_v50 }
 0x19b   :  { %13738 = vst [vmem:[#allocation43_spill] sm:$0xff] %v10950_v38  ;;  %13739 = vst [vmem:[#allocation44_spill] sm:$0xff] %v10952_v2  ;;  %v10957_v62 = vadd.f32 %v8253_v58, %v1628_v53  ;;  %8735 = vmatpush3.msra.mxu0 %v6843_v50 }
 0x19c   :  { %v8170_v11 = vpop.f32.mrf.mxu0  ;;  %v8256_v37 = vpop.f32.mrf.mxu1 }
 0x19d   :  { %v1630_v12 = vadd.f32 %v8170_v11, %v10707_v10 }
 0x19e   :  { %v10960_v56 = vpop.f32.mrf.mxu0  ;;  %v10962_v45 = vpop.f32.mrf.mxu1 }
 0x19f   :  { %13740 = vst [vmem:[#allocation45_spill] sm:$0xff] %v10960_v56  ;;  %13741 = vst [vmem:[#allocation46_spill] sm:$0xff] %v10962_v45  ;;  %v10969_v2 = vadd.f32 %v8256_v37, %v1630_v12 }
 0x1a0   :  { %v8173_v58 = vpop.f32.mrf.mxu0  ;;  %v8259_v53 = vpop.f32.mrf.mxu1 }
 0x1a1   :  { %v1632_v34 = vadd.f32 %v8173_v58, %v10719_v7  ;;  %v10989_v7 = vld [vmem:[%s13608_s6 + $0x2f8] sm:$0xff] }
 0x1a2   :  { %v10973_v10 = vpop.f32.mrf.mxu0  ;;  %v10975_v11 = vpop.f32.mrf.mxu1  ;;  %13745 = vst [vmem:[#allocation50_spill] sm:$0xff] %v10989_v7  ;;  %8816 = vmatprep.subr.mxu0 %v10989_v7 }
 0x1a3   :  { %13743 = vst [vmem:[#allocation48_spill] sm:$0xff] %v10973_v10  ;;  %13744 = vst [vmem:[#allocation49_spill] sm:$0xff] %v10975_v11  ;;  %v10977_v56 = vadd.f32 %v8259_v53, %v1632_v34 }
 0x1a4   :  { %v8176_v50 = vpop.f32.mrf.mxu0  ;;  %v8262_v45 = vpop.f32.mrf.mxu1 }
 0x1a5   :  { %v1634_v38 = vadd.f32 %v8176_v50, %v10732_v9 }
 0x1a6   :  { %v10980_v14 = vpop.f32.mrf.mxu0  ;;  %v10982_v12 = vpop.f32.mrf.mxu1 }
 0x1a7   :  { %v10984_v37 = vadd.f32 %v8262_v45, %v1634_v38 }
 0x1a8   :  { %v8179_v58 = vpop.f32.mrf.mxu0  ;;  %v8265_v10 = vpop.f32.mrf.mxu1 }
 0x1a9   :  { %v1636_v53 = vadd.f32 %v8179_v58, %v10748_v16 }
 0x1aa   :  { %v10993_v34 = vpop.f32.mrf.mxu0  ;;  %v10995_v9 = vpop.f32.mrf.mxu1 }
 0x1ab   :  { %v10997_v50 = vadd.f32 %v8265_v10, %v1636_v53 }
 0x1ac   :  { %v8182_v11 = vpop.f32.mrf.mxu0  ;;  %v8268_v38 = vpop.f32.mrf.mxu1 }
 0x1ad   :  { %v1638_v45 = vadd.f32 %v8182_v11, %v10760_v39 }
 0x1ae   :  { %v11000_v23 = vpop.f32.mrf.mxu0  ;;  %v11002_v31 = vpop.f32.mrf.mxu1 }
 0x1af   :  { %v11004_v55 = vadd.f32 %v8268_v38, %v1638_v45 }
 0x1b0   :  { %v8185_v26 = vpop.f32.mrf.mxu0  ;;  %v8271_v7 = vpop.f32.mrf.mxu1 }
 0x1b1   :  { %v1640_v16 = vadd.f32 %v8185_v26, %v10773_v30 }
 0x1b2   :  { %v11007_v58 = vpop.f32.mrf.mxu0  ;;  %v11009_v19 = vpop.f32.mrf.mxu1 }
 0x1b3   :  { %v11011_v10 = vadd.f32 %v8271_v7, %v1640_v16 }
 0x1b4   :  { %v8188_v53 = vpop.f32.mrf.mxu0  ;;  %v8274_v4 = vpop.f32.mrf.mxu1 }
 0x1b5   :  { %v1642_v39 = vadd.f32 %v8188_v53, %v10785_v36 }
 0x1b6   :  { %v11014_v11 = vpop.f32.mrf.mxu0  ;;  %v11016_v13 = vpop.f32.mrf.mxu1 }
 0x1b7   :  { %v11018_v38 = vadd.f32 %v8274_v4, %v1642_v39 }
 0x1b8   :  { %v8191_v45 = vpop.f32.mrf.mxu0  ;;  %v8277_v20 = vpop.f32.mrf.mxu1 }
 0x1b9   :  { %v1644_v30 = vadd.f32 %v8191_v45, %v10796_v0 }
 0x1ba   :  { %v11021_v26 = vpop.f32.mrf.mxu0  ;;  %v11023_v25 = vpop.f32.mrf.mxu1 }
 0x1bb   :  { %v11025_v7 = vadd.f32 %v8277_v20, %v1644_v30 }
 0x1bc   :  { %v8312_v16 = vpop.f32.mrf.mxu0  ;;  %v11027_v47 = vpop.f32.mrf.mxu1 }
 0x1bd   :  { %v11030_v36 = vadd.f32 %v8312_v16, %v10808_v32 }
 0x1be   :  { %v11032_v53 = vpop.f32.mrf.mxu0  ;;  %v11034_v4 = vpop.f32.mrf.mxu1 }
 0x1bf   :  { %13746 = vst [vmem:[#allocation51_spill] sm:$0xff] %v11032_v53  ;;  %13747 = vst [vmem:[#allocation52_spill] sm:$0xff] %v11034_v4 }
 0x1c0   :  { %v8315_v39 = vpop.f32.mrf.mxu0  ;;  %v11036_v48 = vpop.f32.mrf.mxu1 }
 0x1c1   :  { %v11039_v0 = vadd.f32 %v8315_v39, %v10820_v46 }
 0x1c2   :  { %v11041_v45 = vpop.f32.mrf.mxu0  ;;  %v11043_v20 = vpop.f32.mrf.mxu1 }
 0x1c4   :  { %v8318_v30 = vpop.f32.mrf.mxu0  ;;  %v8404_v8 = vpop.f32.mrf.mxu1 }
 0x1c5   :  { %v2284_v40 = vadd.f32 %v8318_v30, %v10838_v59 }
 0x1c6   :  { %v11046_v32 = vpop.f32.mrf.mxu0  ;;  %v11048_v16 = vpop.f32.mrf.mxu1 }
 0x1c7   :  { %v11050_v53 = vadd.f32 %v8404_v8, %v2284_v40 }
 0x1c8   :  { %v8321_v4 = vpop.f32.mrf.mxu0  ;;  %v11052_v63 = vpop.f32.mrf.mxu1 }
 0x1c9   :  { %13748 = vst [vmem:[#allocation53_spill] sm:$0xff] %v11050_v53  ;;  %13749 = vst [vmem:[#allocation54_spill] sm:$0xff] %v11052_v63  ;;  %v11055_v46 = vadd.f32 %v8321_v4, %v10856_v3 }
 0x1ca   :  { %v11057_v39 = vpop.f32.mrf.mxu0  ;;  %v11059_v28 = vpop.f32.mrf.mxu1 }
 0x1cb   :  { %13750 = vst [vmem:[#allocation55_spill] sm:$0xff] %v11055_v46  ;;  %13751 = vst [vmem:[#allocation56_spill] sm:$0xff] %v11059_v28 }
 0x1cc   :  { %v8324_v15 = vpop.f32.mrf.mxu0  ;;  %v11061_v54 = vpop.f32.mrf.mxu1 }
 0x1cd   :  { %13752 = vst [vmem:[#allocation57_spill] sm:$0xff] %v11061_v54  ;;  %v11064_v59 = vadd.f32 %v8324_v15, %v10877_v33 }
 0x1ce   :  { %v11066_v30 = vpop.f32.mrf.mxu0  ;;  %v11068_v40 = vpop.f32.mrf.mxu1 }
 0x1cf   :  { %13753 = vst [vmem:[#allocation58_spill] sm:$0xff] %v11064_v59  ;;  %13754 = vst [vmem:[#allocation59_spill] sm:$0xff] %v11068_v40 }
 0x1d0   :  { %v8327_v8 = vpop.f32.mrf.mxu0  ;;  %v11070_v53 = vpop.f32.mrf.mxu1 }
 0x1d1   :  { %13755 = vst [vmem:[#allocation60_spill] sm:$0xff] %v11070_v53  ;;  %v11073_v3 = vadd.f32 %v8327_v8, %v10896_v5 }
 0x1d2   :  { %v11075_v4 = vpop.f32.mrf.mxu0  ;;  %v11077_v63 = vpop.f32.mrf.mxu1 }
 0x1d3   :  { %13756 = vst [vmem:[#allocation61_spill] sm:$0xff] %v11073_v3  ;;  %13757 = vst [vmem:[#allocation62_spill] sm:$0xff] %v11077_v63 }
 0x1d4   :  { %v8330_v28 = vpop.f32.mrf.mxu0  ;;  %v11079_v46 = vpop.f32.mrf.mxu1 }
 0x1d5   :  { %13758 = vst [vmem:[#allocation63_spill] sm:$0xff] %v11079_v46  ;;  %v11082_v15 = vadd.f32 %v8330_v28, %v10915_v51 }
 0x1d6   :  { %v11084_v33 = vpop.f32.mrf.mxu0  ;;  %v11086_v54 = vpop.f32.mrf.mxu1 }
 0x1d7   :  { %13759 = vst [vmem:[#allocation64_spill] sm:$0xff] %v11082_v15  ;;  %13760 = vst [vmem:[#allocation65_spill] sm:$0xff] %v11086_v54 }
 0x1d8   :  { %v8333_v40 = vpop.f32.mrf.mxu0  ;;  %v11088_v59 = vpop.f32.mrf.mxu1 }
 0x1d9   :  { %13761 = vst [vmem:[#allocation66_spill] sm:$0xff] %v11088_v59  ;;  %v11091_v5 = vadd.f32 %v8333_v40, %v10931_v21 }
 0x1da   :  { %v11093_v8 = vpop.f32.mrf.mxu0  ;;  %v11095_v53 = vpop.f32.mrf.mxu1 }
 0x1db   :  { %13762 = vst [vmem:[#allocation67_spill] sm:$0xff] %v11091_v5  ;;  %13763 = vst [vmem:[#allocation68_spill] sm:$0xff] %v11095_v53 }
 0x1dc   :  { %v8336_v3 = vpop.f32.mrf.mxu0  ;;  %v11097_v63 = vpop.f32.mrf.mxu1 }
 0x1dd   :  { %13764 = vst [vmem:[#allocation69_spill] sm:$0xff] %v11097_v63  ;;  %v11100_v28 = vadd.f32 %v8336_v3, %v10944_v43 }
 0x1de   :  { %v11102_v51 = vpop.f32.mrf.mxu0  ;;  %v11104_v46 = vpop.f32.mrf.mxu1 }
 0x1df   :  { %13765 = vst [vmem:[#allocation70_spill] sm:$0xff] %v11100_v28  ;;  %v1298_v28 = vadd.f32 %v10727_v1, %v10730_v18 }
 0x1e0   :  { %v8339_v54 = vpop.f32.mrf.mxu0  ;;  %v11106_v15 = vpop.f32.mrf.mxu1 }
 0x1e1   :  { %13766 = vst [vmem:[#allocation71_spill] sm:$0xff] %v11106_v15  ;;  %v11109_v21 = vadd.f32 %v8339_v54, %v10957_v62  ;;  %v1633_v62 = vadd.f32 %v10980_v14, %v1298_v28 }
 0x1e2   :  { %v11111_v40 = vpop.f32.mrf.mxu0  ;;  %v11113_v59 = vpop.f32.mrf.mxu1 }
 0x1e3   :  { %13767 = vst [vmem:[#allocation72_spill] sm:$0xff] %v11109_v21  ;;  %13768 = vst [vmem:[#allocation73_spill] sm:$0xff] %v11113_v59  ;;  %v1968_v1 = vadd.f32 %v10982_v12, %v1633_v62 }
 0x1e4   :  { %v8342_v53 = vpop.f32.mrf.mxu0  ;;  %v11115_v5 = vpop.f32.mrf.mxu1 }
 0x1e5   :  { %13769 = vst [vmem:[#allocation74_spill] sm:$0xff] %v11115_v5  ;;  %v11118_v43 = vadd.f32 %v8342_v53, %v10969_v2  ;;  %v1300_v2 = vadd.f32 %v10743_v52, %v10746_v41  ;;  %v13775_v41 = vld [vmem:[#allocation5_spill] sm:$0xff] }
 0x1e6   :  { %v11120_v3 = vpop.f32.mrf.mxu0  ;;  %v11122_v63 = vpop.f32.mrf.mxu1 }
 0x1e7   :  { %13770 = vst [vmem:[#allocation75_spill] sm:$0xff] %v11122_v63  ;;  %v1635_v18 = vadd.f32 %v10993_v34, %v1300_v2 }
 0x1e8   :  { %v8345_v15 = vpop.f32.mrf.mxu0  ;;  %v11126_v54 = vpop.f32.mrf.mxu1 }
 0x1e9   :  { %13771 = vst [vmem:[#allocation76_spill] sm:$0xff] %v11126_v54  ;;  %v11130_v59 = vadd.f32 %v8345_v15, %v10977_v56  ;;  %v1302_v15 = vadd.f32 %v10755_v6, %v10758_v42  ;;  %v1970_v12 = vadd.f32 %v10995_v9, %v1635_v18  ;;  %v1304_v6 = vadd.f32 %v10768_v17, %v10771_v27  ;;  %v13778_v9 = vld [vmem:[#allocation10_spill] sm:$0xff] }
 0x1ea   :  { %v11132_v21 = vpop.f32.mrf.mxu0  ;;  %v11134_v5 = vpop.f32.mrf.mxu1 }
 0x1eb   :  { %13772 = vst [vmem:[#allocation77_spill] sm:$0xff] %v11130_v59  ;;  %13773 = vst [vmem:[#allocation78_spill] sm:$0xff] %v11134_v5  ;;  %v1637_v34 = vadd.f32 %v11000_v23, %v1302_v15 }
 0x1ec   :  { %v8348_v53 = vpop.f32.mrf.mxu0  ;;  %v11138_v63 = vpop.f32.mrf.mxu1 }
 0x1ed   :  { %13774 = vst [vmem:[#allocation79_spill] sm:$0xff] %v11138_v63  ;;  %v11143_v54 = vadd.f32 %v8348_v53, %v10984_v37  ;;  %v13776_v63 = vld [vmem:[#allocation6_spill] sm:$0xff]  ;;  %v1972_v23 = vadd.f32 %v11002_v31, %v1637_v34 }
 0x1ee   :  { %v2220_v14 = vpop.f32.mrf.mxu0  ;;  %v11145_v56 = vpop.f32.mrf.mxu1  ;;  %v622_v5 = vadd.f32 %v13776_v63, %v13775_v41  ;;  %v13777_v63 = vld [vmem:[#allocation9_spill] sm:$0xff] }
 0x1ef   :  { %v11149_v28 = vadd.f32 %v2220_v14, %v1968_v1  ;;  %v632_v18 = vadd.f32 %v13778_v9, %v13777_v63 }
 0x1f0   :  { %v8351_v59 = vpop.f32.mrf.mxu0  ;;  %v11151_v52 = vpop.f32.mrf.mxu1  ;;  %v971_v42 = vadd.f32 %v10781_v29, %v622_v5 }
 0x1f1   :  { %v11158_v37 = vadd.f32 %v8351_v59, %v10997_v50  ;;  %v1639_v50 = vadd.f32 %v11007_v58, %v1304_v6  ;;  %v973_v27 = vadd.f32 %v10792_v60, %v632_v18  ;;  %v13780_v60 = vld [vmem:[#allocation15_spill] sm:$0xff] }
 0x1f2   :  { %v2230_v62 = vpop.f32.mrf.mxu0  ;;  %v11160_v2 = vpop.f32.mrf.mxu1  ;;  %v1306_v17 = vadd.f32 %v10783_v35, %v971_v42  ;;  %v13781_v42 = vld [vmem:[#allocation14_spill] sm:$0xff] }
 0x1f3   :  { %v11165_v53 = vadd.f32 %v2230_v62, %v1970_v12  ;;  %v1974_v62 = vadd.f32 %v11009_v19, %v1639_v50  ;;  %v1308_v6 = vadd.f32 %v10794_v61, %v973_v27  ;;  %v13782_v27 = vld [vmem:[#allocation17_spill] sm:$0xff] }
 0x1f4   :  { %v8354_v1 = vpop.f32.mrf.mxu0  ;;  %v11167_v14 = vpop.f32.mrf.mxu1  ;;  %v1641_v31 = vadd.f32 %v11014_v11, %v1306_v17 }
 0x1f5   :  { %v11174_v59 = vadd.f32 %v8354_v1, %v11004_v55  ;;  %v1276_v1 = vadd.f32 %v13781_v42, %v13780_v60  ;;  %v1643_v11 = vadd.f32 %v11021_v26, %v1308_v6 }
 0x1f6   :  { %v2240_v15 = vpop.f32.mrf.mxu0  ;;  %v11176_v41 = vpop.f32.mrf.mxu1  ;;  %v1976_v19 = vadd.f32 %v11016_v13, %v1641_v31 }
 0x1f7   :  { %v11180_v29 = vadd.f32 %v2240_v15, %v1972_v23  ;;  %v1611_v18 = vadd.f32 %v10816_v57, %v1276_v1  ;;  %v2615_v57 = vadd.f32 %v11027_v47, %v11030_v36  ;;  %v11223_v1 = vld [vmem:[%s13609_s5] ss:$0 sm:$0xff] }
 0x1f8   :  { %v8357_v5 = vpop.f32.mrf.mxu0  ;;  %v11182_v12 = vpop.f32.mrf.mxu1 }
 0x1f9   :  { %v11187_v58 = vadd.f32 %v8357_v5, %v11011_v10  ;;  %v13783_v5 = vld [vmem:[#allocation16_spill] sm:$0xff]  ;;  %v1946_v26 = vadd.f32 %v10818_v22, %v1611_v18 }
 0x1fa   :  { %v2250_v55 = vpop.f32.mrf.mxu0  ;;  %v11189_v34 = vpop.f32.mrf.mxu1 }
 0x1fb   :  { %13779 = vst [vmem:[#allocation5_spill] sm:$0xff] %v11189_v34  ;;  %v11192_v35 = vadd.f32 %v2250_v55, %v1974_v62  ;;  %v1278_v62 = vadd.f32 %v13783_v5, %v13782_v27  ;;  %v1978_v55 = vadd.f32 %v11023_v25, %v1643_v11  ;;  %v13784_v25 = vld [vmem:[#allocation20_spill] sm:$0xff]  ;;  %v2281_v22 = vadd.f32 %v11041_v45, %v1946_v26  ;;  %v13824_v34 = vld [vmem:[#allocation43_spill] sm:$0xff] }
 0x1fc   :  { %v8360_v63 = vpop.f32.mrf.mxu0  ;;  %v11196_v9 = vpop.f32.mrf.mxu1  ;;  %v2617_v11 = vadd.f32 %v11036_v48, %v11039_v0 }
 0x1fd   :  { %v11201_v10 = vadd.f32 %v8360_v63, %v11018_v38  ;;  %v1613_v31 = vadd.f32 %v10834_v49, %v1278_v62  ;;  %v2616_v5 = vadd.f32 %v11043_v20, %v2281_v22  ;;  %v13792_v22 = vld [vmem:[#allocation53_spill] sm:$0xff] }
 0x1fe   :  { %v2260_v23 = vpop.f32.mrf.mxu0  ;;  %v11204_v50 = vpop.f32.mrf.mxu1 }
 0x1ff   :  { %v11206_v61 = vadd.f32 %v2260_v23, %v1976_v19  ;;  %v1948_v47 = vadd.f32 %v10836_v44, %v1613_v31  ;;  %v13786_v23 = vld [vmem:[#allocation22_spill] sm:$0xff] }
 0x200   :  { %v8363_v15 = vpop.f32.mrf.mxu0  ;;  %v8449_v17 = vpop.f32.mrf.mxu1 }
 0x201   :  { %v2314_v13 = vadd.f32 %v8363_v15, %v11025_v7  ;;  %v13785_v7 = vld [vmem:[#allocation19_spill] sm:$0xff]  ;;  %v13787_v15 = vld [vmem:[#allocation21_spill] sm:$0xff]  ;;  %v2283_v45 = vadd.f32 %v11046_v32, %v1948_v47 }
 0x202   :  { %v2270_v38 = vpop.f32.mrf.mxu0  ;;  %v1280_v63 = vadd.f32 %v13785_v7, %v13784_v25  ;;  %v13793_v47 = vld [vmem:[#allocation11_spill] sm:$0xff] }
 0x203   :  { %v11216_v6 = vadd.f32 %v2270_v38, %v1978_v55  ;;  %v11218_v60 = vadd.f32 %v8449_v17, %v2314_v13  ;;  %v1282_v17 = vadd.f32 %v13787_v15, %v13786_v23  ;;  %v13788_v13 = vld [vmem:[#allocation8_spill] sm:$0xff]  ;;  %v13789_v38 = vld [vmem:[#allocation7_spill] sm:$0xff]  ;;  %v2618_v20 = vadd.f32 %v11048_v16, %v2283_v45  ;;  %v13797_v45 = vld [vmem:[#allocation26_spill] sm:$0xff] }
 0x204   :  { %v8484_v42 = vpop.f32.mrf.mxu0  ;;  %v1615_v36 = vadd.f32 %v10852_v24, %v1280_v63 }
 0x205   :  { %v2950_v19 = vadd.f32 %v8484_v42, %v2615_v57  ;;  %v1617_v26 = vadd.f32 %v13788_v13, %v1282_v17  ;;  %v13790_v57 = vld [vmem:[#allocation24_spill] sm:$0xff]  ;;  %v13791_v42 = vld [vmem:[#allocation23_spill] sm:$0xff] }
 0x206   :  { %v11228_v49 = vpop.f32.mrf.mxu0  ;;  %v1950_v24 = vadd.f32 %v13789_v38, %v1615_v36  ;;  %v1284_v25 = vadd.f32 %v13791_v42, %v13790_v57  ;;  %v13795_v17 = vld [vmem:[#allocation55_spill] sm:$0xff]  ;;  %v13799_v38 = vld [vmem:[#allocation56_spill] sm:$0xff]  ;;  %v13800_v42 = vld [vmem:[#allocation18_spill] sm:$0xff] }
 0x207   :  { %v2993_v18 = vadd.f32 %v11223_v1, %v2950_v19  ;;  %v1952_v36 = vadd.f32 %v13793_v47, %v1617_v26 }
 0x208   :  { %v8487_v27 = vpop.f32.mrf.mxu0  ;;  %v2285_v32 = vadd.f32 %v11057_v39, %v1950_v24  ;;  %v13798_v39 = vld [vmem:[#allocation25_spill] sm:$0xff] }
 0x209   :  { %v3029_v62 = vmul.f32 0.1, %v2993_v18  ;;  %v2952_v55 = vadd.f32 %v8487_v27, %v2617_v11  ;;  %v13794_v11 = vld [vmem:[#allocation2_spill] sm:$0xff]  ;;  %v2287_v13 = vadd.f32 %v11066_v30, %v1952_v36  ;;  %v13803_v36 = vld [vmem:[#allocation57_spill] sm:$0xff] }
 0x20a   :  { %v2780_v44 = vpop.f32.mrf.mxu0  ;;  %v13796_v27 = vld [vmem:[#allocation54_spill] sm:$0xff]  ;;  %v2620_v24 = vadd.f32 %v13799_v38, %v2285_v32 }
 0x20b   :  { %v2995_v31 = vadd.f32 %v11223_v1, %v2952_v55  ;;  %v2951_v48 = vadd.f32 %v2780_v44, %v2616_v5  ;;  %v11242_v0 = vmax.f32 %v2993_v18, %v3029_v62  ;;  %v1619_v18 = vadd.f32 %v13794_v11, %v1284_v25  ;;  %v13802_v30 = vld [vmem:[#allocation58_spill] sm:$0xff] }
 0x20c   :  { %v8490_v7 = vpop.f32.mrf.mxu0  ;;  %v2621_v5 = vadd.f32 %v13796_v27, %v13795_v17  ;;  %v1286_v55 = vadd.f32 %v13798_v39, %v13797_v45  ;;  %v13804_v27 = vld [vmem:[#allocation28_spill] sm:$0xff]  ;;  %v13807_v45 = vld [vmem:[#allocation47_spill] sm:$0xff] }
 0x20d   :  { %v2994_v63 = vadd.f32 %v11223_v1, %v2951_v48  ;;  %v11250_v19 = vadd.f32 %v8490_v7, %v13792_v22  ;;  %8568 = vmatprep.mubr.f32.mxu1 %v11242_v0  ;;  %v3031_v23 = vmul.f32 0.1, %v2995_v31  ;;  %v1954_v25 = vadd.f32 %v13800_v42, %v1619_v18  ;;  %v13801_v7 = vld [vmem:[#allocation37_spill] sm:$0xff]  ;;  %v13805_v18 = vld [vmem:[#allocation27_spill] sm:$0xff] }
 0x20e   :  { %v2790_v15 = vpop.f32.mrf.mxu0  ;;  %v1621_v22 = vadd.f32 %v13801_v7, %v1286_v55  ;;  %v3113_v39 = vld [vmem:[%s13608_s6 + $0x68] sm:$0xff]  ;;  %v3112_v7 = vld [vmem:[%s13608_s6 + $0x60] sm:$0xff] }
 0x20f   :  { %v3030_v62 = vmul.f32 0.1, %v2994_v63  ;;  %v2953_v16 = vadd.f32 %v2790_v15, %v2618_v20  ;;  %v11266_v11 = vmax.f32 %v2995_v31, %v3031_v23  ;;  %v3114_v20 = vld [vmem:[%s13608_s6 + $0x70] sm:$0xff]  ;;  %v2623_v15 = vadd.f32 %v13803_v36, %v13802_v30  ;;  %v13809_v42 = vld [vmem:[#allocation39_spill] sm:$0xff] }
 0x210   :  { %v8493_v44 = vpop.f32.mrf.mxu0  ;;  %v2289_v31 = vadd.f32 %v11075_v4, %v1954_v25 }
 0x211   :  { %v11261_v48 = vmax.f32 %v2994_v63, %v3030_v62  ;;  %v2996_v26 = vadd.f32 %v11223_v1, %v2953_v16  ;;  %v2956_v57 = vadd.f32 %v8493_v44, %v2621_v5  ;;  %v1288_v5 = vadd.f32 %v13805_v18, %v13804_v27  ;;  %v13806_v62 = vld [vmem:[#allocation59_spill] sm:$0xff] }
 0x212   :  { %v2800_v47 = vpop.f32.mrf.mxu0  ;;  %v2622_v16 = vadd.f32 %v13806_v62, %v2287_v13 }
 0x213   :  { %v3032_v32 = vmul.f32 0.1, %v2996_v26  ;;  %v2999_v63 = vadd.f32 %v11223_v1, %v2956_v57  ;;  %v2955_v17 = vadd.f32 %v2800_v47, %v2620_v24  ;;  %8569 = vmatmul.mubr.f32.vlgmr.msra.gmra.mxu1 %v11261_v48  ;;  %v13808_v57 = vld [vmem:[#allocation38_spill] sm:$0xff]  ;;  %v1623_v4 = vadd.f32 %v13809_v42, %v1288_v5  ;;  %v13817_v42 = vld [vmem:[#allocation64_spill] sm:$0xff] }
 0x214   :  { %v8496_v23 = vpop.f32.mrf.mxu0  ;;  %8571 = vmatprep.mubr.f32.mxu1 %v11266_v11  ;;  %8593 = vmatpush3.msra.mxu1 %v13807_v45  ;;  %v1956_v13 = vadd.f32 %v13808_v57, %v1621_v22  ;;  %v13814_v45 = vld [vmem:[#allocation41_spill] sm:$0xff] }
 0x215   :  { %v11284_v55 = vmax.f32 %v2996_v26, %v3032_v32  ;;  %v3035_v44 = vmul.f32 0.1, %v2999_v63  ;;  %v2998_v38 = vadd.f32 %v11223_v1, %v2955_v17  ;;  %v2958_v24 = vadd.f32 %v8496_v23, %v2623_v15  ;;  %8594 = vmatprep.subr.mxu1 %v3114_v20  ;;  %v13810_v15 = vld [vmem:[#allocation30_spill] sm:$0xff]  ;;  %v13811_v32 = vld [vmem:[#allocation29_spill] sm:$0xff] }
 0x216   :  { %v2810_v25 = vpop.f32.mrf.mxu0  ;;  %8595 = vmatpush3.msra.mxu1 %v3114_v20  ;;  %v1290_v22 = vadd.f32 %v13811_v32, %v13810_v15  ;;  %v2291_v17 = vadd.f32 %v11084_v33, %v1956_v13  ;;  %v3111_v20 = vld [vmem:[%s13608_s6 + $0x58] sm:$0xff]  ;;  %v13820_v15 = vld [vmem:[#allocation31_spill] sm:$0xff] }
 0x217   :  { %v11292_v47 = vmax.f32 %v2999_v63, %v3035_v44  ;;  %v3034_v30 = vmul.f32 0.1, %v2998_v38  ;;  %v3001_v26 = vadd.f32 %v11223_v1, %v2958_v24  ;;  %v2957_v36 = vadd.f32 %v2810_v25, %v2622_v16  ;;  %8572 = vmatmul.mubr.f32.gmra.mxu1 %v11284_v55  ;;  %8596 = vmatprep.subr.mxu1 %v3113_v39  ;;  %v13812_v63 = vld [vmem:[#allocation62_spill] sm:$0xff]  ;;  %v13813_v16 = vld [vmem:[#allocation40_spill] sm:$0xff]  ;;  %v13815_v57 = vld [vmem:[#allocation13_spill] sm:$0xff] }
 0x218   :  { %v11299_v27 = vpop.f32.mrf.mxu0  ;;  %8597 = vmatpush3.msra.mxu1 %v3113_v39  ;;  %v2624_v18 = vadd.f32 %v13812_v63, %v2289_v31  ;;  %v1958_v23 = vadd.f32 %v13813_v16, %v1623_v4  ;;  %v1625_v33 = vadd.f32 %v13814_v45, %v1290_v22  ;;  %v3110_v39 = vld [vmem:[%s13608_s6 + $0x50] sm:$0xff]  ;;  %v13818_v25 = vld [vmem:[#allocation63_spill] sm:$0xff]  ;;  %v13821_v22 = vld [vmem:[#allocation65_spill] sm:$0xff] }
 0x219   :  { %v3000_v5 = vadd.f32 %v11223_v1, %v2957_v36  ;;  %8574 = vmatprep.mubr.f32.mxu1 %v11292_v47  ;;  %v11307_v62 = vmax.f32 %v2998_v38, %v3034_v30  ;;  %8598 = vmatprep.subr.mxu1 %v3112_v7  ;;  %v3037_v44 = vmul.f32 0.1, %v3001_v26  ;;  %v13816_v31 = vld [vmem:[#allocation12_spill] sm:$0xff]  ;;  %v2627_v36 = vadd.f32 %v13818_v25, %v13817_v42  ;;  %v13823_v42 = vld [vmem:[#allocation42_spill] sm:$0xff] }
 0x21a   :  { %v2820_v24 = vpop.f32.mrf.mxu0  ;;  %8599 = vmatpush3.msra.mxu1 %v3112_v7  ;;  %v1274_v13 = vadd.f32 %v13816_v31, %v13815_v57  ;;  %v6889_v4 = vld [vmem:[%s13608_s6 + $0x2f0] sm:$0xff]  ;;  %v2626_v63 = vadd.f32 %v13821_v22, %v2291_v17  ;;  %v2293_v16 = vadd.f32 %v11093_v8, %v1958_v23  ;;  %v13822_v31 = vld [vmem:[#allocation50_spill] sm:$0xff]  ;;  %v1960_v25 = vadd.f32 %v13823_v42, %v1625_v33  ;;  %v3109_v8 = vld [vmem:[%s13608_s6 + $0x48] sm:$0xff] }
 0x21b   :  { %v3036_v38 = vmul.f32 0.1, %v3000_v5  ;;  %v2959_v30 = vadd.f32 %v2820_v24, %v2624_v18  ;;  %8736 = vmatprep.mubr.f32.mxu0 %v11307_v62  ;;  %8600 = vmatprep.subr.mxu1 %v3111_v20  ;;  %v13819_v7 = vld [vmem:[#allocation32_spill] sm:$0xff]  ;;  %v13828_v33 = vld [vmem:[#allocation33_spill] sm:$0xff] }
 0x21c   :  { %v1292_v32 = vadd.f32 %v13820_v15, %v13819_v7  ;;  %v8502_v45 = vpop.f32.mrf.mxu0  ;;  %8737 = vmatmul.mubr.f32.vlgmr.msra.gmra.mxu0 %v11292_v47  ;;  %8601 = vmatpush3.msra.mxu1 %v3111_v20  ;;  %v11333_v15 = vmax.f32 %v3001_v26, %v3037_v44  ;;  %v13825_v20 = vld [vmem:[#allocation67_spill] sm:$0xff]  ;;  %v13827_v26 = vld [vmem:[#allocation34_spill] sm:$0xff]  ;;  %v2295_v22 = vadd.f32 %v11102_v51, %v1960_v25  ;;  %v13831_v51 = vld [vmem:[#allocation44_spill] sm:$0xff] }
 0x21d   :  { %v11327_v57 = vmax.f32 %v3000_v5, %v3036_v38  ;;  %v3002_v18 = vadd.f32 %v11223_v1, %v2959_v30  ;;  %v2962_v24 = vadd.f32 %v8502_v45, %v2627_v36  ;;  %8602 = vmatprep.subr.mxu1 %v3110_v39  ;;  %8817 = vmatpush3.msra.mxu0 %v13822_v31  ;;  %v13826_v5 = vld [vmem:[#allocation66_spill] sm:$0xff] }
 0x21e   :  { %v1627_v7 = vadd.f32 %v13824_v34, %v1292_v32  ;;  %v2830_v17 = vpop.f32.mrf.mxu0  ;;  %8603 = vmatpush3.msra.mxu1 %v3110_v39  ;;  %8818 = vmatprep.subr.mxu0 %v6889_v4  ;;  %v2629_v23 = vadd.f32 %v13826_v5, %v13825_v20  ;;  %v6888_v34 = vld [vmem:[%s13608_s6 + $0x2e8] sm:$0xff]  ;;  %v1294_v44 = vadd.f32 %v13828_v33, %v13827_v26  ;;  %v13829_v39 = vld [vmem:[#allocation68_spill] sm:$0xff]  ;;  %v13832_v5 = vld [vmem:[#allocation45_spill] sm:$0xff] }
 0x21f   :  { %v3038_v36 = vmul.f32 0.1, %v3002_v18  ;;  %v3005_v38 = vadd.f32 %v11223_v1, %v2962_v24  ;;  %v2961_v30 = vadd.f32 %v2830_v17, %v2626_v63  ;;  %8575 = vmatmul.mubr.f32.gmra.mxu1 %v11327_v57  ;;  %8739 = vmatprep.mubr.f32.mxu0 %v11327_v57  ;;  %v2628_v32 = vadd.f32 %v13829_v39, %v2293_v16  ;;  %v3108_v63 = vld [vmem:[%s13608_s6 + $0x40] sm:$0xff]  ;;  %v13830_v16 = vld [vmem:[#allocation3_spill] sm:$0xff] }
 0x220   :  { %v8505_v45 = vpop.f32.mrf.mxu0  ;;  %8577 = vmatprep.mubr.f32.mxu1 %v11333_v15  ;;  %8740 = vmatmul.mubr.f32.gmra.mxu0 %v11333_v15  ;;  %v1609_v20 = vadd.f32 %v13830_v16, %v1274_v13  ;;  %v1962_v25 = vadd.f32 %v13831_v51, %v1627_v7  ;;  %v1629_v26 = vadd.f32 %v13832_v5, %v1294_v44  ;;  %v3107_v13 = vld [vmem:[%s13608_s6 + $0x38] sm:$0xff]  ;;  %v13834_v7 = vld [vmem:[#allocation35_spill] sm:$0xff]  ;;  %v13835_v16 = vld [vmem:[#allocation4_spill] sm:$0xff] }
 0x221   :  { %v11355_v24 = vmax.f32 %v3002_v18, %v3038_v36  ;;  %v3041_v31 = vmul.f32 0.1, %v3005_v38  ;;  %v3004_v42 = vadd.f32 %v11223_v1, %v2961_v30  ;;  %v2964_v17 = vadd.f32 %v8505_v45, %v2629_v23  ;;  %8604 = vmatprep.subr.mxu1 %v3109_v8  ;;  %8819 = vmatpush3.msra.mxu0 %v6889_v4  ;;  %v6887_v18 = vld [vmem:[%s13608_s6 + $0x2e0] sm:$0xff]  ;;  %v13833_v4 = vld [vmem:[#allocation36_spill] sm:$0xff] }
 0x222   :  { %v2840_v33 = vpop.f32.mrf.mxu0  ;;  %8605 = vmatpush3.msra.mxu1 %v3109_v8  ;;  %8820 = vmatprep.subr.mxu0 %v6888_v34  ;;  %v1296_v8 = vadd.f32 %v13834_v7, %v13833_v4  ;;  %v2297_v44 = vadd.f32 %v11111_v40, %v1962_v25  ;;  %v1944_v51 = vadd.f32 %v13835_v16, %v1609_v20  ;;  %v13836_v40 = vld [vmem:[#allocation46_spill] sm:$0xff]  ;;  %v13837_v5 = vld [vmem:[#allocation48_spill] sm:$0xff] }
 0x223   :  { %v11364_v36 = vmax.f32 %v3005_v38, %v3041_v31  ;;  %v3040_v39 = vmul.f32 0.1, %v3004_v42  ;;  %v3007_v23 = vadd.f32 %v11223_v1, %v2964_v17  ;;  %v2963_v30 = vadd.f32 %v2840_v33, %v2628_v32  ;;  %8578 = vmatmul.mubr.f32.gmra.mxu1 %v11355_v24  ;;  %8606 = vmatprep.subr.mxu1 %v3108_v63  ;;  %v6886_v17 = vld [vmem:[%s13608_s6 + $0x2d8] sm:$0xff]  ;;  %v6885_v20 = vld [vmem:[%s13608_s6 + $0x2d0] sm:$0xff] }
 0x224   :  { %v11374_v45 = vpop.f32.mrf.mxu0  ;;  %8821 = vmatpush3.msra.mxu0 %v6888_v34  ;;  %8607 = vmatpush3.msra.mxu1 %v3108_v63  ;;  %v2630_v38 = vadd.f32 %v11104_v46, %v2295_v22  ;;  %v1964_v25 = vadd.f32 %v13836_v40, %v1629_v26  ;;  %v1631_v34 = vadd.f32 %v13837_v5, %v1296_v8  ;;  %v3106_v46 = vld [vmem:[%s13608_s6 + $0x30] sm:$0xff]  ;;  %v13840_v26 = vld [vmem:[#allocation51_spill] sm:$0xff]  ;;  %v13841_v8 = vld [vmem:[#allocation73_spill] sm:$0xff] }
 0x225   :  { %v3006_v32 = vadd.f32 %v11223_v1, %v2963_v30  ;;  %8580 = vmatprep.mubr.f32.mxu1 %v11364_v36  ;;  %v11379_v31 = vmax.f32 %v3004_v42, %v3040_v39  ;;  %8822 = vmatprep.subr.mxu0 %v6887_v18  ;;  %v3043_v63 = vmul.f32 0.1, %v3007_v23  ;;  %v13838_v22 = vld [vmem:[#allocation72_spill] sm:$0xff]  ;;  %v13839_v42 = vld [vmem:[#allocation71_spill] sm:$0xff]  ;;  %v2279_v7 = vadd.f32 %v13840_v26, %v1944_v51 }
 0x226   :  { %v2850_v33 = vpop.f32.mrf.mxu0  ;;  %8608 = vmatprep.subr.mxu1 %v3107_v13  ;;  %8823 = vmatpush3.msra.mxu0 %v6887_v18  ;;  %v2633_v39 = vadd.f32 %v13839_v42, %v13838_v22  ;;  %v2632_v18 = vadd.f32 %v13841_v8, %v2297_v44  ;;  %v2299_v16 = vadd.f32 %v11120_v3, %v1964_v25  ;;  %v3105_v3 = vld [vmem:[%s13608_s6 + $0x28] sm:$0xff]  ;;  %v13843_v44 = vld [vmem:[#allocation74_spill] sm:$0xff] }
 0x227   :  { %v3042_v30 = vmul.f32 0.1, %v3006_v32  ;;  %v2965_v4 = vadd.f32 %v2850_v33, %v2630_v38  ;;  %8742 = vmatprep.mubr.f32.mxu0 %v11379_v31  ;;  %8609 = vmatpush3.msra.mxu1 %v3107_v13  ;;  %v13842_v13 = vld [vmem:[#allocation49_spill] sm:$0xff]  ;;  %v11404_v42 = vmax.f32 %v3007_v23, %v3043_v63  ;;  %v6884_v23 = vld [vmem:[%s13608_s6 + $0x2c8] sm:$0xff] }
 0x228   :  { %v8511_v40 = vpop.f32.mrf.mxu0  ;;  %8743 = vmatmul.mubr.f32.gmra.mxu0 %v11364_v36  ;;  %8824 = vmatprep.subr.mxu0 %v6886_v17  ;;  %v1966_v22 = vadd.f32 %v13842_v13, %v1631_v34  ;;  %v13845_v63 = vld [vmem:[#allocation75_spill] sm:$0xff] }
 0x229   :  { %v11400_v5 = vmax.f32 %v3006_v32, %v3042_v30  ;;  %v3008_v38 = vadd.f32 %v11223_v1, %v2965_v4  ;;  %v2968_v33 = vadd.f32 %v8511_v40, %v2633_v39  ;;  %8610 = vmatprep.subr.mxu1 %v3106_v46  ;;  %8825 = vmatpush3.msra.mxu0 %v6886_v17  ;;  %v13844_v17 = vld [vmem:[#allocation52_spill] sm:$0xff] }
 0x22a   :  { %v2860_v51 = vpop.f32.mrf.mxu0  ;;  %8611 = vmatpush3.msra.mxu1 %v3106_v46  ;;  %8826 = vmatprep.subr.mxu0 %v6885_v20  ;;  %v2635_v32 = vadd.f32 %v13843_v44, %v11118_v43  ;;  %v2614_v34 = vadd.f32 %v13844_v17, %v2279_v7  ;;  %v2634_v46 = vadd.f32 %v13845_v63, %v2299_v16  ;;  %v3104_v43 = vld [vmem:[%s13608_s6 + $0x20] sm:$0xff]  ;;  %v13847_v63 = vld [vmem:[#allocation79_spill] sm:$0xff] }
 0x22b   :  { %v3044_v25 = vmul.f32 0.1, %v3008_v38  ;;  %v3011_v30 = vadd.f32 %v11223_v1, %v2968_v33  ;;  %v2967_v39 = vadd.f32 %v2860_v51, %v2632_v18  ;;  %8581 = vmatmul.mubr.f32.gmra.mxu1 %v11400_v5  ;;  %8745 = vmatprep.mubr.f32.mxu0 %v11400_v5  ;;  %v2301_v4 = vadd.f32 %v11132_v21, %v1966_v22  ;;  %v6883_v16 = vld [vmem:[%s13608_s6 + $0x2c0] sm:$0xff] }
 0x22c   :  { %v8514_v26 = vpop.f32.mrf.mxu0  ;;  %8583 = vmatprep.mubr.f32.mxu1 %v11404_v42  ;;  %8746 = vmatmul.mubr.f32.gmra.mxu0 %v11404_v42  ;;  %v2949_v7 = vadd.f32 %v11228_v49, %v2614_v34  ;;  %v3103_v49 = vld [vmem:[%s13608_s6 + $0x18] sm:$0xff] }
 0x22d   :  { %v11425_v8 = vmax.f32 %v3008_v38, %v3044_v25  ;;  %v3047_v18 = vmul.f32 0.1, %v3011_v30  ;;  %v3010_v40 = vadd.f32 %v11223_v1, %v2967_v39  ;;  %v2970_v33 = vadd.f32 %v8514_v26, %v2635_v32  ;;  %8612 = vmatprep.subr.mxu1 %v3105_v3  ;;  %8827 = vmatpush3.msra.mxu0 %v6885_v20 }
 0x22e   :  { %v2870_v21 = vpop.f32.mrf.mxu0  ;;  %8613 = vmatpush3.msra.mxu1 %v3105_v3  ;;  %8828 = vmatprep.subr.mxu0 %v6884_v23  ;;  %v13846_v3 = vld [vmem:[#allocation78_spill] sm:$0xff]  ;;  %v2992_v39 = vadd.f32 %v11223_v1, %v2949_v7 }
 0x22f   :  { %v11432_v13 = vmax.f32 %v3011_v30, %v3047_v18  ;;  %v3046_v22 = vmul.f32 0.1, %v3010_v40  ;;  %v3013_v38 = vadd.f32 %v11223_v1, %v2970_v33  ;;  %v2969_v51 = vadd.f32 %v2870_v21, %v2634_v46  ;;  %8584 = vmatmul.mubr.f32.gmra.mxu1 %v11425_v8  ;;  %8614 = vmatprep.subr.mxu1 %v3104_v43  ;;  %v6882_v30 = vld [vmem:[%s13608_s6 + $0x2b8] sm:$0xff] }
 0x230   :  { %v11439_v20 = vpop.f32.mrf.mxu0  ;;  %8829 = vmatpush3.msra.mxu0 %v6884_v23  ;;  %8615 = vmatpush3.msra.mxu1 %v3104_v43  ;;  %v2636_v44 = vadd.f32 %v13846_v3, %v2301_v4  ;;  %v3102_v23 = vld [vmem:[%s13608_s6 + $0x10] sm:$0xff]  ;;  %v2639_v46 = vadd.f32 %v13847_v63, %v11143_v54  ;;  %v2638_v18 = vadd.f32 %v11145_v56, %v11149_v28  ;;  %v3028_v21 = vmul.f32 0.1, %v2992_v39  ;;  %v3101_v56 = vld [vmem:[%s13608_s6 + $0x8] sm:$0xff] }
 0x231   :  { %v3012_v32 = vadd.f32 %v11223_v1, %v2969_v51  ;;  %8586 = vmatprep.mubr.f32.mxu1 %v11432_v13  ;;  %v11444_v25 = vmax.f32 %v3010_v40, %v3046_v22  ;;  %8830 = vmatprep.subr.mxu0 %v6883_v16  ;;  %v3049_v17 = vmul.f32 0.1, %v3013_v38  ;;  %v6881_v43 = vld [vmem:[%s13608_s6 + $0x2b0] sm:$0xff]  ;;  %v2641_v28 = vadd.f32 %v11151_v52, %v11158_v37  ;;  %v3100_v52 = vld [vmem:[%s13608_s6] sm:$0xff] }
 0x232   :  { %v2880_v34 = vpop.f32.mrf.mxu0  ;;  %8616 = vmatprep.subr.mxu1 %v3103_v49  ;;  %8831 = vmatpush3.msra.mxu0 %v6883_v16 }
 0x233   :  { %v3048_v4 = vmul.f32 0.1, %v3012_v32  ;;  %v2971_v26 = vadd.f32 %v2880_v34, %v2636_v44  ;;  %8748 = vmatprep.mubr.f32.mxu0 %v11444_v25  ;;  %8617 = vmatpush3.msra.mxu1 %v3103_v49  ;;  %v11465_v16 = vmax.f32 %v3013_v38, %v3049_v17  ;;  %v6880_v38 = vld [vmem:[%s13608_s6 + $0x2a8] sm:$0xff]  ;;  %v2640_v44 = vadd.f32 %v11160_v2, %v11165_v53  ;;  %v6879_v2 = vld [vmem:[%s13608_s6 + $0x2a0] sm:$0xff] }
 0x234   :  { %v8520_v40 = vpop.f32.mrf.mxu0  ;;  %8749 = vmatmul.mubr.f32.gmra.mxu0 %v11432_v13  ;;  %8832 = vmatprep.subr.mxu0 %v6882_v30 }
 0x235   :  { %v11462_v33 = vmax.f32 %v3012_v32, %v3048_v4  ;;  %v3014_v54 = vadd.f32 %v11223_v1, %v2971_v26  ;;  %v2974_v7 = vadd.f32 %v8520_v40, %v2639_v46  ;;  %8618 = vmatprep.subr.mxu1 %v3102_v23  ;;  %8833 = vmatpush3.msra.mxu0 %v6882_v30  ;;  %v6842_v4 = vld [vmem:[%s13608_s6 + $0x178] sm:$0xff] }
 0x236   :  { %v2890_v22 = vpop.f32.mrf.mxu0  ;;  %8619 = vmatpush3.msra.mxu1 %v3102_v23  ;;  %8834 = vmatprep.subr.mxu0 %v6881_v43  ;;  %v3064_v23 = vmax.f32 %v2992_v39, %v3028_v21 }
 0x237   :  { %v3050_v51 = vmul.f32 0.1, %v3014_v54  ;;  %v3017_v49 = vadd.f32 %v11223_v1, %v2974_v7  ;;  %v2973_v3 = vadd.f32 %v2890_v22, %v2638_v18  ;;  %8587 = vmatmul.mubr.f32.gmra.mxu1 %v11462_v33  ;;  %8751 = vmatprep.mubr.f32.mxu0 %v11462_v33  ;;  %v6841_v22 = vld [vmem:[%s13608_s6 + $0x170] sm:$0xff] }
 0x238   :  { %v8523_v32 = vpop.f32.mrf.mxu0  ;;  %8589 = vmatprep.mubr.f32.mxu1 %v11465_v16  ;;  %8752 = vmatmul.mubr.f32.gmra.mxu0 %v11465_v16 }
 0x239   :  { %v11485_v37 = vmax.f32 %v3014_v54, %v3050_v51  ;;  %v3016_v30 = vadd.f32 %v11223_v1, %v2973_v3  ;;  %v2976_v17 = vadd.f32 %v8523_v32, %v2641_v28  ;;  %8620 = vmatprep.subr.mxu1 %v3101_v56  ;;  %8835 = vmatpush3.msra.mxu0 %v6881_v43  ;;  %v3053_v53 = vmul.f32 0.1, %v3017_v49  ;;  %v6878_v54 = vld [vmem:[%s13608_s6 + $0x298] sm:$0xff]  ;;  %v6877_v28 = vld [vmem:[%s13608_s6 + $0x290] sm:$0xff] }
 0x23a   :  { %v2900_v34 = vpop.f32.mrf.mxu0  ;;  %8621 = vmatpush3.msra.mxu1 %v3101_v56  ;;  %8836 = vmatprep.subr.mxu0 %v6880_v38 }
 0x23b   :  { %v3052_v63 = vmul.f32 0.1, %v3016_v30  ;;  %v2975_v46 = vadd.f32 %v2900_v34, %v2640_v44  ;;  %8590 = vmatmul.mubr.f32.gmra.mxu1 %v11485_v37  ;;  %8622 = vmatprep.subr.mxu1 %v3100_v52  ;;  %v3019_v39 = vadd.f32 %v11223_v1, %v2976_v17  ;;  %v11506_v7 = vmax.f32 %v3017_v49, %v3053_v53  ;;  %v13849_v44 = vld [vmem:[#allocation60_spill] sm:$0xff]  ;;  %v6838_v53 = vld [vmem:[%s13608_s6 + $0x158] sm:$0xff] }
 0x23c   :  { %v11495_v26 = vpop.f32.mrf.mxu0  ;;  %8624 = vmatprep.mubr.f32.mxu1 %v3064_v23  ;;  %8837 = vmatpush3.msra.mxu0 %v6880_v38  ;;  %v13848_v38 = vld [vmem:[#allocation61_spill] sm:$0xff]  ;;  %v6839_v23 = vld [vmem:[%s13608_s6 + $0x160] sm:$0xff] }
 0x23d   :  { %v3018_v43 = vadd.f32 %v11223_v1, %v2975_v46  ;;  %8623 = vmatpush3.msra.mxu1 %v3100_v52  ;;  %8838 = vmatprep.subr.mxu0 %v6879_v2  ;;  %v11499_v18 = vmax.f32 %v3016_v30, %v3052_v63  ;;  %v3055_v51 = vmul.f32 0.1, %v3019_v39  ;;  %v2625_v32 = vadd.f32 %v13849_v44, %v13848_v38  ;;  %v6876_v30 = vld [vmem:[%s13608_s6 + $0x288] sm:$0xff]  ;;  %v6835_v44 = vld [vmem:[%s13608_s6 + $0x140] sm:$0xff] }
 0x23e   :  { %v11501_v40 = vpop.f32.mrf.mxu0  ;;  %8648 = vmatprep.subr.mxu1 %v6842_v4  ;;  %8839 = vmatpush3.msra.mxu0 %v6879_v2 }
 0x23f   :  { %v3054_v21 = vmul.f32 0.1, %v3018_v43  ;;  %8625 = vmatmul.mubr.f32.vlgmr.msra.gmra.mxu1 %v11242_v0  ;;  %8754 = vmatprep.mubr.f32.mxu0 %v11499_v18  ;;  %v6840_v0 = vld [vmem:[%s13608_s6 + $0x168] sm:$0xff]  ;;  %v2960_v17 = vadd.f32 %v11299_v27, %v2625_v32  ;;  %v11536_v34 = vmax.f32 %v3019_v39, %v3055_v51  ;;  %v6875_v27 = vld [vmem:[%s13608_s6 + $0x280] sm:$0xff]  ;;  %v6837_v39 = vld [vmem:[%s13608_s6 + $0x150] sm:$0xff] }
 0x240   :  { %v11513_v56 = vpop.f32.mrf.mxu0  ;;  %8627 = vmatprep.mubr.f32.mxu1 %v11261_v48  ;;  %8649 = vmatpush3.msra.mxu1 %v6842_v4  ;;  %v6922_v4 = vld [vmem:[%s13608_s6 + $0x3f8] sm:$0xff]  ;;  %v6920_v51 = vld [vmem:[%s13608_s6 + $0x3e8] sm:$0xff]  ;;  %v6919_v32 = vld [vmem:[%s13608_s6 + $0x3e0] sm:$0xff] }
 0x241   :  { %v11519_v49 = vmax.f32 %v3018_v43, %v3054_v21  ;;  %8755 = vmatmul.mubr.f32.gmra.mxu0 %v11506_v7  ;;  %8840 = vmatprep.subr.mxu0 %v6878_v54  ;;  %v3003_v46 = vadd.f32 %v11223_v1, %v2960_v17  ;;  %v13850_v21 = vld [vmem:[#allocation70_spill] sm:$0xff]  ;;  %v6918_v17 = vld [vmem:[%s13608_s6 + $0x3d8] sm:$0xff] }
 0x242   :  { %8650 = vmatprep.subr.mxu1 %v6841_v22  ;;  %8841 = vmatpush3.msra.mxu0 %v6878_v54  ;;  %v11525_v3 = vpop.f32.mrf.mxu0  ;;  %v6836_v54 = vld [vmem:[%s13608_s6 + $0x148] sm:$0xff] }
 0x243   :  { %8651 = vmatpush3.msra.mxu1 %v6841_v22  ;;  %8842 = vmatprep.subr.mxu0 %v6877_v28  ;;  %v3039_v43 = vmul.f32 0.1, %v3003_v46  ;;  %v13851_v22 = vld [vmem:[#allocation69_spill] sm:$0xff] }
 0x244   :  { %8628 = vmatmul.mubr.f32.gmra.mxu1 %v11266_v11  ;;  %8652 = vmatprep.subr.mxu1 %v6840_v0  ;;  %v11530_v52 = vpop.f32.mrf.mxu0 }
 0x245   :  { %8757 = vmatprep.mubr.f32.mxu0 %v11519_v49  ;;  %8843 = vmatpush3.msra.mxu0 %v6877_v28  ;;  %v2631_v28 = vadd.f32 %v13851_v22, %v13850_v21  ;;  %v6831_v21 = vld [vmem:[%s13608_s6 + $0x120] sm:$0xff] }
 0x246   :  { %8630 = vmatprep.mubr.f32.mxu1 %v11307_v62  ;;  %8653 = vmatpush3.msra.mxu1 %v6840_v0  ;;  %v11543_v2 = vpop.f32.mrf.mxu0  ;;  %v11579_v0 = vmax.f32 %v3003_v46, %v3039_v43  ;;  %v13852_v46 = vld [vmem:[#allocation77_spill] sm:$0xff]  ;;  %v6916_v43 = vld [vmem:[%s13608_s6 + $0x3c8] sm:$0xff]  ;;  %v6915_v22 = vld [vmem:[%s13608_s6 + $0x3c0] sm:$0xff] }
 0x247   :  { %8758 = vmatmul.mubr.f32.gmra.mxu0 %v11536_v34  ;;  %8844 = vmatprep.subr.mxu0 %v6876_v30  ;;  %v2966_v38 = vadd.f32 %v11374_v45, %v2631_v28  ;;  %v6834_v45 = vld [vmem:[%s13608_s6 + $0x138] sm:$0xff] }
 0x248   :  { %8654 = vmatprep.subr.mxu1 %v6839_v23  ;;  %8845 = vmatpush3.msra.mxu0 %v6876_v30  ;;  %v8535_v63 = vpop.f32.mrf.mxu0 }
 0x249   :  { %8848 = vmatprep.mubr.f32.mxu0 %v11327_v57  ;;  %8655 = vmatpush3.msra.mxu1 %v6839_v23  ;;  %v11555_v62 = vadd.f32 %v8535_v63, %v11218_v60  ;;  %v6921_v60 = vld [vmem:[%s13608_s6 + $0x3f0] sm:$0xff]  ;;  %v3009_v30 = vadd.f32 %v11223_v1, %v2966_v38  ;;  %v6832_v63 = vld [vmem:[%s13608_s6 + $0x128] sm:$0xff]  ;;  %v6914_v38 = vld [vmem:[%s13608_s6 + $0x3b8] sm:$0xff] }
 0x24a   :  { %8846 = vmatprep.subr.mxu0 %v6875_v27  ;;  %8631 = vmatmul.mubr.f32.gmra.mxu1 %v11292_v47  ;;  %v6833_v23 = vld [vmem:[%s13608_s6 + $0x130] sm:$0xff] }
 0x24b   :  { %8656 = vmatprep.subr.mxu1 %v6838_v53  ;;  %8847 = vmatpush3.msra.mxu0 %v6875_v27  ;;  %v3045_v27 = vmul.f32 0.1, %v3009_v30 }
 0x24c   :  { %8633 = vmatprep.mubr.f32.mxu1 %v11327_v57  ;;  %8657 = vmatpush3.msra.mxu1 %v6838_v53  ;;  %v6917_v53 = vld [vmem:[%s13608_s6 + $0x3d0] sm:$0xff] }
 0x24d   :  { %8849 = vmatmul.mubr.f32.vlgmr.msra.gmra.mxu0 %v11333_v15  ;;  %8928 = vmatprep.subr.mxu0 %v6922_v4 }
 0x24e   :  { %8658 = vmatprep.subr.mxu1 %v6837_v39  ;;  %8851 = vmatprep.mubr.f32.mxu0 %v11355_v24 }
 0x24f   :  { %8929 = vmatpush3.msra.mxu0 %v6922_v4  ;;  %8659 = vmatpush3.msra.mxu1 %v6837_v39  ;;  %v13853_v4 = vld [vmem:[#allocation76_spill] sm:$0xff] }
 0x250   :  { %8930 = vmatprep.subr.mxu0 %v6921_v60  ;;  %8634 = vmatmul.mubr.f32.gmra.mxu1 %v11333_v15  ;;  %v2637_v39 = vadd.f32 %v13853_v4, %v13852_v46  ;;  %v6910_v46 = vld [vmem:[%s13608_s6 + $0x398] sm:$0xff]  ;;  %v6873_v4 = vld [vmem:[%s13608_s6 + $0x270] sm:$0xff] }
 0x251   :  { %8660 = vmatprep.subr.mxu1 %v6836_v54  ;;  %8931 = vmatpush3.msra.mxu0 %v6921_v60  ;;  %v11617_v60 = vmax.f32 %v3009_v30, %v3045_v27 }
 0x252   :  { %8636 = vmatprep.mubr.f32.mxu1 %v11379_v31  ;;  %8661 = vmatpush3.msra.mxu1 %v6836_v54  ;;  %v2972_v54 = vadd.f32 %v11439_v20, %v2637_v39  ;;  %v6830_v20 = vld [vmem:[%s13608_s6 + $0x118] sm:$0xff] }
 0x253   :  { %8852 = vmatmul.mubr.f32.gmra.mxu0 %v11579_v0  ;;  %8932 = vmatprep.subr.mxu0 %v6920_v51 }
 0x254   :  { %8662 = vmatprep.subr.mxu1 %v6835_v44  ;;  %8854 = vmatprep.mubr.f32.mxu0 %v11400_v5  ;;  %v3015_v28 = vadd.f32 %v11223_v1, %v2972_v54  ;;  %v6872_v54 = vld [vmem:[%s13608_s6 + $0x268] sm:$0xff] }
 0x255   :  { %8933 = vmatpush3.msra.mxu0 %v6920_v51  ;;  %8663 = vmatpush3.msra.mxu1 %v6835_v44  ;;  %v2642_v51 = vadd.f32 %v11176_v41, %v11180_v29  ;;  %v6829_v44 = vld [vmem:[%s13608_s6 + $0x110] sm:$0xff]  ;;  %v6828_v29 = vld [vmem:[%s13608_s6 + $0x108] sm:$0xff] }
 0x256   :  { %8934 = vmatprep.subr.mxu0 %v6919_v32  ;;  %8637 = vmatmul.mubr.f32.gmra.mxu1 %v11364_v36  ;;  %v6913_v41 = vld [vmem:[%s13608_s6 + $0x3b0] sm:$0xff] }
 0x257   :  { %8664 = vmatprep.subr.mxu1 %v6834_v45  ;;  %8935 = vmatpush3.msra.mxu0 %v6919_v32  ;;  %v2977_v32 = vadd.f32 %v11501_v40, %v2642_v51  ;;  %v2643_v40 = vadd.f32 %v11167_v14, %v11174_v59  ;;  %v6827_v14 = vld [vmem:[%s13608_s6 + $0x100] sm:$0xff]  ;;  %v2997_v59 = vadd.f32 %v11223_v1, %v11250_v19  ;;  %v6869_v51 = vld [vmem:[%s13608_s6 + $0x250] sm:$0xff] }
 0x258   :  { %8639 = vmatprep.mubr.f32.mxu1 %v11400_v5  ;;  %8665 = vmatpush3.msra.mxu1 %v6834_v45  ;;  %v3051_v45 = vmul.f32 0.1, %v3015_v28 }
 0x259   :  { %8855 = vmatmul.mubr.f32.gmra.mxu0 %v11404_v42  ;;  %8936 = vmatprep.subr.mxu0 %v6918_v17  ;;  %v3020_v30 = vadd.f32 %v11223_v1, %v2977_v32  ;;  %v2978_v27 = vadd.f32 %v11495_v26, %v2643_v40  ;;  %v6866_v32 = vld [vmem:[%s13608_s6 + $0x238] sm:$0xff]  ;;  %v2605_v40 = vpop.f32.mrf.mxu1 }
 0x25a   :  { %8666 = vmatprep.subr.mxu1 %v6833_v23  ;;  %8857 = vmatprep.mubr.f32.mxu0 %v11425_v8 }
 0x25b   :  { %8937 = vmatpush3.msra.mxu0 %v6918_v17  ;;  %8667 = vmatpush3.msra.mxu1 %v6833_v23  ;;  %v6912_v17 = vld [vmem:[%s13608_s6 + $0x3a8] sm:$0xff]  ;;  %v11659_v23 = vmax.f32 %v3015_v28, %v3051_v45  ;;  %v3056_v26 = vmul.f32 0.1, %v3020_v30  ;;  %v3021_v19 = vadd.f32 %v11223_v1, %v2978_v27  ;;  %v6870_v28 = vld [vmem:[%s13608_s6 + $0x258] sm:$0xff]  ;;  %v2645_v45 = vadd.f32 %v11182_v12, %v11187_v58 }
 0x25c   :  { %8938 = vmatprep.subr.mxu0 %v6917_v53  ;;  %8640 = vmatmul.mubr.f32.gmra.mxu1 %v11404_v42  ;;  %v2646_v12 = vadd.f32 %v11204_v50, %v11206_v61  ;;  %v2647_v58 = vadd.f32 %v11196_v9, %v11201_v10  ;;  %v11757_v50 = vld [vmem:[%s13609_s5] ss:$0 sm:$0xff]  ;;  %v2940_v61 = vpop.f32.mrf.mxu0  ;;  %s9304_s5 = smov 32  }
 0x25d   :  { %8668 = vmatprep.subr.mxu1 %v6832_v63  ;;  %8939 = vmatpush3.msra.mxu0 %v6917_v53  ;;  %v6911_v53 = vld [vmem:[%s13608_s6 + $0x3a0] sm:$0xff]  ;;  %v11684_v39 = vmax.f32 %v3020_v30, %v3056_v26  ;;  %v3057_v1 = vmul.f32 0.1, %v3021_v19 }
 0x25e   :  { %8642 = vmatprep.mubr.f32.mxu1 %v11444_v25  ;;  %8669 = vmatpush3.msra.mxu1 %v6832_v63  ;;  %v6874_v63 = vld [vmem:[%s13608_s6 + $0x278] sm:$0xff]  ;;  %v2981_v30 = vadd.f32 %v11543_v2, %v2646_v12  ;;  %v2982_v10 = vadd.f32 %v11530_v52, %v2647_v58  ;;  %v6861_v52 = vld [vmem:[%s13608_s6 + $0x210] sm:$0xff]  ;;  %v6859_v26 = vld [vmem:[%s13608_s6 + $0x200] sm:$0xff] }
 0x25f   :  { %8858 = vmatmul.mubr.f32.gmra.mxu0 %v11617_v60  ;;  %8940 = vmatprep.subr.mxu0 %v6916_v43  ;;  %v6862_v2 = vld [vmem:[%s13608_s6 + $0x218] sm:$0xff]  ;;  %v6893_v58 = vld [vmem:[%s13608_s6 + $0x310] sm:$0xff] }
 0x260   :  { %8670 = vmatprep.subr.mxu1 %v6831_v21  ;;  %8860 = vmatprep.mubr.f32.mxu0 %v11462_v33  ;;  %v3024_v27 = vadd.f32 %v11757_v50, %v2981_v30  ;;  %v6894_v12 = vld [vmem:[%s13608_s6 + $0x318] sm:$0xff]  ;;  %v6891_v30 = vld [vmem:[%s13608_s6 + $0x300] sm:$0xff] }
 0x261   :  { %8941 = vmatpush3.msra.mxu0 %v6916_v43  ;;  %8671 = vmatpush3.msra.mxu1 %v6831_v21  ;;  %v11698_v21 = vmax.f32 %v3021_v19, %v3057_v1  ;;  %v6905_v1 = vld [vmem:[%s13608_s6 + $0x370] sm:$0xff] }
 0x262   :  { %8942 = vmatprep.subr.mxu0 %v6915_v22  ;;  %8643 = vmatmul.mubr.f32.gmra.mxu1 %v11432_v13 }
 0x263   :  { %8672 = vmatprep.subr.mxu1 %v6830_v20  ;;  %8943 = vmatpush3.msra.mxu0 %v6915_v22  ;;  %v6871_v22 = vld [vmem:[%s13608_s6 + $0x260] sm:$0xff] }
 0x264   :  { %8645 = vmatprep.mubr.f32.mxu1 %v11462_v33  ;;  %8673 = vmatpush3.msra.mxu1 %v6830_v20  ;;  %v6907_v20 = vld [vmem:[%s13608_s6 + $0x380] sm:$0xff] }
 0x265   :  { %8861 = vmatmul.mubr.f32.gmra.mxu0 %v11465_v16  ;;  %8944 = vmatprep.subr.mxu0 %v6914_v38 }
 0x266   :  { %8674 = vmatprep.subr.mxu1 %v6829_v44  ;;  %8863 = vmatprep.mubr.f32.mxu0 %v11485_v37 }
 0x267   :  { %8945 = vmatpush3.msra.mxu0 %v6914_v38  ;;  %8675 = vmatpush3.msra.mxu1 %v6829_v44  ;;  %v6868_v38 = vld [vmem:[%s13608_s6 + $0x248] sm:$0xff]  ;;  %v6867_v44 = vld [vmem:[%s13608_s6 + $0x240] sm:$0xff] }
 0x268   :  { %8946 = vmatprep.subr.mxu0 %v6913_v41  ;;  %8646 = vmatmul.mubr.f32.gmra.mxu1 %v11465_v16 }
 0x269   :  { %8676 = vmatprep.subr.mxu1 %v6828_v29  ;;  %8947 = vmatpush3.msra.mxu0 %v6913_v41  ;;  %v2980_v41 = vadd.f32 %v11513_v56, %v2645_v45  ;;  %v6863_v56 = vld [vmem:[%s13608_s6 + $0x220] sm:$0xff]  ;;  %v4759_v45 = vld [vmem:[%s13610_s2 + $0x68] sm:$0xff] }
 0x26a   :  { %8677 = vmatpush3.msra.mxu1 %v6828_v29  ;;  %8680 = vmatprep.mubr.f32.mxu1 %v11261_v48  ;;  %v3033_v48 = vmul.f32 0.1, %v2997_v59  ;;  %v6864_v29 = vld [vmem:[%s13608_s6 + $0x228] sm:$0xff] }
 0x26b   :  { %8864 = vmatmul.mubr.f32.gmra.mxu0 %v11659_v23  ;;  %8948 = vmatprep.subr.mxu0 %v6912_v17  ;;  %v3023_v9 = vadd.f32 %v11757_v50, %v2980_v41  ;;  %v6895_v41 = vld [vmem:[%s13608_s6 + $0x320] sm:$0xff] }
 0x26c   :  { %8678 = vmatprep.subr.mxu1 %v6827_v14  ;;  %8866 = vmatprep.mubr.f32.mxu0 %v11519_v49  ;;  %v3069_v43 = vmax.f32 %v2997_v59, %v3033_v48 }
 0x26d   :  { %8949 = vmatpush3.msra.mxu0 %v6912_v17  ;;  %8679 = vmatpush3.msra.mxu1 %v6827_v14  ;;  %v2648_v17 = vadd.f32 %v2605_v40, %v11216_v6  ;;  %v3059_v59 = vmul.f32 0.1, %v3023_v9  ;;  %v6860_v6 = vld [vmem:[%s13608_s6 + $0x208] sm:$0xff]  ;;  %v4757_v40 = vld [vmem:[%s13610_s2 + $0x58] sm:$0xff] }
 0x26e   :  { %8950 = vmatprep.subr.mxu0 %v6911_v53  ;;  %8681 = vmatmul.mubr.f32.vlgmr.msra.gmra.mxu1 %v11266_v11  ;;  %v6909_v11 = vld [vmem:[%s13608_s6 + $0x390] sm:$0xff] }
 0x26f   :  { %8760 = vmatprep.subr.mxu1 %v6874_v63  ;;  %8951 = vmatpush3.msra.mxu0 %v6911_v53  ;;  %v2983_v14 = vadd.f32 %v2940_v61, %v2648_v17  ;;  %v3025_v53 = vadd.f32 %v11757_v50, %v2982_v10  ;;  %v6938_v10 = vld [vmem:[%s13608_s6 + $0x478] sm:$0xff]  ;;  %v6937_v61 = vld [vmem:[%s13608_s6 + $0x470] sm:$0xff]  ;;  %v6935_v17 = vld [vmem:[%s13608_s6 + $0x460] sm:$0xff] }
 0x270   :  { %8683 = vmatprep.mubr.f32.mxu1 %v11284_v55  ;;  %8761 = vmatpush3.msra.mxu1 %v6874_v63  ;;  %v6908_v55 = vld [vmem:[%s13608_s6 + $0x388] sm:$0xff]  ;;  %v3060_v63 = vmul.f32 0.1, %v3024_v27 }
 0x271   :  { %8867 = vmatmul.mubr.f32.gmra.mxu0 %v11536_v34  ;;  %8952 = vmatprep.subr.mxu0 %v6910_v46  ;;  %v3026_v19 = vadd.f32 %v11757_v50, %v2983_v14  ;;  %v3061_v48 = vmul.f32 0.1, %v3025_v53  ;;  %v6934_v14 = vld [vmem:[%s13608_s6 + $0x458] sm:$0xff] }
 0x272   :  { %8762 = vmatprep.subr.mxu1 %v6873_v4  ;;  %8869 = vmatprep.mubr.f32.mxu0 %v11684_v39 }
 0x273   :  { %8953 = vmatpush3.msra.mxu0 %v6910_v46  ;;  %8763 = vmatpush3.msra.mxu1 %v6873_v4  ;;  %v11786_v46 = vmax.f32 %v3023_v9, %v3059_v59  ;;  %v6906_v4 = vld [vmem:[%s13608_s6 + $0x378] sm:$0xff]  ;;  %v4756_v9 = vld [vmem:[%s13610_s2 + $0x50] sm:$0xff] }
 0x274   :  { %8954 = vmatprep.subr.mxu0 %v6909_v11  ;;  %8684 = vmatmul.mubr.f32.gmra.mxu1 %v3069_v43  ;;  %v3062_v43 = vmul.f32 0.1, %v3026_v19 }
 0x275   :  { %8764 = vmatprep.subr.mxu1 %v6872_v54  ;;  %8955 = vmatpush3.msra.mxu0 %v6909_v11  ;;  %v11796_v11 = vmax.f32 %v3024_v27, %v3060_v63 }
 0x276   :  { %8686 = vmatprep.mubr.f32.mxu1 %v11327_v57  ;;  %8765 = vmatpush3.msra.mxu1 %v6872_v54  ;;  %v6904_v54 = vld [vmem:[%s13608_s6 + $0x368] sm:$0xff] }
 0x277   :  { %8870 = vmatmul.mubr.f32.gmra.mxu0 %v11698_v21  ;;  %8956 = vmatprep.subr.mxu0 %v6908_v55 }
 0x278   :  { %8766 = vmatprep.subr.mxu1 %v6871_v22  ;;  %8957 = vmatpush3.msra.mxu0 %v6908_v55  ;;  %v11810_v55 = vmax.f32 %v3026_v19, %v3062_v43  ;;  %v6929_v19 = vld [vmem:[%s13608_s6 + $0x430] sm:$0xff]  ;;  %v6926_v43 = vld [vmem:[%s13608_s6 + $0x418] sm:$0xff] }
 0x279   :  { %8960 = vmatprep.mubr.f32.mxu0 %v11364_v36  ;;  %8767 = vmatpush3.msra.mxu1 %v6871_v22  ;;  %v6901_v22 = vld [vmem:[%s13608_s6 + $0x350] sm:$0xff] }
 0x27a   :  { %8958 = vmatprep.subr.mxu0 %v6907_v20  ;;  %8687 = vmatmul.mubr.f32.gmra.mxu1 %v11333_v15 }
 0x27b   :  { %8768 = vmatprep.subr.mxu1 %v6870_v28  ;;  %8959 = vmatpush3.msra.mxu0 %v6907_v20  ;;  %v13627_v20 = vmov 0.0  }
 0x27c   :  { %8689 = vmatprep.mubr.f32.mxu1 %v11355_v24  ;;  %8769 = vmatpush3.msra.mxu1 %v6870_v28  ;;  %v6900_v28 = vld [vmem:[%s13608_s6 + $0x348] sm:$0xff] }
 0x27d   :  { %8961 = vmatmul.mubr.f32.vlgmr.msra.gmra.mxu0 %v11400_v5  ;;  %8770 = vmatprep.subr.mxu1 %v6869_v51 }
 0x27e   :  { %8963 = vmatprep.mubr.f32.mxu0 %v11404_v42  ;;  %8771 = vmatpush3.msra.mxu1 %v6869_v51  ;;  %v6899_v51 = vld [vmem:[%s13608_s6 + $0x340] sm:$0xff] }
 0x27f   :  { %8690 = vmatmul.mubr.f32.gmra.mxu1 %v11579_v0  ;;  %8772 = vmatprep.subr.mxu1 %v6868_v38  ;;  %v6865_v0 = vld [vmem:[%s13608_s6 + $0x230] sm:$0xff] }
 0x280   :  { %8692 = vmatprep.mubr.f32.mxu1 %v11400_v5  ;;  %8773 = vmatpush3.msra.mxu1 %v6868_v38  ;;  %v4760_v38 = vld [vmem:[%s13610_s2 + $0x70] sm:$0xff] }
 0x281   :  { %8964 = vmatmul.mubr.f32.gmra.mxu0 %v11425_v8  ;;  %8774 = vmatprep.subr.mxu1 %v6867_v44 }
 0x282   :  { %8966 = vmatprep.mubr.f32.mxu0 %v11432_v13  ;;  %8775 = vmatpush3.msra.mxu1 %v6867_v44  ;;  %v6898_v44 = vld [vmem:[%s13608_s6 + $0x338] sm:$0xff] }
 0x283   :  { %8693 = vmatmul.mubr.f32.gmra.mxu1 %v11404_v42  ;;  %8776 = vmatprep.subr.mxu1 %v6866_v32 }
 0x284   :  { %8695 = vmatprep.mubr.f32.mxu1 %v11425_v8  ;;  %8777 = vmatpush3.msra.mxu1 %v6866_v32  ;;  %v6897_v32 = vld [vmem:[%s13608_s6 + $0x330] sm:$0xff] }
 0x285   :  { %8967 = vmatmul.mubr.f32.gmra.mxu0 %v11462_v33  ;;  %8778 = vmatprep.subr.mxu1 %v6865_v0 }
 0x286   :  { %8969 = vmatprep.mubr.f32.mxu0 %v11465_v16  ;;  %8779 = vmatpush3.msra.mxu1 %v6865_v0  ;;  %v6896_v0 = vld [vmem:[%s13608_s6 + $0x328] sm:$0xff] }
 0x287   :  { %8696 = vmatmul.mubr.f32.gmra.mxu1 %v11617_v60  ;;  %8780 = vmatprep.subr.mxu1 %v6864_v29 }
 0x288   :  { %8698 = vmatprep.mubr.f32.mxu1 %v11462_v33  ;;  %8781 = vmatpush3.msra.mxu1 %v6864_v29  ;;  %v4758_v29 = vld [vmem:[%s13610_s2 + $0x60] sm:$0xff] }
 0x289   :  { %8970 = vmatmul.mubr.f32.gmra.mxu0 %v11485_v37  ;;  %8782 = vmatprep.subr.mxu1 %v6863_v56 }
 0x28a   :  { %8972 = vmatprep.mubr.f32.mxu0 %v11506_v7  ;;  %8783 = vmatpush3.msra.mxu1 %v6863_v56  ;;  %v6892_v56 = vld [vmem:[%s13608_s6 + $0x308] sm:$0xff] }
 0x28b   :  { %8699 = vmatmul.mubr.f32.gmra.mxu1 %v11465_v16  ;;  %8784 = vmatprep.subr.mxu1 %v6862_v2 }
 0x28c   :  { %8701 = vmatprep.mubr.f32.mxu1 %v11485_v37  ;;  %8785 = vmatpush3.msra.mxu1 %v6862_v2  ;;  %v4755_v2 = vld [vmem:[%s13610_s2 + $0x48] sm:$0xff] }
 0x28d   :  { %8973 = vmatmul.mubr.f32.gmra.mxu0 %v11519_v49  ;;  %8786 = vmatprep.subr.mxu1 %v6861_v52 }
 0x28e   :  { %8975 = vmatprep.mubr.f32.mxu0 %v11536_v34  ;;  %8787 = vmatpush3.msra.mxu1 %v6861_v52  ;;  %v13854_v52 = vld [vmem:[#allocation5_spill] sm:$0xff] }
 0x28f   :  { %8702 = vmatmul.mubr.f32.gmra.mxu1 %v11659_v23  ;;  %8788 = vmatprep.subr.mxu1 %v6860_v6  ;;  %v2644_v27 = vadd.f32 %v13854_v52, %v11192_v35  ;;  %v4753_v35 = vld [vmem:[%s13610_s2 + $0x38] sm:$0xff] }
 0x290   :  { %8789 = vmatpush3.msra.mxu1 %v6860_v6  ;;  %8792 = vmatprep.mubr.f32.mxu1 %v11292_v47  ;;  %v11800_v47 = vmax.f32 %v3025_v53, %v3061_v48  ;;  %v6933_v53 = vld [vmem:[%s13608_s6 + $0x450] sm:$0xff]  ;;  %v6931_v6 = vld [vmem:[%s13608_s6 + $0x440] sm:$0xff]  ;;  %v4751_v48 = vld [vmem:[%s13610_s2 + $0x28] sm:$0xff] }
 0x291   :  { %8976 = vmatmul.mubr.f32.gmra.mxu0 %v11684_v39  ;;  %8790 = vmatprep.subr.mxu1 %v6859_v26  ;;  %v2979_v59 = vadd.f32 %v11525_v3, %v2644_v27 }
 0x292   :  { %8978 = vmatprep.mubr.f32.mxu0 %v11786_v46  ;;  %8791 = vmatpush3.msra.mxu1 %v6859_v26  ;;  %v6930_v26 = vld [vmem:[%s13608_s6 + $0x438] sm:$0xff] }
 0x293   :  { %8793 = vmatmul.mubr.f32.vlgmr.msra.gmra.mxu1 %v11327_v57  ;;  %8872 = vmatprep.subr.mxu1 %v6906_v4  ;;  %v6903_v57 = vld [vmem:[%s13608_s6 + $0x360] sm:$0xff]  ;;  %v3022_v3 = vadd.f32 %v11757_v50, %v2979_v59 }
 0x294   :  { %8795 = vmatprep.mubr.f32.mxu1 %v11333_v15  ;;  %8873 = vmatpush3.msra.mxu1 %v6906_v4  ;;  %v6902_v15 = vld [vmem:[%s13608_s6 + $0x358] sm:$0xff] }
 0x295   :  { %8979 = vmatmul.mubr.f32.gmra.mxu0 %v11796_v11  ;;  %8874 = vmatprep.subr.mxu1 %v6905_v1  ;;  %v3058_v63 = vmul.f32 0.1, %v3022_v3 }
 0x296   :  { %8981 = vmatprep.mubr.f32.mxu0 %v11800_v47  ;;  %8875 = vmatpush3.msra.mxu1 %v6905_v1  ;;  %v6927_v1 = vld [vmem:[%s13608_s6 + $0x420] sm:$0xff] }
 0x297   :  { %8796 = vmatmul.mubr.f32.gmra.mxu1 %v11355_v24  ;;  %8876 = vmatprep.subr.mxu1 %v6904_v54  ;;  %v4761_v24 = vld [vmem:[%s13610_s2 + $0x78] sm:$0xff]  ;;  %v3094_v4 = vmax.f32 %v3022_v3, %v3058_v63 }
 0x298   :  { %8798 = vmatprep.mubr.f32.mxu1 %v11364_v36  ;;  %8877 = vmatpush3.msra.mxu1 %v6904_v54  ;;  %v6925_v54 = vld [vmem:[%s13608_s6 + $0x410] sm:$0xff] }
 0x299   :  { %8982 = vmatmul.mubr.f32.gmra.mxu0 %v11810_v55  ;;  %8878 = vmatprep.subr.mxu1 %v6903_v57 }
 0x29a   :  { %8879 = vmatpush3.msra.mxu1 %v6903_v57  ;;  %9040 = vmatprep.subr.mxu0 %v13627_v20  ;;  %v4749_v57 = vld [vmem:[%s13610_s2 + $0x18] sm:$0xff] }
 0x29b   :  { %8799 = vmatmul.mubr.f32.gmra.mxu1 %v11400_v5  ;;  %8880 = vmatprep.subr.mxu1 %v6902_v15 }
 0x29c   :  { %8801 = vmatprep.mubr.f32.mxu1 %v11404_v42  ;;  %8881 = vmatpush3.msra.mxu1 %v6902_v15  ;;  %v6924_v15 = vld [vmem:[%s13608_s6 + $0x408] sm:$0xff] }
 0x29d   :  { %8882 = vmatprep.subr.mxu1 %v6901_v22  ;;  %9041 = vmatpush3.msra.mxu0 %v4761_v24  ;;  %v4747_v24 = vld [vmem:[%s13610_s2 + $0x8] sm:$0xff] }
 0x29e   :  { %8883 = vmatpush3.msra.mxu1 %v6901_v22  ;;  %9042 = vmatprep.subr.mxu0 %v13627_v20  ;;  %v6923_v22 = vld [vmem:[%s13608_s6 + $0x400] sm:$0xff] }
 0x29f   :  { %8802 = vmatmul.mubr.f32.gmra.mxu1 %v11425_v8  ;;  %8884 = vmatprep.subr.mxu1 %v6900_v28 }
 0x2a0   :  { %8804 = vmatprep.mubr.f32.mxu1 %v11432_v13  ;;  %8885 = vmatpush3.msra.mxu1 %v6900_v28  ;;  %v4746_v28 = vld [vmem:[%s13610_s2] sm:$0xff] }
 0x2a1   :  { %8886 = vmatprep.subr.mxu1 %v6899_v51  ;;  %9043 = vmatpush3.msra.mxu0 %v4760_v38 }
 0x2a2   :  { %8887 = vmatpush3.msra.mxu1 %v6899_v51  ;;  %9044 = vmatprep.subr.mxu0 %v13627_v20 }
 0x2a3   :  { %8805 = vmatmul.mubr.f32.gmra.mxu1 %v11462_v33  ;;  %8888 = vmatprep.subr.mxu1 %v6898_v44 }
 0x2a4   :  { %8807 = vmatprep.mubr.f32.mxu1 %v11465_v16  ;;  %8889 = vmatpush3.msra.mxu1 %v6898_v44 }
 0x2a5   :  { %8890 = vmatprep.subr.mxu1 %v6897_v32  ;;  %9045 = vmatpush3.msra.mxu0 %v4759_v45 }
 0x2a6   :  { %8891 = vmatpush3.msra.mxu1 %v6897_v32  ;;  %9046 = vmatprep.subr.mxu0 %v13627_v20 }
 0x2a7   :  { %8808 = vmatmul.mubr.f32.gmra.mxu1 %v11485_v37  ;;  %8892 = vmatprep.subr.mxu1 %v6896_v0 }
 0x2a8   :  { %8810 = vmatprep.mubr.f32.mxu1 %v11506_v7  ;;  %8893 = vmatpush3.msra.mxu1 %v6896_v0 }
 0x2a9   :  { %8894 = vmatprep.subr.mxu1 %v6895_v41  ;;  %9047 = vmatpush3.msra.mxu0 %v4758_v29 }
 0x2aa   :  { %8895 = vmatpush3.msra.mxu1 %v6895_v41  ;;  %9048 = vmatprep.subr.mxu0 %v13627_v20 }
 0x2ab   :  { %8811 = vmatmul.mubr.f32.gmra.mxu1 %v11519_v49  ;;  %8896 = vmatprep.subr.mxu1 %v6894_v12 }
 0x2ac   :  { %8813 = vmatprep.mubr.f32.mxu1 %v11536_v34  ;;  %8897 = vmatpush3.msra.mxu1 %v6894_v12 }
 0x2ad   :  { %8898 = vmatprep.subr.mxu1 %v6893_v58  ;;  %9049 = vmatpush3.msra.mxu0 %v4757_v40 }
 0x2ae   :  { %8899 = vmatpush3.msra.mxu1 %v6893_v58  ;;  %9050 = vmatprep.subr.mxu0 %v13627_v20 }
 0x2af   :  { %8814 = vmatmul.mubr.f32.gmra.mxu1 %v11684_v39  ;;  %8900 = vmatprep.subr.mxu1 %v6892_v56 }
 0x2b0   :  { %8901 = vmatpush3.msra.mxu1 %v6892_v56  ;;  %8904 = vmatprep.mubr.f32.mxu1 %v11379_v31  ;;  %v6936_v31 = vld [vmem:[%s13608_s6 + $0x468] sm:$0xff] }
 0x2b1   :  { %8902 = vmatprep.subr.mxu1 %v6891_v30  ;;  %9051 = vmatpush3.msra.mxu0 %v4756_v9 }
 0x2b2   :  { %8903 = vmatpush3.msra.mxu1 %v6891_v30  ;;  %9052 = vmatprep.subr.mxu0 %v13627_v20 }
 0x2b3   :  { %8905 = vmatmul.mubr.f32.vlgmr.msra.gmra.mxu1 %v11364_v36  ;;  %8984 = vmatprep.subr.mxu1 %v6938_v10  ;;  %v4754_v36 = vld [vmem:[%s13610_s2 + $0x40] sm:$0xff] }
 0x2b4   :  { %8907 = vmatprep.mubr.f32.mxu1 %v11400_v5  ;;  %8985 = vmatpush3.msra.mxu1 %v6938_v10 }
 0x2b5   :  { %8986 = vmatprep.subr.mxu1 %v6937_v61  ;;  %9053 = vmatpush3.msra.mxu0 %v4755_v2 }
 0x2b6   :  { %8987 = vmatpush3.msra.mxu1 %v6937_v61  ;;  %9054 = vmatprep.subr.mxu0 %v13627_v20 }
 0x2b7   :  { %8908 = vmatmul.mubr.f32.gmra.mxu1 %v11404_v42  ;;  %8988 = vmatprep.subr.mxu1 %v6936_v31 }
 0x2b8   :  { %8910 = vmatprep.mubr.f32.mxu1 %v11444_v25  ;;  %8989 = vmatpush3.msra.mxu1 %v6936_v31  ;;  %v6932_v25 = vld [vmem:[%s13608_s6 + $0x448] sm:$0xff] }
 0x2b9   :  { %8990 = vmatprep.subr.mxu1 %v6935_v17  ;;  %9055 = vmatpush3.msra.mxu0 %v4754_v36 }
 0x2ba   :  { %8991 = vmatpush3.msra.mxu1 %v6935_v17  ;;  %9056 = vmatprep.subr.mxu0 %v13627_v20 }
 0x2bb   :  { %8911 = vmatmul.mubr.f32.gmra.mxu1 %v11432_v13  ;;  %8992 = vmatprep.subr.mxu1 %v6934_v14  ;;  %v4752_v13 = vld [vmem:[%s13610_s2 + $0x30] sm:$0xff] }
 0x2bc   :  { %8913 = vmatprep.mubr.f32.mxu1 %v11462_v33  ;;  %8993 = vmatpush3.msra.mxu1 %v6934_v14 }
 0x2bd   :  { %8994 = vmatprep.subr.mxu1 %v6933_v53  ;;  %9057 = vmatpush3.msra.mxu0 %v4753_v35 }
 0x2be   :  { %8995 = vmatpush3.msra.mxu1 %v6933_v53  ;;  %9058 = vmatprep.subr.mxu0 %v13627_v20 }
 0x2bf   :  { %8914 = vmatmul.mubr.f32.gmra.mxu1 %v11465_v16  ;;  %8996 = vmatprep.subr.mxu1 %v6932_v25 }
 0x2c0   :  { %8916 = vmatprep.mubr.f32.mxu1 %v11499_v18  ;;  %8997 = vmatpush3.msra.mxu1 %v6932_v25  ;;  %v6928_v18 = vld [vmem:[%s13608_s6 + $0x428] sm:$0xff] }
 0x2c1   :  { %8998 = vmatprep.subr.mxu1 %v6931_v6  ;;  %9059 = vmatpush3.msra.mxu0 %v4752_v13 }
 0x2c2   :  { %8999 = vmatpush3.msra.mxu1 %v6931_v6  ;;  %9060 = vmatprep.subr.mxu0 %v13627_v20 }
 0x2c3   :  { %8917 = vmatmul.mubr.f32.gmra.mxu1 %v11506_v7  ;;  %9000 = vmatprep.subr.mxu1 %v6930_v26  ;;  %v4750_v7 = vld [vmem:[%s13610_s2 + $0x20] sm:$0xff] }
 0x2c4   :  { %8919 = vmatprep.mubr.f32.mxu1 %v11519_v49  ;;  %9001 = vmatpush3.msra.mxu1 %v6930_v26 }
 0x2c5   :  { %9002 = vmatprep.subr.mxu1 %v6929_v19  ;;  %9061 = vmatpush3.msra.mxu0 %v4751_v48 }
 0x2c6   :  { %9003 = vmatpush3.msra.mxu1 %v6929_v19  ;;  %9062 = vmatprep.subr.mxu0 %v13627_v20 }
 0x2c7   :  { %8920 = vmatmul.mubr.f32.gmra.mxu1 %v11536_v34  ;;  %9004 = vmatprep.subr.mxu1 %v6928_v18 }
 0x2c8   :  { %8922 = vmatprep.mubr.f32.mxu1 %v3094_v4  ;;  %9005 = vmatpush3.msra.mxu1 %v6928_v18 }
 0x2c9   :  { %9006 = vmatprep.subr.mxu1 %v6927_v1  ;;  %9063 = vmatpush3.msra.mxu0 %v4750_v7 }
 0x2ca   :  { %9007 = vmatpush3.msra.mxu1 %v6927_v1  ;;  %9064 = vmatprep.subr.mxu0 %v13627_v20 }
 0x2cb   :  { %8923 = vmatmul.mubr.f32.gmra.mxu1 %v11786_v46  ;;  %9008 = vmatprep.subr.mxu1 %v6926_v43  ;;  %v4748_v46 = vld [vmem:[%s13610_s2 + $0x10] sm:$0xff] }
 0x2cc   :  { %8925 = vmatprep.mubr.f32.mxu1 %v11796_v11  ;;  %9009 = vmatpush3.msra.mxu1 %v6926_v43 }
 0x2cd   :  { %9010 = vmatprep.subr.mxu1 %v6925_v54  ;;  %9065 = vmatpush3.msra.mxu0 %v4749_v57 }
 0x2ce   :  { %9011 = vmatpush3.msra.mxu1 %v6925_v54  ;;  %9066 = vmatprep.subr.mxu0 %v13627_v20 }
 0x2cf   :  { %8926 = vmatmul.mubr.f32.gmra.mxu1 %v11800_v47  ;;  %9012 = vmatprep.subr.mxu1 %v6924_v15 }
 0x2d0   :  { %9013 = vmatpush3.msra.mxu1 %v6924_v15  ;;  %9016 = vmatprep.mubr.f32.mxu1 %v11400_v5  ;;  %v4745_v5 = vld [vmem:[%s13611_s1] sm:$0xff] }
 0x2d1   :  { %9014 = vmatprep.subr.mxu1 %v6923_v22  ;;  %9067 = vmatpush3.msra.mxu0 %v4748_v46 }
 0x2d2   :  { %9015 = vmatpush3.msra.mxu1 %v6923_v22  ;;  %9068 = vmatprep.subr.mxu0 %v13627_v20 }
 0x2d3   :  { %9017 = vmatmul.mubr.f32.vlgmr.msra.gmra.mxu1 %v11404_v42  ;;  %v8570_v51 = vpop.f32.mrf.mxu1  ;;  %9069 = vmatpush3.msra.mxu0 %v4747_v24 }
 0x2d4   :  { %9019 = vmatprep.mubr.f32.mxu1 %v11425_v8  ;;  %9070 = vmatprep.subr.mxu0 %v13627_v20 }
 0x2d5   :  { %v11999_v38 = vpop.f32.mrf.mxu1  ;;  %9071 = vmatpush3.msra.mxu0 %v4746_v28  ;;  %9072 = vmatprep.mubr.msk.f32.mxu0 %vm9301_vm0, %v13627_v20 }
 0x2d6   :  { %9073 = vmatmul.mubr.f32.vlgmr.msra.gmra.mxu0 %v4745_v5 }
 0x2d7   :  { %9020 = vmatmul.mubr.f32.gmra.mxu1 %v11617_v60  ;;  %v8573_v42 = vpop.f32.mrf.mxu1 }
 0x2d8   :  { %9022 = vmatprep.mubr.f32.mxu1 %v11462_v33  ;;  %v3027_v33 = vadd.f32 %v11757_v50, %v11555_v62 }
 0x2d9   :  { %v12006_v44 = vpop.f32.mrf.mxu1 }
 0x2da   :  { %v3063_v60 = vmul.f32 0.1, %v3027_v33 }
 0x2db   :  { %9023 = vmatmul.mubr.f32.gmra.mxu1 %v11465_v16 }
 0x2dc   :  { %9025 = vmatprep.mubr.f32.mxu1 %v11485_v37  ;;  %v12008_v8 = vpop.f32.mrf.mxu0 }
 0x2de   :  { %v12012_v0 = vpop.f32.mrf.mxu0 }
 0x2df   :  { %9026 = vmatmul.mubr.f32.gmra.mxu1 %v11659_v23  ;;  %v8576_v32 = vpop.f32.mrf.mxu1 }
 0x2e0   :  { %9028 = vmatprep.mubr.f32.mxu1 %v11519_v49  ;;  %v12018_v37 = vpop.f32.mrf.mxu0 }
 0x2e1   :  { %v3219_v45 = vpop.f32.mrf.mxu1 }
 0x2e2   :  { %v12022_v49 = vpop.f32.mrf.mxu0 }
 0x2e3   :  { %9029 = vmatmul.mubr.f32.gmra.mxu1 %v11536_v34  ;;  %v8579_v16 = vpop.f32.mrf.mxu1 }
 0x2e4   :  { %9031 = vmatprep.mubr.f32.mxu1 %v11684_v39  ;;  %v3099_v39 = vmax.f32 %v3027_v33, %v3063_v60 }
 0x2e5   :  { %v3229_v23 = vpop.f32.mrf.mxu1 }
 0x2e7   :  { %9032 = vmatmul.mubr.f32.gmra.mxu1 %v11698_v21 }
 0x2e8   :  { %9034 = vmatprep.mubr.f32.mxu1 %v11796_v11  ;;  %v12026_v34 = vpop.f32.mrf.mxu0 }
 0x2ea   :  { %v12028_v50 = vpop.f32.mrf.mxu0 }
 0x2eb   :  { %9035 = vmatmul.mubr.f32.gmra.mxu1 %v11800_v47  ;;  %v8582_v41 = vpop.f32.mrf.mxu1 }
 0x2ec   :  { %9037 = vmatprep.mubr.f32.mxu1 %v11810_v55  ;;  %v12030_v21 = vpop.f32.mrf.mxu0 }
 0x2ed   :  { %v3239_v62 = vpop.f32.mrf.mxu1 }
 0x2ee   :  { %v12032_v58 = vpop.f32.mrf.mxu0 }
 0x2ef   :  { %9038 = vmatmul.mubr.f32.gmra.mxu1 %v3099_v39  ;;  %v8585_v29 = vpop.f32.mrf.mxu1 }
 0x2f1   :  { %v3249_v11 = vpop.f32.mrf.mxu1 }
 0x2f4   :  { %v12034_v56 = vpop.f32.mrf.mxu0 }
 0x2f6   :  { %v12036_v55 = vpop.f32.mrf.mxu0 }
 0x2f7   :  { %v8588_v12 = vpop.f32.mrf.mxu1 }
 0x2f8   :  { %v12038_v2 = vpop.f32.mrf.mxu0 }
 0x2f9   :  { %v3259_v40 = vpop.f32.mrf.mxu1 }
 0x2fa   :  { %v12040_v36 = vpop.f32.mrf.mxu0 }
 0x2fb   :  { %v8591_v47 = vpop.f32.mrf.mxu1 }
 0x2fd   :  { %v3269_v30 = vpop.f32.mrf.mxu1 }
 0x2ff   :  { %v8626_v9 = vpop.f32.mrf.mxu1 }
 0x300   :  { %v3350_v10 = vadd.f32 %v8626_v9, %v8570_v51 }
 0x301   :  { %v3344_v61 = vpop.f32.mrf.mxu1  ;;  %v12042_v27 = vpop.f32.mrf.mxu0 }
 0x302   :  { %v3345_v39 = vadd.f32 %v3344_v61, %v11999_v38 }
 0x303   :  { %v12044_v53 = vpop.f32.mrf.mxu0 }
 0x304   :  { %v8629_v31 = vpop.f32.mrf.mxu1 }
 0x305   :  { %v3360_v17 = vadd.f32 %v8629_v31, %v8573_v42 }
 0x306   :  { %v3354_v52 = vpop.f32.mrf.mxu1 }
 0x307   :  { %v12046_v3 = vpop.f32.mrf.mxu0 }
 0x309   :  { %v12048_v19 = vpop.f32.mrf.mxu0 }
 0x30a   :  { %v8632_v14 = vpop.f32.mrf.mxu1 }
 0x30b   :  { %v3370_v59 = vadd.f32 %v8632_v14, %v8576_v32 }
 0x30c   :  { %v3364_v35 = vpop.f32.mrf.mxu1 }
 0x30d   :  { %v3365_v25 = vadd.f32 %v3364_v35, %v3219_v45  ;;  %v12052_v4 = vpop.f32.mrf.mxu0 }
 0x30f   :  { %v12056_v43 = vpop.f32.mrf.mxu0 }
 0x310   :  { %v8635_v6 = vpop.f32.mrf.mxu1 }
 0x311   :  { %v3380_v13 = vadd.f32 %v8635_v6, %v8579_v16 }
 0x312   :  { %v3374_v26 = vpop.f32.mrf.mxu1 }
 0x313   :  { %v3375_v63 = vadd.f32 %v3374_v26, %v3229_v23  ;;  %v12062_v46 = vpop.f32.mrf.mxu0 }
 0x315   :  { %v12066_v51 = vpop.f32.mrf.mxu0 }
 0x316   :  { %v8638_v48 = vpop.f32.mrf.mxu1 }
 0x317   :  { %v12050_v18 = vadd.f32 %v8638_v48, %v8582_v41 }
 0x318   :  { %v3384_v1 = vpop.f32.mrf.mxu1 }
 0x319   :  { %v12054_v7 = vadd.f32 %v3384_v1, %v3239_v62  ;;  %v12070_v32 = vpop.f32.mrf.mxu0 }
 0x31b   :  { %v12076_v23 = vpop.f32.mrf.mxu0 }
 0x31c   :  { %v8641_v54 = vpop.f32.mrf.mxu1 }
 0x31d   :  { %v12058_v57 = vadd.f32 %v8641_v54, %v8585_v29 }
 0x31e   :  { %v3394_v15 = vpop.f32.mrf.mxu1 }
 0x31f   :  { %v12060_v22 = vadd.f32 %v3394_v15, %v3249_v11  ;;  %v12081_v29 = vpop.f32.mrf.mxu0  ;;  %v4947_v15 = vld [vmem:[%s13612_s8 + $0x1d8] sm:$0xff] }
 0x322   :  { %v8644_v24 = vpop.f32.mrf.mxu1 }
 0x323   :  { %v12064_v28 = vadd.f32 %v8644_v24, %v8588_v12 }
 0x324   :  { %v3404_v5 = vpop.f32.mrf.mxu1 }
 0x325   :  { %v12068_v42 = vadd.f32 %v3404_v5, %v3259_v40  ;;  %v12085_v40 = vpop.f32.mrf.mxu0  ;;  %v4944_v5 = vld [vmem:[%s13612_s8 + $0x1c0] sm:$0xff] }
 0x327   :  { %v12092_v35 = vpop.f32.mrf.mxu0 }
 0x328   :  { %v8647_v45 = vpop.f32.mrf.mxu1 }
 0x329   :  { %v12072_v33 = vadd.f32 %v8647_v45, %v8591_v47  ;;  %v3355_v47 = vadd.f32 %v3354_v52, %v12006_v44  ;;  %v12096_v61 = vpop.f32.mrf.mxu0  ;;  %v4949_v44 = vld [vmem:[%s13612_s8 + $0x1e8] sm:$0xff]  ;;  %v4948_v52 = vld [vmem:[%s13612_s8 + $0x1e0] sm:$0xff]  ;;  %v4946_v45 = vld [vmem:[%s13612_s8 + $0x1d0] sm:$0xff] }
 0x32a   :  { %v3414_v16 = vpop.f32.mrf.mxu1  ;;  %5001 = vmatprep.subr.mxu1 %v4949_v44 }
 0x32b   :  { %v12074_v60 = vadd.f32 %v3414_v16, %v3269_v30  ;;  %v12100_v1 = vpop.f32.mrf.mxu0  ;;  %5002 = vmatpush1.msra.mxu1 %v4948_v52  ;;  %v4941_v16 = vld [vmem:[%s13612_s8 + $0x1a8] sm:$0xff]  ;;  %v4935_v52 = vld [vmem:[%s13612_s8 + $0x178] sm:$0xff] }
 0x32c   :  { %13855 = vst [vmem:[#allocation6_spill] sm:$0xff] %v12100_v1 }
 0x32e   :  { %v8682_v41 = vpop.f32.mrf.mxu1 }
 0x32f   :  { %v12079_v62 = vadd.f32 %v8682_v41, %v3350_v10 }
 0x330   :  { %v3506_v11 = vpop.f32.mrf.mxu1 }
 0x331   :  { %v12083_v12 = vadd.f32 %v3506_v11, %v3345_v39  ;;  %v4940_v39 = vld [vmem:[%s13612_s8 + $0x1a0] sm:$0xff]  ;;  %v4942_v11 = vld [vmem:[%s13612_s8 + $0x1b0] sm:$0xff] }
 0x334   :  { %v8685_v9 = vpop.f32.mrf.mxu1 }
 0x335   :  { %v12088_v31 = vadd.f32 %v8685_v9, %v3360_v17  ;;  %v4951_v17 = vld [vmem:[%s13612_s8 + $0x1f8] sm:$0xff]  ;;  %v12142_v9 = vpop.f32.mrf.mxu0 }
 0x336   :  { %v3516_v30 = vpop.f32.mrf.mxu1  ;;  %5072 = vmatprep.subr.mxu0 %v4951_v17  ;;  %13856 = vst [vmem:[#allocation9_spill] sm:$0xff] %v12142_v9  ;;  %v4933_v17 = vld [vmem:[%s13612_s8 + $0x168] sm:$0xff] }
 0x337   :  { %v12090_v14 = vadd.f32 %v3516_v30, %v3355_v47  ;;  %v4937_v30 = vld [vmem:[%s13612_s8 + $0x188] sm:$0xff] }
 0x33a   :  { %v8688_v38 = vpop.f32.mrf.mxu1 }
 0x33b   :  { %v12094_v10 = vadd.f32 %v8688_v38, %v3370_v59  ;;  %v4939_v38 = vld [vmem:[%s13612_s8 + $0x198] sm:$0xff] }
 0x33c   :  { %v3526_v6 = vpop.f32.mrf.mxu1 }
 0x33d   :  { %v12098_v26 = vadd.f32 %v3526_v6, %v3365_v25  ;;  %v4950_v25 = vld [vmem:[%s13612_s8 + $0x1f0] sm:$0xff] }
 0x33e   :  { %5073 = vmatpush1.msra.mxu0 %v4950_v25  ;;  %v4932_v25 = vld [vmem:[%s13612_s8 + $0x160] sm:$0xff] }
 0x33f   :  { %v8691_v48 = vpop.f32.mrf.mxu1  ;;  %5074 = vmatprep.subr.mxu0 %v4947_v15 }
 0x340   :  { %v12102_v54 = vadd.f32 %v8691_v48, %v3380_v13  ;;  %v4945_v13 = vld [vmem:[%s13612_s8 + $0x1c8] sm:$0xff]  ;;  %5075 = vmatpush1.msra.mxu0 %v4946_v45  ;;  %v4936_v48 = vld [vmem:[%s13612_s8 + $0x180] sm:$0xff]  ;;  %v4931_v45 = vld [vmem:[%s13612_s8 + $0x158] sm:$0xff] }
 0x341   :  { %v3536_v59 = vpop.f32.mrf.mxu1  ;;  %5003 = vmatprep.subr.mxu1 %v4945_v13  ;;  %v12174_v13 = vpop.f32.mrf.mxu0 }
 0x342   :  { %v12122_v24 = vadd.f32 %v3536_v59, %v3375_v63  ;;  %v4943_v63 = vld [vmem:[%s13612_s8 + $0x1b8] sm:$0xff]  ;;  %5004 = vmatpush1.msra.mxu1 %v4944_v5  ;;  %13857 = vst [vmem:[#allocation10_spill] sm:$0xff] %v12174_v13  ;;  %v4929_v5 = vld [vmem:[%s13612_s8 + $0x148] sm:$0xff] }
 0x343   :  { %v8694_v41 = vpop.f32.mrf.mxu1  ;;  %5005 = vmatprep.subr.mxu1 %v4941_v16  ;;  %5076 = vmatprep.subr.mxu0 %v4943_v63 }
 0x344   :  { %v12145_v47 = vadd.f32 %v8694_v41, %v12050_v18  ;;  %v4938_v18 = vld [vmem:[%s13612_s8 + $0x190] sm:$0xff]  ;;  %5006 = vmatpush1.msra.mxu1 %v4940_v39  ;;  %5077 = vmatpush1.msra.mxu0 %v4942_v11  ;;  %v4928_v41 = vld [vmem:[%s13612_s8 + $0x140] sm:$0xff]  ;;  %v4925_v39 = vld [vmem:[%s13612_s8 + $0x128] sm:$0xff] }
 0x345   :  { %v3546_v6 = vpop.f32.mrf.mxu1  ;;  %5007 = vmatprep.subr.mxu1 %v4937_v30  ;;  %5078 = vmatprep.subr.mxu0 %v4939_v38  ;;  %v4927_v11 = vld [vmem:[%s13612_s8 + $0x138] sm:$0xff]  ;;  %v4924_v38 = vld [vmem:[%s13612_s8 + $0x120] sm:$0xff] }
 0x346   :  { %v12160_v44 = vadd.f32 %v3546_v6, %v12054_v7  ;;  %v4934_v7 = vld [vmem:[%s13612_s8 + $0x170] sm:$0xff]  ;;  %5008 = vmatpush1.msra.mxu1 %v4936_v48  ;;  %5079 = vmatpush1.msra.mxu0 %v4938_v18  ;;  %v12206_v6 = vpop.f32.mrf.mxu0  ;;  %v4921_v18 = vld [vmem:[%s13612_s8 + $0x108] sm:$0xff] }
 0x347   :  { %v8697_v59 = vpop.f32.mrf.mxu1  ;;  %5009 = vmatprep.subr.mxu1 %v4933_v17  ;;  %5080 = vmatprep.subr.mxu0 %v4935_v52  ;;  %13858 = vst [vmem:[#allocation15_spill] sm:$0xff] %v12206_v6  ;;  %v4923_v17 = vld [vmem:[%s13612_s8 + $0x118] sm:$0xff] }
 0x348   :  { %v12177_v15 = vadd.f32 %v8697_v59, %v12058_v57  ;;  %v4930_v57 = vld [vmem:[%s13612_s8 + $0x150] sm:$0xff]  ;;  %5010 = vmatpush1.msra.mxu1 %v4932_v25  ;;  %5081 = vmatpush1.msra.mxu0 %v4934_v7  ;;  %v4920_v59 = vld [vmem:[%s13612_s8 + $0x100] sm:$0xff]  ;;  %v4917_v7 = vld [vmem:[%s13612_s8 + $0xe8] sm:$0xff] }
 0x349   :  { %v3556_v16 = vpop.f32.mrf.mxu1  ;;  %5011 = vmatprep.subr.mxu1 %v4929_v5  ;;  %5082 = vmatprep.subr.mxu0 %v4931_v45  ;;  %v4919_v5 = vld [vmem:[%s13612_s8 + $0xf8] sm:$0xff] }
 0x34a   :  { %v12192_v63 = vadd.f32 %v3556_v16, %v12060_v22  ;;  %v4926_v22 = vld [vmem:[%s13612_s8 + $0x130] sm:$0xff]  ;;  %5012 = vmatpush1.msra.mxu1 %v4928_v41  ;;  %5083 = vmatpush1.msra.mxu0 %v4930_v57  ;;  %v4916_v16 = vld [vmem:[%s13612_s8 + $0xe0] sm:$0xff]  ;;  %v12238_v41 = vpop.f32.mrf.mxu0 }
 0x34b   :  { %v8700_v30 = vpop.f32.mrf.mxu1  ;;  %5013 = vmatprep.subr.mxu1 %v4925_v39  ;;  %5084 = vmatprep.subr.mxu0 %v4927_v11  ;;  %v4913_v39 = vld [vmem:[%s13612_s8 + $0xc8] sm:$0xff]  ;;  %v4915_v11 = vld [vmem:[%s13612_s8 + $0xd8] sm:$0xff] }
 0x34c   :  { %v12209_v48 = vadd.f32 %v8700_v30, %v12064_v28  ;;  %v4922_v28 = vld [vmem:[%s13612_s8 + $0x110] sm:$0xff]  ;;  %5014 = vmatpush1.msra.mxu1 %v4924_v38  ;;  %5085 = vmatpush1.msra.mxu0 %v4926_v22  ;;  %v4912_v38 = vld [vmem:[%s13612_s8 + $0xc0] sm:$0xff] }
 0x34d   :  { %v3566_v52 = vpop.f32.mrf.mxu1  ;;  %5015 = vmatprep.subr.mxu1 %v4921_v18  ;;  %5086 = vmatprep.subr.mxu0 %v4923_v17  ;;  %v3764_v18 = vadd.f32 %v12008_v8, %v12079_v62  ;;  %v4909_v17 = vld [vmem:[%s13612_s8 + $0xa8] sm:$0xff]  ;;  %v4910_v8 = vld [vmem:[%s13612_s8 + $0xb0] sm:$0xff]  ;;  %v12272_v62 = vpop.f32.mrf.mxu0 }
 0x34e   :  { %v12224_v25 = vadd.f32 %v3566_v52, %v12068_v42  ;;  %v4918_v42 = vld [vmem:[%s13612_s8 + $0xf0] sm:$0xff]  ;;  %5016 = vmatpush1.msra.mxu1 %v4920_v59  ;;  %5087 = vmatpush1.msra.mxu0 %v4922_v28  ;;  %v4911_v52 = vld [vmem:[%s13612_s8 + $0xb8] sm:$0xff]  ;;  %13859 = vst [vmem:[#allocation14_spill] sm:$0xff] %v12272_v62 }
 0x34f   :  { %v8703_v45 = vpop.f32.mrf.mxu1  ;;  %5017 = vmatprep.subr.mxu1 %v4917_v7  ;;  %5088 = vmatprep.subr.mxu0 %v4919_v5  ;;  %v3763_v7 = vadd.f32 %v12012_v0, %v12083_v12  ;;  %v4905_v5 = vld [vmem:[%s13612_s8 + $0x88] sm:$0xff]  ;;  %v4906_v0 = vld [vmem:[%s13612_s8 + $0x90] sm:$0xff] }
 0x350   :  { %v12241_v57 = vadd.f32 %v8703_v45, %v12072_v33  ;;  %v4914_v33 = vld [vmem:[%s13612_s8 + $0xd0] sm:$0xff]  ;;  %5018 = vmatpush1.msra.mxu1 %v4916_v16  ;;  %5089 = vmatpush1.msra.mxu0 %v4918_v42  ;;  %v4907_v45 = vld [vmem:[%s13612_s8 + $0x98] sm:$0xff]  ;;  %v4904_v42 = vld [vmem:[%s13612_s8 + $0x80] sm:$0xff] }
 0x351   :  { %v3576_v30 = vpop.f32.mrf.mxu1  ;;  %5019 = vmatprep.subr.mxu1 %v4913_v39  ;;  %5090 = vmatprep.subr.mxu0 %v4915_v11  ;;  %v3766_v39 = vadd.f32 %v12018_v37, %v12088_v31  ;;  %v4901_v11 = vld [vmem:[%s13612_s8 + $0x68] sm:$0xff]  ;;  %v4902_v37 = vld [vmem:[%s13612_s8 + $0x70] sm:$0xff]  ;;  %v12304_v31 = vpop.f32.mrf.mxu0 }
 0x352   :  { %v12256_v22 = vadd.f32 %v3576_v30, %v12074_v60  ;;  %v4908_v60 = vld [vmem:[%s13612_s8 + $0xa0] sm:$0xff]  ;;  %5020 = vmatpush1.msra.mxu1 %v4912_v38  ;;  %5091 = vmatpush1.msra.mxu0 %v4914_v33  ;;  %v4903_v30 = vld [vmem:[%s13612_s8 + $0x78] sm:$0xff] }
 0x353   :  { %v8794_v59 = vpop.f32.mrf.mxu1  ;;  %5021 = vmatprep.subr.mxu1 %v4909_v17  ;;  %5092 = vmatprep.subr.mxu0 %v4911_v52  ;;  %v4900_v33 = vld [vmem:[%s13612_s8 + $0x60] sm:$0xff]  ;;  %v3765_v17 = vadd.f32 %v12022_v49, %v12090_v14  ;;  %v4897_v52 = vld [vmem:[%s13612_s8 + $0x48] sm:$0xff]  ;;  %v4898_v49 = vld [vmem:[%s13612_s8 + $0x50] sm:$0xff] }
 0x354   :  { %v12274_v28 = vadd.f32 %v8794_v59, %v3764_v18  ;;  %5022 = vmatpush1.msra.mxu1 %v4908_v60  ;;  %5093 = vmatpush1.msra.mxu0 %v4910_v8  ;;  %v4899_v59 = vld [vmem:[%s13612_s8 + $0x58] sm:$0xff]  ;;  %v4896_v8 = vld [vmem:[%s13612_s8 + $0x40] sm:$0xff] }
 0x355   :  { %v3862_v16 = vpop.f32.mrf.mxu1  ;;  %5023 = vmatprep.subr.mxu1 %v4905_v5  ;;  %5094 = vmatprep.subr.mxu0 %v4907_v45  ;;  %v4396_v5 = vpop.f32.mrf.mxu0  ;;  %v3767_v45 = vadd.f32 %v12028_v50, %v12098_v26 }
 0x356   :  { %v3941_v12 = vadd.f32 %v3862_v16, %v3763_v7  ;;  %5024 = vmatpush1.msra.mxu1 %v4904_v42  ;;  %5095 = vmatpush1.msra.mxu0 %v4906_v0 }
 0x357   :  { %v8797_v38 = vpop.f32.mrf.mxu1  ;;  %5025 = vmatprep.subr.mxu1 %v4901_v11  ;;  %5096 = vmatprep.subr.mxu0 %v4903_v30  ;;  %v12327_v11 = vpop.f32.mrf.mxu0 }
 0x358   :  { %v12306_v18 = vadd.f32 %v8797_v38, %v3766_v39  ;;  %5026 = vmatpush1.msra.mxu1 %v4900_v33  ;;  %5097 = vmatpush1.msra.mxu0 %v4902_v37  ;;  %v4119_v62 = vadd.f32 %v12056_v43, %v3941_v12 }
 0x359   :  { %v3872_v60 = vpop.f32.mrf.mxu1  ;;  %5027 = vmatprep.subr.mxu1 %v4897_v52  ;;  %5098 = vmatprep.subr.mxu0 %v4899_v59  ;;  %v12332_v37 = vpop.f32.mrf.mxu0 }
 0x35a   :  { %v3943_v14 = vadd.f32 %v3872_v60, %v3765_v17  ;;  %5028 = vmatpush1.msra.mxu1 %v4896_v8  ;;  %5099 = vmatpush1.msra.mxu0 %v4898_v49 }
 0x35b   :  { %v8800_v7 = vpop.f32.mrf.mxu1 }
 0x35c   :  { %v12325_v16 = vadd.f32 %v12066_v51, %v3943_v14  ;;  %v12338_v51 = vpop.f32.mrf.mxu0 }
 0x35d   :  { %v3882_v42 = vpop.f32.mrf.mxu1 }
 0x35e   :  { %v3945_v0 = vadd.f32 %v3882_v42, %v3767_v45  ;;  %v12344_v59 = vpop.f32.mrf.mxu0 }
 0x35f   :  { %v8803_v39 = vpop.f32.mrf.mxu1  ;;  %13860 = vst [vmem:[#allocation17_spill] sm:$0xff] %v12344_v59 }
 0x360   :  { %v12330_v30 = vadd.f32 %v12076_v23, %v3945_v0  ;;  %v3778_v23 = vadd.f32 %v12046_v3, %v12241_v57  ;;  %v12350_v49 = vpop.f32.mrf.mxu0 }
 0x361   :  { %v3892_v38 = vpop.f32.mrf.mxu1 }
 0x362   :  { %v12355_v20 = vpop.f32.mrf.mxu0 }
 0x363   :  { %v8806_v33 = vpop.f32.mrf.mxu1  ;;  %13863 = vst [vmem:[#allocation19_spill] sm:$0xff] %v12355_v20 }
 0x364   :  { %v12358_v9 = vpop.f32.mrf.mxu0 }
 0x365   :  { %v12334_v17 = vpop.f32.mrf.mxu1  ;;  %13864 = vst [vmem:[#allocation22_spill] sm:$0xff] %v12358_v9 }
 0x367   :  { %v12336_v50 = vpop.f32.mrf.mxu1 }
 0x369   :  { %v12340_v26 = vpop.f32.mrf.mxu1 }
 0x36b   :  { %v12342_v52 = vpop.f32.mrf.mxu1 }
 0x36d   :  { %v12346_v60 = vpop.f32.mrf.mxu1 }
 0x36e   :  { %13861 = vst [vmem:[#allocation16_spill] sm:$0xff] %v12346_v60  ;;  %v12360_v60 = vpop.f32.mrf.mxu0 }
 0x36f   :  { %v8815_v8 = vpop.f32.mrf.mxu1  ;;  %13865 = vst [vmem:[#allocation21_spill] sm:$0xff] %v12360_v60 }
 0x370   :  { %v3956_v14 = vadd.f32 %v8815_v8, %v3778_v23 }
 0x371   :  { %v12352_v45 = vpop.f32.mrf.mxu1 }
 0x372   :  { %13862 = vst [vmem:[#allocation20_spill] sm:$0xff] %v12352_v45  ;;  %v4134_v42 = vadd.f32 %v12238_v41, %v3956_v14  ;;  %v12362_v45 = vpop.f32.mrf.mxu0 }
 0x373   :  { %v8906_v0 = vpop.f32.mrf.mxu1  ;;  %13866 = vst [vmem:[#allocation8_spill] sm:$0xff] %v12362_v45  ;;  %v4120_v45 = vadd.f32 %v12052_v4, %v12274_v28  ;;  %v3772_v4 = vadd.f32 %v12034_v56, %v12145_v47  ;;  %v12408_v56 = vld [vmem:[%s13613_s7] ss:$0 sm:$0xff]  ;;  %s9306_s7 = smov 80  }
 0x374   :  { %v12368_v20 = vpop.f32.mrf.mxu0 }
 0x375   :  { %v4218_v6 = vpop.f32.mrf.mxu1  ;;  %13868 = vst [vmem:[#allocation24_spill] sm:$0xff] %v12368_v20  ;;  %v3768_v20 = vadd.f32 %v12026_v34, %v12094_v10  ;;  %v4298_v9 = vadd.f32 %v8906_v0, %v4120_v45  ;;  %v3771_v34 = vadd.f32 %v12036_v55, %v12160_v44  ;;  %v3950_v45 = vadd.f32 %v8806_v33, %v3772_v4 }
 0x376   :  { %v4297_v13 = vadd.f32 %v4218_v6, %v4119_v62  ;;  %v12374_v62 = vpop.f32.mrf.mxu0  ;;  %v3773_v55 = vadd.f32 %v12040_v36, %v12192_v63 }
 0x377   :  { %v8909_v59 = vpop.f32.mrf.mxu1  ;;  %13871 = vst [vmem:[#allocation11_spill] sm:$0xff] %v12374_v62  ;;  %v4122_v62 = vadd.f32 %v12062_v46, %v12306_v18  ;;  %v3949_v44 = vadd.f32 %v12334_v17, %v3771_v34  ;;  %v13878_v34 = vld [vmem:[#allocation17_spill] sm:$0xff] }
 0x378   :  { %v4475_v1 = vadd.f32 %v4396_v5, %v4297_v13  ;;  %v12380_v5 = vpop.f32.mrf.mxu0 }
 0x379   :  { %v4228_v3 = vpop.f32.mrf.mxu1  ;;  %13874 = vst [vmem:[#allocation54_spill] sm:$0xff] %v12380_v5  ;;  %v3769_v5 = vadd.f32 %v12032_v58, %v12122_v24  ;;  %v4300_v10 = vadd.f32 %v8909_v59, %v4122_v62  ;;  %v13876_v62 = vld [vmem:[#allocation6_spill] sm:$0xff] }
 0x37a   :  { %v4299_v24 = vadd.f32 %v4228_v3, %v12325_v16 }
 0x37b   :  { %v8912_v57 = vpop.f32.mrf.mxu1  ;;  %v3947_v18 = vadd.f32 %v3892_v38, %v3769_v5  ;;  %v4478_v16 = vadd.f32 %v12327_v11, %v4300_v10  ;;  %v3951_v11 = vadd.f32 %v12340_v26, %v3773_v55  ;;  %v13881_v55 = vld [vmem:[#allocation10_spill] sm:$0xff] }
 0x37c   :  { %v4477_v59 = vadd.f32 %v12332_v37, %v4299_v24 }
 0x37d   :  { %v4238_v23 = vpop.f32.mrf.mxu1 }
 0x37f   :  { %v8915_v8 = vpop.f32.mrf.mxu1 }
 0x381   :  { %v12364_v41 = vpop.f32.mrf.mxu1 }
 0x383   :  { %v12366_v14 = vpop.f32.mrf.mxu1 }
 0x384   :  { %13867 = vst [vmem:[#allocation7_spill] sm:$0xff] %v12366_v14  ;;  %v8983_v14 = vpop.f32.mrf.mxu0 }
 0x385   :  { %v12370_v43 = vpop.f32.mrf.mxu1 }
 0x386   :  { %13869 = vst [vmem:[#allocation23_spill] sm:$0xff] %v12370_v43 }
 0x387   :  { %v12372_v6 = vpop.f32.mrf.mxu1 }
 0x388   :  { %13870 = vst [vmem:[#allocation53_spill] sm:$0xff] %v12372_v6  ;;  %v3946_v6 = vadd.f32 %v8800_v7, %v3768_v20  ;;  %v4476_v20 = vadd.f32 %v12304_v31, %v4298_v9  ;;  %v3777_v31 = vadd.f32 %v12048_v19, %v12256_v22 }
 0x389   :  { %v12376_v13 = vpop.f32.mrf.mxu1 }
 0x38a   :  { %13872 = vst [vmem:[#allocation2_spill] sm:$0xff] %v12376_v13  ;;  %v4124_v9 = vadd.f32 %v12070_v32, %v3946_v6 }
 0x38b   :  { %v12378_v12 = vpop.f32.mrf.mxu1 }
 0x38c   :  { %13873 = vst [vmem:[#allocation55_spill] sm:$0xff] %v12378_v12  ;;  %v3770_v12 = vadd.f32 %v12030_v21, %v12102_v54  ;;  %v3774_v21 = vadd.f32 %v12038_v2, %v12177_v15  ;;  %v12410_v54 = vpop.f32.mrf.mxu0  ;;  %v3776_v2 = vadd.f32 %v12042_v27, %v12209_v48  ;;  %v3775_v15 = vadd.f32 %v12044_v53, %v12224_v25 }
 0x38d   :  { %v12384_v60 = vpop.f32.mrf.mxu1  ;;  %v4302_v38 = vadd.f32 %v8912_v57, %v4124_v9  ;;  %v4125_v27 = vadd.f32 %v12085_v40, %v3947_v18  ;;  %v4128_v53 = vadd.f32 %v12092_v35, %v3950_v45  ;;  %v13882_v9 = vld [vmem:[#allocation15_spill] sm:$0xff] }
 0x38e   :  { %v3948_v46 = vadd.f32 %v8803_v39, %v3770_v12  ;;  %v3952_v33 = vadd.f32 %v12336_v50, %v3774_v21  ;;  %v4127_v50 = vadd.f32 %v12096_v61, %v3949_v44  ;;  %v13877_v12 = vld [vmem:[#allocation9_spill] sm:$0xff]  ;;  %v13880_v21 = vld [vmem:[#allocation23_spill] sm:$0xff] }
 0x38f   :  { %v8927_v43 = vpop.f32.mrf.mxu1  ;;  %v4480_v57 = vadd.f32 %v12338_v51, %v4302_v38  ;;  %v4303_v37 = vadd.f32 %v12364_v41, %v4125_v27  ;;  %v4129_v5 = vadd.f32 %v13877_v12, %v3951_v11 }
 0x390   :  { %v4312_v13 = vadd.f32 %v8927_v43, %v4134_v42  ;;  %v4126_v17 = vadd.f32 %v12081_v29, %v3948_v46  ;;  %v4301_v42 = vadd.f32 %v4238_v23, %v12330_v30  ;;  %v13875_v43 = vld [vmem:[#allocation16_spill] sm:$0xff]  ;;  %v4130_v26 = vadd.f32 %v13876_v62, %v3952_v33 }
 0x391   :  { %v12396_v28 = vpop.f32.mrf.mxu1  ;;  %v3953_v6 = vadd.f32 %v13875_v43, %v3775_v15  ;;  %v13883_v15 = vld [vmem:[#allocation53_spill] sm:$0xff]  ;;  %v4890_v62 = vld [vmem:[%s13612_s8 + $0x10] sm:$0xff] }
 0x392   :  { %v12401_v7 = vadd.f32 %v8983_v14, %v4312_v13  ;;  %v4304_v0 = vadd.f32 %v8915_v8, %v4126_v17  ;;  %v3954_v14 = vadd.f32 %v12342_v52, %v3776_v2  ;;  %v4479_v51 = vadd.f32 %v13878_v34, %v4301_v42  ;;  %v4892_v42 = vld [vmem:[%s13612_s8 + $0x20] sm:$0xff] }
 0x393   :  { %v9018_v58 = vpop.f32.mrf.mxu1 }
 0x394   :  { %v4654_v47 = vadd.f32 %v9018_v58, %v4476_v20  ;;  %v4482_v52 = vadd.f32 %v12350_v49, %v4304_v0  ;;  %v13879_v20 = vld [vmem:[#allocation7_spill] sm:$0xff]  ;;  %v4305_v58 = vadd.f32 %v13880_v21, %v4127_v50  ;;  %v4132_v24 = vadd.f32 %v13881_v55, %v3954_v14  ;;  %v4894_v0 = vld [vmem:[%s13612_s8 + $0x30] sm:$0xff]  ;;  %v4972_v21 = vld [vmem:[%s13612_s8 + $0x2a0] sm:$0xff] }
 0x395   :  { %v4574_v39 = vpop.f32.mrf.mxu1  ;;  %v4306_v46 = vadd.f32 %v13879_v20, %v4128_v53  ;;  %v4889_v50 = vld [vmem:[%s13612_s8 + $0x8] sm:$0xff] }
 0x396   :  { %v4677_v36 = vadd.f32 %v12408_v56, %v4654_v47  ;;  %v4653_v63 = vadd.f32 %v4574_v39, %v4475_v1  ;;  %v12425_v32 = vpop.f32.mrf.mxu0  ;;  %v4131_v47 = vadd.f32 %v13882_v9, %v3953_v6  ;;  %v4308_v39 = vadd.f32 %v13883_v15, %v4130_v26  ;;  %v4891_v6 = vld [vmem:[%s13612_s8 + $0x18] sm:$0xff]  ;;  %v4969_v55 = vld [vmem:[%s13612_s8 + $0x288] sm:$0xff] }
 0x397   :  { %v9021_v48 = vpop.f32.mrf.mxu1  ;;  %v4971_v15 = vld [vmem:[%s13612_s8 + $0x298] sm:$0xff] }
 0x398   :  { %v4693_v25 = vmul.f32 0.1, %v4677_v36  ;;  %v4676_v19 = vadd.f32 %v12408_v56, %v4653_v63  ;;  %v4656_v22 = vadd.f32 %v9021_v48, %v4478_v16  ;;  %v9074_v1 = vpop.f32.mrf.mxu0  ;;  %v13885_v16 = vld [vmem:[#allocation20_spill] sm:$0xff]  ;;  %v4309_v20 = vadd.f32 %v12384_v60, %v4131_v47 }
 0x399   :  { %v4584_v29 = vpop.f32.mrf.mxu1  ;;  %v3955_v33 = vadd.f32 %v13885_v16, %v3777_v31  ;;  %v13886_v1 = vld [vmem:[#allocation22_spill] sm:$0xff]  ;;  %v13892_v47 = vld [vmem:[#allocation24_spill] sm:$0xff] }
 0x39a   :  { %v4692_v3 = vmul.f32 0.1, %v4676_v19  ;;  %v4679_v40 = vadd.f32 %v12408_v56, %v4656_v22  ;;  %v4655_v35 = vadd.f32 %v4584_v29, %v4477_v59  ;;  %v12442_v30 = vmax.f32 %v4677_v36, %v4693_v25  ;;  %v13884_v36 = vld [vmem:[#allocation19_spill] sm:$0xff]  ;;  %v13887_v29 = vld [vmem:[#allocation2_spill] sm:$0xff] }
 0x39b   :  { %v9024_v13 = vpop.f32.mrf.mxu1  ;;  %v4481_v63 = vadd.f32 %v13884_v36, %v4303_v37  ;;  %v4893_v25 = vld [vmem:[%s13612_s8 + $0x28] sm:$0xff]  ;;  %v4484_v11 = vadd.f32 %v13886_v1, %v4306_v46  ;;  %v4888_v37 = vld [vmem:[%s13612_s8] sm:$0xff] }
 0x39c   :  { %v4708_v23 = vmax.f32 %v4676_v19, %v4692_v3  ;;  %v4678_v61 = vadd.f32 %v12408_v56, %v4655_v35  ;;  %v4658_v8 = vadd.f32 %v9024_v13, %v4480_v57  ;;  %v4695_v4 = vmul.f32 0.1, %v4679_v40  ;;  %v4895_v19 = vld [vmem:[%s13612_s8 + $0x38] sm:$0xff]  ;;  %5029 = vmatprep.subr.mxu1 %v4893_v25 }
 0x39d   :  { %v4594_v10 = vpop.f32.mrf.mxu1  ;;  %v4307_v3 = vadd.f32 %v13887_v29, %v4129_v5  ;;  %v13888_v57 = vld [vmem:[#allocation21_spill] sm:$0xff]  ;;  %5100 = vmatprep.subr.mxu0 %v4895_v19  ;;  %5030 = vmatpush1.msra.mxu1 %v4892_v42  ;;  %v4965_v19 = vld [vmem:[%s13612_s8 + $0x268] sm:$0xff]  ;;  %v13894_v42 = vld [vmem:[#allocation54_spill] sm:$0xff] }
 0x39e   :  { %v12450_v41 = vmax.f32 %v4708_v23, %v12442_v30  ;;  %v4694_v18 = vmul.f32 0.1, %v4678_v61  ;;  %v4681_v45 = vadd.f32 %v12408_v56, %v4658_v8  ;;  %v4657_v44 = vadd.f32 %v4594_v10, %v4479_v51  ;;  %v13889_v23 = vld [vmem:[#allocation8_spill] sm:$0xff]  ;;  %5101 = vmatpush1.msra.mxu0 %v4894_v0  ;;  %5031 = vmatprep.subr.mxu1 %v4889_v50  ;;  %v13890_v8 = vld [vmem:[#allocation55_spill] sm:$0xff]  ;;  %v4964_v50 = vld [vmem:[%s13612_s8 + $0x260] sm:$0xff] }
 0x39f   :  { %v9027_v2 = vpop.f32.mrf.mxu1  ;;  %v4711_v17 = vmax.f32 %v4679_v40, %v4695_v4  ;;  %v4483_v14 = vadd.f32 %v13888_v57, %v4305_v58  ;;  %v4310_v12 = vadd.f32 %v13890_v8, %v4132_v24  ;;  %5102 = vmatprep.subr.mxu0 %v4891_v6  ;;  %5032 = vmatpush1.msra.mxu1 %v4888_v37  ;;  %v4973_v10 = vld [vmem:[%s13612_s8 + $0x2a8] sm:$0xff]  ;;  %v4974_v58 = vld [vmem:[%s13612_s8 + $0x2b0] sm:$0xff]  ;;  %v13891_v24 = vld [vmem:[#allocation14_spill] sm:$0xff] }
 0x3a0   :  { %v12457_v38 = vmax.f32 %v4678_v61, %v4694_v18  ;;  %v4660_v49 = vadd.f32 %v9027_v2, %v4482_v52  ;;  %v4697_v27 = vmul.f32 0.1, %v4681_v45  ;;  %v4680_v53 = vadd.f32 %v12408_v56, %v4657_v44  ;;  %v4975_v52 = vld [vmem:[%s13612_s8 + $0x2b8] sm:$0xff]  ;;  %5103 = vmatpush1.msra.mxu0 %v4890_v62  ;;  %5053 = vmatprep.subr.mxu1 %v4973_v10  ;;  %v4966_v29 = vld [vmem:[%s13612_s8 + $0x270] sm:$0xff]  ;;  %v4960_v37 = vld [vmem:[%s13612_s8 + $0x240] sm:$0xff] }
 0x3a1   :  { %v4604_v48 = vpop.f32.mrf.mxu1  ;;  %v4486_v61 = vadd.f32 %v13889_v23, %v4308_v39  ;;  %v4133_v60 = vadd.f32 %v13891_v24, %v3955_v33  ;;  %v4485_v44 = vadd.f32 %v13892_v47, %v4307_v3  ;;  %5124 = vmatprep.subr.mxu0 %v4975_v52  ;;  %5054 = vmatpush2.msra.mxu1 %v4972_v21  ;;  %v4968_v39 = vld [vmem:[%s13612_s8 + $0x280] sm:$0xff]  ;;  %v4963_v6 = vld [vmem:[%s13612_s8 + $0x258] sm:$0xff]  ;;  %v4962_v23 = vld [vmem:[%s13612_s8 + $0x250] sm:$0xff] }
 0x3a2   :  { %v12469_v22 = vadd.f32 %v12408_v56, %v4660_v49  ;;  %v4659_v59 = vadd.f32 %v4604_v48, %v4481_v63  ;;  %v4725_v31 = vmax.f32 %v12442_v30, %v12457_v38  ;;  %v4696_v40 = vmul.f32 0.1, %v4680_v53  ;;  %v4970_v49 = vld [vmem:[%s13612_s8 + $0x290] sm:$0xff]  ;;  %5125 = vmatpush2.msra.mxu0 %v4974_v58  ;;  %5055 = vmatprep.subr.mxu1 %v4969_v55  ;;  %v4956_v30 = vld [vmem:[%s13612_s8 + $0x220] sm:$0xff]  ;;  %v4955_v21 = vld [vmem:[%s13612_s8 + $0x218] sm:$0xff] }
 0x3a3   :  { %v9030_v35 = vpop.f32.mrf.mxu1  ;;  %v12486_v43 = vmax.f32 %v12457_v38, %v4711_v17  ;;  %v4713_v5 = vmax.f32 %v4681_v45, %v4697_v27  ;;  %5126 = vmatprep.subr.mxu0 %v4971_v15  ;;  %5056 = vmatpush2.msra.mxu1 %v4968_v39  ;;  %v4487_v0 = vadd.f32 %v13894_v42, %v4309_v20  ;;  %v4958_v38 = vld [vmem:[%s13612_s8 + $0x230] sm:$0xff]  ;;  %v4952_v58 = vld [vmem:[%s13612_s8 + $0x200] sm:$0xff]  ;;  %v12615_v15 = vld [vmem:[%s13615_s9 + $0x1e8] sm:$0xff] }
 0x3a4   :  { %v4682_v26 = vadd.f32 %v12408_v56, %v4659_v59  ;;  %v4662_v13 = vadd.f32 %v9030_v35, %v4484_v11  ;;  %v4712_v4 = vmax.f32 %v4680_v53, %v4696_v40  ;;  %v4699_v34 = vmul.f32 0.1, %v12469_v22  ;;  %v13893_v53 = vld [vmem:[#allocation11_spill] sm:$0xff]  ;;  %v4967_v59 = vld [vmem:[%s13612_s8 + $0x278] sm:$0xff]  ;;  %5127 = vmatpush2.msra.mxu0 %v4970_v49  ;;  %5057 = vmatprep.subr.mxu1 %v4965_v19 }
 0x3a5   :  { %v4614_v51 = vpop.f32.mrf.mxu1  ;;  %v4488_v48 = vadd.f32 %v13893_v53, %v4310_v12  ;;  %v4311_v3 = vadd.f32 %v12396_v28, %v4133_v60  ;;  %5128 = vmatprep.subr.mxu0 %v4967_v59  ;;  %5058 = vmatpush2.msra.mxu1 %v4964_v50  ;;  %13895 = vst [vmem:[#allocation26_spill] sm:$0xff] %v12615_v15 }
 0x3a6   :  { %v4698_v46 = vmul.f32 0.1, %v4682_v26  ;;  %v4685_v18 = vadd.f32 %v12408_v56, %v4662_v13  ;;  %v4661_v45 = vadd.f32 %v4614_v51, %v4483_v14  ;;  %v12520_v2 = vmax.f32 %v4712_v4, %v4713_v5  ;;  %v4961_v14 = vld [vmem:[%s13612_s8 + $0x248] sm:$0xff]  ;;  %v6940_v13 = vld [vmem:[%s13614_s3] ss:$0 sm:$0xff]  ;;  %5129 = vmatpush2.msra.mxu0 %v4966_v29  ;;  %v4959_v51 = vld [vmem:[%s13612_s8 + $0x238] sm:$0xff] }
 0x3a7   :  { %v9033_v9 = vpop.f32.mrf.mxu1  ;;  %v4715_v33 = vmax.f32 %v12469_v22, %v4699_v34  ;;  %5059 = vmatprep.subr.mxu1 %v4961_v14  ;;  %5130 = vmatprep.subr.mxu0 %v4963_v6  ;;  %v4957_v34 = vld [vmem:[%s13612_s8 + $0x228] sm:$0xff]  ;;  %s9308_s3 = smov 112  }
 0x3a8   :  { %v4714_v36 = vmax.f32 %v4682_v26, %v4698_v46  ;;  %v4684_v63 = vadd.f32 %v12408_v56, %v4661_v45  ;;  %v4664_v16 = vadd.f32 %v9033_v9, %v4486_v61  ;;  %v4701_v17 = vmul.f32 0.1, %v4685_v18  ;;  %5060 = vmatpush2.msra.mxu1 %v4960_v37  ;;  %5131 = vmatpush2.msra.mxu0 %v4962_v23  ;;  %v4953_v45 = vld [vmem:[%s13612_s8 + $0x208] sm:$0xff] }
 0x3a9   :  { %v4624_v27 = vpop.f32.mrf.mxu1  ;;  %v4736_v25 = vmax.f32 %v12450_v41, %v12520_v2  ;;  %5061 = vmatprep.subr.mxu1 %v4957_v34  ;;  %5132 = vmatprep.subr.mxu0 %v4959_v51  ;;  %v12647_v34 = vld [vmem:[%s13615_s9 + $0x1c8] sm:$0xff]  ;;  %v12652_v51 = vld [vmem:[%s13615_s9 + $0x1d8] sm:$0xff] }
 0x3aa   :  { %v4700_v1 = vmul.f32 0.1, %v4684_v63  ;;  %v12543_v22 = vadd.f32 %v12408_v56, %v4664_v16  ;;  %v4663_v11 = vadd.f32 %v4624_v27, %v4485_v44  ;;  %v12553_v35 = vmax.f32 %v4713_v5, %v4714_v36  ;;  %5062 = vmatpush2.msra.mxu1 %v4956_v30  ;;  %5133 = vmatpush2.msra.mxu0 %v4958_v38  ;;  %v12674_v30 = vld [vmem:[%s13615_s9 + $0x1b8] sm:$0xff]  ;;  %v12681_v38 = vld [vmem:[%s13615_s9 + $0x1a0] sm:$0xff] }
 0x3ab   :  { %v9036_v40 = vpop.f32.mrf.mxu1  ;;  %v12555_v57 = vmax.f32 %v4714_v36, %v4715_v33  ;;  %v4717_v61 = vmax.f32 %v4685_v18, %v4701_v17  ;;  %v4836_v18 = vadd.f32 %v6940_v13, %v12425_v32  ;;  %v4954_v32 = vld [vmem:[%s13612_s8 + $0x210] sm:$0xff]  ;;  %5063 = vmatprep.subr.mxu1 %v4953_v45  ;;  %5134 = vmatprep.subr.mxu0 %v4955_v21  ;;  %s9303_s8 = smov 48   ;;  %v12717_v21 = vld [vmem:[%s13615_s9 + $0x168] sm:$0xff] }
 0x3ac   :  { %v4716_v28 = vmax.f32 %v4684_v63, %v4700_v1  ;;  %v4686_v62 = vadd.f32 %v12408_v56, %v4663_v11  ;;  %v4666_v26 = vadd.f32 %v9036_v40, %v4488_v48  ;;  %v4703_v8 = vmul.f32 0.1, %v12543_v22  ;;  %5064 = vmatpush2.msra.mxu1 %v4952_v58  ;;  %5135 = vmatpush2.msra.mxu0 %v4954_v32  ;;  %v12710_v45 = vld [vmem:[%s13615_s9 + $0x190] sm:$0xff]  ;;  %v12722_v58 = vld [vmem:[%s13615_s9 + $0x178] sm:$0xff]  ;;  %v12753_v32 = vld [vmem:[%s13615_s9 + $0x140] sm:$0xff] }
 0x3ad   :  { %v4634_v12 = vpop.f32.mrf.mxu1  ;;  %v4737_v5 = vmax.f32 %v4725_v31, %v12553_v35  ;;  %v4738_v4 = vmax.f32 %v12486_v43, %v12555_v57  ;;  %v4489_v43 = vadd.f32 %v12410_v54, %v4311_v3  ;;  %v4839_v63 = vmul.f32 0.1, %v4836_v18  ;;  %5207 = vmatprep.subr.mxu1 %v12615_v15 }
 0x3ae   :  { %v4702_v10 = vmul.f32 0.1, %v4686_v62  ;;  %v4689_v52 = vadd.f32 %v12408_v56, %v4666_v26  ;;  %v4665_v20 = vadd.f32 %v4634_v12, %v4487_v0  ;;  %v4730_v46 = vmax.f32 %v4716_v28, %v4717_v61 }
 0x3af   :  { %4842 = vrot.lane.b32.xlu0 %v4737_v5, %s9302_s24  ;;  %v9039_v31 = vpop.f32.mrf.mxu1  ;;  %v4719_v9 = vmax.f32 %v12543_v22, %v4703_v8  ;;  %v4840_v11 = vmax.f32 %v4836_v18, %v4839_v63  ;;  %v12642_v5 = vld [vmem:[%s13615_s9 + $0x1f0] sm:$0xff]  ;;  %v12705_v18 = vld [vmem:[%s13615_s9 + $0x180] sm:$0xff]  ;;  %v12794_v63 = vld [vmem:[%s13615_s9 + $0x118] sm:$0xff] }
 0x3b0   :  { %v4718_v55 = vmax.f32 %v4686_v62, %v4702_v10  ;;  %v4705_v24 = vmul.f32 0.1, %v4689_v52  ;;  %v4688_v54 = vadd.f32 %v12408_v56, %v4665_v20  ;;  %v4668_v60 = vadd.f32 %v9039_v31, %v12401_v7  ;;  %v12620_v7 = vld [vmem:[%s13615_s9 + $0x1f8] sm:$0xff]  ;;  %v12657_v10 = vld [vmem:[%s13615_s9 + $0x1c0] sm:$0xff]  ;;  %v12669_v20 = vld [vmem:[%s13615_s9 + $0x1a8] sm:$0xff] }
 0x3b1   :  { %v4644_v47 = vpop.f32.mrf.mxu1  ;;  %v4739_v44 = vmax.f32 %v12520_v2, %v4730_v46  ;;  %13896 = vst [vmem:[#allocation25_spill] sm:$0xff] %v12620_v7  ;;  %5278 = vmatprep.subr.mxu0 %v12620_v7  ;;  %v12686_v31 = vld [vmem:[%s13615_s9 + $0x1b0] sm:$0xff] }
 0x3b2   :  { %v4704_v39 = vmul.f32 0.1, %v4688_v54  ;;  %v4691_v49 = vadd.f32 %v12408_v56, %v4668_v60  ;;  %v4667_v36 = vadd.f32 %v4644_v47, %v4489_v43  ;;  %v4731_v16 = vmax.f32 %v4717_v61, %v4718_v55  ;;  %v12693_v43 = vld [vmem:[%s13615_s9 + $0x188] sm:$0xff]  ;;  %v12746_v60 = vld [vmem:[%s13615_s9 + $0x158] sm:$0xff] }
 0x3b3   :  { %4850 = vrot.lane.b32.xlu1 %v4739_v44, %s9303_s8  ;;  %4846 = vrot.lane.b32.xlu0 %v4738_v4, %s9304_s5  ;;  %v4732_v33 = vmax.f32 %v4718_v55, %v4719_v9  ;;  %v4721_v17 = vmax.f32 %v4689_v52, %v4705_v24  ;;  %v12662_v52 = vld [vmem:[%s13615_s9 + $0x1d0] sm:$0xff]  ;;  %v12729_v55 = vld [vmem:[%s13615_s9 + $0x160] sm:$0xff] }
 0x3b4   :  { %v4720_v27 = vmax.f32 %v4688_v54, %v4704_v39  ;;  %v4707_v53 = vmul.f32 0.1, %v4691_v49  ;;  %v4690_v48 = vadd.f32 %v12408_v56, %v4667_v36  ;;  %v4740_v19 = vmax.f32 %v12553_v35, %v4731_v16  ;;  %v12734_v24 = vld [vmem:[%s13615_s9 + $0x170] sm:$0xff]  ;;  %v12741_v54 = vld [vmem:[%s13615_s9 + $0x148] sm:$0xff]  ;;  %v12770_v44 = vld [vmem:[%s13615_s9 + $0x138] sm:$0xff] }
 0x3b5   :  { %v4741_v59 = vmax.f32 %v12555_v57, %v4732_v33  ;;  %v12758_v9 = vld [vmem:[%s13615_s9 + $0x150] sm:$0xff]  ;;  %v12765_v47 = vld [vmem:[%s13615_s9 + $0x128] sm:$0xff]  ;;  %v12777_v39 = vld [vmem:[%s13615_s9 + $0x120] sm:$0xff] }
 0x3b6   :  { %v4706_v1 = vmul.f32 0.1, %v4690_v48  ;;  %v4733_v22 = vmax.f32 %v4720_v27, %v4721_v17  ;;  %v4723_v42 = vmax.f32 %v4691_v49, %v4707_v53  ;;  %v12782_v49 = vld [vmem:[%s13615_s9 + $0x130] sm:$0xff]  ;;  %v12789_v36 = vld [vmem:[%s13615_s9 + $0x108] sm:$0xff]  ;;  %v12818_v27 = vld [vmem:[%s13615_s9 + $0xf8] sm:$0xff] }
 0x3b7   :  { %4854 = vrot.lane.b32.xlu1 %v4740_v19, %s9305_s19  ;;  %4858 = vrot.lane.b32.xlu0 %v4741_v59, %s9306_s7  ;;  %v12825_v53 = vld [vmem:[%s13615_s9 + $0xe0] sm:$0xff]  ;;  %v12837_v19 = vld [vmem:[%s13615_s9 + $0xc8] sm:$0xff] }
 0x3b8   :  { %v4722_v0 = vmax.f32 %v4690_v48, %v4706_v1  ;;  %v4742_v50 = vmax.f32 %v4730_v46, %v4733_v22  ;;  %v12698_v46 = vld [vmem:[%s13615_s9 + $0x198] sm:$0xff]  ;;  %v12830_v48 = vld [vmem:[%s13615_s9 + $0xf0] sm:$0xff]  ;;  %v12849_v1 = vld [vmem:[%s13615_s9 + $0xc0] sm:$0xff] }
 0x3b9   :  { %v12842_v59 = vld [vmem:[%s13615_s9 + $0xd8] sm:$0xff]  ;;  %v12854_v22 = vld [vmem:[%s13615_s9 + $0xd0] sm:$0xff] }
 0x3ba   :  { %v4735_v29 = vmax.f32 %v4722_v0, %v4723_v42  ;;  %v4734_v56 = vmax.f32 %v4721_v17, %v4722_v0  ;;  %v12813_v17 = vld [vmem:[%s13615_s9 + $0xe8] sm:$0xff]  ;;  %v12866_v42 = vld [vmem:[%s13615_s9 + $0xb8] sm:$0xff]  ;;  %v12873_v0 = vld [vmem:[%s13615_s9 + $0xa0] sm:$0xff] }
 0x3bb   :  { %4862 = vrot.lane.b32.xlu1 %v4742_v50, %s9307_s20  ;;  %4870 = vrot.lane.b32.xlu0 %v4840_v11, %s9302_s24  ;;  %v12861_v11 = vld [vmem:[%s13615_s9 + $0xa8] sm:$0xff]  ;;  %v12878_v50 = vld [vmem:[%s13615_s9 + $0xb0] sm:$0xff] }
 0x3bc   :  { %v4743_v3 = vmax.f32 %v4731_v16, %v4734_v56  ;;  %v4744_v40 = vmax.f32 %v4732_v33, %v4735_v29  ;;  %v12801_v16 = vld [vmem:[%s13615_s9 + $0x100] sm:$0xff]  ;;  %v12806_v33 = vld [vmem:[%s13615_s9 + $0x110] sm:$0xff]  ;;  %v12885_v29 = vld [vmem:[%s13615_s9 + $0x88] sm:$0xff] }
 0x3bd   :  { %13897 = vst [vmem:[#allocation56_spill] sm:$0xff] %v12885_v29  ;;  %v12890_v56 = vld [vmem:[%s13615_s9 + $0x98] sm:$0xff] }
 0x3be   :  { %13898 = vst [vmem:[#allocation18_spill] sm:$0xff] %v12890_v56 }
 0x3bf   :  { %4866 = vrot.lane.b32.xlu1 %v4743_v3, %s9308_s3  ;;  %v12897_v3 = vld [vmem:[%s13615_s9 + $0x80] sm:$0xff] }
 0x3c0   :  { %13899 = vst [vmem:[#allocation37_spill] sm:$0xff] %v12897_v3 }
 0x421   :  { %v4843_v35 = vpop.permute.xlu0 %4842 }
 0x422   :  { %v4874_v6 = vsel %vm4873_vm1, %v4736_v25, %v4843_v35  ;;  %v12637_v25 = vld [vmem:[%s13615_s9 + $0x1e0] sm:$0xff]  ;;  %v12909_v35 = vld [vmem:[%s13615_s9 + $0x68] sm:$0xff] }
 0x423   :  { %13901 = vst [vmem:[#allocation57_spill] sm:$0xff] %v12909_v35 }
 0x425   :  { %v4851_v57 = vpop.permute.xlu1 %4850  ;;  %v4847_v14 = vpop.permute.xlu0 %4846 }
 0x426   :  { %v4876_v37 = vsel %vm4875_vm2, %v4874_v6, %v4847_v14  ;;  %v12921_v14 = vld [vmem:[%s13615_s9 + $0x60] sm:$0xff]  ;;  %v12926_v6 = vld [vmem:[%s13615_s9 + $0x70] sm:$0xff] }
 0x427   :  { %v4878_v26 = vsel %vm4877_vm3, %v4876_v37, %v4851_v57  ;;  %v12914_v57 = vld [vmem:[%s13615_s9 + $0x78] sm:$0xff]  ;;  %13903 = vst [vmem:[#allocation27_spill] sm:$0xff] %v12921_v14  ;;  %13904 = vst [vmem:[#allocation59_spill] sm:$0xff] %v12926_v6  ;;  %v12933_v37 = vld [vmem:[%s13615_s9 + $0x48] sm:$0xff] }
 0x428   :  { %13902 = vst [vmem:[#allocation28_spill] sm:$0xff] %v12914_v57  ;;  %13905 = vst [vmem:[#allocation47_spill] sm:$0xff] %v12933_v37 }
 0x429   :  { %v4855_v28 = vpop.permute.xlu1 %4854  ;;  %v4859_v62 = vpop.permute.xlu0 %4858 }
 0x42a   :  { %v4880_v13 = vsel %vm4879_vm4, %v4878_v26, %v4855_v28  ;;  %v12938_v28 = vld [vmem:[%s13615_s9 + $0x58] sm:$0xff]  ;;  %v12950_v26 = vld [vmem:[%s13615_s9 + $0x50] sm:$0xff] }
 0x42b   :  { %v4882_v12 = vsel %vm4881_vm5, %v4880_v13, %v4859_v62  ;;  %13906 = vst [vmem:[#allocation38_spill] sm:$0xff] %v12938_v28  ;;  %v12945_v62 = vld [vmem:[%s13615_s9 + $0x40] sm:$0xff]  ;;  %13908 = vst [vmem:[#allocation30_spill] sm:$0xff] %v12950_v26  ;;  %v12957_v13 = vld [vmem:[%s13615_s9 + $0x28] sm:$0xff] }
 0x42c   :  { %13907 = vst [vmem:[#allocation39_spill] sm:$0xff] %v12945_v62  ;;  %13909 = vst [vmem:[#allocation29_spill] sm:$0xff] %v12957_v13 }
 0x42d   :  { %v4863_v23 = vpop.permute.xlu1 %4862  ;;  %v4871_v61 = vpop.permute.xlu0 %4870 }
 0x42e   :  { %v4887_v8 = vsel %vm4873_vm1, %v4744_v40, %v4871_v61  ;;  %v4884_v41 = vsel %vm4883_vm6, %v4882_v12, %v4863_v23  ;;  %v12902_v40 = vld [vmem:[%s13615_s9 + $0x90] sm:$0xff]  ;;  %v12962_v23 = vld [vmem:[%s13615_s9 + $0x38] sm:$0xff]  ;;  %v12969_v61 = vld [vmem:[%s13615_s9 + $0x20] sm:$0xff] }
 0x42f   :  { %6941 = vmatprep.mubr.msk.f32.mxu1 %vm4877_vm3, %v4887_v8  ;;  %6942 = vmatprep.mubr.msk.f32.mxu0 %vm4877_vm3, %v4887_v8  ;;  %13900 = vst [vmem:[#allocation58_spill] sm:$0xff] %v12902_v40  ;;  %13910 = vst [vmem:[#allocation62_spill] sm:$0xff] %v12962_v23  ;;  %v12974_v8 = vld [vmem:[%s13615_s9 + $0x30] sm:$0xff]  ;;  %v12981_v12 = vld [vmem:[%s13615_s9 + $0x8] sm:$0xff] }
 0x430   :  { %13911 = vst [vmem:[#allocation40_spill] sm:$0xff] %v12969_v61  ;;  %13912 = vst [vmem:[#allocation41_spill] sm:$0xff] %v12974_v8 }
 0x431   :  { %v4867_v2 = vpop.permute.xlu1 %4866  ;;  %13913 = vst [vmem:[#allocation13_spill] sm:$0xff] %v12981_v12 }
 0x432   :  { %v4886_v4 = vsel %vm4885_vm7, %v4884_v41, %v4867_v2  ;;  %v12986_v41 = vld [vmem:[%s13615_s9 + $0x18] sm:$0xff]  ;;  %v12993_v2 = vld [vmem:[%s13615_s9] sm:$0xff] }
 0x433   :  { %5066 = vmatmul.mubr.f32.vlgmr.msra.gmra.mxu1 %v4886_v4  ;;  %5137 = vmatmul.mubr.f32.vlgmr.msra.gmra.mxu0 %v4886_v4  ;;  %13914 = vst [vmem:[#allocation12_spill] sm:$0xff] %v12986_v41  ;;  %13915 = vst [vmem:[#allocation64_spill] sm:$0xff] %v12993_v2  ;;  %v13000_v4 = vld [vmem:[%s13615_s9 + $0x10] sm:$0xff] }
 0x434   :  { %5208 = vmatpush1.msra.mxu1 %v12637_v25  ;;  %5279 = vmatpush1.msra.mxu0 %v12642_v5  ;;  %13916 = vst [vmem:[#allocation63_spill] sm:$0xff] %v13000_v4 }
 0x435   :  { %5209 = vmatprep.subr.mxu1 %v12647_v34  ;;  %5280 = vmatprep.subr.mxu0 %v12652_v51 }
 0x436   :  { %5210 = vmatpush1.msra.mxu1 %v12657_v10  ;;  %5281 = vmatpush1.msra.mxu0 %v12662_v52 }
 0x437   :  { %5211 = vmatprep.subr.mxu1 %v12669_v20  ;;  %5282 = vmatprep.subr.mxu0 %v12674_v30 }
 0x438   :  { %5212 = vmatpush1.msra.mxu1 %v12681_v38  ;;  %5283 = vmatpush1.msra.mxu0 %v12686_v31 }
 0x439   :  { %5213 = vmatprep.subr.mxu1 %v12693_v43  ;;  %5284 = vmatprep.subr.mxu0 %v12698_v46 }
 0x43a   :  { %5214 = vmatpush1.msra.mxu1 %v12705_v18  ;;  %5285 = vmatpush1.msra.mxu0 %v12710_v45 }
 0x43b   :  { %5215 = vmatprep.subr.mxu1 %v12717_v21  ;;  %5286 = vmatprep.subr.mxu0 %v12722_v58 }
 0x43c   :  { %5216 = vmatpush1.msra.mxu1 %v12729_v55  ;;  %5287 = vmatpush1.msra.mxu0 %v12734_v24 }
 0x43d   :  { %5217 = vmatprep.subr.mxu1 %v12741_v54  ;;  %5288 = vmatprep.subr.mxu0 %v12746_v60 }
 0x43e   :  { %5218 = vmatpush1.msra.mxu1 %v12753_v32  ;;  %5289 = vmatpush1.msra.mxu0 %v12758_v9 }
 0x43f   :  { %5219 = vmatprep.subr.mxu1 %v12765_v47  ;;  %5290 = vmatprep.subr.mxu0 %v12770_v44 }
 0x440   :  { %5220 = vmatpush1.msra.mxu1 %v12777_v39  ;;  %5291 = vmatpush1.msra.mxu0 %v12782_v49 }
 0x441   :  { %5221 = vmatprep.subr.mxu1 %v12789_v36  ;;  %5292 = vmatprep.subr.mxu0 %v12794_v63 }
 0x442   :  { %5222 = vmatpush1.msra.mxu1 %v12801_v16  ;;  %5293 = vmatpush1.msra.mxu0 %v12806_v33 }
 0x443   :  { %5223 = vmatprep.subr.mxu1 %v12813_v17  ;;  %5294 = vmatprep.subr.mxu0 %v12818_v27 }
 0x444   :  { %5224 = vmatpush1.msra.mxu1 %v12825_v53  ;;  %5295 = vmatpush1.msra.mxu0 %v12830_v48 }
 0x445   :  { %5225 = vmatprep.subr.mxu1 %v12837_v19  ;;  %5296 = vmatprep.subr.mxu0 %v12842_v59 }
 0x446   :  { %5226 = vmatpush1.msra.mxu1 %v12849_v1  ;;  %5297 = vmatpush1.msra.mxu0 %v12854_v22 }
 0x447   :  { %5227 = vmatprep.subr.mxu1 %v12861_v11  ;;  %5298 = vmatprep.subr.mxu0 %v12866_v42 }
 0x448   :  { %5228 = vmatpush1.msra.mxu1 %v12873_v0  ;;  %5299 = vmatpush1.msra.mxu0 %v12878_v50 }
 0x449   :  { %5229 = vmatprep.subr.mxu1 %v12885_v29  ;;  %5300 = vmatprep.subr.mxu0 %v12890_v56 }
 0x44a   :  { %5230 = vmatpush1.msra.mxu1 %v12897_v3  ;;  %5301 = vmatpush1.msra.mxu0 %v12902_v40 }
 0x44b   :  { %5231 = vmatprep.subr.mxu1 %v12909_v35  ;;  %5302 = vmatprep.subr.mxu0 %v12914_v57 }
 0x44c   :  { %5232 = vmatpush1.msra.mxu1 %v12921_v14  ;;  %5303 = vmatpush1.msra.mxu0 %v12926_v6 }
 0x44d   :  { %5233 = vmatprep.subr.mxu1 %v12933_v37  ;;  %5304 = vmatprep.subr.mxu0 %v12938_v28 }
 0x44e   :  { %5234 = vmatpush1.msra.mxu1 %v12945_v62  ;;  %5305 = vmatpush1.msra.mxu0 %v12950_v26 }
 0x44f   :  { %5235 = vmatprep.subr.mxu1 %v12957_v13  ;;  %5306 = vmatprep.subr.mxu0 %v12962_v23  ;;  %v13917_v23 = vmov 0.0  }
 0x450   :  { %5236 = vmatpush1.msra.mxu1 %v12969_v61  ;;  %5307 = vmatpush1.msra.mxu0 %v12974_v8 }
 0x451   :  { %5237 = vmatprep.subr.mxu1 %v12981_v12  ;;  %5308 = vmatprep.subr.mxu0 %v12986_v41 }
 0x452   :  { %5238 = vmatpush1.msra.mxu1 %v12993_v2  ;;  %5271 = vmatprep.mubr.f32.mxu1 %v13917_v23 }
 0x453   :  { %5309 = vmatpush1.msra.mxu0 %v13000_v4  ;;  %5342 = vmatprep.mubr.f32.mxu0 %v13917_v23 }
 0x454   :  { %5272 = vmatmul.mubr.f32.vlgmr.msra.gmra.mxu1 %v13917_v23  ;;  %5343 = vmatmul.mubr.f32.vlgmr.msra.gmra.mxu0 %v13917_v23 }
 0x455   :  { %5377 = vmatprep.subr.mxu1 %v12615_v15  ;;  %5448 = vmatprep.subr.mxu0 %v12620_v7 }
 0x456   :  { %5378 = vmatpush1.msra.mxu1 %v12637_v25  ;;  %5449 = vmatpush1.msra.mxu0 %v12642_v5 }
 0x457   :  { %5379 = vmatprep.subr.mxu1 %v12647_v34  ;;  %5450 = vmatprep.subr.mxu0 %v12652_v51 }
 0x458   :  { %5380 = vmatpush1.msra.mxu1 %v12657_v10  ;;  %5451 = vmatpush1.msra.mxu0 %v12662_v52 }
 0x459   :  { %5381 = vmatprep.subr.mxu1 %v12669_v20  ;;  %5452 = vmatprep.subr.mxu0 %v12674_v30 }
 0x45a   :  { %5382 = vmatpush1.msra.mxu1 %v12681_v38  ;;  %5453 = vmatpush1.msra.mxu0 %v12686_v31 }
 0x45b   :  { %5383 = vmatprep.subr.mxu1 %v12693_v43  ;;  %5454 = vmatprep.subr.mxu0 %v12698_v46 }
 0x45c   :  { %5384 = vmatpush1.msra.mxu1 %v12705_v18  ;;  %5455 = vmatpush1.msra.mxu0 %v12710_v45 }
 0x45d   :  { %5385 = vmatprep.subr.mxu1 %v12717_v21  ;;  %5456 = vmatprep.subr.mxu0 %v12722_v58 }
 0x45e   :  { %5386 = vmatpush1.msra.mxu1 %v12729_v55  ;;  %5457 = vmatpush1.msra.mxu0 %v12734_v24 }
 0x45f   :  { %5387 = vmatprep.subr.mxu1 %v12741_v54  ;;  %5458 = vmatprep.subr.mxu0 %v12746_v60 }
 0x460   :  { %5388 = vmatpush1.msra.mxu1 %v12753_v32  ;;  %5459 = vmatpush1.msra.mxu0 %v12758_v9 }
 0x461   :  { %5389 = vmatprep.subr.mxu1 %v12765_v47  ;;  %5460 = vmatprep.subr.mxu0 %v12770_v44 }
 0x462   :  { %5390 = vmatpush1.msra.mxu1 %v12777_v39  ;;  %5461 = vmatpush1.msra.mxu0 %v12782_v49 }
 0x463   :  { %5391 = vmatprep.subr.mxu1 %v12789_v36  ;;  %5462 = vmatprep.subr.mxu0 %v12794_v63 }
 0x464   :  { %5392 = vmatpush1.msra.mxu1 %v12801_v16  ;;  %5463 = vmatpush1.msra.mxu0 %v12806_v33 }
 0x465   :  { %5393 = vmatprep.subr.mxu1 %v12813_v17  ;;  %5464 = vmatprep.subr.mxu0 %v12818_v27 }
 0x466   :  { %5394 = vmatpush1.msra.mxu1 %v12825_v53  ;;  %5465 = vmatpush1.msra.mxu0 %v12830_v48 }
 0x467   :  { %5395 = vmatprep.subr.mxu1 %v12837_v19  ;;  %5466 = vmatprep.subr.mxu0 %v12842_v59 }
 0x468   :  { %5396 = vmatpush1.msra.mxu1 %v12849_v1  ;;  %5467 = vmatpush1.msra.mxu0 %v12854_v22 }
 0x469   :  { %5397 = vmatprep.subr.mxu1 %v12861_v11  ;;  %5468 = vmatprep.subr.mxu0 %v12866_v42 }
 0x46a   :  { %5398 = vmatpush1.msra.mxu1 %v12873_v0  ;;  %5469 = vmatpush1.msra.mxu0 %v12878_v50 }
 0x46b   :  { %5399 = vmatprep.subr.mxu1 %v12885_v29  ;;  %5470 = vmatprep.subr.mxu0 %v12890_v56 }
 0x46c   :  { %5400 = vmatpush1.msra.mxu1 %v12897_v3  ;;  %5471 = vmatpush1.msra.mxu0 %v12902_v40  ;;  %v13918_v3 = vld [vmem:[#allocation62_spill] sm:$0xff] }
 0x46d   :  { %5401 = vmatprep.subr.mxu1 %v12909_v35  ;;  %5472 = vmatprep.subr.mxu0 %v12914_v57 }
 0x46e   :  { %5402 = vmatpush1.msra.mxu1 %v12921_v14  ;;  %5473 = vmatpush1.msra.mxu0 %v12926_v6 }
 0x46f   :  { %5403 = vmatprep.subr.mxu1 %v12933_v37  ;;  %5474 = vmatprep.subr.mxu0 %v12938_v28 }
 0x470   :  { %5404 = vmatpush1.msra.mxu1 %v12945_v62  ;;  %5475 = vmatpush1.msra.mxu0 %v12950_v26 }
 0x471   :  { %5405 = vmatprep.subr.mxu1 %v12957_v13  ;;  %5476 = vmatprep.subr.mxu0 %v13918_v3  ;;  %v13660_v3 = vlaneseq }
 0x472   :  { %5406 = vmatpush1.msra.mxu1 %v12969_v61  ;;  %5477 = vmatpush1.msra.mxu0 %v12974_v8 }
 0x473   :  { %5407 = vmatprep.subr.mxu1 %v12981_v12  ;;  %5478 = vmatprep.subr.mxu0 %v12986_v41  ;;  %v4979_v61 = vshrl.u32 %v13660_v3, 7  ;;  %v4976_v41 = vld [vmem:[%s13616_s10] sm:$0xf] }
 0x474   :  { %5408 = vmatpush1.msra.mxu1 %v12993_v2  ;;  %5441 = vmatprep.mubr.f32.mxu1 %v13917_v23 }
 0x475   :  { %5479 = vmatpush1.msra.mxu0 %v13000_v4  ;;  %5512 = vmatprep.mubr.f32.mxu0 %v13917_v23  ;;  %v4980_v8 = vsub.s32 0, %v4979_v61  ;;  %v4984_v12 = vsub.s32 1, %v4979_v61  ;;  %v4992_v37 = vsub.s32 3, %v4979_v61 }
 0x476   :  { %5547 = vmatprep.subr.mxu1 %v12615_v15  ;;  %5618 = vmatprep.subr.mxu0 %v12620_v7 }
 0x477   :  { %v4981_v13 = vrot.slane %v4976_v41, %v4980_v8  ;;  %v4985_v26 = vrot.slane %v4976_v41, %v4984_v12  ;;  %v4993_v8 = vrot.slane %v4976_v41, %v4992_v37  ;;  %v4988_v12 = vsub.s32 2, %v4979_v61 }
 0x479   :  { %v4989_v56 = vrot.slane %v4976_v41, %v4988_v12  ;;  %v13923_v12 = vld [vmem:[#allocation18_spill] sm:$0xff] }
 0x4f3   :  { %v5067_v2 = vpop.f32.mrf.mxu1  ;;  %v5138_v23 = vpop.f32.mrf.mxu0 }
 0x4f4   :  { %v13082_v4 = vadd.f32 %v5067_v2, %v4981_v13 }
 0x4f5   :  { %v5069_v62 = vpop.f32.mrf.mxu1  ;;  %v5140_v6 = vpop.f32.mrf.mxu0 }
 0x4f6   :  { %13919 = vst [vmem:[#allocation32_spill] sm:$0xff] %v13082_v4  ;;  %v13084_v15 = vadd.f32 %v5069_v62, %v4985_v26  ;;  %v13088_v2 = vadd.f32 %v5140_v6, %v4993_v8  ;;  %v13091_v26 = vadd.f32 %v5138_v23, %v4989_v56 }
 0x4f8   :  { %13920 = vst [vmem:[#allocation31_spill] sm:$0xff] %v13084_v15 }
 0x514   :  { %v5273_v28 = vpop.f32.mrf.mxu1  ;;  %v5344_v35 = vpop.f32.mrf.mxu0 }
 0x515   :  { %v5349_v7 = vadd.f32 %v5273_v28, %v13082_v4 }
 0x516   :  { %v5275_v3 = vpop.f32.mrf.mxu1  ;;  %v5346_v13 = vpop.f32.mrf.mxu0 }
 0x517   :  { %v6943_v14 = vmul.f32 -1.442695, %v5349_v7  ;;  %v5350_v57 = vadd.f32 %v5275_v3, %v13084_v15  ;;  %v5352_v62 = vadd.f32 %v5346_v13, %v13088_v2  ;;  %v5351_v7 = vadd.f32 %v5344_v35, %v13091_v26  ;;  %v13924_v13 = vld [vmem:[#allocation37_spill] sm:$0xff] }
 0x519   :  { %9125 = vpow2.f32 %v6943_v14  ;;  %v6944_v40 = vmul.f32 -1.442695, %v5350_v57  ;;  %v6945_v28 = vmul.f32 -1.442695, %v5352_v62  ;;  %v13925_v62 = vld [vmem:[#allocation58_spill] sm:$0xff] }
 0x51b   :  { %9127 = vpow2.f32 %v6944_v40 }
 0x51c   :  { %9129 = vpow2.f32 %v6945_v28  ;;  %v13926_v28 = vld [vmem:[#allocation57_spill] sm:$0xff] }
 0x526   :  { %v9126_v4 = vpop.eup %9125 }
 0x527   :  { %v5356_v29 = vadd.f32 1.0, %v9126_v4 }
 0x528   :  { %v9128_v3 = vpop.eup %9127 }
 0x529   :  { %9131 = vrcp.f32 %v5356_v29  ;;  %v5362_v57 = vadd.f32 1.0, %v9128_v3  ;;  %v9130_v40 = vpop.eup %9129  ;;  %v13922_v29 = vld [vmem:[#allocation56_spill] sm:$0xff]  ;;  %v13928_v3 = vld [vmem:[#allocation27_spill] sm:$0xff] }
 0x52a   :  { %9133 = vtanh.f32 %v5351_v7  ;;  %v5369_v61 = vadd.f32 1.0, %v9130_v40  ;;  %v13927_v7 = vld [vmem:[#allocation28_spill] sm:$0xff]  ;;  %v13930_v40 = vld [vmem:[#allocation47_spill] sm:$0xff] }
 0x52b   :  { %9135 = vrcp.f32 %v5362_v57  ;;  %v13929_v57 = vld [vmem:[#allocation59_spill] sm:$0xff] }
 0x52c   :  { %9137 = vrcp.f32 %v5369_v61  ;;  %v13934_v61 = vld [vmem:[#allocation29_spill] sm:$0xff] }
 0x536   :  { %v9132_v14 = vpop.eup %9131 }
 0x537   :  { %v9134_v6 = vpop.eup %9133 }
 0x538   :  { %v9136_v37 = vpop.eup %9135  ;;  %v5373_v8 = vmul.f32 %v9134_v6, %v9132_v14  ;;  %v13931_v14 = vld [vmem:[#allocation38_spill] sm:$0xff]  ;;  %v13932_v6 = vld [vmem:[#allocation39_spill] sm:$0xff] }
 0x539   :  { %v5372_v41 = vmul.f32 0.0, %v9136_v37  ;;  %v9138_v35 = vpop.eup %9137  ;;  %v13933_v37 = vld [vmem:[#allocation30_spill] sm:$0xff] }
 0x53b   :  { %v13094_v56 = vadd.f32 %v5373_v8, %v5372_v41  ;;  %v13935_v41 = vld [vmem:[#allocation62_spill] sm:$0xff]  ;;  %v13936_v8 = vld [vmem:[#allocation40_spill] sm:$0xff] }
 0x53d   :  { %9139 = vtanh.f32 %v13094_v56 }
 0x54a   :  { %v9140_v23 = vpop.eup %9139 }
 0x54b   :  { %v13097_v4 = vmul.f32 %v9140_v23, %v9138_v35  ;;  %v13937_v35 = vld [vmem:[#allocation41_spill] sm:$0xff] }
 0x54c   :  { %v13938_v23 = vld [vmem:[#allocation13_spill] sm:$0xff] }
 0x54d   :  { %13921 = vst [vmem:[#allocation65_spill] sm:$0xff] %v13097_v4  ;;  %5442 = vmatmul.mubr.f32.vlgmr.msra.gmra.mxu1 %v13097_v4  ;;  %5513 = vmatmul.mubr.f32.vlgmr.msra.gmra.mxu0 %v13097_v4  ;;  %v13939_v4 = vld [vmem:[#allocation12_spill] sm:$0xff] }
 0x54e   :  { %5548 = vmatpush1.msra.mxu1 %v12637_v25  ;;  %5619 = vmatpush1.msra.mxu0 %v12642_v5 }
 0x54f   :  { %5549 = vmatprep.subr.mxu1 %v12647_v34  ;;  %5620 = vmatprep.subr.mxu0 %v12652_v51 }
 0x550   :  { %5550 = vmatpush1.msra.mxu1 %v12657_v10  ;;  %5621 = vmatpush1.msra.mxu0 %v12662_v52 }
 0x551   :  { %5551 = vmatprep.subr.mxu1 %v12669_v20  ;;  %5622 = vmatprep.subr.mxu0 %v12674_v30 }
 0x552   :  { %5552 = vmatpush1.msra.mxu1 %v12681_v38  ;;  %5623 = vmatpush1.msra.mxu0 %v12686_v31 }
 0x553   :  { %5553 = vmatprep.subr.mxu1 %v12693_v43  ;;  %5624 = vmatprep.subr.mxu0 %v12698_v46 }
 0x554   :  { %5554 = vmatpush1.msra.mxu1 %v12705_v18  ;;  %5625 = vmatpush1.msra.mxu0 %v12710_v45 }
 0x555   :  { %5555 = vmatprep.subr.mxu1 %v12717_v21  ;;  %5626 = vmatprep.subr.mxu0 %v12722_v58 }
 0x556   :  { %5556 = vmatpush1.msra.mxu1 %v12729_v55  ;;  %5627 = vmatpush1.msra.mxu0 %v12734_v24 }
 0x557   :  { %5557 = vmatprep.subr.mxu1 %v12741_v54  ;;  %5628 = vmatprep.subr.mxu0 %v12746_v60 }
 0x558   :  { %5558 = vmatpush1.msra.mxu1 %v12753_v32  ;;  %5629 = vmatpush1.msra.mxu0 %v12758_v9 }
 0x559   :  { %5559 = vmatprep.subr.mxu1 %v12765_v47  ;;  %5630 = vmatprep.subr.mxu0 %v12770_v44 }
 0x55a   :  { %5560 = vmatpush1.msra.mxu1 %v12777_v39  ;;  %5631 = vmatpush1.msra.mxu0 %v12782_v49 }
 0x55b   :  { %5561 = vmatprep.subr.mxu1 %v12789_v36  ;;  %5632 = vmatprep.subr.mxu0 %v12794_v63 }
 0x55c   :  { %5562 = vmatpush1.msra.mxu1 %v12801_v16  ;;  %5633 = vmatpush1.msra.mxu0 %v12806_v33 }
 0x55d   :  { %5563 = vmatprep.subr.mxu1 %v12813_v17  ;;  %5634 = vmatprep.subr.mxu0 %v12818_v27 }
 0x55e   :  { %5564 = vmatpush1.msra.mxu1 %v12825_v53  ;;  %5635 = vmatpush1.msra.mxu0 %v12830_v48 }
 0x55f   :  { %5565 = vmatprep.subr.mxu1 %v12837_v19  ;;  %5636 = vmatprep.subr.mxu0 %v12842_v59 }
 0x560   :  { %5566 = vmatpush1.msra.mxu1 %v12849_v1  ;;  %5637 = vmatpush1.msra.mxu0 %v12854_v22 }
 0x561   :  { %5567 = vmatprep.subr.mxu1 %v12861_v11  ;;  %5638 = vmatprep.subr.mxu0 %v12866_v42 }
 0x562   :  { %5568 = vmatpush1.msra.mxu1 %v12873_v0  ;;  %5639 = vmatpush1.msra.mxu0 %v12878_v50 }
 0x563   :  { %5569 = vmatprep.subr.mxu1 %v13922_v29  ;;  %5640 = vmatprep.subr.mxu0 %v13923_v12 }
 0x564   :  { %5570 = vmatpush1.msra.mxu1 %v13924_v13  ;;  %5641 = vmatpush1.msra.mxu0 %v13925_v62 }
 0x565   :  { %5571 = vmatprep.subr.mxu1 %v13926_v28  ;;  %5642 = vmatprep.subr.mxu0 %v13927_v7 }
 0x566   :  { %5572 = vmatpush1.msra.mxu1 %v13928_v3  ;;  %5643 = vmatpush1.msra.mxu0 %v13929_v57  ;;  %v13940_v57 = vld [vmem:[#allocation64_spill] sm:$0xff] }
 0x567   :  { %5573 = vmatprep.subr.mxu1 %v13930_v40  ;;  %5644 = vmatprep.subr.mxu0 %v13931_v14  ;;  %v13941_v40 = vmov 0.0   ;;  %v13942_v14 = vld [vmem:[#allocation63_spill] sm:$0xff] }
 0x568   :  { %5574 = vmatpush1.msra.mxu1 %v13932_v6  ;;  %5645 = vmatpush1.msra.mxu0 %v13933_v37  ;;  %v13943_v37 = vld [vmem:[#allocation26_spill] sm:$0xff] }
 0x569   :  { %5575 = vmatprep.subr.mxu1 %v13934_v61  ;;  %5646 = vmatprep.subr.mxu0 %v13935_v41  ;;  %v13944_v61 = vld [vmem:[#allocation25_spill] sm:$0xff] }
 0x56a   :  { %5576 = vmatpush1.msra.mxu1 %v13936_v8  ;;  %5647 = vmatpush1.msra.mxu0 %v13937_v35  ;;  %v13945_v8 = vld [vmem:[#allocation32_spill] sm:$0xff] }
 0x56b   :  { %5577 = vmatprep.subr.mxu1 %v13938_v23  ;;  %5648 = vmatprep.subr.mxu0 %v13939_v4 }
 0x56c   :  { %5578 = vmatpush1.msra.mxu1 %v13940_v57  ;;  %5611 = vmatprep.mubr.f32.mxu1 %v13941_v40 }
 0x56d   :  { %5649 = vmatpush1.msra.mxu0 %v13942_v14  ;;  %5682 = vmatprep.mubr.f32.mxu0 %v13941_v40 }
 0x56e   :  { %5717 = vmatprep.subr.mxu1 %v13943_v37  ;;  %5788 = vmatprep.subr.mxu0 %v13944_v61 }
 0x60d   :  { %v5443_v41 = vpop.f32.mrf.mxu1  ;;  %v5514_v4 = vpop.f32.mrf.mxu0 }
 0x60e   :  { %v5519_v6 = vadd.f32 %v5443_v41, %v13945_v8  ;;  %v5521_v37 = vadd.f32 %v5514_v4, %v13091_v26 }
 0x60f   :  { %v5445_v35 = vpop.f32.mrf.mxu1  ;;  %v5516_v7 = vpop.f32.mrf.mxu0 }
 0x610   :  { %v6946_v3 = vmul.f32 -1.442695, %v5519_v6  ;;  %v5520_v23 = vadd.f32 %v5445_v35, %v13084_v15  ;;  %v5522_v14 = vadd.f32 %v5516_v7, %v13088_v2 }
 0x612   :  { %9141 = vpow2.f32 %v6946_v3  ;;  %v6947_v57 = vmul.f32 -1.442695, %v5520_v23  ;;  %v6948_v28 = vmul.f32 -1.442695, %v5522_v14  ;;  %v13950_v14 = vld [vmem:[#allocation27_spill] sm:$0xff] }
 0x614   :  { %9143 = vpow2.f32 %v6947_v57 }
 0x615   :  { %9145 = vpow2.f32 %v6948_v28 }
 0x61f   :  { %v9142_v40 = vpop.eup %9141 }
 0x620   :  { %v5526_v62 = vadd.f32 1.0, %v9142_v40 }
 0x621   :  { %v9144_v61 = vpop.eup %9143 }
 0x622   :  { %9147 = vrcp.f32 %v5526_v62  ;;  %v5532_v41 = vadd.f32 1.0, %v9144_v61  ;;  %v9146_v6 = vpop.eup %9145  ;;  %v13949_v62 = vld [vmem:[#allocation28_spill] sm:$0xff]  ;;  %v13952_v61 = vld [vmem:[#allocation47_spill] sm:$0xff] }
 0x623   :  { %9149 = vtanh.f32 %v5521_v37  ;;  %v5539_v23 = vadd.f32 1.0, %v9146_v6  ;;  %v13951_v37 = vld [vmem:[#allocation59_spill] sm:$0xff]  ;;  %v13955_v6 = vld [vmem:[#allocation30_spill] sm:$0xff] }
 0x624   :  { %9151 = vrcp.f32 %v5532_v41  ;;  %v13954_v41 = vld [vmem:[#allocation39_spill] sm:$0xff] }
 0x625   :  { %9153 = vrcp.f32 %v5539_v23  ;;  %v13958_v23 = vld [vmem:[#allocation40_spill] sm:$0xff] }
 0x62f   :  { %v9148_v35 = vpop.eup %9147 }
 0x630   :  { %v9150_v3 = vpop.eup %9149 }
 0x631   :  { %v9152_v15 = vpop.eup %9151  ;;  %v5543_v57 = vmul.f32 %v9150_v3, %v9148_v35  ;;  %v13956_v35 = vld [vmem:[#allocation29_spill] sm:$0xff]  ;;  %v13957_v3 = vld [vmem:[#allocation62_spill] sm:$0xff] }
 0x632   :  { %v5542_v8 = vmul.f32 %v9152_v15, %v13094_v56  ;;  %v9154_v4 = vpop.eup %9153  ;;  %v13947_v15 = vld [vmem:[#allocation58_spill] sm:$0xff]  ;;  %v13948_v56 = vld [vmem:[#allocation57_spill] sm:$0xff] }
 0x634   :  { %v13172_v7 = vadd.f32 %v5543_v57, %v5542_v8  ;;  %v13953_v8 = vld [vmem:[#allocation38_spill] sm:$0xff]  ;;  %v13959_v57 = vld [vmem:[#allocation41_spill] sm:$0xff] }
 0x636   :  { %9155 = vtanh.f32 %v13172_v7 }
 0x643   :  { %v9156_v40 = vpop.eup %9155 }
 0x644   :  { %v13175_v28 = vmul.f32 %v9156_v40, %v9154_v4  ;;  %v13960_v4 = vld [vmem:[#allocation13_spill] sm:$0xff]  ;;  %v13961_v40 = vld [vmem:[#allocation12_spill] sm:$0xff] }
 0x646   :  { %13946 = vst [vmem:[#allocation50_spill] sm:$0xff] %v13175_v28  ;;  %5612 = vmatmul.mubr.f32.vlgmr.msra.gmra.mxu1 %v13175_v28  ;;  %5683 = vmatmul.mubr.f32.vlgmr.msra.gmra.mxu0 %v13175_v28  ;;  %v13962_v28 = vld [vmem:[#allocation64_spill] sm:$0xff] }
 0x647   :  { %5718 = vmatpush1.msra.mxu1 %v12637_v25  ;;  %5789 = vmatpush1.msra.mxu0 %v12642_v5 }
 0x648   :  { %5719 = vmatprep.subr.mxu1 %v12647_v34  ;;  %5790 = vmatprep.subr.mxu0 %v12652_v51 }
 0x649   :  { %5720 = vmatpush1.msra.mxu1 %v12657_v10  ;;  %5791 = vmatpush1.msra.mxu0 %v12662_v52 }
 0x64a   :  { %5721 = vmatprep.subr.mxu1 %v12669_v20  ;;  %5792 = vmatprep.subr.mxu0 %v12674_v30 }
 0x64b   :  { %5722 = vmatpush1.msra.mxu1 %v12681_v38  ;;  %5793 = vmatpush1.msra.mxu0 %v12686_v31 }
 0x64c   :  { %5723 = vmatprep.subr.mxu1 %v12693_v43  ;;  %5794 = vmatprep.subr.mxu0 %v12698_v46 }
 0x64d   :  { %5724 = vmatpush1.msra.mxu1 %v12705_v18  ;;  %5795 = vmatpush1.msra.mxu0 %v12710_v45 }
 0x64e   :  { %5725 = vmatprep.subr.mxu1 %v12717_v21  ;;  %5796 = vmatprep.subr.mxu0 %v12722_v58 }
 0x64f   :  { %5726 = vmatpush1.msra.mxu1 %v12729_v55  ;;  %5797 = vmatpush1.msra.mxu0 %v12734_v24 }
 0x650   :  { %5727 = vmatprep.subr.mxu1 %v12741_v54  ;;  %5798 = vmatprep.subr.mxu0 %v12746_v60 }
 0x651   :  { %5728 = vmatpush1.msra.mxu1 %v12753_v32  ;;  %5799 = vmatpush1.msra.mxu0 %v12758_v9 }
 0x652   :  { %5729 = vmatprep.subr.mxu1 %v12765_v47  ;;  %5800 = vmatprep.subr.mxu0 %v12770_v44 }
 0x653   :  { %5730 = vmatpush1.msra.mxu1 %v12777_v39  ;;  %5801 = vmatpush1.msra.mxu0 %v12782_v49 }
 0x654   :  { %5731 = vmatprep.subr.mxu1 %v12789_v36  ;;  %5802 = vmatprep.subr.mxu0 %v12794_v63 }
 0x655   :  { %5732 = vmatpush1.msra.mxu1 %v12801_v16  ;;  %5803 = vmatpush1.msra.mxu0 %v12806_v33 }
 0x656   :  { %5733 = vmatprep.subr.mxu1 %v12813_v17  ;;  %5804 = vmatprep.subr.mxu0 %v12818_v27 }
 0x657   :  { %5734 = vmatpush1.msra.mxu1 %v12825_v53  ;;  %5805 = vmatpush1.msra.mxu0 %v12830_v48 }
 0x658   :  { %5735 = vmatprep.subr.mxu1 %v12837_v19  ;;  %5806 = vmatprep.subr.mxu0 %v12842_v59 }
 0x659   :  { %5736 = vmatpush1.msra.mxu1 %v12849_v1  ;;  %5807 = vmatpush1.msra.mxu0 %v12854_v22 }
 0x65a   :  { %5737 = vmatprep.subr.mxu1 %v12861_v11  ;;  %5808 = vmatprep.subr.mxu0 %v12866_v42 }
 0x65b   :  { %5738 = vmatpush1.msra.mxu1 %v12873_v0  ;;  %5809 = vmatpush1.msra.mxu0 %v12878_v50 }
 0x65c   :  { %5739 = vmatprep.subr.mxu1 %v13922_v29  ;;  %5810 = vmatprep.subr.mxu0 %v13923_v12 }
 0x65d   :  { %5740 = vmatpush1.msra.mxu1 %v13924_v13  ;;  %5811 = vmatpush1.msra.mxu0 %v13947_v15 }
 0x65e   :  { %5741 = vmatprep.subr.mxu1 %v13948_v56  ;;  %5812 = vmatprep.subr.mxu0 %v13949_v62 }
 0x65f   :  { %5742 = vmatpush1.msra.mxu1 %v13950_v14  ;;  %5813 = vmatpush1.msra.mxu0 %v13951_v37 }
 0x660   :  { %5743 = vmatprep.subr.mxu1 %v13952_v61  ;;  %5814 = vmatprep.subr.mxu0 %v13953_v8  ;;  %v13963_v61 = vmov 0.0   ;;  %v13964_v8 = vld [vmem:[#allocation63_spill] sm:$0xff] }
 0x661   :  { %5744 = vmatpush1.msra.mxu1 %v13954_v41  ;;  %5815 = vmatpush1.msra.mxu0 %v13955_v6  ;;  %v13965_v6 = vld [vmem:[#allocation26_spill] sm:$0xff] }
 0x662   :  { %5745 = vmatprep.subr.mxu1 %v13956_v35  ;;  %5816 = vmatprep.subr.mxu0 %v13957_v3  ;;  %v13966_v35 = vld [vmem:[#allocation25_spill] sm:$0xff] }
 0x663   :  { %5746 = vmatpush1.msra.mxu1 %v13958_v23  ;;  %5817 = vmatpush1.msra.mxu0 %v13959_v57  ;;  %v13967_v23 = vld [vmem:[#allocation32_spill] sm:$0xff] }
 0x664   :  { %5747 = vmatprep.subr.mxu1 %v13960_v4  ;;  %5818 = vmatprep.subr.mxu0 %v13961_v40  ;;  %v13968_v4 = vld [vmem:[#allocation31_spill] sm:$0xff] }
 0x665   :  { %5748 = vmatpush1.msra.mxu1 %v13962_v28  ;;  %5781 = vmatprep.mubr.f32.mxu1 %v13963_v61 }
 0x666   :  { %5819 = vmatpush1.msra.mxu0 %v13964_v8  ;;  %5852 = vmatprep.mubr.f32.mxu0 %v13963_v61 }
 0x667   :  { %5887 = vmatprep.subr.mxu1 %v13965_v6  ;;  %5958 = vmatprep.subr.mxu0 %v13966_v35 }
 0x706   :  { %v5613_v3 = vpop.f32.mrf.mxu1  ;;  %v5684_v40 = vpop.f32.mrf.mxu0 }
 0x707   :  { %v5689_v41 = vadd.f32 %v5613_v3, %v13967_v23  ;;  %v5691_v6 = vadd.f32 %v5684_v40, %v13091_v26  ;;  %v9249_v40 = vld [vmem:[%s13615_s9 + $0x1f0] sm:$0xff] }
 0x708   :  { %v5615_v57 = vpop.f32.mrf.mxu1  ;;  %v5686_v62 = vpop.f32.mrf.mxu0 }
 0x709   :  { %v6949_v37 = vmul.f32 -1.442695, %v5689_v41  ;;  %v5690_v14 = vadd.f32 %v5615_v57, %v13968_v4  ;;  %v5692_v8 = vadd.f32 %v5686_v62, %v13088_v2 }
 0x70b   :  { %9157 = vpow2.f32 %v6949_v37  ;;  %v6950_v28 = vmul.f32 -1.442695, %v5690_v14  ;;  %v6951_v56 = vmul.f32 -1.442695, %v5692_v8 }
 0x70d   :  { %9159 = vpow2.f32 %v6950_v28 }
 0x70e   :  { %9161 = vpow2.f32 %v6951_v56 }
 0x718   :  { %v9158_v61 = vpop.eup %9157 }
 0x719   :  { %v5696_v15 = vadd.f32 1.0, %v9158_v61 }
 0x71a   :  { %v9160_v35 = vpop.eup %9159 }
 0x71b   :  { %9163 = vrcp.f32 %v5696_v15  ;;  %v5702_v3 = vadd.f32 1.0, %v9160_v35  ;;  %v9162_v41 = vpop.eup %9161  ;;  %v9251_v35 = vld [vmem:[%s13615_s9 + $0x1d8] sm:$0xff] }
 0x71c   :  { %9165 = vtanh.f32 %v5691_v6  ;;  %v5709_v14 = vadd.f32 1.0, %v9162_v41  ;;  %v9250_v6 = vld [vmem:[%s13615_s9 + $0x1c8] sm:$0xff]  ;;  %v9253_v41 = vld [vmem:[%s13615_s9 + $0x1d0] sm:$0xff] }
 0x71d   :  { %9167 = vrcp.f32 %v5702_v3  ;;  %v9252_v3 = vld [vmem:[%s13615_s9 + $0x1c0] sm:$0xff] }
 0x71e   :  { %9169 = vrcp.f32 %v5709_v14  ;;  %v9256_v14 = vld [vmem:[%s13615_s9 + $0x1a0] sm:$0xff] }
 0x728   :  { %v9164_v57 = vpop.eup %9163 }
 0x729   :  { %v9166_v37 = vpop.eup %9165 }
 0x72a   :  { %v9168_v4 = vpop.eup %9167  ;;  %v5713_v28 = vmul.f32 %v9166_v37, %v9164_v57  ;;  %v9254_v57 = vld [vmem:[%s13615_s9 + $0x1a8] sm:$0xff]  ;;  %v9255_v37 = vld [vmem:[%s13615_s9 + $0x1b8] sm:$0xff] }
 0x72b   :  { %v5712_v23 = vmul.f32 %v9168_v4, %v13172_v7  ;;  %v9170_v61 = vpop.eup %9169  ;;  %v9248_v4 = vld [vmem:[%s13615_s9 + $0x1e0] sm:$0xff] }
 0x72d   :  { %v13250_v62 = vadd.f32 %v5713_v28, %v5712_v23  ;;  %v9257_v28 = vld [vmem:[%s13615_s9 + $0x1b0] sm:$0xff] }
 0x72f   :  { %9171 = vtanh.f32 %v13250_v62 }
 0x73c   :  { %v9172_v8 = vpop.eup %9171 }
 0x73d   :  { %v13253_v56 = vmul.f32 %v9172_v8, %v9170_v61  ;;  %v9259_v61 = vld [vmem:[%s13615_s9 + $0x198] sm:$0xff]  ;;  %v9260_v8 = vld [vmem:[%s13615_s9 + $0x180] sm:$0xff] }
 0x73f   :  { %5782 = vmatmul.mubr.f32.vlgmr.msra.gmra.mxu1 %v13253_v56  ;;  %5853 = vmatmul.mubr.f32.vlgmr.msra.gmra.mxu0 %v13253_v56 }
 0x740   :  { %5888 = vmatpush1.msra.mxu1 %v12637_v25  ;;  %5959 = vmatpush1.msra.mxu0 %v12642_v5  ;;  %v13969_v25 = vld [vmem:[#allocation58_spill] sm:$0xff]  ;;  %v13970_v5 = vld [vmem:[#allocation57_spill] sm:$0xff] }
 0x741   :  { %5889 = vmatprep.subr.mxu1 %v12647_v34  ;;  %5960 = vmatprep.subr.mxu0 %v12652_v51  ;;  %v13971_v34 = vld [vmem:[#allocation28_spill] sm:$0xff]  ;;  %v13972_v51 = vld [vmem:[#allocation27_spill] sm:$0xff] }
 0x742   :  { %5890 = vmatpush1.msra.mxu1 %v12657_v10  ;;  %5961 = vmatpush1.msra.mxu0 %v12662_v52  ;;  %v13973_v10 = vld [vmem:[#allocation59_spill] sm:$0xff] }
 0x743   :  { %5891 = vmatprep.subr.mxu1 %v12669_v20  ;;  %5962 = vmatprep.subr.mxu0 %v12674_v30  ;;  %v13974_v52 = vld [vmem:[#allocation47_spill] sm:$0xff]  ;;  %v13975_v20 = vld [vmem:[#allocation38_spill] sm:$0xff] }
 0x744   :  { %5892 = vmatpush1.msra.mxu1 %v12681_v38  ;;  %5963 = vmatpush1.msra.mxu0 %v12686_v31  ;;  %v13976_v30 = vld [vmem:[#allocation39_spill] sm:$0xff]  ;;  %v13977_v38 = vld [vmem:[#allocation30_spill] sm:$0xff]  ;;  %v13978_v31 = vld [vmem:[#allocation29_spill] sm:$0xff] }
 0x745   :  { %5893 = vmatprep.subr.mxu1 %v12693_v43  ;;  %5964 = vmatprep.subr.mxu0 %v12698_v46  ;;  %v13979_v43 = vld [vmem:[#allocation62_spill] sm:$0xff]  ;;  %v13980_v46 = vld [vmem:[#allocation40_spill] sm:$0xff] }
 0x746   :  { %5894 = vmatpush1.msra.mxu1 %v12705_v18  ;;  %5965 = vmatpush1.msra.mxu0 %v12710_v45  ;;  %v13981_v18 = vld [vmem:[#allocation41_spill] sm:$0xff] }
 0x747   :  { %5895 = vmatprep.subr.mxu1 %v12717_v21  ;;  %5966 = vmatprep.subr.mxu0 %v12722_v58  ;;  %v13982_v45 = vld [vmem:[#allocation13_spill] sm:$0xff]  ;;  %v13983_v21 = vld [vmem:[#allocation12_spill] sm:$0xff] }
 0x748   :  { %5896 = vmatpush1.msra.mxu1 %v12729_v55  ;;  %5967 = vmatpush1.msra.mxu0 %v12734_v24  ;;  %v13984_v58 = vld [vmem:[#allocation64_spill] sm:$0xff]  ;;  %v13985_v55 = vmov 0.0   ;;  %v13986_v24 = vld [vmem:[#allocation63_spill] sm:$0xff] }
 0x749   :  { %5897 = vmatprep.subr.mxu1 %v12741_v54  ;;  %5968 = vmatprep.subr.mxu0 %v12746_v60  ;;  %v9246_v54 = vld [vmem:[%s13615_s9 + $0x1e8] sm:$0xff]  ;;  %v9247_v60 = vld [vmem:[%s13615_s9 + $0x1f8] sm:$0xff] }
 0x74a   :  { %5898 = vmatpush1.msra.mxu1 %v12753_v32  ;;  %5969 = vmatpush1.msra.mxu0 %v12758_v9  ;;  %v13987_v9 = vld [vmem:[#allocation32_spill] sm:$0xff] }
 0x74b   :  { %5899 = vmatprep.subr.mxu1 %v12765_v47  ;;  %5970 = vmatprep.subr.mxu0 %v12770_v44 }
 0x74c   :  { %5900 = vmatpush1.msra.mxu1 %v12777_v39  ;;  %5971 = vmatpush1.msra.mxu0 %v12782_v49  ;;  %v13988_v49 = vld [vmem:[#allocation31_spill] sm:$0xff] }
 0x74d   :  { %5901 = vmatprep.subr.mxu1 %v12789_v36  ;;  %5972 = vmatprep.subr.mxu0 %v12794_v63 }
 0x74e   :  { %5902 = vmatpush1.msra.mxu1 %v12801_v16  ;;  %5973 = vmatpush1.msra.mxu0 %v12806_v33 }
 0x74f   :  { %5903 = vmatprep.subr.mxu1 %v12813_v17  ;;  %5974 = vmatprep.subr.mxu0 %v12818_v27 }
 0x750   :  { %5904 = vmatpush1.msra.mxu1 %v12825_v53  ;;  %5975 = vmatpush1.msra.mxu0 %v12830_v48 }
 0x751   :  { %5905 = vmatprep.subr.mxu1 %v12837_v19  ;;  %5976 = vmatprep.subr.mxu0 %v12842_v59 }
 0x752   :  { %5906 = vmatpush1.msra.mxu1 %v12849_v1  ;;  %5977 = vmatpush1.msra.mxu0 %v12854_v22 }
 0x753   :  { %5907 = vmatprep.subr.mxu1 %v12861_v11  ;;  %5978 = vmatprep.subr.mxu0 %v12866_v42 }
 0x754   :  { %5908 = vmatpush1.msra.mxu1 %v12873_v0  ;;  %5979 = vmatpush1.msra.mxu0 %v12878_v50 }
 0x755   :  { %5909 = vmatprep.subr.mxu1 %v13922_v29  ;;  %5980 = vmatprep.subr.mxu0 %v13923_v12 }
 0x756   :  { %5910 = vmatpush1.msra.mxu1 %v13924_v13  ;;  %5981 = vmatpush1.msra.mxu0 %v13969_v25  ;;  %v9261_v25 = vld [vmem:[%s13615_s9 + $0x190] sm:$0xff] }
 0x757   :  { %5911 = vmatprep.subr.mxu1 %v13970_v5  ;;  %5982 = vmatprep.subr.mxu0 %v13971_v34  ;;  %v9262_v5 = vld [vmem:[%s13615_s9 + $0x168] sm:$0xff]  ;;  %v9263_v34 = vld [vmem:[%s13615_s9 + $0x178] sm:$0xff] }
 0x758   :  { %5912 = vmatpush1.msra.mxu1 %v13972_v51  ;;  %5983 = vmatpush1.msra.mxu0 %v13973_v10  ;;  %v9264_v51 = vld [vmem:[%s13615_s9 + $0x160] sm:$0xff]  ;;  %v9265_v10 = vld [vmem:[%s13615_s9 + $0x170] sm:$0xff] }
 0x759   :  { %5913 = vmatprep.subr.mxu1 %v13974_v52  ;;  %5984 = vmatprep.subr.mxu0 %v13975_v20  ;;  %v9266_v52 = vld [vmem:[%s13615_s9 + $0x148] sm:$0xff]  ;;  %v9267_v20 = vld [vmem:[%s13615_s9 + $0x158] sm:$0xff] }
 0x75a   :  { %5914 = vmatpush1.msra.mxu1 %v13976_v30  ;;  %5985 = vmatpush1.msra.mxu0 %v13977_v38 }
 0x75b   :  { %5915 = vmatprep.subr.mxu1 %v13978_v31  ;;  %5986 = vmatprep.subr.mxu0 %v13979_v43 }
 0x75c   :  { %5916 = vmatpush1.msra.mxu1 %v13980_v46  ;;  %5987 = vmatpush1.msra.mxu0 %v13981_v18 }
 0x75d   :  { %5917 = vmatprep.subr.mxu1 %v13982_v45  ;;  %5988 = vmatprep.subr.mxu0 %v13983_v21 }
 0x75e   :  { %5918 = vmatpush1.msra.mxu1 %v13984_v58  ;;  %5951 = vmatprep.mubr.f32.mxu1 %v13985_v55 }
 0x75f   :  { %5989 = vmatpush1.msra.mxu0 %v13986_v24  ;;  %6022 = vmatprep.mubr.f32.mxu0 %v13985_v55 }
 0x760   :  { %6057 = vmatprep.subr.mxu1 %v9246_v54  ;;  %6128 = vmatprep.subr.mxu0 %v9247_v60  ;;  %v9268_v54 = vld [vmem:[%s13615_s9 + $0x140] sm:$0xff]  ;;  %v9269_v60 = vld [vmem:[%s13615_s9 + $0x150] sm:$0xff] }
 0x7ff   :  { %v5783_v32 = vpop.f32.mrf.mxu1  ;;  %v5854_v63 = vpop.f32.mrf.mxu0 }
 0x800   :  { %v5859_v47 = vadd.f32 %v5783_v32, %v13987_v9  ;;  %v5861_v48 = vadd.f32 %v5854_v63, %v13091_v26  ;;  %v9270_v32 = vld [vmem:[%s13615_s9 + $0x128] sm:$0xff]  ;;  %v9275_v63 = vld [vmem:[%s13615_s9 + $0x118] sm:$0xff] }
 0x801   :  { %v5785_v44 = vpop.f32.mrf.mxu1  ;;  %v5856_v33 = vpop.f32.mrf.mxu0 }
 0x802   :  { %v6952_v39 = vmul.f32 -1.442695, %v5859_v47  ;;  %v5860_v36 = vadd.f32 %v5785_v44, %v13988_v49  ;;  %v5862_v17 = vadd.f32 %v5856_v33, %v13088_v2  ;;  %v9271_v47 = vld [vmem:[%s13615_s9 + $0x138] sm:$0xff]  ;;  %v9272_v44 = vld [vmem:[%s13615_s9 + $0x120] sm:$0xff]  ;;  %v9277_v33 = vld [vmem:[%s13615_s9 + $0x110] sm:$0xff] }
 0x804   :  { %9173 = vpow2.f32 %v6952_v39  ;;  %v6953_v16 = vmul.f32 -1.442695, %v5860_v36  ;;  %v6954_v27 = vmul.f32 -1.442695, %v5862_v17  ;;  %v9273_v39 = vld [vmem:[%s13615_s9 + $0x130] sm:$0xff]  ;;  %v9274_v36 = vld [vmem:[%s13615_s9 + $0x108] sm:$0xff] }
 0x805   :  { %v9278_v17 = vld [vmem:[%s13615_s9 + $0xe8] sm:$0xff] }
 0x806   :  { %9175 = vpow2.f32 %v6953_v16  ;;  %v9276_v16 = vld [vmem:[%s13615_s9 + $0x100] sm:$0xff] }
 0x807   :  { %9177 = vpow2.f32 %v6954_v27  ;;  %v9279_v27 = vld [vmem:[%s13615_s9 + $0xf8] sm:$0xff] }
 0x811   :  { %v9174_v53 = vpop.eup %9173 }
 0x812   :  { %v5866_v19 = vadd.f32 1.0, %v9174_v53  ;;  %v9280_v53 = vld [vmem:[%s13615_s9 + $0xe0] sm:$0xff] }
 0x813   :  { %v9176_v59 = vpop.eup %9175 }
 0x814   :  { %9179 = vrcp.f32 %v5866_v19  ;;  %v5872_v1 = vadd.f32 1.0, %v9176_v59  ;;  %v9178_v22 = vpop.eup %9177  ;;  %v9282_v19 = vld [vmem:[%s13615_s9 + $0xc8] sm:$0xff]  ;;  %v9283_v59 = vld [vmem:[%s13615_s9 + $0xd8] sm:$0xff] }
 0x815   :  { %9181 = vtanh.f32 %v5861_v48  ;;  %v5879_v50 = vadd.f32 1.0, %v9178_v22  ;;  %v9281_v48 = vld [vmem:[%s13615_s9 + $0xf0] sm:$0xff] }
 0x816   :  { %9183 = vrcp.f32 %v5872_v1  ;;  %v9284_v1 = vld [vmem:[%s13615_s9 + $0xc0] sm:$0xff]  ;;  %v9285_v22 = vld [vmem:[%s13615_s9 + $0xd0] sm:$0xff] }
 0x817   :  { %9185 = vrcp.f32 %v5879_v50  ;;  %v9289_v50 = vld [vmem:[%s13615_s9 + $0xb0] sm:$0xff] }
 0x821   :  { %v9180_v11 = vpop.eup %9179 }
 0x822   :  { %v9182_v42 = vpop.eup %9181 }
 0x823   :  { %v9184_v0 = vpop.eup %9183  ;;  %v5883_v29 = vmul.f32 %v9182_v42, %v9180_v11  ;;  %v9286_v11 = vld [vmem:[%s13615_s9 + $0xa8] sm:$0xff]  ;;  %v9287_v42 = vld [vmem:[%s13615_s9 + $0xb8] sm:$0xff] }
 0x824   :  { %v5882_v12 = vmul.f32 %v9184_v0, %v13250_v62  ;;  %v9186_v7 = vpop.eup %9185  ;;  %v9258_v62 = vld [vmem:[%s13615_s9 + $0x188] sm:$0xff]  ;;  %v9288_v0 = vld [vmem:[%s13615_s9 + $0xa0] sm:$0xff] }
 0x826   :  { %v13332_v13 = vadd.f32 %v5883_v29, %v5882_v12  ;;  %v9290_v29 = vld [vmem:[%s13615_s9 + $0x88] sm:$0xff]  ;;  %v9291_v12 = vld [vmem:[%s13615_s9 + $0x98] sm:$0xff] }
 0x828   :  { %9187 = vtanh.f32 %v13332_v13 }
 0x835   :  { %v9188_v15 = vpop.eup %9187 }
 0x836   :  { %v13335_v23 = vmul.f32 %v9188_v15, %v9186_v7  ;;  %v9292_v7 = vld [vmem:[%s13615_s9 + $0x80] sm:$0xff]  ;;  %v9293_v15 = vld [vmem:[%s13615_s9 + $0x90] sm:$0xff] }
 0x838   :  { %5952 = vmatmul.mubr.f32.vlgmr.msra.gmra.mxu1 %v13335_v23  ;;  %6023 = vmatmul.mubr.f32.vlgmr.msra.gmra.mxu0 %v13335_v23 }
 0x839   :  { %6058 = vmatpush1.msra.mxu1 %v9248_v4  ;;  %6129 = vmatpush1.msra.mxu0 %v9249_v40  ;;  %v9294_v4 = vld [vmem:[%s13615_s9 + $0x68] sm:$0xff]  ;;  %v9295_v40 = vld [vmem:[%s13615_s9 + $0x78] sm:$0xff] }
 0x83a   :  { %6059 = vmatprep.subr.mxu1 %v9250_v6  ;;  %6130 = vmatprep.subr.mxu0 %v9251_v35  ;;  %v9296_v6 = vld [vmem:[%s13615_s9 + $0x60] sm:$0xff]  ;;  %v9297_v35 = vld [vmem:[%s13615_s9 + $0x70] sm:$0xff] }
 0x83b   :  { %6060 = vmatpush1.msra.mxu1 %v9252_v3  ;;  %6131 = vmatpush1.msra.mxu0 %v9253_v41  ;;  %v9298_v3 = vld [vmem:[%s13615_s9 + $0x48] sm:$0xff]  ;;  %v9299_v41 = vld [vmem:[%s13615_s9 + $0x58] sm:$0xff] }
 0x83c   :  { %6061 = vmatprep.subr.mxu1 %v9254_v57  ;;  %6132 = vmatprep.subr.mxu0 %v9255_v37 }
 0x83d   :  { %6062 = vmatpush1.msra.mxu1 %v9256_v14  ;;  %6133 = vmatpush1.msra.mxu0 %v9257_v28 }
 0x83e   :  { %6063 = vmatprep.subr.mxu1 %v9258_v62  ;;  %6134 = vmatprep.subr.mxu0 %v9259_v61 }
 0x83f   :  { %6064 = vmatpush1.msra.mxu1 %v9260_v8  ;;  %6135 = vmatpush1.msra.mxu0 %v9261_v25 }
 0x840   :  { %6065 = vmatprep.subr.mxu1 %v9262_v5  ;;  %6136 = vmatprep.subr.mxu0 %v9263_v34 }
 0x841   :  { %6066 = vmatpush1.msra.mxu1 %v9264_v51  ;;  %6137 = vmatpush1.msra.mxu0 %v9265_v10 }
 0x842   :  { %6067 = vmatprep.subr.mxu1 %v9266_v52  ;;  %6138 = vmatprep.subr.mxu0 %v9267_v20 }
 0x843   :  { %6068 = vmatpush1.msra.mxu1 %v9268_v54  ;;  %6139 = vmatpush1.msra.mxu0 %v9269_v60 }
 0x844   :  { %6069 = vmatprep.subr.mxu1 %v9270_v32  ;;  %6140 = vmatprep.subr.mxu0 %v9271_v47  ;;  %v6241_v32 = vld [vmem:[%s13617_s11 + $0x70] sm:$0xff]  ;;  %v13989_v47 = vld [vmem:[#allocation65_spill] sm:$0xff] }
 0x845   :  { %6070 = vmatpush1.msra.mxu1 %v9272_v44  ;;  %6141 = vmatpush1.msra.mxu0 %v9273_v39  ;;  %v6239_v44 = vld [vmem:[%s13617_s11 + $0x60] sm:$0xff]  ;;  %v6238_v39 = vld [vmem:[%s13617_s11 + $0x58] sm:$0xff] }
 0x846   :  { %6071 = vmatprep.subr.mxu1 %v9274_v36  ;;  %6142 = vmatprep.subr.mxu0 %v9275_v63  ;;  %v6237_v36 = vld [vmem:[%s13617_s11 + $0x50] sm:$0xff]  ;;  %v6236_v63 = vld [vmem:[%s13617_s11 + $0x48] sm:$0xff] }
 0x847   :  { %6072 = vmatpush1.msra.mxu1 %v9276_v16  ;;  %6143 = vmatpush1.msra.mxu0 %v9277_v33  ;;  %v6235_v16 = vld [vmem:[%s13617_s11 + $0x40] sm:$0xff]  ;;  %v6234_v33 = vld [vmem:[%s13617_s11 + $0x38] sm:$0xff] }
 0x848   :  { %6073 = vmatprep.subr.mxu1 %v9278_v17  ;;  %6144 = vmatprep.subr.mxu0 %v9279_v27  ;;  %v6233_v17 = vld [vmem:[%s13617_s11 + $0x30] sm:$0xff]  ;;  %v6232_v27 = vld [vmem:[%s13617_s11 + $0x28] sm:$0xff] }
 0x849   :  { %6074 = vmatpush1.msra.mxu1 %v9280_v53  ;;  %6145 = vmatpush1.msra.mxu0 %v9281_v48  ;;  %v6231_v53 = vld [vmem:[%s13617_s11 + $0x20] sm:$0xff]  ;;  %v6230_v48 = vld [vmem:[%s13617_s11 + $0x18] sm:$0xff] }
 0x84a   :  { %6075 = vmatprep.subr.mxu1 %v9282_v19  ;;  %6146 = vmatprep.subr.mxu0 %v9283_v59  ;;  %v6229_v19 = vld [vmem:[%s13617_s11 + $0x10] sm:$0xff]  ;;  %v6228_v59 = vld [vmem:[%s13617_s11 + $0x8] sm:$0xff] }
 0x84b   :  { %6076 = vmatpush1.msra.mxu1 %v9284_v1  ;;  %6147 = vmatpush1.msra.mxu0 %v9285_v22  ;;  %v6227_v1 = vld [vmem:[%s13617_s11] sm:$0xff] }
 0x84c   :  { %6077 = vmatprep.subr.mxu1 %v9286_v11  ;;  %6148 = vmatprep.subr.mxu0 %v9287_v42  ;;  %v13990_v22 = vld [vmem:[#allocation50_spill] sm:$0xff] }
 0x84d   :  { %6078 = vmatpush1.msra.mxu1 %v9288_v0  ;;  %6149 = vmatpush1.msra.mxu0 %v9289_v50 }
 0x84e   :  { %6079 = vmatprep.subr.mxu1 %v9290_v29  ;;  %6150 = vmatprep.subr.mxu0 %v9291_v12 }
 0x84f   :  { %6080 = vmatpush1.msra.mxu1 %v9292_v7  ;;  %6151 = vmatpush1.msra.mxu0 %v9293_v15 }
 0x850   :  { %6081 = vmatprep.subr.mxu1 %v9294_v4  ;;  %6152 = vmatprep.subr.mxu0 %v9295_v40 }
 0x851   :  { %6082 = vmatpush1.msra.mxu1 %v9296_v6  ;;  %6153 = vmatpush1.msra.mxu0 %v9297_v35 }
 0x852   :  { %6083 = vmatprep.subr.mxu1 %v9298_v3  ;;  %6154 = vmatprep.subr.mxu0 %v9299_v41 }
 0x853   :  { %6084 = vmatpush1.msra.mxu1 %v13976_v30  ;;  %6155 = vmatpush1.msra.mxu0 %v13977_v38  ;;  %v6242_v30 = vld [vmem:[%s13617_s11 + $0x78] sm:$0xff] }
 0x854   :  { %6085 = vmatprep.subr.mxu1 %v13978_v31  ;;  %6156 = vmatprep.subr.mxu0 %v13979_v43 }
 0x855   :  { %6086 = vmatpush1.msra.mxu1 %v13980_v46  ;;  %6157 = vmatpush1.msra.mxu0 %v13981_v18 }
 0x856   :  { %6087 = vmatprep.subr.mxu1 %v13982_v45  ;;  %6158 = vmatprep.subr.mxu0 %v13983_v21 }
 0x857   :  { %6088 = vmatpush1.msra.mxu1 %v13984_v58  ;;  %6121 = vmatprep.mubr.f32.mxu1 %v13985_v55 }
 0x858   :  { %6159 = vmatpush1.msra.mxu0 %v13986_v24  ;;  %6192 = vmatprep.mubr.f32.mxu0 %v13985_v55 }
 0x859   :  { %9075 = vmatprep.subr.mxu1 %v6242_v30 }
 0x8f8   :  { %v5953_v38 = vpop.f32.mrf.mxu1  ;;  %v6024_v45 = vpop.f32.mrf.mxu0 }
 0x8f9   :  { %v6029_v31 = vadd.f32 %v5953_v38, %v13987_v9  ;;  %v6031_v37 = vadd.f32 %v6024_v45, %v13091_v26 }
 0x8fa   :  { %v5955_v43 = vpop.f32.mrf.mxu1  ;;  %v6026_v58 = vpop.f32.mrf.mxu0 }
 0x8fb   :  { %v6955_v46 = vmul.f32 -1.442695, %v6029_v31  ;;  %v6030_v18 = vadd.f32 %v5955_v43, %v13988_v49  ;;  %v6032_v24 = vadd.f32 %v6026_v58, %v13088_v2 }
 0x8fd   :  { %9189 = vpow2.f32 %v6955_v46  ;;  %v6956_v21 = vmul.f32 -1.442695, %v6030_v18  ;;  %v6957_v55 = vmul.f32 -1.442695, %v6032_v24 }
 0x8ff   :  { %9191 = vpow2.f32 %v6956_v21 }
 0x900   :  { %9193 = vpow2.f32 %v6957_v55 }
 0x90a   :  { %v9190_v57 = vpop.eup %9189 }
 0x90b   :  { %v6036_v14 = vadd.f32 1.0, %v9190_v57 }
 0x90c   :  { %v9192_v28 = vpop.eup %9191 }
 0x90d   :  { %9195 = vrcp.f32 %v6036_v14  ;;  %v6042_v62 = vadd.f32 1.0, %v9192_v28  ;;  %v9194_v61 = vpop.eup %9193 }
 0x90e   :  { %9197 = vtanh.f32 %v6031_v37  ;;  %v6049_v34 = vadd.f32 1.0, %v9194_v61  ;;  %v13991_v61 = vlaneseq }
 0x90f   :  { %9199 = vrcp.f32 %v6042_v62 }
 0x910   :  { %9201 = vrcp.f32 %v6049_v34 }
 0x91a   :  { %v9196_v8 = vpop.eup %9195 }
 0x91b   :  { %v9198_v25 = vpop.eup %9197 }
 0x91c   :  { %v9200_v5 = vpop.eup %9199  ;;  %v6053_v51 = vmul.f32 %v9198_v25, %v9196_v8  ;;  %v6346_v8 = vand.u32 127, %v13991_v61 }
 0x91d   :  { %v6052_v10 = vmul.f32 %v9200_v5, %v13332_v13  ;;  %v9202_v20 = vpop.eup %9201  ;;  %v6240_v13 = vld [vmem:[%s13617_s11 + $0x68] sm:$0xff] }
 0x91e   :  { %vm6348_vm8 = vcmp.lt.s32.totalorder %v6346_v8, 4  ;;  %vm6347_vm9 = vcmp.lt.s32.totalorder %v6346_v8, 2 }
 0x91f   :  { %v13515_v52 = vadd.f32 %v6053_v51, %v6052_v10 }
 0x921   :  { %9203 = vtanh.f32 %v13515_v52 }
 0x92e   :  { %v9204_v54 = vpop.eup %9203 }
 0x92f   :  { %v6056_v60 = vmul.f32 %v9204_v54, %v9202_v20 }
 0x931   :  { %6122 = vmatmul.mubr.f32.vlgmr.msra.gmra.mxu1 %v6056_v60  ;;  %6193 = vmatmul.mubr.f32.vlgmr.msra.gmra.mxu0 %v6056_v60 }
 0x932   :  { %9076 = vmatpush3.msra.mxu1 %v6242_v30  ;;  %9107 = vmatprep.mubr.f32.mxu1 %v13989_v47 }
 0x933   :  { %9077 = vmatprep.subr.mxu1 %v6241_v32 }
 0x934   :  { %9078 = vmatpush3.msra.mxu1 %v6241_v32 }
 0x935   :  { %9079 = vmatprep.subr.mxu1 %v6240_v13 }
 0x936   :  { %9080 = vmatpush3.msra.mxu1 %v6240_v13 }
 0x937   :  { %9081 = vmatprep.subr.mxu1 %v6239_v44 }
 0x938   :  { %9082 = vmatpush3.msra.mxu1 %v6239_v44 }
 0x939   :  { %9083 = vmatprep.subr.mxu1 %v6238_v39 }
 0x93a   :  { %9084 = vmatpush3.msra.mxu1 %v6238_v39 }
 0x93b   :  { %9085 = vmatprep.subr.mxu1 %v6237_v36 }
 0x93c   :  { %9086 = vmatpush3.msra.mxu1 %v6237_v36 }
 0x93d   :  { %9087 = vmatprep.subr.mxu1 %v6236_v63 }
 0x93e   :  { %9088 = vmatpush3.msra.mxu1 %v6236_v63 }
 0x93f   :  { %9089 = vmatprep.subr.mxu1 %v6235_v16 }
 0x940   :  { %9090 = vmatpush3.msra.mxu1 %v6235_v16 }
 0x941   :  { %9091 = vmatprep.subr.mxu1 %v6234_v33 }
 0x942   :  { %9092 = vmatpush3.msra.mxu1 %v6234_v33 }
 0x943   :  { %9093 = vmatprep.subr.mxu1 %v6233_v17 }
 0x944   :  { %9094 = vmatpush3.msra.mxu1 %v6233_v17 }
 0x945   :  { %9095 = vmatprep.subr.mxu1 %v6232_v27 }
 0x946   :  { %9096 = vmatpush3.msra.mxu1 %v6232_v27 }
 0x947   :  { %9097 = vmatprep.subr.mxu1 %v6231_v53 }
 0x948   :  { %9098 = vmatpush3.msra.mxu1 %v6231_v53 }
 0x949   :  { %9099 = vmatprep.subr.mxu1 %v6230_v48 }
 0x94a   :  { %9100 = vmatpush3.msra.mxu1 %v6230_v48 }
 0x94b   :  { %9101 = vmatprep.subr.mxu1 %v6229_v19 }
 0x94c   :  { %9102 = vmatpush3.msra.mxu1 %v6229_v19 }
 0x94d   :  { %9103 = vmatprep.subr.mxu1 %v6228_v59 }
 0x94e   :  { %9104 = vmatpush3.msra.mxu1 %v6228_v59 }
 0x94f   :  { %9105 = vmatprep.subr.mxu1 %v6227_v1 }
 0x950   :  { %9106 = vmatpush3.msra.mxu1 %v6227_v1 }
 0x951   :  { %9108 = vmatmul.mubr.f32.vlgmr.msra.gmra.mxu1 %v13990_v22 }
 0x952   :  { %9110 = vmatprep.mubr.f32.mxu1 %v13253_v56 }
 0x955   :  { %9111 = vmatmul.mubr.f32.gmra.mxu1 %v13335_v23 }
 0x956   :  { %9113 = vmatprep.mubr.f32.mxu1 %v6056_v60 }
 0x9f1   :  { %v6123_v11 = vpop.f32.mrf.mxu1  ;;  %v6194_v42 = vpop.f32.mrf.mxu0 }
 0x9f2   :  { %v6199_v0 = vadd.f32 %v6123_v11, %v13987_v9  ;;  %v6201_v35 = vadd.f32 %v6194_v42, %v13091_v26 }
 0x9f3   :  { %v6125_v50 = vpop.f32.mrf.mxu1  ;;  %v6196_v7 = vpop.f32.mrf.mxu0 }
 0x9f4   :  { %v6958_v29 = vmul.f32 -1.442695, %v6199_v0  ;;  %v6200_v12 = vadd.f32 %v6125_v50, %v13988_v49  ;;  %v6202_v4 = vadd.f32 %v6196_v7, %v13088_v2  ;;  %v6961_v49 = vld [vmem:[%s13618_s12] ss:$0 sm:$0xff] }
 0x9f6   :  { %9205 = vpow2.f32 %v6958_v29  ;;  %v6959_v15 = vmul.f32 -1.442695, %v6200_v12  ;;  %v6960_v40 = vmul.f32 -1.442695, %v6202_v4 }
 0x9f8   :  { %9207 = vpow2.f32 %v6959_v15 }
 0x9f9   :  { %9209 = vpow2.f32 %v6960_v40 }
 0xa03   :  { %v9206_v56 = vpop.eup %9205 }
 0xa04   :  { %v6206_v6 = vadd.f32 1.0, %v9206_v56 }
 0xa05   :  { %v9208_v23 = vpop.eup %9207 }
 0xa06   :  { %v6212_v3 = vadd.f32 1.0, %v9208_v23  ;;  %9211 = vrcp.f32 %v6206_v6  ;;  %v9210_v9 = vpop.eup %9209 }
 0xa07   :  { %v6219_v41 = vadd.f32 1.0, %v9210_v9 }
 0xa08   :  { %9213 = vrcp.f32 %v6212_v3 }
 0xa09   :  { %9215 = vtanh.f32 %v6201_v35 }
 0xa0a   :  { %9217 = vrcp.f32 %v6219_v41 }
 0xa11   :  { %v9109_v30 = vpop.f32.mrf.mxu1 }
 0xa12   :  { %v6322_v38 = vadd.f32 %v9109_v30, %v6961_v49 }
 0xa13   :  { %v6316_v2 = vpop.f32.mrf.mxu1  ;;  %v9212_v31 = vpop.eup %9211 }
 0xa14   :  { %v6351_v43 = vmul.f32 1.442695, %v6322_v38  ;;  %v6317_v46 = vadd.f32 %v6961_v49, %v6316_v2  ;;  %9219 = vtanh.f32 %v6322_v38 }
 0xa15   :  { %v9214_v18 = vpop.eup %9213  ;;  %v9112_v26 = vpop.f32.mrf.mxu1 }
 0xa16   :  { %v9216_v45 = vpop.eup %9215  ;;  %v6222_v21 = vmul.f32 %v9214_v18, %v13515_v52  ;;  %9221 = vpow2.f32 %v6351_v43  ;;  %v6349_v58 = vmul.f32 1.442695, %v6317_v46  ;;  %v6332_v24 = vadd.f32 %v9112_v26, %v6961_v49 }
 0xa17   :  { %v6223_v55 = vmul.f32 %v9216_v45, %v9212_v31  ;;  %9223 = vtanh.f32 %v6317_v46  ;;  %v6326_v57 = vpop.f32.mrf.mxu1  ;;  %v9218_v25 = vpop.eup %9217 }
 0xa18   :  { %9225 = vpow2.f32 %v6349_v58  ;;  %v6355_v37 = vmul.f32 1.442695, %v6332_v24  ;;  %v6327_v14 = vadd.f32 %v6961_v49, %v6326_v57 }
 0xa19   :  { %v6224_v28 = vadd.f32 %v6223_v55, %v6222_v21  ;;  %9227 = vtanh.f32 %v6332_v24 }
 0xa1a   :  { %9229 = vpow2.f32 %v6355_v37  ;;  %v6353_v62 = vmul.f32 1.442695, %v6327_v14 }
 0xa1b   :  { %9231 = vtanh.f32 %v6327_v14 }
 0xa1c   :  { %9233 = vpow2.f32 %v6353_v62 }
 0xa1d   :  { %9235 = vtanh.f32 %v6224_v28 }
 0xa21   :  { %v9220_v5 = vpop.eup %9219 }
 0xa23   :  { %v9222_v34 = vpop.eup %9221 }
 0xa24   :  { %v9224_v51 = vpop.eup %9223  ;;  %v6368_v10 = vsel %vm6348_vm8, %v9222_v34, %v9220_v5 }
 0xa25   :  { %v9226_v52 = vpop.eup %9225  ;;  %v6374_v20 = vsel %vm6347_vm9, %v6322_v38, %v6368_v10 }
 0xa26   :  { %v9228_v54 = vpop.eup %9227  ;;  %6962 = vst [vmem:[%s13619_s13 + $0x8] sm:$0xff] %v6374_v20  ;;  %v6367_v60 = vsel %vm6348_vm8, %v9226_v52, %v9224_v51 }
 0xa27   :  { %v9230_v32 = vpop.eup %9229  ;;  %v6373_v47 = vsel %vm6347_vm9, %v6317_v46, %v6367_v60 }
 0xa28   :  { %v9232_v13 = vpop.eup %9231  ;;  %6379 = vst [vmem:[%s13619_s13] sm:$0xff] %v6373_v47  ;;  %v6370_v44 = vsel %vm6348_vm8, %v9230_v32, %v9228_v54 }
 0xa29   :  { %v9234_v39 = vpop.eup %9233  ;;  %v6376_v36 = vsel %vm6347_vm9, %v6332_v24, %v6370_v44 }
 0xa2a   :  { %v9236_v63 = vpop.eup %9235  ;;  %6964 = vst [vmem:[%s13619_s13 + $0x18] sm:$0xff] %v6376_v36  ;;  %v6369_v16 = vsel %vm6348_vm8, %v9234_v39, %v9232_v13 }
 0xa2b   :  { %v6375_v33 = vsel %vm6347_vm9, %v6327_v14, %v6369_v16  ;;  %v6226_v17 = vmul.f32 %v9236_v63, %v9218_v25 }
 0xa2c   :  { %6963 = vst [vmem:[%s13619_s13 + $0x10] sm:$0xff] %v6375_v33 }
 0xa2d   :  { %9114 = vmatmul.mubr.f32.gmra.mxu1 %v6226_v17 }
 0xaed   :  { %v9115_v27 = vpop.f32.mrf.mxu1 }
 0xaee   :  { %v6342_v53 = vadd.f32 %v9115_v27, %v6961_v49 }
 0xaef   :  { %v6336_v48 = vpop.f32.mrf.mxu1 }
 0xaf0   :  { %v6359_v19 = vmul.f32 1.442695, %v6342_v53  ;;  %v6337_v59 = vadd.f32 %v6961_v49, %v6336_v48  ;;  %9237 = vtanh.f32 %v6342_v53 }
 0xaf2   :  { %9239 = vpow2.f32 %v6359_v19  ;;  %v6357_v1 = vmul.f32 1.442695, %v6337_v59 }
 0xaf3   :  { %9241 = vtanh.f32 %v6337_v59 }
 0xaf4   :  { %9243 = vpow2.f32 %v6357_v1 }
 0xafd   :  { %v9238_v22 = vpop.eup %9237 }
 0xaff   :  { %v9240_v11 = vpop.eup %9239 }
 0xb00   :  { %v9242_v42 = vpop.eup %9241  ;;  %v6372_v0 = vsel %vm6348_vm8, %v9240_v11, %v9238_v22 }
 0xb01   :  { %v9244_v50 = vpop.eup %9243  ;;  %v6378_v29 = vsel %vm6347_vm9, %v6342_v53, %v6372_v0 }
 0xb02   :  { %6966 = vst [vmem:[%s13619_s13 + $0x28] sm:$0xff] %v6378_v29  ;;  %v6371_v12 = vsel %vm6348_vm8, %v9244_v50, %v9242_v42 }
 0xb03   :  { %v6377_v7 = vsel %vm6347_vm9, %v6337_v59, %v6371_v12 }
 0xb04   :  { %6965 = vst [vmem:[%s13619_s13 + $0x20] sm:$0xff] %v6377_v7 }

</bundles_post_ra>
